<compile_context>
chip_gen: v7x
topology: tpu7x:2x2x1
jax: 0.10.0
libtpu: 0.0.40
codegen_flags: <defaults>
</compile_context>

<pallas_src>
import jax
import jax.numpy as jnp
from jax.experimental import pallas as pl
from jax.experimental.pallas import tpu as pltpu

# ---- module hyper-parameters (PyTorch __init__ defaults) --------------------
D = 8
W = 256
W2 = W // 2                                   # 128
INPUT_CH = 3
INPUT_CH_VIEWS = 3
DIM_AUD = 76
DIM_IMG = 0
OUTPUT_CH = 4
SKIPS = (4,)
IN_ALL = INPUT_CH + DIM_AUD + DIM_IMG         # 82
FEAT_TOTAL = IN_ALL + INPUT_CH_VIEWS          # 85 (total last-dim of x)
PTS_PAD = 128                                 # x (85 lanes) zero-padded to 128
OUT_PAD = 128                                 # lane-dense output (cols 0..3 real)
N_VIEW_LAYERS = 1 + D // 4                    # 3 views_linears layers


def _default_epilogue_dtype():
    """bf16 bias+ReLU epilogue on v6e/v7x (bf16 VALU); f32 elsewhere (v5e/older)."""
    try:
        kind = jax.devices()[0].device_kind.lower()
    except Exception:
        return jnp.float32
    if "v6" in kind or "v7" in kind:
        return jnp.bfloat16
    return jnp.float32


# ---- Pallas kernels ----------------------------------------------------------
def _trunk(x_in, w_pts_ref, w_h_ref, b_trunk):
    """8-layer pts_linears trunk; skip concat expressed as split-matmul sum.

    x_in: (tile, 128) bf16  -- pts in lanes 0..81, views in 82..84, rest 0.
    Trunk pts-weight rows 82..127 are zero, so the view lanes never leak in.
    """
    ep = b_trunk.dtype
    acc = jnp.dot(x_in, w_pts_ref[0], preferred_element_type=jnp.float32)
    h = jnp.maximum(acc.astype(ep) + b_trunk[0:1, :], 0.0).astype(jnp.bfloat16)
    hi = 0
    for i in range(1, D):
        acc = jnp.dot(h, w_h_ref[hi], preferred_element_type=jnp.float32)
        hi += 1
        if (i - 1) in SKIPS:
            # layer consuming cat([input_pts, h]) -> sum of two matmuls
            acc = acc + jnp.dot(x_in, w_pts_ref[1],
                                preferred_element_type=jnp.float32)
        h = jnp.maximum(acc.astype(ep) + b_trunk[i:i + 1, :],
                        0.0).astype(jnp.bfloat16)
    return h


def _nerf_kernel_novd(x_ref, w_pts_ref, w_h_ref, b_trunk_ref,
                      w_out_ref, b_out_ref, o_ref):
    h = _trunk(x_ref[...], w_pts_ref, w_h_ref, b_trunk_ref[...])
    out = (jnp.dot(h, w_out_ref[...], preferred_element_type=jnp.float32)
           + b_out_ref[...])
    o_ref[...] = out.astype(o_ref.dtype)


def _nerf_kernel_vd(x_ref, w_pts_ref, w_h_ref, b_trunk_ref,
                    w_v0f_ref, w_vs_ref, b_view_ref,
                    w_out_h_ref, w_out_hv_ref, b_out_ref, o_ref):
    x_in = x_ref[...]                                       # (tile, 128) bf16
    b_view = b_view_ref[...]                                # (3, 128)
    ep = b_view.dtype
    h = _trunk(x_in, w_pts_ref, w_h_ref, b_trunk_ref[...])  # (tile, 256) bf16

    # views_linears[0] consumes cat([feature, input_views]) -> split matmul.
    # w_vs[0] has the 3 real view-weight rows at 82..84, zeros elsewhere, so
    # dot(x_in, w_vs[0]) picks up only the view lanes of the fused input.
    acc0 = (jnp.dot(h, w_v0f_ref[...], preferred_element_type=jnp.float32)
            + jnp.dot(x_in, w_vs_ref[0], preferred_element_type=jnp.float32))
    hv = jnp.maximum(acc0.astype(ep) + b_view[0:1, :], 0.0).astype(jnp.bfloat16)
    for j in range(1, N_VIEW_LAYERS):
        acc = jnp.dot(hv, w_vs_ref[j], preferred_element_type=jnp.float32)
        hv = jnp.maximum(acc.astype(ep) + b_view[j:j + 1, :],
                         0.0).astype(jnp.bfloat16)

    # outputs = cat([rgb, alpha], -1): rgb weights in cols 0..2 of w_out_hv,
    # alpha weights in col 3 of w_out_h; remaining 124 lanes are zero padding.
    out = (jnp.dot(hv, w_out_hv_ref[...], preferred_element_type=jnp.float32)
           + jnp.dot(h, w_out_h_ref[...], preferred_element_type=jnp.float32)
           + b_out_ref[...])
    o_ref[...] = out.astype(o_ref.dtype)


# ---- parameter construction (logical nn.Linear shapes, weights as (in, out)) -
def init_params(key, use_viewdirs):
    def lin(k, fan_in, fan_out):
        k1, k2 = jax.random.split(k)
        w = jax.random.normal(k1, (fan_in, fan_out), jnp.float32) * 0.05
        b = jax.random.normal(k2, (fan_out,), jnp.float32) * 0.05
        # round weights to bf16 once so kernel and reference share identical weights
        w = w.astype(jnp.bfloat16).astype(jnp.float32)
        return w, b

    keys = iter(jax.random.split(key, 64))
    p = {"pts": [], "views": []}
    for i in range(D):
        if i == 0:
            fan_in = IN_ALL
        elif (i - 1) in SKIPS:
            fan_in = W + IN_ALL
        else:
            fan_in = W
        p["pts"].append(lin(next(keys), fan_in, W))
    if use_viewdirs:
        p["alpha"] = lin(next(keys), W, 1)
        p["views"].append(lin(next(keys), W + INPUT_CH_VIEWS, W2))
        for _ in range(D // 4):
            p["views"].append(lin(next(keys), W2, W2))
        p["rgb"] = lin(next(keys), W2, 3)
        # NOTE: feature_linear exists in the PyTorch __init__ but is never used
        # in forward(), so it is intentionally not materialized here.
    else:
        p["out"] = lin(next(keys), W, OUTPUT_CH)
    return p


# ---- packing: pad + split + stack weights into dense VMEM-friendly slabs ----
def pack_params(p, use_viewdirs, epilogue_dtype=jnp.float32):
    def pad_rows(w, rows):
        return jnp.pad(w, ((0, rows - w.shape[0]), (0, 0)))

    w_pts, w_h, trunk_b = [], [], []
    for i in range(D):
        w, b = p["pts"][i]
        trunk_b.append(b)
        if i == 0:
            w_pts.append(pad_rows(w, PTS_PAD))               # (82->128, 256)
        elif (i - 1) in SKIPS:
            w_pts.append(pad_rows(w[:IN_ALL], PTS_PAD))      # pts part (82->128, 256)
            w_h.append(w[IN_ALL:])                           # h part   (256, 256)
        else:
            w_h.append(w)                                    # (256, 256)
    packed = {
        "w_pts": jnp.stack(w_pts).astype(jnp.bfloat16),      # (2, 128, 256)
        "w_h": jnp.stack(w_h).astype(jnp.bfloat16),          # (7, 256, 256)
        "b_trunk": jnp.stack(trunk_b).astype(epilogue_dtype),  # (8, 256)
    }
    if use_viewdirs:
        w0, b0 = p["views"][0]                               # (259, 128), feature rows first
        # fold the 3 view-weight rows into a (128,128) slab at rows 82..84
        w_v0v = jnp.zeros((PTS_PAD, W2), jnp.float32)
        w_v0v = w_v0v.at[IN_ALL:IN_ALL + INPUT_CH_VIEWS].set(w0[W:])
        w_vs = [w_v0v]
        b_view = [b0]
        for j in range(1, N_VIEW_LAYERS):
            wj, bj = p["views"][j]
            w_vs.append(wj)
            b_view.append(bj)
        wa, ba = p["alpha"]                                  # (256, 1), (1,)
        wr, br = p["rgb"]                                    # (128, 3), (3,)
        w_out_h = jnp.zeros((W, OUT_PAD), jnp.float32).at[:, 3:4].set(wa)
        w_out_hv = jnp.zeros((W2, OUT_PAD), jnp.float32).at[:, 0:3].set(wr)
        b_out = (jnp.zeros((1, OUT_PAD), jnp.float32)
                 .at[0, 0:3].set(br).at[0, 3:4].set(ba))
        packed.update({
            "w_v0f": w0[:W].astype(jnp.bfloat16),            # (256, 128)
            "w_vs": jnp.stack(w_vs).astype(jnp.bfloat16),    # (3, 128, 128)
            "b_view": jnp.stack(b_view).astype(epilogue_dtype),  # (3, 128)
            "w_out_h": w_out_h.astype(jnp.bfloat16),         # (256, 128) alpha head
            "w_out_hv": w_out_hv.astype(jnp.bfloat16),       # (128, 128) rgb head
            "b_out": b_out.astype(jnp.float32),              # (1, 128)
        })
    else:
        wo, bo = p["out"]                                    # (256, 4), (4,)
        w_out = jnp.zeros((W, OUT_PAD), jnp.float32).at[:, :OUTPUT_CH].set(wo)
        b_out = jnp.zeros((1, OUT_PAD), jnp.float32).at[0, :OUTPUT_CH].set(bo)
        packed["w_out"] = w_out.astype(jnp.bfloat16)         # (256, 128)
        packed["b_out"] = b_out.astype(jnp.float32)          # (1, 128)
    return packed


# ---- wrapper -----------------------------------------------------------------
def face_feature_nerf(x, packed, use_viewdirs, tile_rows=None):
    n = x.shape[0]
    if tile_rows is None:
        # biggest tile that still gives a grid length >= 2 (keeps both v7x TCs
        # busy and amortizes the ~0.35us/step pipeline overhead on v6e).
        tile_rows = 256
        for t in (2048, 1024, 512):
            if n >= 2 * t:
                tile_rows = t
                break
    n_pad = ((n + tile_rows - 1) // tile_rows) * tile_rows

    # single fused 128-lane input slab: pts lanes 0..81, views lanes 82..84
    x_in = jnp.pad(x[:, :FEAT_TOTAL],
                   ((0, n_pad - n), (0, PTS_PAD - FEAT_TOTAL))).astype(jnp.bfloat16)

    def full(a):
        # whole-array weight slab; constant block index -> stays resident
        return pl.BlockSpec(a.shape, lambda i: (0,) * a.ndim)

    if use_viewdirs:
        args = (x_in, packed["w_pts"], packed["w_h"], packed["b_trunk"],
                packed["w_v0f"], packed["w_vs"], packed["b_view"],
                packed["w_out_h"], packed["w_out_hv"], packed["b_out"])
        kernel = _nerf_kernel_vd
    else:
        args = (x_in, packed["w_pts"], packed["w_h"], packed["b_trunk"],
                packed["w_out"], packed["b_out"])
        kernel = _nerf_kernel_novd
    in_specs = [pl.BlockSpec((tile_rows, PTS_PAD), lambda i: (i, 0))]
    in_specs += [full(a) for a in args[1:]]

    # advisory cost hint for XLA's scheduler
    flops = 2 * n_pad * (2 * PTS_PAD * W + (D - 1) * W * W)
    if use_viewdirs:
        flops += 2 * n_pad * (W * W2 + PTS_PAD * W2
                              + (N_VIEW_LAYERS - 1) * W2 * W2
                              + W2 * OUT_PAD + W * OUT_PAD)
    else:
        flops += 2 * n_pad * W * OUT_PAD
    bytes_accessed = (sum(int(a.size) * a.dtype.itemsize for a in args)
                      + n_pad * OUT_PAD * 4)

    out = pl.pallas_call(
        kernel,
        out_shape=jax.ShapeDtypeStruct((n_pad, OUT_PAD), jnp.float32),
        grid=(n_pad // tile_rows,),
        in_specs=in_specs,
        out_specs=pl.BlockSpec((tile_rows, OUT_PAD), lambda i: (i, 0)),
        compiler_params=pltpu.CompilerParams(
            dimension_semantics=("parallel",),
            vmem_limit_bytes=32 * 1024 * 1024),
        cost_estimate=pl.CostEstimate(flops=flops, transcendentals=0,
                                      bytes_accessed=bytes_accessed),
    )(*args)
    return out[:n, :OUTPUT_CH]


# ---- pure-JAX reference (mirrors the PyTorch forward with explicit concats) --
def nerf_ref(x, p, use_viewdirs):
    pts = x[:, :IN_ALL]
    views = x[:, IN_ALL:IN_ALL + INPUT_CH_VIEWS]
    h = pts
    for i in range(D):
        if (i - 1) in SKIPS:
            h = jnp.concatenate([pts, h], axis=-1)
        w, b = p["pts"][i]
        h = jax.nn.relu(h @ w + b)
    if use_viewdirs:
        wa, ba = p["alpha"]
        alpha = h @ wa + ba
        hv = jnp.concatenate([h, views], axis=-1)
        for j in range(N_VIEW_LAYERS):
            w, b = p["views"][j]
            hv = jax.nn.relu(hv @ w + b)
        wr, br = p["rgb"]
        rgb = hv @ wr + br
        return jnp.concatenate([rgb, alpha], axis=-1)
    else:
        wo, bo = p["out"]
        return h @ wo + bo


if __name__ == "__main__":
    key = jax.random.PRNGKey(0)
    kx, kp1, kp2 = jax.random.split(key, 3)

    N = 1024  # sampled points (rows); grid of 2 x 512-row tiles
    x = jax.random.normal(kx, (N, FEAT_TOTAL), jnp.float32)
    ep_dtype = _default_epilogue_dtype()

    ok = True
    # Module default path (use_viewdirs=False -> output_linear, output_ch=4)
    p_f = init_params(kp1, use_viewdirs=False)
    out_f = jax.block_until_ready(
        face_feature_nerf(x, pack_params(p_f, False, ep_dtype), False))
    ref_f = nerf_ref(x, p_f, False)
    ok &= bool(jnp.allclose(out_f, ref_f, atol=5e-2, rtol=5e-2))

    # use_viewdirs=True path (rgb + alpha -> 4 channels)
    p_t = init_params(kp2, use_viewdirs=True)
    out_t = jax.block_until_ready(
        face_feature_nerf(x, pack_params(p_t, True, ep_dtype), True))
    ref_t = nerf_ref(x, p_t, True)
    ok &= bool(jnp.allclose(out_t, ref_t, atol=5e-2, rtol=5e-2))

    assert out_f.shape == (N, OUTPUT_CH) and out_t.shape == (N, OUTPUT_CH)
    if ok:
        print("KERNEL_OK")
</pallas_src>

<mosaic_0001>
module attributes {stable_mosaic.version = 11 : i64} {
  func.func @_nerf_kernel_novd(%arg0: i32, %arg1: memref<512x128xbf16, #tpu.memory_space<vmem>>, %arg2: memref<2x128x256xbf16, #tpu.memory_space<vmem>>, %arg3: memref<7x256x256xbf16, #tpu.memory_space<vmem>>, %arg4: memref<8x256xf32, #tpu.memory_space<vmem>>, %arg5: memref<256x128xbf16, #tpu.memory_space<vmem>>, %arg6: memref<1x128xf32, #tpu.memory_space<vmem>>, %arg7: memref<512x128xf32, #tpu.memory_space<vmem>>) attributes {dimension_semantics = [#tpu.dimension_semantics<parallel>], iteration_bounds = array<i64: 2>, scalar_prefetch = 0 : i64, scratch_operands = 0 : i64, tpu.core_type = #tpu.core_type<tc>, window_params = [{transform_indices = @transform_0, window_bounds = array<i64: 512, 128>}, {pipeline_mode = #tpu.pipeline_mode<synchronous>, transform_indices = @transform_1, window_bounds = array<i64: 2, 128, 256>}, {pipeline_mode = #tpu.pipeline_mode<synchronous>, transform_indices = @transform_2, window_bounds = array<i64: 7, 256, 256>}, {pipeline_mode = #tpu.pipeline_mode<synchronous>, transform_indices = @transform_3, window_bounds = array<i64: 8, 256>}, {pipeline_mode = #tpu.pipeline_mode<synchronous>, transform_indices = @transform_4, window_bounds = array<i64: 256, 128>}, {pipeline_mode = #tpu.pipeline_mode<synchronous>, transform_indices = @transform_5, window_bounds = array<i64: 1, 128>}, {transform_indices = @transform_6, window_bounds = array<i64: 512, 128>}]} {
    %c0 = arith.constant 0 : index
    %c0_0 = arith.constant 0 : index
    %0 = vector.load %arg1[%c0, %c0_0] : memref<512x128xbf16, #tpu.memory_space<vmem>>, vector<512x128xbf16>
    %c0_1 = arith.constant 0 : index
    %c0_2 = arith.constant 0 : index
    %1 = vector.load %arg4[%c0_1, %c0_2] : memref<8x256xf32, #tpu.memory_space<vmem>>, vector<8x256xf32>
    %c0_3 = arith.constant 0 : index
    %c0_4 = arith.constant 0 : index
    %c0_5 = arith.constant 0 : index
    %2 = vector.load %arg2[%c0_3, %c0_4, %c0_5] : memref<2x128x256xbf16, #tpu.memory_space<vmem>>, vector<1x128x256xbf16>
    %3 = vector.shape_cast %2 : vector<1x128x256xbf16> to vector<128x256xbf16>
    %cst = arith.constant dense<0.000000e+00> : vector<512x256xf32>
    %4 = tpu.matmul %0, %3, %cst {dimension_numbers = #tpu.dot_dimension_numbers<[1], [0], [0], [1], [0, 0, 1, 1], [], []>} : vector<512x128xbf16>, vector<128x256xbf16>, vector<512x256xf32> -> vector<512x256xf32>
    %5 = vector.extract_strided_slice %1 {offsets = [0, 0], sizes = [1, 256], strides = [1, 1]} : vector<8x256xf32> to vector<1x256xf32>
    %6 = vector.broadcast %5 : vector<1x256xf32> to vector<512x256xf32>
    %7 = arith.addf %4, %6 : vector<512x256xf32>
    %cst_6 = arith.constant 0.000000e+00 : f32
    %8 = vector.broadcast %cst_6 : f32 to vector<512x256xf32>
    %9 = arith.maximumf %7, %8 : vector<512x256xf32>
    %10 = arith.truncf %9 : vector<512x256xf32> to vector<512x256xbf16>
    %c0_7 = arith.constant 0 : index
    %c0_8 = arith.constant 0 : index
    %c0_9 = arith.constant 0 : index
    %11 = vector.load %arg3[%c0_7, %c0_8, %c0_9] : memref<7x256x256xbf16, #tpu.memory_space<vmem>>, vector<1x256x256xbf16>
    %12 = vector.shape_cast %11 : vector<1x256x256xbf16> to vector<256x256xbf16>
    %cst_10 = arith.constant dense<0.000000e+00> : vector<512x256xf32>
    %13 = tpu.matmul %10, %12, %cst_10 {dimension_numbers = #tpu.dot_dimension_numbers<[1], [0], [0], [1], [0, 0, 1, 1], [], []>} : vector<512x256xbf16>, vector<256x256xbf16>, vector<512x256xf32> -> vector<512x256xf32>
    %14 = vector.extract_strided_slice %1 {offsets = [1, 0], sizes = [1, 256], strides = [1, 1]} : vector<8x256xf32> to vector<1x256xf32>
    %15 = vector.broadcast %14 : vector<1x256xf32> to vector<512x256xf32>
    %16 = arith.addf %13, %15 : vector<512x256xf32>
    %cst_11 = arith.constant 0.000000e+00 : f32
    %17 = vector.broadcast %cst_11 : f32 to vector<512x256xf32>
    %18 = arith.maximumf %16, %17 : vector<512x256xf32>
    %19 = arith.truncf %18 : vector<512x256xf32> to vector<512x256xbf16>
    %c1 = arith.constant 1 : index
    %c0_12 = arith.constant 0 : index
    %c0_13 = arith.constant 0 : index
    %20 = vector.load %arg3[%c1, %c0_12, %c0_13] : memref<7x256x256xbf16, #tpu.memory_space<vmem>>, vector<1x256x256xbf16>
    %21 = vector.shape_cast %20 : vector<1x256x256xbf16> to vector<256x256xbf16>
    %cst_14 = arith.constant dense<0.000000e+00> : vector<512x256xf32>
    %22 = tpu.matmul %19, %21, %cst_14 {dimension_numbers = #tpu.dot_dimension_numbers<[1], [0], [0], [1], [0, 0, 1, 1], [], []>} : vector<512x256xbf16>, vector<256x256xbf16>, vector<512x256xf32> -> vector<512x256xf32>
    %23 = vector.extract_strided_slice %1 {offsets = [2, 0], sizes = [1, 256], strides = [1, 1]} : vector<8x256xf32> to vector<1x256xf32>
    %24 = vector.broadcast %23 : vector<1x256xf32> to vector<512x256xf32>
    %25 = arith.addf %22, %24 : vector<512x256xf32>
    %cst_15 = arith.constant 0.000000e+00 : f32
    %26 = vector.broadcast %cst_15 : f32 to vector<512x256xf32>
    %27 = arith.maximumf %25, %26 : vector<512x256xf32>
    %28 = arith.truncf %27 : vector<512x256xf32> to vector<512x256xbf16>
    %c2 = arith.constant 2 : index
    %c0_16 = arith.constant 0 : index
    %c0_17 = arith.constant 0 : index
    %29 = vector.load %arg3[%c2, %c0_16, %c0_17] : memref<7x256x256xbf16, #tpu.memory_space<vmem>>, vector<1x256x256xbf16>
    %30 = vector.shape_cast %29 : vector<1x256x256xbf16> to vector<256x256xbf16>
    %cst_18 = arith.constant dense<0.000000e+00> : vector<512x256xf32>
    %31 = tpu.matmul %28, %30, %cst_18 {dimension_numbers = #tpu.dot_dimension_numbers<[1], [0], [0], [1], [0, 0, 1, 1], [], []>} : vector<512x256xbf16>, vector<256x256xbf16>, vector<512x256xf32> -> vector<512x256xf32>
    %32 = vector.extract_strided_slice %1 {offsets = [3, 0], sizes = [1, 256], strides = [1, 1]} : vector<8x256xf32> to vector<1x256xf32>
    %33 = vector.broadcast %32 : vector<1x256xf32> to vector<512x256xf32>
    %34 = arith.addf %31, %33 : vector<512x256xf32>
    %cst_19 = arith.constant 0.000000e+00 : f32
    %35 = vector.broadcast %cst_19 : f32 to vector<512x256xf32>
    %36 = arith.maximumf %34, %35 : vector<512x256xf32>
    %37 = arith.truncf %36 : vector<512x256xf32> to vector<512x256xbf16>
    %c3 = arith.constant 3 : index
    %c0_20 = arith.constant 0 : index
    %c0_21 = arith.constant 0 : index
    %38 = vector.load %arg3[%c3, %c0_20, %c0_21] : memref<7x256x256xbf16, #tpu.memory_space<vmem>>, vector<1x256x256xbf16>
    %39 = vector.shape_cast %38 : vector<1x256x256xbf16> to vector<256x256xbf16>
    %cst_22 = arith.constant dense<0.000000e+00> : vector<512x256xf32>
    %40 = tpu.matmul %37, %39, %cst_22 {dimension_numbers = #tpu.dot_dimension_numbers<[1], [0], [0], [1], [0, 0, 1, 1], [], []>} : vector<512x256xbf16>, vector<256x256xbf16>, vector<512x256xf32> -> vector<512x256xf32>
    %41 = vector.extract_strided_slice %1 {offsets = [4, 0], sizes = [1, 256], strides = [1, 1]} : vector<8x256xf32> to vector<1x256xf32>
    %42 = vector.broadcast %41 : vector<1x256xf32> to vector<512x256xf32>
    %43 = arith.addf %40, %42 : vector<512x256xf32>
    %cst_23 = arith.constant 0.000000e+00 : f32
    %44 = vector.broadcast %cst_23 : f32 to vector<512x256xf32>
    %45 = arith.maximumf %43, %44 : vector<512x256xf32>
    %46 = arith.truncf %45 : vector<512x256xf32> to vector<512x256xbf16>
    %c4 = arith.constant 4 : index
    %c0_24 = arith.constant 0 : index
    %c0_25 = arith.constant 0 : index
    %47 = vector.load %arg3[%c4, %c0_24, %c0_25] : memref<7x256x256xbf16, #tpu.memory_space<vmem>>, vector<1x256x256xbf16>
    %48 = vector.shape_cast %47 : vector<1x256x256xbf16> to vector<256x256xbf16>
    %cst_26 = arith.constant dense<0.000000e+00> : vector<512x256xf32>
    %49 = tpu.matmul %46, %48, %cst_26 {dimension_numbers = #tpu.dot_dimension_numbers<[1], [0], [0], [1], [0, 0, 1, 1], [], []>} : vector<512x256xbf16>, vector<256x256xbf16>, vector<512x256xf32> -> vector<512x256xf32>
    %c1_27 = arith.constant 1 : index
    %c0_28 = arith.constant 0 : index
    %c0_29 = arith.constant 0 : index
    %50 = vector.load %arg2[%c1_27, %c0_28, %c0_29] : memref<2x128x256xbf16, #tpu.memory_space<vmem>>, vector<1x128x256xbf16>
    %51 = vector.shape_cast %50 : vector<1x128x256xbf16> to vector<128x256xbf16>
    %cst_30 = arith.constant dense<0.000000e+00> : vector<512x256xf32>
    %52 = tpu.matmul %0, %51, %cst_30 {dimension_numbers = #tpu.dot_dimension_numbers<[1], [0], [0], [1], [0, 0, 1, 1], [], []>} : vector<512x128xbf16>, vector<128x256xbf16>, vector<512x256xf32> -> vector<512x256xf32>
    %53 = arith.addf %49, %52 : vector<512x256xf32>
    %54 = vector.extract_strided_slice %1 {offsets = [5, 0], sizes = [1, 256], strides = [1, 1]} : vector<8x256xf32> to vector<1x256xf32>
    %55 = vector.broadcast %54 : vector<1x256xf32> to vector<512x256xf32>
    %56 = arith.addf %53, %55 : vector<512x256xf32>
    %cst_31 = arith.constant 0.000000e+00 : f32
    %57 = vector.broadcast %cst_31 : f32 to vector<512x256xf32>
    %58 = arith.maximumf %56, %57 : vector<512x256xf32>
    %59 = arith.truncf %58 : vector<512x256xf32> to vector<512x256xbf16>
    %c5 = arith.constant 5 : index
    %c0_32 = arith.constant 0 : index
    %c0_33 = arith.constant 0 : index
    %60 = vector.load %arg3[%c5, %c0_32, %c0_33] : memref<7x256x256xbf16, #tpu.memory_space<vmem>>, vector<1x256x256xbf16>
    %61 = vector.shape_cast %60 : vector<1x256x256xbf16> to vector<256x256xbf16>
    %cst_34 = arith.constant dense<0.000000e+00> : vector<512x256xf32>
    %62 = tpu.matmul %59, %61, %cst_34 {dimension_numbers = #tpu.dot_dimension_numbers<[1], [0], [0], [1], [0, 0, 1, 1], [], []>} : vector<512x256xbf16>, vector<256x256xbf16>, vector<512x256xf32> -> vector<512x256xf32>
    %63 = vector.extract_strided_slice %1 {offsets = [6, 0], sizes = [1, 256], strides = [1, 1]} : vector<8x256xf32> to vector<1x256xf32>
    %64 = vector.broadcast %63 : vector<1x256xf32> to vector<512x256xf32>
    %65 = arith.addf %62, %64 : vector<512x256xf32>
    %cst_35 = arith.constant 0.000000e+00 : f32
    %66 = vector.broadcast %cst_35 : f32 to vector<512x256xf32>
    %67 = arith.maximumf %65, %66 : vector<512x256xf32>
    %68 = arith.truncf %67 : vector<512x256xf32> to vector<512x256xbf16>
    %c6 = arith.constant 6 : index
    %c0_36 = arith.constant 0 : index
    %c0_37 = arith.constant 0 : index
    %69 = vector.load %arg3[%c6, %c0_36, %c0_37] : memref<7x256x256xbf16, #tpu.memory_space<vmem>>, vector<1x256x256xbf16>
    %70 = vector.shape_cast %69 : vector<1x256x256xbf16> to vector<256x256xbf16>
    %cst_38 = arith.constant dense<0.000000e+00> : vector<512x256xf32>
    %71 = tpu.matmul %68, %70, %cst_38 {dimension_numbers = #tpu.dot_dimension_numbers<[1], [0], [0], [1], [0, 0, 1, 1], [], []>} : vector<512x256xbf16>, vector<256x256xbf16>, vector<512x256xf32> -> vector<512x256xf32>
    %72 = vector.extract_strided_slice %1 {offsets = [7, 0], sizes = [1, 256], strides = [1, 1]} : vector<8x256xf32> to vector<1x256xf32>
    %73 = vector.broadcast %72 : vector<1x256xf32> to vector<512x256xf32>
    %74 = arith.addf %71, %73 : vector<512x256xf32>
    %cst_39 = arith.constant 0.000000e+00 : f32
    %75 = vector.broadcast %cst_39 : f32 to vector<512x256xf32>
    %76 = arith.maximumf %74, %75 : vector<512x256xf32>
    %77 = arith.truncf %76 : vector<512x256xf32> to vector<512x256xbf16>
    %c0_40 = arith.constant 0 : index
    %c0_41 = arith.constant 0 : index
    %78 = vector.load %arg5[%c0_40, %c0_41] : memref<256x128xbf16, #tpu.memory_space<vmem>>, vector<256x128xbf16>
    %cst_42 = arith.constant dense<0.000000e+00> : vector<512x128xf32>
    %79 = tpu.matmul %77, %78, %cst_42 {dimension_numbers = #tpu.dot_dimension_numbers<[1], [0], [0], [1], [0, 0, 1, 1], [], []>} : vector<512x256xbf16>, vector<256x128xbf16>, vector<512x128xf32> -> vector<512x128xf32>
    %c0_43 = arith.constant 0 : index
    %c0_44 = arith.constant 0 : index
    %80 = vector.load %arg6[%c0_43, %c0_44] : memref<1x128xf32, #tpu.memory_space<vmem>>, vector<1x128xf32>
    %81 = vector.broadcast %80 : vector<1x128xf32> to vector<512x128xf32>
    %82 = arith.addf %79, %81 : vector<512x128xf32>
    %c0_45 = arith.constant 0 : index
    %c0_46 = arith.constant 0 : index
    %83 = vector.load %arg7[%c0_45, %c0_46] : memref<512x128xf32, #tpu.memory_space<vmem>>, vector<512x128xf32>
    tpu.vector_store %arg7[%c0_45, %c0_46], %82 {strides = array<i32>} : memref<512x128xf32, #tpu.memory_space<vmem>>, vector<512x128xf32>,
    return
  }
  func.func @transform_0(%arg0: i32) -> (i32, i32) {
    %c0_i32 = arith.constant 0 : i32
    %c0_i32_0 = arith.constant 0 : i32
    return %arg0, %c0_i32 : i32, i32
  }
  func.func @transform_1(%arg0: i32) -> (i32, i32, i32) {
    %c0_i32 = arith.constant 0 : i32
    %c0_i32_0 = arith.constant 0 : i32
    %c0_i32_1 = arith.constant 0 : i32
    %c0_i32_2 = arith.constant 0 : i32
    return %c0_i32, %c0_i32_0, %c0_i32_1 : i32, i32, i32
  }
  func.func @transform_2(%arg0: i32) -> (i32, i32, i32) {
    %c0_i32 = arith.constant 0 : i32
    %c0_i32_0 = arith.constant 0 : i32
    %c0_i32_1 = arith.constant 0 : i32
    %c0_i32_2 = arith.constant 0 : i32
    return %c0_i32, %c0_i32_0, %c0_i32_1 : i32, i32, i32
  }
  func.func @transform_3(%arg0: i32) -> (i32, i32) {
    %c0_i32 = arith.constant 0 : i32
    %c0_i32_0 = arith.constant 0 : i32
    %c0_i32_1 = arith.constant 0 : i32
    return %c0_i32, %c0_i32_0 : i32, i32
  }
  func.func @transform_4(%arg0: i32) -> (i32, i32) {
    %c0_i32 = arith.constant 0 : i32
    %c0_i32_0 = arith.constant 0 : i32
    %c0_i32_1 = arith.constant 0 : i32
    return %c0_i32, %c0_i32_0 : i32, i32
  }
  func.func @transform_5(%arg0: i32) -> (i32, i32) {
    %c0_i32 = arith.constant 0 : i32
    %c0_i32_0 = arith.constant 0 : i32
    %c0_i32_1 = arith.constant 0 : i32
    return %c0_i32, %c0_i32_0 : i32, i32
  }
  func.func @transform_6(%arg0: i32) -> (i32, i32) {
    %c0_i32 = arith.constant 0 : i32
    %c0_i32_0 = arith.constant 0 : i32
    return %arg0, %c0_i32 : i32, i32
  }
}

</mosaic_0001>

<bundles_post_ra>
// kernel: tpu_custom_call.1
= control target key start
LH: loop header
LB: loop body
LE: loop exit
PB: predicated region body
PF: predicated region fallthrough
CT: control target
= control target key end

     0   :  { %11 = vsyncpa [#allocation3], 0  ;;  %s11038_s0 = inlined_call_operand.hbm [shape: bf16[1024,128], index: 0, kind: input, shape index: {}]   ;;  %s11039_s1 = inlined_call_operand.hbm [shape: bf16[2,128,256], index: 1, kind: input, shape index: {}]   ;;  %s11040_s2 = inlined_call_operand.hbm [shape: bf16[7,256,256], index: 2, kind: input, shape index: {}]   ;;  %s11041_s3 = inlined_call_operand.hbm [shape: f32[8,256], index: 3, kind: input, shape index: {}]   ;;  %s11042_s4 = inlined_call_operand.hbm [shape: bf16[256,128], index: 4, kind: input, shape index: {}]   ;;  %s11043_s5 = inlined_call_operand.vmem [shape: f32[1,128], index: 5, kind: input, shape index: {}]   ;;  %s11044_s6 = inlined_call_operand.hbm [shape: f32[1024,128], index: 6, kind: output, shape index: {}]  }
   0x1   :  { %13 = vsyncpa [#allocation3 + $0x1], 0 }
   0x2   :  { %14 = vsyncpa [#allocation6], 0 }
   0x3   :  { %15 = vsyncpa [#allocation9], 0 }
   0x4   :  { %16 = vsyncpa [#allocation4], 0 }
   0x5   :  { %18 = vsyncpa [#allocation4 + $0x1], 0  ;;  %s8975_s21 = smov 0   ;;  %s8977_s22 = smov 0  }
   0x6   :  { %s8979_s23 = smov 0   ;;  %s8981_s24 = smov 0  }
   0x7 LB: > { %s8996_s25 = sadd.s32 4294967295, %s8925_s24   ;;  %s7648_s26 = sadd.s32 4294967294, %s8925_s24   ;;  %s8925_s24 = sphi %s8981_s24, %s11067_s24   ;;  %s8921_s23 = sphi %s8979_s23, %s11066_s23   ;;  %s8917_s22 = sphi %s8977_s22, %s11065_s22   ;;  %s8913_s21 = sphi %s8975_s21, %s11064_s21  }
   0x8   : > { %p44_p0 = scmp.ne.s32.totalorder %s8917_s22, %s8913_s21  ;;  %p11045_p1 = scmp.eq.s32.totalorder %s8996_s25, 0 }
   0x9   : > { %p179_p3 = scmp.eq.s32.totalorder %s7648_s26, 1  ;;  %p7649_p5 = scmp.ge.s32.totalorder %s8925_s24, 1 }
   0xa   : > { %p9005_p4 = por %p11045_p1, %p44_p0  ;;  %p186_p7 = scmp.lt.s32.totalorder %s8925_s24, 3 }
   0xb   : > { %p9010_p6 = por %p179_p3, %p44_p0  ;;  %s8927_s30 = smov [#allocation5]  }
   0xc   : > { %s11048_s27 = scalar_select %p9005_p4, 1, 0 }
   0xd   : > { %s11049_s28 = scalar_select %p9010_p6, 1, 0 }
   0xe   : > { %p9015_p8 = pnand %p7649_p5, %p186_p7  ;;  %s198_s7 = sshll.u32 %s8927_s30, 4  ;;  %s9019_s7 = int_to_ptr.vmem [resolvable:$true] %s198_s7 }
   0xf   : > { %s8928_s9 = smov [#allocation8]   ;;  %s8929_s11 = smov [#allocation7]  }
  0x10   : > { %s11050_s29 = scalar_select %p9015_p8, 1, 0 }
  0x11   : > { %p8157_p9 = pneg %p9015_p8  ;;  %s225_s10 = sshll.u32 %s8928_s9, 4  ;;  %s9030_s10 = int_to_ptr.vmem [resolvable:$true] %s225_s10 }
  0x12   : > { %s9032_s12 = sshll.u32 %s8929_s11, 4  ;;  %s8709_s15 = scalar_lea.hbm %s11039_s1, 4096  ;;  %s212_s12 = int_to_ptr.vmem [resolvable:$true] %s9032_s12 }
  0x13   : > { %p9026_p11 = pnand %p8157_p9, %p11045_p1  ;;  %p8710_p12 = scmp.ne.s32.totalorder %s11039_s1, %s8709_s15 }
  0x14   : > { %p8716_p5 = scmp.lt.u32.totalorder %s8709_s15, %s11039_s1 }
  0x15   : > { %p9042_p13 = pneg %p9026_p11 }
  0x17   : > { %p8712_p0 = pnand %p9042_p13, %p8710_p12 }
  0x19   : > { %p8713_p3 = pneg %p8712_p0 }
  0x1b   : > { %p8718_p7 = pnand %p8716_p5, %p8713_p3 }
  0x1d   : > { %8721 = shalt.err (!%p8718_p7)
}
  0x1e   : > { %s8722_s26 = scalar_lea.vmem %s9019_s7, 4096  ;;  %p8730_p2 = scmp.lt.s32.totalorder %s9019_s7, %s9019_s7 }
  0x1f   : > { %p8723_p9 = scmp.ne.s32.totalorder %s9019_s7, %s8722_s26  ;;  %p8731_p6 = scmp.lt.s32.totalorder %s8722_s26, %s8722_s26 }
  0x21   : > { %p8725_p10 = pnand %p8723_p9, %p9042_p13  ;;  %p8732_p12 = por %p8731_p6, %p8730_p2 }
  0x23   : > { %p8726_p1 = pneg %p8725_p10 }
  0x25   : > { %p8733_p0 = pnand %p8732_p12, %p8726_p1 }
  0x27   : > { %8736 = shalt.err (!%p8733_p0)
}
  0x28   : > { %s8930_s30 = smov 128   ;;  %s8931_s9 = smov 8  }
  0x29   : > { %8160 = dma.hbm_to_vmem [thread:$0]  (!%p9026_p11), %s11039_s1, 4096, %s9019_s7, [#allocation6], %s8930_s30, %s8930_s30, %s8931_s9  }
  0x2a   : > { %s8737_s16 = scalar_lea.hbm %s11041_s3, 256 }
  0x2b   : > { %p8738_p1 = scmp.ne.s32.totalorder %s11041_s3, %s8737_s16  ;;  %p8744_p10 = scmp.lt.u32.totalorder %s8737_s16, %s11041_s3 }
  0x2d   : > { %p8740_p2 = pnand %p8738_p1, %p9042_p13 }
  0x2f   : > { %p8741_p6 = pneg %p8740_p2 }
  0x31   : > { %p8746_p3 = pnand %p8744_p10, %p8741_p6 }
  0x33   : > { %8749 = shalt.err (!%p8746_p3)
}
  0x34   : > { %s8750_s7 = scalar_lea.vmem %s9030_s10, 256  ;;  %p8758_p12 = scmp.lt.s32.totalorder %s9030_s10, %s9030_s10 }
  0x35   : > { %p8751_p5 = scmp.ne.s32.totalorder %s9030_s10, %s8750_s7  ;;  %p8759_p0 = scmp.lt.s32.totalorder %s8750_s7, %s8750_s7 }
  0x37   : > { %p8753_p7 = pnand %p8751_p5, %p9042_p13  ;;  %p8760_p1 = por %p8759_p0, %p8758_p12 }
  0x39   : > { %p8754_p9 = pneg %p8753_p7 }
  0x3b   : > { %p8761_p2 = pnand %p8760_p1, %p8754_p9 }
  0x3d   : > { %8764 = shalt.err (!%p8761_p2)
}
  0x3e   : > { %8166 = dma.hbm_to_vmem [thread:$0]  (!%p9026_p11), %s11041_s3, 256, %s9030_s10, [#allocation9]  }
  0x3f   : > { %s8765_s16 = scalar_lea.hbm %s11040_s2, 28672 }
  0x40   : > { %p8766_p6 = scmp.ne.s32.totalorder %s11040_s2, %s8765_s16  ;;  %p8772_p5 = scmp.lt.u32.totalorder %s8765_s16, %s11040_s2 }
  0x42   : > { %p8768_p10 = pnand %p8766_p6, %p9042_p13 }
  0x44   : > { %p8769_p3 = pneg %p8768_p10 }
  0x46   : > { %p8774_p7 = pnand %p8772_p5, %p8769_p3 }
  0x48   : > { %8777 = shalt.err (!%p8774_p7)
}
  0x49   : > { %s8778_s7 = scalar_lea.vmem %s212_s12, 28672  ;;  %p8786_p1 = scmp.lt.s32.totalorder %s212_s12, %s212_s12 }
  0x4a   : > { %p8779_p9 = scmp.ne.s32.totalorder %s212_s12, %s8778_s7  ;;  %p8787_p2 = scmp.lt.s32.totalorder %s8778_s7, %s8778_s7 }
  0x4c   : > { %p8781_p12 = pnand %p8779_p9, %p9042_p13  ;;  %p8788_p4 = por %p8787_p2, %p8786_p1 }
  0x4e   : > { %p8782_p0 = pneg %p8781_p12 }
  0x50   : > { %p8789_p8 = pnand %p8788_p4, %p8782_p0 }
  0x52   : > { %8792 = shalt.err (!%p8789_p8)
}
  0x53   : > { %8163 = dma.hbm_to_vmem [thread:$0]  (!%p9026_p11), %s11040_s2, 28672, %s212_s12, [#allocation6], %s8930_s30, %s8930_s30, %s8931_s9  }
  0x54   : > { %s8932_s13 = smov [#allocation10]   ;;  %s8793_s17 = scalar_lea.hbm %s11042_s4, 2048 }
  0x55   : > { %s235_s14 = sshll.u32 %s8932_s13, 4  ;;  %p8794_p4 = scmp.ne.s32.totalorder %s11042_s4, %s8793_s17  ;;  %s236_s14 = int_to_ptr.vmem [resolvable:$true] %s235_s14 }
  0x56   : > { %p8800_p10 = scmp.lt.u32.totalorder %s8793_s17, %s11042_s4 }
  0x57   : > { %p8796_p8 = pnand %p8794_p4, %p9042_p13 }
  0x59   : > { %p8797_p6 = pneg %p8796_p8 }
  0x5b   : > { %p8802_p3 = pnand %p8800_p10, %p8797_p6 }
  0x5d   : > { %8805 = shalt.err (!%p8802_p3)
}
  0x5e   : > { %s8806_s12 = scalar_lea.vmem %s236_s14, 2048  ;;  %p8814_p12 = scmp.lt.s32.totalorder %s236_s14, %s236_s14 }
  0x5f   : > { %p8807_p5 = scmp.ne.s32.totalorder %s236_s14, %s8806_s12  ;;  %p8815_p0 = scmp.lt.s32.totalorder %s8806_s12, %s8806_s12 }
  0x61   : > { %p8809_p7 = pnand %p8807_p5, %p9042_p13  ;;  %p8816_p1 = por %p8815_p0, %p8814_p12 }
  0x63   : > { %p8810_p9 = pneg %p8809_p7 }
  0x65   : > { %p8817_p2 = pnand %p8816_p1, %p8810_p9 }
  0x67   : > { %8820 = shalt.err (!%p8817_p2)
}
  0x68   : > { %s8933_s30 = smov 64   ;;  %s8934_s18 = smov 4  }
  0x69   : > { %8169 = dma.hbm_to_vmem [thread:$0]  (!%p9026_p11), %s11042_s4, 2048, %s236_s14, [#allocation9], %s8933_s30, %s8933_s30, %s8934_s18  }
  0x6a   : > { %s9133_s11 = sadd.s32 1, %s8925_s24   ;;  %s31_s15 = sadd.s32 1, %s8921_s23 }
  0x6b   : > { %s28_s13 = ssub.s32 %s8925_s24, %s9133_s11  ;;  %p38_p4 = scmp.ne.s32.totalorder %s8921_s23, %s8917_s22 }
  0x6c   : > { %p29_p13 = scmp.eq.s32.totalorder %s28_s13, 0  ;;  %p39_p8 = scmp.eq.s32.totalorder %s8925_s24, 0 }
  0x6d   : > { %p11053_p10 = scmp.eq.s32.totalorder %s8996_s25, 1  ;;  %p8182_p5 = scmp.lt.s32.totalorder %s8925_s24, 2 }
  0x6e   : > { %s9142_s16 = scalar_select %p29_p13, %s8921_s23, %s31_s15  }
  0x6f   : > { %p40_p6 = por %p39_p8, %p38_p4  ;;  %p9146_p3 = por %p11053_p10, %p38_p4 }
  0x70   : > { %s252_s17 = sand.u32 1, %s8921_s23   ;;  %s7975_s14 = sshll.u32 %s8925_s24, 12 }
  0x71   : > { %s7655_s19 = sshll.u32 %s252_s17, 8  ;;  %s9156_s7 = scalar_lea.hbm %s11038_s0, %s7975_s14 }
  0x72   : > { %s256_s12 = scalar_lea.vmem [#allocation2], %s7655_s19  ;;  %p9160_p11 = pnand %p8182_p5, %p40_p6 }
  0x73   : > { %s263_s9 = sshll.u32 %s256_s12, 4  ;;  %s9164_s13 = scalar_lea.sflag [#allocation3], %s252_s17  ;;  %s9158_s9 = int_to_ptr.vmem [resolvable:$true] %s263_s9 }
  0x74   : > { %s8821_s15 = scalar_lea.hbm %s9156_s7, 4096  ;;  %p8823_p9 = pneg %p9160_p11 }
  0x75   : > { %p8822_p7 = scmp.ne.s32.totalorder %s9156_s7, %s8821_s15  ;;  %s8826_s20 = scalar_lea.hbm %s11038_s0, 8192 }
  0x76   : > { %p8827_p1 = scmp.lt.u32.totalorder %s9156_s7, %s11038_s0  ;;  %p8828_p2 = scmp.lt.u32.totalorder %s8826_s20, %s8821_s15 }
  0x77   : > { %p8824_p12 = pnand %p8823_p9, %p8822_p7  ;;  %p8830_p4 = scmp.lt.u32.totalorder %s8821_s15, %s9156_s7 }
  0x78   : > { %p8829_p13 = por %p8828_p2, %p8827_p1 }
  0x79   : > { %p8825_p0 = pneg %p8824_p12 }
  0x7a   : > { %p8831_p8 = por %p8830_p4, %p8829_p13 }
  0x7c   : > { %p8832_p6 = pnand %p8831_p8, %p8825_p0 }
  0x7e   : > { %8835 = shalt.err (!%p8832_p6)
}
  0x7f   : > { %s8836_s17 = scalar_lea.vmem %s9158_s9, 4096  ;;  %s8935_s19 = smov [#allocation2]  }
  0x80   : > { %p8837_p10 = scmp.ne.s32.totalorder %s9158_s9, %s8836_s17  ;;  %s8841_s14 = sshll.u32 %s8935_s19, 4  ;;  %s8842_s14 = int_to_ptr.vmem [resolvable:$false] %s8841_s14 }
  0x81   : > { %s8843_s26 = scalar_lea.vmem %s8842_s14, 8192  ;;  %p8844_p12 = scmp.lt.s32.totalorder %s9158_s9, %s8842_s14 }
  0x82   : > { %p8839_p5 = pnand %p8837_p10, %p8823_p9  ;;  %p8845_p1 = scmp.lt.s32.totalorder %s8843_s26, %s8836_s17 }
  0x84   : > { %p8840_p7 = pneg %p8839_p5  ;;  %p8846_p2 = por %p8845_p1, %p8844_p12 }
  0x86   : > { %p8847_p13 = pnand %p8846_p2, %p8840_p7 }
  0x88   : > { %8850 = shalt.err (!%p8847_p13)
}
  0x89   : > { %8173 = dma.hbm_to_vmem [thread:$0]  (!%p9160_p11), %s9156_s7, 4096, %s9158_s9, %s9164_s13, %s8933_s30, %s8933_s30, %s8934_s18  }
  0x8a   : > { %p11056_p9 = scmp.ne.s32.totalorder %s11050_s29, 0 }
  0x8b   : > { %s9198_s15 = sand.u32 (!%p11056_p9), 1, %s8917_s22   ;;  %p11057_p0 = scmp.ne.s32.totalorder (!%p11056_p9), %s11048_s27, 0 }
  0x8c   : > { %275 = sbr.rel (%p11056_p9) target bundleno = 2545 (0x9f1), region = 44  ;;  %s7659_s20 = sshll.u32 (!%p11056_p9), %s9198_s15, 8 }
  0x8d   : > { %s278_s12 = scalar_lea.sflag (!%p11056_p9), [#allocation3], %s9198_s15  ;;  %s9202_s17 = scalar_lea.vmem (!%p11056_p9), [#allocation2], %s7659_s20 }
  0x93   : > { %8896 = dma.done.wait (%p11057_p0), %s278_s12, 4096  }
  0x94   : > { %8898 = vsyncadd (%p11057_p0), %s278_s12, 4294963200  ;;  %p11058_p11 = scmp.eq.s32.totalorder %s8996_s25, 0 }
  0x96   : > { %8900 = dma.done.wait (%p11058_p11), [#allocation6], 32768   ;;  %p11059_p4 = pmov %p11058_p11 }
  0x98   : > { %8902 = vsyncadd (%p11059_p4), [#allocation6], 4294934528  ;;  %p11060_p8 = pmov %p11059_p4 }
  0x99   : > { %p11061_p6 = pmov %p11059_p4 }
  0x9a   : > { %8904 = dma.done.wait (%p11060_p8), [#allocation9], 2304  }
  0x9b   : > { %8906 = vsyncadd (%p11061_p6), [#allocation9], 4294964992  ;;  %v8936_v0 = vmov 0   ;;  %v8231_v1 = vld [vmem:[#allocation5 + $0x4] ss:$8 sps:$4 sm:$0xff]   ;;  %v8257_v19 = vld [vmem:[%s9202_s17 + $0x10] sm:$0xff]  }
  0x9c   : > { %723 = vmatprep.mubr.bf16.mxu0 %v8936_v0  ;;  %v8233_v2 = vld [vmem:[#allocation5] ss:$8 sps:$4 sm:$0xff]   ;;  %691 = vmatprep.subr.bf16.mxu0 %v8231_v1  ;;  %v8234_v3 = vld [vmem:[#allocation5 + $0x14] ss:$8 sps:$4 sm:$0xff]   ;;  %v8236_v4 = vld [vmem:[#allocation5 + $0x10] ss:$8 sps:$4 sm:$0xff]  }
  0x9d   : > { %692 = vmatpush1.bf16.msra.mxu0 %v8233_v2  ;;  %v8237_v5 = vld [vmem:[#allocation5 + $0x24] ss:$8 sps:$4 sm:$0xff]   ;;  %v8239_v6 = vld [vmem:[#allocation5 + $0x20] ss:$8 sps:$4 sm:$0xff]   ;;  %v8240_v7 = vld [vmem:[#allocation5 + $0x34] ss:$8 sps:$4 sm:$0xff]  }
  0x9e   : > { %693 = vmatprep.subr.bf16.mxu0 %v8234_v3  ;;  %v8242_v8 = vld [vmem:[#allocation5 + $0x30] ss:$8 sps:$4 sm:$0xff]   ;;  %v8243_v9 = vld [vmem:[#allocation5 + $0x44] ss:$8 sps:$4 sm:$0xff]   ;;  %v8245_v10 = vld [vmem:[#allocation5 + $0x40] ss:$8 sps:$4 sm:$0xff]  }
  0x9f   : > { %v8246_v11 = vld [vmem:[#allocation5 + $0x54] ss:$8 sps:$4 sm:$0xff]   ;;  %v8248_v12 = vld [vmem:[#allocation5 + $0x50] ss:$8 sps:$4 sm:$0xff]   ;;  %v8249_v13 = vld [vmem:[#allocation5 + $0x64] ss:$8 sps:$4 sm:$0xff]  }
  0xa0   : > { %v8251_v14 = vld [vmem:[#allocation5 + $0x60] ss:$8 sps:$4 sm:$0xff]   ;;  %v8252_v15 = vld [vmem:[#allocation5 + $0x74] ss:$8 sps:$4 sm:$0xff]   ;;  %v8254_v16 = vld [vmem:[#allocation5 + $0x70] ss:$8 sps:$4 sm:$0xff]  }
  0xa1   : > { %694 = vmatpush1.bf16.msra.mxu0 %v8236_v4  ;;  %v8255_v17 = vld [vmem:[%s9202_s17] sm:$0xff]   ;;  %v8256_v18 = vld [vmem:[%s9202_s17 + $0x8] sm:$0xff]   ;;  %v8258_v20 = vld [vmem:[%s9202_s17 + $0x18] sm:$0xff]   ;;  %s7664_s27 = sshll.u32 %s9198_s15, 9  ;;  %s7976_s7 = sshll.u32 %s8996_s25, 13 }
  0xa2   : > { %695 = vmatprep.subr.bf16.mxu0 %v8237_v5  ;;  %v8275_v21 = vld [vmem:[#allocation7 + $0x4] ss:$8 sps:$4 sm:$0xff]   ;;  %v8277_v22 = vld [vmem:[#allocation7] ss:$8 sps:$4 sm:$0xff]   ;;  %v8279_v24 = vld [vmem:[#allocation7 + $0x14] ss:$8 sps:$4 sm:$0xff]   ;;  %s10989_s19 = scalar_lea.hbm %s11044_s6, %s7976_s7 }
  0xa3   : > { %v8259_v23 = vld [vmem:[%s9202_s17 + $0x20] sm:$0xff]   ;;  %1436 = vmatprep.subr.bf16.mxu1 %v8275_v21  ;;  %v8281_v25 = vld [vmem:[#allocation7 + $0x10] ss:$8 sps:$4 sm:$0xff]   ;;  %v8260_v28 = vld [vmem:[%s9202_s17 + $0x28] sm:$0xff]   ;;  %s10850_s18 = scalar_lea.vmem [#allocation11], %s7664_s27  ;;  %s7524_s25 = scalar_lea.sflag [#allocation4], %s9198_s15 }
  0xa4   : > { %1437 = vmatpush1.bf16.msra.mxu1 %v8277_v22  ;;  %v8282_v26 = vld [vmem:[#allocation7 + $0x24] ss:$8 sps:$4 sm:$0xff]   ;;  %v8284_v27 = vld [vmem:[#allocation7 + $0x20] ss:$8 sps:$4 sm:$0xff]   ;;  %v8286_v29 = vld [vmem:[#allocation7 + $0x34] ss:$8 sps:$4 sm:$0xff]  }
  0xa5   : > { %696 = vmatpush1.bf16.msra.mxu0 %v8239_v6  ;;  %1438 = vmatprep.subr.bf16.mxu1 %v8279_v24  ;;  %v8288_v30 = vld [vmem:[#allocation7 + $0x30] ss:$8 sps:$4 sm:$0xff]   ;;  %v8289_v31 = vld [vmem:[#allocation7 + $0x44] ss:$8 sps:$4 sm:$0xff]   ;;  %v8291_v32 = vld [vmem:[#allocation7 + $0x40] ss:$8 sps:$4 sm:$0xff]  }
  0xa6   : > { %697 = vmatprep.subr.bf16.mxu0 %v8240_v7  ;;  %v8261_v33 = vld [vmem:[%s9202_s17 + $0x30] sm:$0xff]   ;;  %v8296_v36 = vld [vmem:[#allocation7 + $0x64] ss:$8 sps:$4 sm:$0xff]   ;;  %v8298_v37 = vld [vmem:[#allocation7 + $0x60] ss:$8 sps:$4 sm:$0xff]   ;;  %s7537_s9 = sshll.u32 %s10850_s18, 4  ;;  %s10991_s9 = int_to_ptr.vmem [resolvable:$true] %s7537_s9 }
  0xa7   : > { %v8293_v34 = vld [vmem:[#allocation7 + $0x54] ss:$8 sps:$4 sm:$0xff]   ;;  %v8295_v35 = vld [vmem:[#allocation7 + $0x50] ss:$8 sps:$4 sm:$0xff]   ;;  %v8303_v41 = vld [vmem:[#allocation7 + $0x100] ss:$8 sps:$4 sm:$0xff]  }
  0xa8   : > { %1439 = vmatpush1.bf16.msra.mxu1 %v8281_v25  ;;  %v8262_v38 = vld [vmem:[%s9202_s17 + $0x38] sm:$0xff]   ;;  %v8305_v42 = vld [vmem:[#allocation7 + $0x104] ss:$8 sps:$4 sm:$0xff]   ;;  %v8308_v45 = vld [vmem:[#allocation7 + $0x80] ss:$8 sps:$4 sm:$0xff]   ;;  %s8851_s14 = scalar_lea.vmem %s10991_s9, 8192 }
  0xa9   : > { %698 = vmatpush1.bf16.msra.mxu0 %v8242_v8  ;;  %1440 = vmatprep.subr.bf16.mxu1 %v8282_v26  ;;  %v8300_v39 = vld [vmem:[#allocation7 + $0x74] ss:$8 sps:$4 sm:$0xff]   ;;  %v8302_v40 = vld [vmem:[#allocation7 + $0x70] ss:$8 sps:$4 sm:$0xff]   ;;  %v8306_v43 = vld [vmem:[#allocation7 + $0x84] ss:$8 sps:$4 sm:$0xff]   ;;  %p8852_p10 = scmp.ne.s32.totalorder %s10991_s9, %s8851_s14 }
  0xaa   : > { %699 = vmatprep.subr.bf16.mxu0 %v8243_v9  ;;  %v8263_v44 = vld [vmem:[%s9202_s17 + $0x40] sm:$0xff]   ;;  %v8310_v46 = vld [vmem:[#allocation7 + $0x94] ss:$8 sps:$4 sm:$0xff]   ;;  %v8312_v47 = vld [vmem:[#allocation7 + $0x90] ss:$8 sps:$4 sm:$0xff]   ;;  %s8937_s26 = smov [#allocation11]  }
  0xab   : > { %v8313_v48 = vld [vmem:[#allocation7 + $0xa4] ss:$8 sps:$4 sm:$0xff]   ;;  %v8315_v49 = vld [vmem:[#allocation7 + $0xa0] ss:$8 sps:$4 sm:$0xff]   ;;  %v8317_v51 = vld [vmem:[#allocation7 + $0xb4] ss:$8 sps:$4 sm:$0xff]   ;;  %p8853_p5 = pnand %p8852_p10, %p9146_p3 }
  0xac   : > { %1441 = vmatpush1.bf16.msra.mxu1 %v8284_v27  ;;  %v8264_v50 = vld [vmem:[%s9202_s17 + $0x48] sm:$0xff]   ;;  %v8319_v52 = vld [vmem:[#allocation7 + $0xb0] ss:$8 sps:$4 sm:$0xff]   ;;  %v8322_v54 = vld [vmem:[#allocation7 + $0x114] ss:$8 sps:$4 sm:$0xff]   ;;  %s8855_s20 = sshll.u32 %s8937_s26, 4  ;;  %s8856_s20 = int_to_ptr.vmem [resolvable:$false] %s8855_s20 }
  0xad   : > { %700 = vmatpush1.bf16.msra.mxu0 %v8245_v10  ;;  %1442 = vmatprep.subr.bf16.mxu1 %v8286_v29  ;;  %v8320_v53 = vld [vmem:[#allocation7 + $0x110] ss:$8 sps:$4 sm:$0xff]   ;;  %v8323_v55 = vld [vmem:[#allocation7 + $0xc4] ss:$8 sps:$4 sm:$0xff]   ;;  %v8325_v57 = vld [vmem:[#allocation7 + $0xc0] ss:$8 sps:$4 sm:$0xff]   ;;  %p8854_p7 = pneg %p8853_p5  ;;  %p8858_p12 = scmp.lt.s32.totalorder %s10991_s9, %s8856_s20 }
  0xae   : > { %701 = vmatprep.subr.bf16.mxu0 %v8246_v11  ;;  %v8265_v56 = vld [vmem:[%s9202_s17 + $0x50] sm:$0xff]   ;;  %v8266_v60 = vld [vmem:[%s9202_s17 + $0x58] sm:$0xff]   ;;  %v8330_v61 = vld [vmem:[#allocation7 + $0xe4] ss:$8 sps:$4 sm:$0xff]   ;;  %s8857_s12 = scalar_lea.vmem %s8856_s20, 16384 }
  0xaf   : > { %v8327_v58 = vld [vmem:[#allocation7 + $0xd4] ss:$8 sps:$4 sm:$0xff]   ;;  %v8329_v59 = vld [vmem:[#allocation7 + $0xd0] ss:$8 sps:$4 sm:$0xff]   ;;  %v8332_v62 = vld [vmem:[#allocation7 + $0xe0] ss:$8 sps:$4 sm:$0xff]   ;;  %p8859_p1 = scmp.lt.s32.totalorder %s8857_s12, %s8851_s14 }
  0xb0   : > { %1443 = vmatpush1.bf16.msra.mxu1 %v8288_v30  ;;  %v8334_v63 = vld [vmem:[#allocation7 + $0xf4] ss:$8 sps:$4 sm:$0xff]   ;;  %v8336_v1 = vld [vmem:[#allocation7 + $0xf0] ss:$8 sps:$4 sm:$0xff]   ;;  %v8267_v2 = vld [vmem:[%s9202_s17 + $0x60] sm:$0xff]   ;;  %v411_v30 = vlaneseq }
  0xb1   : > { %702 = vmatpush1.bf16.msra.mxu0 %v8248_v12  ;;  %1444 = vmatprep.subr.bf16.mxu1 %v8289_v31  ;;  %v8337_v3 = vld [vmem:[#allocation7 + $0x120] ss:$8 sps:$4 sm:$0xff]   ;;  %v8339_v4 = vld [vmem:[#allocation7 + $0x124] ss:$8 sps:$4 sm:$0xff]   ;;  %v8269_v6 = vld [vmem:[%s9202_s17 + $0x70] sm:$0xff]   ;;  %p8860_p2 = por %p8859_p1, %p8858_p12 }
  0xb2   : > { %703 = vmatprep.subr.bf16.mxu0 %v8249_v13  ;;  %v8268_v5 = vld [vmem:[%s9202_s17 + $0x68] sm:$0xff]   ;;  %v8342_v7 = vld [vmem:[#allocation7 + $0x130] ss:$8 sps:$4 sm:$0xff]   ;;  %v8344_v8 = vld [vmem:[#allocation7 + $0x134] ss:$8 sps:$4 sm:$0xff]   ;;  %v9268_v31 = vshrl.u32 %v411_v30, 7 }
  0xb3   : > { %v8270_v9 = vld [vmem:[%s9202_s17 + $0x78] sm:$0xff]   ;;  %v8271_v10 = vld [vmem:[%s9202_s17 + $0x80] sm:$0xff]   ;;  %v8272_v13 = vld [vmem:[%s9202_s17 + $0x88] sm:$0xff]   ;;  %p8861_p13 = pnand %p8860_p2, %p8854_p7 }
  0xb4   : > { %1445 = vmatpush1.bf16.msra.mxu1 %v8291_v32  ;;  %v8347_v11 = vld [vmem:[#allocation7 + $0x140] ss:$8 sps:$4 sm:$0xff]   ;;  %v8349_v12 = vld [vmem:[#allocation7 + $0x144] ss:$8 sps:$4 sm:$0xff]   ;;  %v8292_v22 = vld [vmem:[%s9202_s17 + $0xb0] sm:$0xff]  }
  0xb5   : > { %704 = vmatpush1.bf16.msra.mxu0 %v8251_v14  ;;  %1446 = vmatprep.subr.bf16.mxu1 %v8293_v34  ;;  %v8273_v14 = vld [vmem:[%s9202_s17 + $0x90] sm:$0xff]   ;;  %v8285_v21 = vld [vmem:[%s9202_s17 + $0xa8] sm:$0xff]   ;;  %v8299_v25 = vld [vmem:[%s9202_s17 + $0xb8] sm:$0xff]  }
  0xb6   : > { %705 = vmatprep.subr.bf16.mxu0 %v8252_v15  ;;  %v8350_v15 = vld [vmem:[#allocation7 + $0x150] ss:$8 sps:$4 sm:$0xff]   ;;  %v8358_v24 = vld [vmem:[#allocation7 + $0x174] ss:$8 sps:$4 sm:$0xff]   ;;  %v8309_v26 = vld [vmem:[%s9202_s17 + $0xc0] sm:$0xff]  }
  0xb7   : > { %v8359_v27 = vld [vmem:[#allocation7 + $0x180] ss:$8 sps:$4 sm:$0xff]   ;;  %v8326_v32 = vld [vmem:[%s9202_s17 + $0xd0] sm:$0xff]  }
  0xb8   : > { %1447 = vmatpush1.bf16.msra.mxu1 %v8295_v35  ;;  %v8316_v29 = vld [vmem:[%s9202_s17 + $0xc8] sm:$0xff]   ;;  %v393_v34 = vld [vmem:[#allocation8] sm:$0xff] }
  0xb9   : > { %706 = vmatpush1.bf16.msra.mxu0 %v8254_v16  ;;  %1448 = vmatprep.subr.bf16.mxu1 %v8296_v36  ;;  %v8352_v16 = vld [vmem:[#allocation7 + $0x154] ss:$8 sps:$4 sm:$0xff]   ;;  %v394_v35 = vld [vmem:[#allocation8 + $0x8] sm:$0xff]  ;;  %v8362_v36 = vld [vmem:[#allocation7 + $0x190] ss:$8 sps:$4 sm:$0xff]  }
  0xba   : > { %2182 = vmatprep.subr.bf16.mxu0 %v8305_v42 }
  0xbc   : > { %724 = vmatmul.mubr.bf16.vlgmr.msra.gmra.mrb[0].mxu0 %v8255_v17  ;;  %1449 = vmatpush1.bf16.msra.mxu1 %v8298_v37  ;;  %v8274_v17 = vld [vmem:[%s9202_s17 + $0x98] sm:$0xff]  }
  0xbd   : > { %733 = vmatprep.mubr.bf16.mxu0 %v8936_v0  ;;  %1450 = vmatprep.subr.bf16.mxu1 %v8300_v39  ;;  %v8364_v37 = vld [vmem:[#allocation7 + $0x194] ss:$8 sps:$4 sm:$0xff]  }
  0xbe   : > { %2183 = vmatpush1.bf16.msra.mxu0 %v8303_v41 }
  0xbf   : > { %2184 = vmatprep.subr.bf16.mxu0 %v8322_v54 }
  0xc0   : > { %1451 = vmatpush1.bf16.msra.mxu1 %v8302_v40 }
  0xc1   : > { %1452 = vmatprep.subr.bf16.mxu1 %v8306_v43  ;;  %v8333_v43 = vld [vmem:[%s9202_s17 + $0xd8] sm:$0xff]  }
  0xc2   : > { %2185 = vmatpush1.bf16.msra.mxu0 %v8320_v53 }
  0xc3   : > { %2186 = vmatprep.subr.bf16.mxu0 %v8339_v4 }
  0xc4   : > { %734 = vmatmul.mubr.bf16.gmra.mrb[4].mxu0 %v8256_v18  ;;  %1453 = vmatpush1.bf16.msra.mxu1 %v8308_v45  ;;  %v8278_v18 = vld [vmem:[%s9202_s17 + $0xa0] sm:$0xff]  }
  0xc5   : > { %743 = vmatprep.mubr.bf16.mxu0 %v8936_v0  ;;  %1454 = vmatprep.subr.bf16.mxu1 %v8310_v46 }
  0xc6   : > { %2187 = vmatpush1.bf16.msra.mxu0 %v8337_v3 }
  0xc7   : > { %2188 = vmatprep.subr.bf16.mxu0 %v8344_v8 }
  0xc8   : > { %1455 = vmatpush1.bf16.msra.mxu1 %v8312_v47 }
  0xc9   : > { %1456 = vmatprep.subr.bf16.mxu1 %v8313_v48 }
  0xca   : > { %2189 = vmatpush1.bf16.msra.mxu0 %v8342_v7 }
  0xcb   : > { %2190 = vmatprep.subr.bf16.mxu0 %v8349_v12  ;;  %v8341_v12 = vld [vmem:[%s9202_s17 + $0xe8] sm:$0xff]  }
  0xcc   : > { %744 = vmatmul.mubr.bf16.gmra.mrb[8].mxu0 %v8257_v19  ;;  %1457 = vmatpush1.bf16.msra.mxu1 %v8315_v49  ;;  %v8353_v19 = vld [vmem:[#allocation7 + $0x160] ss:$8 sps:$4 sm:$0xff]  }
  0xcd   : > { %753 = vmatprep.mubr.bf16.mxu0 %v8936_v0  ;;  %1458 = vmatprep.subr.bf16.mxu1 %v8317_v51 }
  0xce   : > { %2191 = vmatpush1.bf16.msra.mxu0 %v8347_v11 }
  0xcf   : > { %2192 = vmatprep.subr.bf16.mxu0 %v8352_v16 }
  0xd0   : > { %1459 = vmatpush1.bf16.msra.mxu1 %v8319_v52 }
  0xd1   : > { %1460 = vmatprep.subr.bf16.mxu1 %v8323_v55 }
  0xd2   : > { %2193 = vmatpush1.bf16.msra.mxu0 %v8350_v15 }
  0xd4   : > { %754 = vmatmul.mubr.bf16.gmra.mrb[12].mxu0 %v8258_v20  ;;  %1461 = vmatpush1.bf16.msra.mxu1 %v8325_v57  ;;  %v8355_v20 = vld [vmem:[#allocation7 + $0x164] ss:$8 sps:$4 sm:$0xff]  }
  0xd5   : > { %763 = vmatprep.mubr.bf16.mxu0 %v8936_v0  ;;  %1462 = vmatprep.subr.bf16.mxu1 %v8327_v58  ;;  %v8340_v58 = vld [vmem:[%s9202_s17 + $0xe0] sm:$0xff]  }
  0xd6   : > { %2194 = vmatprep.subr.bf16.mxu0 %v8355_v20 }
  0xd7   : > { %2195 = vmatpush1.bf16.msra.mxu0 %v8353_v19 }
  0xd8   : > { %1463 = vmatpush1.bf16.msra.mxu1 %v8329_v59  ;;  %2196 = vmatprep.subr.bf16.mxu0 %v8358_v24 }
  0xd9   : > { %1464 = vmatprep.subr.bf16.mxu1 %v8330_v61 }
  0xdc   : > { %764 = vmatmul.mubr.bf16.gmra.mrb[16].mxu0 %v8259_v23  ;;  %1465 = vmatpush1.bf16.msra.mxu1 %v8332_v62  ;;  %v8356_v23 = vld [vmem:[#allocation7 + $0x170] ss:$8 sps:$4 sm:$0xff]  }
  0xdd   : > { %773 = vmatprep.mubr.bf16.mxu0 %v8936_v0  ;;  %1466 = vmatprep.subr.bf16.mxu1 %v8334_v63  ;;  %v8365_v63 = vld [vmem:[#allocation7 + $0x1a0] ss:$8 sps:$4 sm:$0xff]  }
  0xde   : > { %2197 = vmatpush1.bf16.msra.mxu0 %v8356_v23 }
  0xe0   : > { %1467 = vmatpush1.bf16.msra.mxu1 %v8336_v1  ;;  %v8367_v1 = vld [vmem:[#allocation7 + $0x1a4] ss:$8 sps:$4 sm:$0xff]  }
  0xe4   : > { %774 = vmatmul.mubr.bf16.gmra.mrb[20].mxu0 %v8260_v28  ;;  %v8361_v28 = vld [vmem:[#allocation7 + $0x184] ss:$8 sps:$4 sm:$0xff]  }
  0xe5   : > { %783 = vmatprep.mubr.bf16.mxu0 %v8936_v0  ;;  %2198 = vmatprep.subr.bf16.mxu0 %v8361_v28 }
  0xe6   : > { %2199 = vmatpush1.bf16.msra.mxu0 %v8359_v27  ;;  %v8345_v27 = vld [vmem:[%s9202_s17 + $0xf0] sm:$0xff]  }
  0xe7   : > { %2200 = vmatprep.subr.bf16.mxu0 %v8364_v37 }
  0xea   : > { %2201 = vmatpush1.bf16.msra.mxu0 %v8362_v36 }
  0xeb   : > { %2202 = vmatprep.subr.bf16.mxu0 %v8367_v1 }
  0xec   : > { %784 = vmatmul.mubr.bf16.gmra.mrb[24].mxu0 %v8261_v33  ;;  %v413_v33 = vsub.s32 0, %v9268_v31 }
  0xed   : > { %793 = vmatprep.mubr.bf16.mxu0 %v8936_v0 }
  0xee   : > { %v9276_v39 = vrot.slane %v394_v35, %v413_v33  ;;  %2203 = vmatpush1.bf16.msra.mxu0 %v8365_v63 }
  0xf4   : > { %794 = vmatmul.mubr.bf16.gmra.mrb[28].mxu0 %v8262_v38  ;;  %v9273_v38 = vrot.slane %v393_v34, %v413_v33  ;;  %v8368_v33 = vld [vmem:[#allocation7 + $0x1b0] ss:$8 sps:$4 sm:$0xff]   ;;  %v8370_v34 = vld [vmem:[#allocation7 + $0x1b4] ss:$8 sps:$4 sm:$0xff]  }
  0xf5   : > { %803 = vmatprep.mubr.bf16.mxu0 %v8936_v0  ;;  %2204 = vmatprep.subr.bf16.mxu0 %v8370_v34  ;;  %v8374_v34 = vld [vmem:[#allocation7 + $0x1d0] ss:$8 sps:$4 sm:$0xff]  }
  0xf6   : > { %2205 = vmatpush1.bf16.msra.mxu0 %v8368_v33 }
  0xfc   : > { %804 = vmatmul.mubr.bf16.gmra.mrb[32].mxu0 %v8263_v44 }
  0xfd   : > { %813 = vmatprep.mubr.bf16.mxu0 %v8936_v0 }
 0x104   : > { %814 = vmatmul.mubr.bf16.gmra.mrb[36].mxu0 %v8264_v50 }
 0x105   : > { %823 = vmatprep.mubr.bf16.mxu0 %v8936_v0 }
 0x10c   : > { %824 = vmatmul.mubr.bf16.gmra.mrb[40].mxu0 %v8265_v56 }
 0x10d   : > { %833 = vmatprep.mubr.bf16.mxu0 %v8936_v0 }
 0x114   : > { %834 = vmatmul.mubr.bf16.gmra.mrb[44].mxu0 %v8266_v60 }
 0x115   : > { %843 = vmatprep.mubr.bf16.mxu0 %v8936_v0 }
 0x11c   : > { %844 = vmatmul.mubr.bf16.gmra.mrb[48].mxu0 %v8267_v2 }
 0x11d   : > { %853 = vmatprep.mubr.bf16.mxu0 %v8936_v0 }
 0x124   : > { %854 = vmatmul.mubr.bf16.gmra.mrb[52].mxu0 %v8268_v5 }
 0x125   : > { %863 = vmatprep.mubr.bf16.mxu0 %v8936_v0 }
 0x12c   : > { %864 = vmatmul.mubr.bf16.gmra.mrb[56].mxu0 %v8269_v6 }
 0x12d   : > { %873 = vmatprep.mubr.bf16.mxu0 %v8936_v0 }
 0x134   : > { %874 = vmatmul.mubr.bf16.gmra.mrb[60].mxu0 %v8270_v9 }
 0x135   : > { %883 = vmatprep.mubr.bf16.mxu0 %v8936_v0 }
 0x13c   : > { %884 = vmatmul.mubr.bf16.gmra.mrb[64].mxu0 %v8271_v10 }
 0x13d   : > { %893 = vmatprep.mubr.bf16.mxu0 %v8936_v0 }
 0x144   : > { %894 = vmatmul.mubr.bf16.gmra.mrb[68].mxu0 %v8272_v13 }
 0x145   : > { %903 = vmatprep.mubr.bf16.mxu0 %v8936_v0 }
 0x14c   : > { %904 = vmatmul.mubr.bf16.gmra.mrb[72].mxu0 %v8273_v14 }
 0x14d   : > { %913 = vmatprep.mubr.bf16.mxu0 %v8936_v0 }
 0x154   : > { %914 = vmatmul.mubr.bf16.gmra.mrb[76].mxu0 %v8274_v17 }
 0x155   : > { %923 = vmatprep.mubr.bf16.mxu0 %v8936_v0 }
 0x15c   : > { %924 = vmatmul.mubr.bf16.gmra.mrb[80].mxu0 %v8278_v18 }
 0x15d   : > { %933 = vmatprep.mubr.bf16.mxu0 %v8936_v0 }
 0x164   : > { %934 = vmatmul.mubr.bf16.gmra.mrb[84].mxu0 %v8285_v21 }
 0x165   : > { %943 = vmatprep.mubr.bf16.mxu0 %v8936_v0 }
 0x16c   : > { %944 = vmatmul.mubr.bf16.gmra.mrb[88].mxu0 %v8292_v22 }
 0x16d   : > { %953 = vmatprep.mubr.bf16.mxu0 %v8936_v0 }
 0x174   : > { %954 = vmatmul.mubr.bf16.gmra.mrb[92].mxu0 %v8299_v25 }
 0x175   : > { %963 = vmatprep.mubr.bf16.mxu0 %v8936_v0 }
 0x17c   : > { %964 = vmatmul.mubr.bf16.gmra.mrb[96].mxu0 %v8309_v26 }
 0x17d   : > { %973 = vmatprep.mubr.bf16.mxu0 %v8936_v0 }
 0x184   : > { %974 = vmatmul.mubr.bf16.gmra.mrb[100].mxu0 %v8316_v29 }
 0x185   : > { %983 = vmatprep.mubr.bf16.mxu0 %v8936_v0 }
 0x18c   : > { %984 = vmatmul.mubr.bf16.gmra.mrb[104].mxu0 %v8326_v32 }
 0x18d   : > { %993 = vmatprep.mubr.bf16.mxu0 %v8936_v0 }
 0x18f   : > { %v725_v40 = vpop.f32.mrb[0].mxu0 }
 0x190   : > { %v726_v41 = vadd.f32 %v725_v40, %v9273_v38  ;;  %v727_v42 = vpop.f32.mrb[1].mxu0 }
 0x191   : > { %v729_v44 = vpop.f32.mrb[2].mxu0  ;;  %v728_v45 = vadd.f32 %v727_v42, %v9276_v39 }
 0x192   : > { %v730_v46 = vadd.f32 %v729_v44, %v9273_v38  ;;  %v731_v47 = vpop.f32.mrb[3].mxu0  ;;  %v1044_v49 = vmax.f32 %v726_v41, 0.0 }
 0x193   : > { %v732_v48 = vadd.f32 %v731_v47, %v9276_v39  ;;  %v1045_v51 = vmax.f32 %v728_v45, 0.0  ;;  %v8346_v47 = vld [vmem:[%s9202_s17 + $0xf8] sm:$0xff]  }
 0x194   : > { %v1046_v50 = vmax.f32 %v730_v46, 0.0  ;;  %994 = vmatmul.mubr.bf16.gmra.mrb[108].mxu0 %v8333_v43 }
 0x195   : > { %v1047_v52 = vmax.f32 %v732_v48, 0.0  ;;  %1003 = vmatprep.mubr.bf16.mxu0 %v8936_v0 }
 0x196   : > { %v1172_v53 = vpack.c.bf16 %v1046_v50, %v1044_v49 }
 0x197   : > { %v735_v54 = vpop.f32.mrb[4].mxu0  ;;  %v1173_v55 = vpack.c.bf16 %v1047_v52, %v1045_v51 }
 0x198   : > { %v736_v56 = vadd.f32 %v735_v54, %v9273_v38  ;;  %v737_v57 = vpop.f32.mrb[5].mxu0 }
 0x199   : > { %v738_v59 = vadd.f32 %v737_v57, %v9276_v39  ;;  %v739_v60 = vpop.f32.mrb[6].mxu0  ;;  %1468 = vmatprep.mubr.bf16.mxu1 %v1173_v55 }
 0x19a   : > { %v740_v61 = vadd.f32 %v739_v60, %v9273_v38  ;;  %v741_v62 = vpop.f32.mrb[7].mxu0  ;;  %1469 = vmatmul.mubr.bf16.vlgmr.msra.gmra.mrb[0].mxu1 %v1172_v53  ;;  %v1048_v3 = vmax.f32 %v736_v56, 0.0 }
 0x19b   : > { %v742_v2 = vadd.f32 %v741_v62, %v9276_v39  ;;  %v1049_v5 = vmax.f32 %v738_v59, 0.0 }
 0x19c   : > { %v1050_v4 = vmax.f32 %v740_v61, 0.0  ;;  %1004 = vmatmul.mubr.bf16.gmra.mrb[112].mxu0 %v8340_v58 }
 0x19d   : > { %v1051_v6 = vmax.f32 %v742_v2, 0.0  ;;  %1013 = vmatprep.mubr.bf16.mxu0 %v8936_v0 }
 0x19e   : > { %v1174_v7 = vpack.c.bf16 %v1050_v4, %v1048_v3  ;;  %v8371_v3 = vld [vmem:[#allocation7 + $0x1c0] ss:$8 sps:$4 sm:$0xff]   ;;  %v8373_v4 = vld [vmem:[#allocation7 + $0x1c4] ss:$8 sps:$4 sm:$0xff]  }
 0x19f   : > { %v745_v8 = vpop.f32.mrb[8].mxu0  ;;  %v1175_v9 = vpack.c.bf16 %v1051_v6, %v1049_v5  ;;  %2206 = vmatprep.subr.bf16.mxu0 %v8373_v4 }
 0x1a0   : > { %v746_v10 = vadd.f32 %v745_v8, %v9273_v38  ;;  %v747_v11 = vpop.f32.mrb[9].mxu0  ;;  %2207 = vmatpush1.bf16.msra.mxu0 %v8371_v3 }
 0x1a1   : > { %v748_v13 = vadd.f32 %v747_v11, %v9276_v39  ;;  %v749_v14 = vpop.f32.mrb[10].mxu0  ;;  %1478 = vmatprep.mubr.bf16.mxu1 %v1175_v9 }
 0x1a2   : > { %v750_v15 = vadd.f32 %v749_v14, %v9273_v38  ;;  %v751_v16 = vpop.f32.mrb[11].mxu0  ;;  %1479 = vmatmul.mubr.bf16.gmra.mrb[4].mxu1 %v1174_v7  ;;  %v1052_v18 = vmax.f32 %v746_v10, 0.0 }
 0x1a3   : > { %v752_v17 = vadd.f32 %v751_v16, %v9276_v39  ;;  %v1053_v20 = vmax.f32 %v748_v13, 0.0 }
 0x1a4   : > { %v1054_v19 = vmax.f32 %v750_v15, 0.0  ;;  %1014 = vmatmul.mubr.bf16.gmra.mrb[116].mxu0 %v8341_v12 }
 0x1a5   : > { %v1055_v21 = vmax.f32 %v752_v17, 0.0  ;;  %1023 = vmatprep.mubr.bf16.mxu0 %v8936_v0 }
 0x1a6   : > { %v1176_v22 = vpack.c.bf16 %v1054_v19, %v1052_v18 }
 0x1a7   : > { %v755_v23 = vpop.f32.mrb[12].mxu0  ;;  %v1177_v24 = vpack.c.bf16 %v1055_v21, %v1053_v20 }
 0x1a8   : > { %v756_v25 = vadd.f32 %v755_v23, %v9273_v38  ;;  %v757_v26 = vpop.f32.mrb[13].mxu0 }
 0x1a9   : > { %v758_v28 = vadd.f32 %v757_v26, %v9276_v39  ;;  %v759_v29 = vpop.f32.mrb[14].mxu0  ;;  %1488 = vmatprep.mubr.bf16.mxu1 %v1177_v24 }
 0x1aa   : > { %v760_v30 = vadd.f32 %v759_v29, %v9273_v38  ;;  %v761_v32 = vpop.f32.mrb[15].mxu0  ;;  %1489 = vmatmul.mubr.bf16.gmra.mrb[8].mxu1 %v1176_v22  ;;  %v1056_v36 = vmax.f32 %v756_v25, 0.0 }
 0x1ab   : > { %v762_v35 = vadd.f32 %v761_v32, %v9276_v39  ;;  %v1057_v40 = vmax.f32 %v758_v28, 0.0 }
 0x1ac   : > { %v1058_v37 = vmax.f32 %v760_v30, 0.0  ;;  %1024 = vmatmul.mubr.bf16.gmra.mrb[120].mxu0 %v8345_v27 }
 0x1ad   : > { %v1059_v41 = vmax.f32 %v762_v35, 0.0  ;;  %1033 = vmatprep.mubr.bf16.mxu0 %v8936_v0  ;;  %v8376_v35 = vld [vmem:[#allocation7 + $0x1d4] ss:$8 sps:$4 sm:$0xff]  }
 0x1ae   : > { %v1178_v42 = vpack.c.bf16 %v1058_v37, %v1056_v36  ;;  %2208 = vmatprep.subr.bf16.mxu0 %v8376_v35 }
 0x1af   : > { %v765_v43 = vpop.f32.mrb[16].mxu0  ;;  %v1179_v44 = vpack.c.bf16 %v1059_v41, %v1057_v40  ;;  %2209 = vmatpush1.bf16.msra.mxu0 %v8374_v34 }
 0x1b0   : > { %v766_v45 = vadd.f32 %v765_v43, %v9273_v38  ;;  %v767_v46 = vpop.f32.mrb[17].mxu0 }
 0x1b1   : > { %v768_v48 = vadd.f32 %v767_v46, %v9276_v39  ;;  %v769_v49 = vpop.f32.mrb[18].mxu0  ;;  %1498 = vmatprep.mubr.bf16.mxu1 %v1179_v44 }
 0x1b2   : > { %v770_v50 = vadd.f32 %v769_v49, %v9273_v38  ;;  %v771_v51 = vpop.f32.mrb[19].mxu0  ;;  %1499 = vmatmul.mubr.bf16.gmra.mrb[12].mxu1 %v1178_v42  ;;  %v1060_v53 = vmax.f32 %v766_v45, 0.0 }
 0x1b3   : > { %v772_v52 = vadd.f32 %v771_v51, %v9276_v39  ;;  %v1061_v55 = vmax.f32 %v768_v48, 0.0 }
 0x1b4   : > { %v1062_v54 = vmax.f32 %v770_v50, 0.0  ;;  %1034 = vmatmul.mubr.bf16.gmra.mrb[124].mxu0 %v8346_v47 }
 0x1b5   : > { %v1063_v56 = vmax.f32 %v772_v52, 0.0 }
 0x1b6   : > { %v1180_v57 = vpack.c.bf16 %v1062_v54, %v1060_v53 }
 0x1b7   : > { %v775_v58 = vpop.f32.mrb[20].mxu0  ;;  %v1181_v59 = vpack.c.bf16 %v1063_v56, %v1061_v55 }
 0x1b8   : > { %v776_v60 = vadd.f32 %v775_v58, %v9273_v38  ;;  %v777_v61 = vpop.f32.mrb[21].mxu0  ;;  %v8379_v58 = vld [vmem:[#allocation7 + $0x204] ss:$8 sps:$4 sm:$0xff]  }
 0x1b9   : > { %v778_v62 = vadd.f32 %v777_v61, %v9276_v39  ;;  %v779_v63 = vpop.f32.mrb[22].mxu0  ;;  %1508 = vmatprep.mubr.bf16.mxu1 %v1181_v59  ;;  %2928 = vmatprep.subr.bf16.mxu1 %v8379_v58 }
 0x1ba   : > { %v780_v1 = vadd.f32 %v779_v63, %v9273_v38  ;;  %v781_v2 = vpop.f32.mrb[23].mxu0  ;;  %1509 = vmatmul.mubr.bf16.gmra.mrb[16].mxu1 %v1180_v57  ;;  %v1064_v6 = vmax.f32 %v776_v60, 0.0  ;;  %v8377_v57 = vld [vmem:[#allocation7 + $0x200] ss:$8 sps:$4 sm:$0xff]  }
 0x1bb   : > { %v782_v5 = vadd.f32 %v781_v2, %v9276_v39  ;;  %v1065_v8 = vmax.f32 %v778_v62, 0.0  ;;  %2929 = vmatpush1.bf16.msra.mxu1 %v8377_v57 }
 0x1bc   : > { %v1066_v7 = vmax.f32 %v780_v1, 0.0 }
 0x1bd   : > { %v1067_v9 = vmax.f32 %v782_v5, 0.0  ;;  %v8380_v5 = vld [vmem:[#allocation7 + $0x1e0] ss:$8 sps:$4 sm:$0xff]  }
 0x1be   : > { %v1182_v10 = vpack.c.bf16 %v1066_v7, %v1064_v6  ;;  %v8382_v6 = vld [vmem:[#allocation7 + $0x1e4] ss:$8 sps:$4 sm:$0xff]  }
 0x1bf   : > { %v785_v11 = vpop.f32.mrb[24].mxu0  ;;  %v1183_v12 = vpack.c.bf16 %v1067_v9, %v1065_v8  ;;  %2210 = vmatprep.subr.bf16.mxu0 %v8382_v6 }
 0x1c0   : > { %v786_v13 = vadd.f32 %v785_v11, %v9273_v38  ;;  %v787_v14 = vpop.f32.mrb[25].mxu0  ;;  %2211 = vmatpush1.bf16.msra.mxu0 %v8380_v5 }
 0x1c1   : > { %v788_v15 = vadd.f32 %v787_v14, %v9276_v39  ;;  %v789_v16 = vpop.f32.mrb[26].mxu0  ;;  %1518 = vmatprep.mubr.bf16.mxu1 %v1183_v12 }
 0x1c2   : > { %v790_v17 = vadd.f32 %v789_v16, %v9273_v38  ;;  %v791_v18 = vpop.f32.mrb[27].mxu0  ;;  %1519 = vmatmul.mubr.bf16.gmra.mrb[20].mxu1 %v1182_v10  ;;  %v1068_v20 = vmax.f32 %v786_v13, 0.0 }
 0x1c3   : > { %v792_v19 = vadd.f32 %v791_v18, %v9276_v39  ;;  %v1069_v22 = vmax.f32 %v788_v15, 0.0 }
 0x1c4   : > { %v1070_v21 = vmax.f32 %v790_v17, 0.0 }
 0x1c5   : > { %v1071_v23 = vmax.f32 %v792_v19, 0.0 }
 0x1c6   : > { %v1184_v24 = vpack.c.bf16 %v1070_v21, %v1068_v20 }
 0x1c7   : > { %v795_v25 = vpop.f32.mrb[28].mxu0  ;;  %v1185_v26 = vpack.c.bf16 %v1071_v23, %v1069_v22 }
 0x1c8   : > { %v796_v27 = vadd.f32 %v795_v25, %v9273_v38  ;;  %v797_v28 = vpop.f32.mrb[29].mxu0 }
 0x1c9   : > { %v798_v29 = vadd.f32 %v797_v28, %v9276_v39  ;;  %v799_v30 = vpop.f32.mrb[30].mxu0  ;;  %1528 = vmatprep.mubr.bf16.mxu1 %v1185_v26  ;;  %v8383_v26 = vld [vmem:[#allocation7 + $0x210] ss:$8 sps:$4 sm:$0xff]  }
 0x1ca   : > { %v800_v32 = vadd.f32 %v799_v30, %v9273_v38  ;;  %v801_v33 = vpop.f32.mrb[31].mxu0  ;;  %1529 = vmatmul.mubr.bf16.gmra.mrb[24].mxu1 %v1184_v24  ;;  %v1072_v37 = vmax.f32 %v796_v27, 0.0  ;;  %v8385_v27 = vld [vmem:[#allocation7 + $0x214] ss:$8 sps:$4 sm:$0xff]  }
 0x1cb   : > { %v802_v36 = vadd.f32 %v801_v33, %v9276_v39  ;;  %v1073_v41 = vmax.f32 %v798_v29, 0.0  ;;  %2930 = vmatprep.subr.bf16.mxu1 %v8385_v27 }
 0x1cc   : > { %v1074_v40 = vmax.f32 %v800_v32, 0.0  ;;  %2931 = vmatpush1.bf16.msra.mxu1 %v8383_v26 }
 0x1cd   : > { %v1075_v42 = vmax.f32 %v802_v36, 0.0 }
 0x1ce   : > { %v1186_v43 = vpack.c.bf16 %v1074_v40, %v1072_v37  ;;  %v8386_v40 = vld [vmem:[#allocation7 + $0x1f0] ss:$8 sps:$4 sm:$0xff]  }
 0x1cf   : > { %v805_v44 = vpop.f32.mrb[32].mxu0  ;;  %v1187_v45 = vpack.c.bf16 %v1075_v42, %v1073_v41  ;;  %v8388_v41 = vld [vmem:[#allocation7 + $0x1f4] ss:$8 sps:$4 sm:$0xff]  }
 0x1d0   : > { %v806_v46 = vadd.f32 %v805_v44, %v9273_v38  ;;  %v807_v47 = vpop.f32.mrb[33].mxu0  ;;  %2212 = vmatprep.subr.bf16.mxu0 %v8388_v41 }
 0x1d1   : > { %v808_v48 = vadd.f32 %v807_v47, %v9276_v39  ;;  %v809_v49 = vpop.f32.mrb[34].mxu0  ;;  %1538 = vmatprep.mubr.bf16.mxu1 %v1187_v45  ;;  %2213 = vmatpush1.bf16.msra.mxu0 %v8386_v40 }
 0x1d2   : > { %v810_v50 = vadd.f32 %v809_v49, %v9273_v38  ;;  %v811_v51 = vpop.f32.mrb[35].mxu0  ;;  %1539 = vmatmul.mubr.bf16.gmra.mrb[28].mxu1 %v1186_v43  ;;  %v1076_v53 = vmax.f32 %v806_v46, 0.0 }
 0x1d3   : > { %v812_v52 = vadd.f32 %v811_v51, %v9276_v39  ;;  %v1077_v55 = vmax.f32 %v808_v48, 0.0 }
 0x1d4   : > { %v1078_v54 = vmax.f32 %v810_v50, 0.0 }
 0x1d5   : > { %v1079_v56 = vmax.f32 %v812_v52, 0.0 }
 0x1d6   : > { %v1188_v59 = vpack.c.bf16 %v1078_v54, %v1076_v53 }
 0x1d7   : > { %v815_v60 = vpop.f32.mrb[36].mxu0  ;;  %v1189_v61 = vpack.c.bf16 %v1079_v56, %v1077_v55 }
 0x1d8   : > { %v816_v62 = vadd.f32 %v815_v60, %v9273_v38  ;;  %v817_v63 = vpop.f32.mrb[37].mxu0 }
 0x1d9   : > { %v818_v1 = vadd.f32 %v817_v63, %v9276_v39  ;;  %v819_v2 = vpop.f32.mrb[38].mxu0  ;;  %1548 = vmatprep.mubr.bf16.mxu1 %v1189_v61  ;;  %v8391_v63 = vld [vmem:[#allocation7 + $0x224] ss:$8 sps:$4 sm:$0xff]  }
 0x1da   : > { %v820_v3 = vadd.f32 %v819_v2, %v9273_v38  ;;  %v821_v4 = vpop.f32.mrb[39].mxu0  ;;  %1549 = vmatmul.mubr.bf16.gmra.mrb[32].mxu1 %v1188_v59  ;;  %v1080_v8 = vmax.f32 %v816_v62, 0.0  ;;  %v8389_v62 = vld [vmem:[#allocation7 + $0x220] ss:$8 sps:$4 sm:$0xff]   ;;  %2932 = vmatprep.subr.bf16.mxu1 %v8391_v63  ;;  %v8397_v63 = vld [vmem:[#allocation7 + $0x244] ss:$8 sps:$4 sm:$0xff]  }
 0x1db   : > { %v822_v7 = vadd.f32 %v821_v4, %v9276_v39  ;;  %v1081_v10 = vmax.f32 %v818_v1, 0.0  ;;  %2933 = vmatpush1.bf16.msra.mxu1 %v8389_v62  ;;  %v8395_v62 = vld [vmem:[#allocation7 + $0x240] ss:$8 sps:$4 sm:$0xff]  }
 0x1dc   : > { %v1082_v9 = vmax.f32 %v820_v3, 0.0 }
 0x1dd   : > { %v1083_v11 = vmax.f32 %v822_v7, 0.0 }
 0x1de   : > { %v1190_v12 = vpack.c.bf16 %v1082_v9, %v1080_v8 }
 0x1df   : > { %v825_v13 = vpop.f32.mrb[40].mxu0  ;;  %v1191_v14 = vpack.c.bf16 %v1083_v11, %v1081_v10 }
 0x1e0   : > { %v826_v15 = vadd.f32 %v825_v13, %v9273_v38  ;;  %v827_v16 = vpop.f32.mrb[41].mxu0 }
 0x1e1   : > { %v828_v17 = vadd.f32 %v827_v16, %v9276_v39  ;;  %v829_v18 = vpop.f32.mrb[42].mxu0  ;;  %1558 = vmatprep.mubr.bf16.mxu1 %v1191_v14 }
 0x1e2   : > { %v830_v19 = vadd.f32 %v829_v18, %v9273_v38  ;;  %v831_v20 = vpop.f32.mrb[43].mxu0  ;;  %1559 = vmatmul.mubr.bf16.gmra.mrb[36].mxu1 %v1190_v12  ;;  %v1084_v22 = vmax.f32 %v826_v15, 0.0 }
 0x1e3   : > { %v832_v21 = vadd.f32 %v831_v20, %v9276_v39  ;;  %v1085_v24 = vmax.f32 %v828_v17, 0.0 }
 0x1e4   : > { %v1086_v23 = vmax.f32 %v830_v19, 0.0 }
 0x1e5   : > { %v1087_v25 = vmax.f32 %v832_v21, 0.0 }
 0x1e6   : > { %v1192_v28 = vpack.c.bf16 %v1086_v23, %v1084_v22 }
 0x1e7   : > { %v835_v29 = vpop.f32.mrb[44].mxu0  ;;  %v1193_v30 = vpack.c.bf16 %v1087_v25, %v1085_v24 }
 0x1e8   : > { %v836_v32 = vadd.f32 %v835_v29, %v9273_v38  ;;  %v837_v33 = vpop.f32.mrb[45].mxu0  ;;  %v8392_v29 = vld [vmem:[#allocation7 + $0x230] ss:$8 sps:$4 sm:$0xff]  }
 0x1e9   : > { %v838_v34 = vadd.f32 %v837_v33, %v9276_v39  ;;  %v839_v35 = vpop.f32.mrb[46].mxu0  ;;  %1568 = vmatprep.mubr.bf16.mxu1 %v1193_v30  ;;  %v8394_v30 = vld [vmem:[#allocation7 + $0x234] ss:$8 sps:$4 sm:$0xff]  }
 0x1ea   : > { %v840_v36 = vadd.f32 %v839_v35, %v9273_v38  ;;  %v841_v37 = vpop.f32.mrb[47].mxu0  ;;  %1569 = vmatmul.mubr.bf16.gmra.mrb[40].mxu1 %v1192_v28  ;;  %v1088_v43 = vmax.f32 %v836_v32, 0.0  ;;  %2934 = vmatprep.subr.bf16.mxu1 %v8394_v30  ;;  %v8400_v30 = vld [vmem:[#allocation7 + $0x254] ss:$8 sps:$4 sm:$0xff]  }
 0x1eb   : > { %v842_v42 = vadd.f32 %v841_v37, %v9276_v39  ;;  %v1089_v45 = vmax.f32 %v838_v34, 0.0  ;;  %2935 = vmatpush1.bf16.msra.mxu1 %v8392_v29  ;;  %v8398_v29 = vld [vmem:[#allocation7 + $0x250] ss:$8 sps:$4 sm:$0xff]  }
 0x1ec   : > { %v1090_v44 = vmax.f32 %v840_v36, 0.0  ;;  %2936 = vmatprep.subr.bf16.mxu1 %v8397_v63  ;;  %v8403_v63 = vld [vmem:[#allocation7 + $0x264] ss:$8 sps:$4 sm:$0xff]  }
 0x1ed   : > { %v1091_v46 = vmax.f32 %v842_v42, 0.0 }
 0x1ee   : > { %v1194_v47 = vpack.c.bf16 %v1090_v44, %v1088_v43 }
 0x1ef   : > { %v845_v48 = vpop.f32.mrb[48].mxu0  ;;  %v1195_v49 = vpack.c.bf16 %v1091_v46, %v1089_v45  ;;  %2937 = vmatpush1.bf16.msra.mxu1 %v8395_v62  ;;  %v8401_v62 = vld [vmem:[#allocation7 + $0x260] ss:$8 sps:$4 sm:$0xff]  }
 0x1f0   : > { %v846_v50 = vadd.f32 %v845_v48, %v9273_v38  ;;  %v847_v51 = vpop.f32.mrb[49].mxu0  ;;  %2938 = vmatprep.subr.bf16.mxu1 %v8400_v30  ;;  %v8406_v30 = vld [vmem:[#allocation7 + $0x274] ss:$8 sps:$4 sm:$0xff]  }
 0x1f1   : > { %v848_v52 = vadd.f32 %v847_v51, %v9276_v39  ;;  %v849_v53 = vpop.f32.mrb[50].mxu0  ;;  %1578 = vmatprep.mubr.bf16.mxu1 %v1195_v49 }
 0x1f2   : > { %v850_v54 = vadd.f32 %v849_v53, %v9273_v38  ;;  %v851_v55 = vpop.f32.mrb[51].mxu0  ;;  %1579 = vmatmul.mubr.bf16.gmra.mrb[44].mxu1 %v1194_v47  ;;  %v1092_v57 = vmax.f32 %v846_v50, 0.0 }
 0x1f3   : > { %v852_v56 = vadd.f32 %v851_v55, %v9276_v39  ;;  %v1093_v59 = vmax.f32 %v848_v52, 0.0  ;;  %2939 = vmatpush1.bf16.msra.mxu1 %v8398_v29  ;;  %v8404_v29 = vld [vmem:[#allocation7 + $0x270] ss:$8 sps:$4 sm:$0xff]  }
 0x1f4   : > { %v1094_v58 = vmax.f32 %v850_v54, 0.0  ;;  %2940 = vmatprep.subr.bf16.mxu1 %v8403_v63  ;;  %v8409_v63 = vld [vmem:[#allocation7 + $0x284] ss:$8 sps:$4 sm:$0xff]  }
 0x1f5   : > { %v1095_v60 = vmax.f32 %v852_v56, 0.0 }
 0x1f6   : > { %v1196_v61 = vpack.c.bf16 %v1094_v58, %v1092_v57 }
 0x1f7   : > { %v855_v1 = vpop.f32.mrb[52].mxu0  ;;  %v1197_v2 = vpack.c.bf16 %v1095_v60, %v1093_v59  ;;  %2941 = vmatpush1.bf16.msra.mxu1 %v8401_v62  ;;  %v8407_v62 = vld [vmem:[#allocation7 + $0x280] ss:$8 sps:$4 sm:$0xff]  }
 0x1f8   : > { %v856_v3 = vadd.f32 %v855_v1, %v9273_v38  ;;  %v857_v4 = vpop.f32.mrb[53].mxu0  ;;  %2942 = vmatprep.subr.bf16.mxu1 %v8406_v30  ;;  %v8410_v30 = vld [vmem:[#allocation7 + $0x290] ss:$8 sps:$4 sm:$0xff]  }
 0x1f9   : > { %v858_v5 = vadd.f32 %v857_v4, %v9276_v39  ;;  %v859_v6 = vpop.f32.mrb[54].mxu0  ;;  %1588 = vmatprep.mubr.bf16.mxu1 %v1197_v2 }
 0x1fa   : > { %v860_v7 = vadd.f32 %v859_v6, %v9273_v38  ;;  %v861_v8 = vpop.f32.mrb[55].mxu0  ;;  %1589 = vmatmul.mubr.bf16.gmra.mrb[48].mxu1 %v1196_v61  ;;  %v1096_v10 = vmax.f32 %v856_v3, 0.0 }
 0x1fb   : > { %v862_v9 = vadd.f32 %v861_v8, %v9276_v39  ;;  %v1097_v12 = vmax.f32 %v858_v5, 0.0  ;;  %2943 = vmatpush1.bf16.msra.mxu1 %v8404_v29  ;;  %v1270_v29 = vsub.s32 1, %v9268_v31 }
 0x1fc   : > { %v1098_v11 = vmax.f32 %v860_v7, 0.0  ;;  %2944 = vmatprep.subr.bf16.mxu1 %v8409_v63 }
 0x1fd   : > { %v1099_v13 = vmax.f32 %v862_v9, 0.0 }
 0x1fe   : > { %v1198_v14 = vpack.c.bf16 %v1098_v11, %v1096_v10 }
 0x1ff   : > { %v865_v15 = vpop.f32.mrb[56].mxu0  ;;  %v1199_v16 = vpack.c.bf16 %v1099_v13, %v1097_v12  ;;  %2945 = vmatpush1.bf16.msra.mxu1 %v8407_v62 }
 0x200   : > { %v866_v17 = vadd.f32 %v865_v15, %v9273_v38  ;;  %v867_v18 = vpop.f32.mrb[57].mxu0 }
 0x201   : > { %v868_v19 = vadd.f32 %v867_v18, %v9276_v39  ;;  %v869_v20 = vpop.f32.mrb[58].mxu0  ;;  %1598 = vmatprep.mubr.bf16.mxu1 %v1199_v16 }
 0x202   : > { %v870_v21 = vadd.f32 %v869_v20, %v9273_v38  ;;  %v871_v22 = vpop.f32.mrb[59].mxu0  ;;  %1599 = vmatmul.mubr.bf16.gmra.mrb[52].mxu1 %v1198_v14  ;;  %v1100_v24 = vmax.f32 %v866_v17, 0.0 }
 0x203   : > { %v872_v23 = vadd.f32 %v871_v22, %v9276_v39  ;;  %v1101_v26 = vmax.f32 %v868_v19, 0.0 }
 0x204   : > { %v1102_v25 = vmax.f32 %v870_v21, 0.0 }
 0x205   : > { %v1103_v27 = vmax.f32 %v872_v23, 0.0 }
 0x206   : > { %v1200_v28 = vpack.c.bf16 %v1102_v25, %v1100_v24 }
 0x207   : > { %v875_v32 = vpop.f32.mrb[60].mxu0  ;;  %v1201_v33 = vpack.c.bf16 %v1103_v27, %v1101_v26 }
 0x208   : > { %v876_v34 = vadd.f32 %v875_v32, %v9273_v38  ;;  %v877_v35 = vpop.f32.mrb[61].mxu0 }
 0x209   : > { %v878_v36 = vadd.f32 %v877_v35, %v9276_v39  ;;  %v879_v37 = vpop.f32.mrb[62].mxu0  ;;  %1608 = vmatprep.mubr.bf16.mxu1 %v1201_v33 }
 0x20a   : > { %v880_v40 = vadd.f32 %v879_v37, %v9273_v38  ;;  %v881_v41 = vpop.f32.mrb[63].mxu0  ;;  %1609 = vmatmul.mubr.bf16.gmra.mrb[56].mxu1 %v1200_v28  ;;  %v1104_v43 = vmax.f32 %v876_v34, 0.0 }
 0x20b   : > { %v882_v42 = vadd.f32 %v881_v41, %v9276_v39  ;;  %v1105_v45 = vmax.f32 %v878_v36, 0.0 }
 0x20c   : > { %v1106_v44 = vmax.f32 %v880_v40, 0.0 }
 0x20d   : > { %v1107_v46 = vmax.f32 %v882_v42, 0.0 }
 0x20e   : > { %v1202_v47 = vpack.c.bf16 %v1106_v44, %v1104_v43 }
 0x20f   : > { %v885_v48 = vpop.f32.mrb[64].mxu0  ;;  %v1203_v49 = vpack.c.bf16 %v1107_v46, %v1105_v45 }
 0x210   : > { %v886_v50 = vadd.f32 %v885_v48, %v9273_v38  ;;  %v887_v51 = vpop.f32.mrb[65].mxu0 }
 0x211   : > { %v888_v52 = vadd.f32 %v887_v51, %v9276_v39  ;;  %v889_v53 = vpop.f32.mrb[66].mxu0  ;;  %1618 = vmatprep.mubr.bf16.mxu1 %v1203_v49 }
 0x212   : > { %v890_v54 = vadd.f32 %v889_v53, %v9273_v38  ;;  %v891_v55 = vpop.f32.mrb[67].mxu0  ;;  %1619 = vmatmul.mubr.bf16.gmra.mrb[60].mxu1 %v1202_v47  ;;  %v1108_v57 = vmax.f32 %v886_v50, 0.0 }
 0x213   : > { %v892_v56 = vadd.f32 %v891_v55, %v9276_v39  ;;  %v1109_v59 = vmax.f32 %v888_v52, 0.0 }
 0x214   : > { %v1110_v58 = vmax.f32 %v890_v54, 0.0 }
 0x215   : > { %v1111_v60 = vmax.f32 %v892_v56, 0.0 }
 0x216   : > { %v1204_v61 = vpack.c.bf16 %v1110_v58, %v1108_v57 }
 0x217   : > { %v895_v1 = vpop.f32.mrb[68].mxu0  ;;  %v1205_v2 = vpack.c.bf16 %v1111_v60, %v1109_v59 }
 0x218   : > { %v896_v3 = vadd.f32 %v895_v1, %v9273_v38  ;;  %v897_v4 = vpop.f32.mrb[69].mxu0 }
 0x219   : > { %v898_v5 = vadd.f32 %v897_v4, %v9276_v39  ;;  %v899_v6 = vpop.f32.mrb[70].mxu0  ;;  %1628 = vmatprep.mubr.bf16.mxu1 %v1205_v2 }
 0x21a   : > { %v900_v7 = vadd.f32 %v899_v6, %v9273_v38  ;;  %v901_v8 = vpop.f32.mrb[71].mxu0  ;;  %1629 = vmatmul.mubr.bf16.gmra.mrb[64].mxu1 %v1204_v61  ;;  %v1112_v10 = vmax.f32 %v896_v3, 0.0 }
 0x21b   : > { %v902_v9 = vadd.f32 %v901_v8, %v9276_v39  ;;  %v1113_v12 = vmax.f32 %v898_v5, 0.0 }
 0x21c   : > { %v1114_v11 = vmax.f32 %v900_v7, 0.0 }
 0x21d   : > { %v1115_v13 = vmax.f32 %v902_v9, 0.0 }
 0x21e   : > { %v1206_v14 = vpack.c.bf16 %v1114_v11, %v1112_v10 }
 0x21f   : > { %v905_v15 = vpop.f32.mrb[72].mxu0  ;;  %v1207_v16 = vpack.c.bf16 %v1115_v13, %v1113_v12 }
 0x220   : > { %v906_v17 = vadd.f32 %v905_v15, %v9273_v38  ;;  %v907_v18 = vpop.f32.mrb[73].mxu0 }
 0x221   : > { %v908_v19 = vadd.f32 %v907_v18, %v9276_v39  ;;  %v909_v20 = vpop.f32.mrb[74].mxu0  ;;  %1638 = vmatprep.mubr.bf16.mxu1 %v1207_v16 }
 0x222   : > { %v910_v21 = vadd.f32 %v909_v20, %v9273_v38  ;;  %v911_v22 = vpop.f32.mrb[75].mxu0  ;;  %1639 = vmatmul.mubr.bf16.gmra.mrb[68].mxu1 %v1206_v14  ;;  %v1116_v24 = vmax.f32 %v906_v17, 0.0 }
 0x223   : > { %v912_v23 = vadd.f32 %v911_v22, %v9276_v39  ;;  %v1117_v26 = vmax.f32 %v908_v19, 0.0 }
 0x224   : > { %v1118_v25 = vmax.f32 %v910_v21, 0.0 }
 0x225   : > { %v1119_v27 = vmax.f32 %v912_v23, 0.0 }
 0x226   : > { %v1208_v28 = vpack.c.bf16 %v1118_v25, %v1116_v24 }
 0x227   : > { %v915_v32 = vpop.f32.mrb[76].mxu0  ;;  %v1209_v33 = vpack.c.bf16 %v1119_v27, %v1117_v26 }
 0x228   : > { %v916_v34 = vadd.f32 %v915_v32, %v9273_v38  ;;  %v917_v35 = vpop.f32.mrb[77].mxu0 }
 0x229   : > { %v918_v36 = vadd.f32 %v917_v35, %v9276_v39  ;;  %v919_v37 = vpop.f32.mrb[78].mxu0  ;;  %1648 = vmatprep.mubr.bf16.mxu1 %v1209_v33 }
 0x22a   : > { %v920_v40 = vadd.f32 %v919_v37, %v9273_v38  ;;  %v921_v41 = vpop.f32.mrb[79].mxu0  ;;  %1649 = vmatmul.mubr.bf16.gmra.mrb[72].mxu1 %v1208_v28  ;;  %v1120_v43 = vmax.f32 %v916_v34, 0.0 }
 0x22b   : > { %v922_v42 = vadd.f32 %v921_v41, %v9276_v39  ;;  %v1121_v45 = vmax.f32 %v918_v36, 0.0 }
 0x22c   : > { %v1122_v44 = vmax.f32 %v920_v40, 0.0 }
 0x22d   : > { %v1123_v46 = vmax.f32 %v922_v42, 0.0 }
 0x22e   : > { %v1210_v47 = vpack.c.bf16 %v1122_v44, %v1120_v43 }
 0x22f   : > { %v925_v48 = vpop.f32.mrb[80].mxu0  ;;  %v1211_v49 = vpack.c.bf16 %v1123_v46, %v1121_v45 }
 0x230   : > { %v926_v50 = vadd.f32 %v925_v48, %v9273_v38  ;;  %v927_v51 = vpop.f32.mrb[81].mxu0 }
 0x231   : > { %v928_v52 = vadd.f32 %v927_v51, %v9276_v39  ;;  %v929_v53 = vpop.f32.mrb[82].mxu0  ;;  %1658 = vmatprep.mubr.bf16.mxu1 %v1211_v49 }
 0x232   : > { %v930_v54 = vadd.f32 %v929_v53, %v9273_v38  ;;  %v931_v55 = vpop.f32.mrb[83].mxu0  ;;  %1659 = vmatmul.mubr.bf16.gmra.mrb[76].mxu1 %v1210_v47  ;;  %v1124_v57 = vmax.f32 %v926_v50, 0.0 }
 0x233   : > { %v932_v56 = vadd.f32 %v931_v55, %v9276_v39  ;;  %v1125_v59 = vmax.f32 %v928_v52, 0.0 }
 0x234   : > { %v1126_v58 = vmax.f32 %v930_v54, 0.0 }
 0x235   : > { %v1127_v60 = vmax.f32 %v932_v56, 0.0 }
 0x236   : > { %v1212_v61 = vpack.c.bf16 %v1126_v58, %v1124_v57 }
 0x237   : > { %v935_v1 = vpop.f32.mrb[84].mxu0  ;;  %v1213_v2 = vpack.c.bf16 %v1127_v60, %v1125_v59 }
 0x238   : > { %v936_v3 = vadd.f32 %v935_v1, %v9273_v38  ;;  %v937_v4 = vpop.f32.mrb[85].mxu0 }
 0x239   : > { %v938_v5 = vadd.f32 %v937_v4, %v9276_v39  ;;  %v939_v6 = vpop.f32.mrb[86].mxu0  ;;  %1668 = vmatprep.mubr.bf16.mxu1 %v1213_v2 }
 0x23a   : > { %v940_v7 = vadd.f32 %v939_v6, %v9273_v38  ;;  %v941_v8 = vpop.f32.mrb[87].mxu0  ;;  %1669 = vmatmul.mubr.bf16.gmra.mrb[80].mxu1 %v1212_v61  ;;  %v1128_v10 = vmax.f32 %v936_v3, 0.0 }
 0x23b   : > { %v942_v9 = vadd.f32 %v941_v8, %v9276_v39  ;;  %v1129_v12 = vmax.f32 %v938_v5, 0.0 }
 0x23c   : > { %v1130_v11 = vmax.f32 %v940_v7, 0.0 }
 0x23d   : > { %v1131_v13 = vmax.f32 %v942_v9, 0.0 }
 0x23e   : > { %v1214_v14 = vpack.c.bf16 %v1130_v11, %v1128_v10 }
 0x23f   : > { %v945_v15 = vpop.f32.mrb[88].mxu0  ;;  %v1215_v16 = vpack.c.bf16 %v1131_v13, %v1129_v12 }
 0x240   : > { %v946_v17 = vadd.f32 %v945_v15, %v9273_v38  ;;  %v947_v18 = vpop.f32.mrb[89].mxu0 }
 0x241   : > { %v948_v19 = vadd.f32 %v947_v18, %v9276_v39  ;;  %v949_v20 = vpop.f32.mrb[90].mxu0  ;;  %1678 = vmatprep.mubr.bf16.mxu1 %v1215_v16 }
 0x242   : > { %v950_v21 = vadd.f32 %v949_v20, %v9273_v38  ;;  %v951_v22 = vpop.f32.mrb[91].mxu0  ;;  %1679 = vmatmul.mubr.bf16.gmra.mrb[84].mxu1 %v1214_v14  ;;  %v1132_v24 = vmax.f32 %v946_v17, 0.0 }
 0x243   : > { %v952_v23 = vadd.f32 %v951_v22, %v9276_v39  ;;  %v1133_v26 = vmax.f32 %v948_v19, 0.0 }
 0x244   : > { %v1134_v25 = vmax.f32 %v950_v21, 0.0 }
 0x245   : > { %v1135_v27 = vmax.f32 %v952_v23, 0.0 }
 0x246   : > { %v1216_v28 = vpack.c.bf16 %v1134_v25, %v1132_v24 }
 0x247   : > { %v955_v32 = vpop.f32.mrb[92].mxu0  ;;  %v1217_v33 = vpack.c.bf16 %v1135_v27, %v1133_v26 }
 0x248   : > { %v956_v34 = vadd.f32 %v955_v32, %v9273_v38  ;;  %v957_v35 = vpop.f32.mrb[93].mxu0  ;;  %v8412_v32 = vld [vmem:[#allocation7 + $0x294] ss:$8 sps:$4 sm:$0xff]  }
 0x249   : > { %v958_v36 = vadd.f32 %v957_v35, %v9276_v39  ;;  %v959_v37 = vpop.f32.mrb[94].mxu0  ;;  %1688 = vmatprep.mubr.bf16.mxu1 %v1217_v33  ;;  %2946 = vmatprep.subr.bf16.mxu1 %v8412_v32 }
 0x24a   : > { %v960_v40 = vadd.f32 %v959_v37, %v9273_v38  ;;  %v961_v41 = vpop.f32.mrb[95].mxu0  ;;  %1689 = vmatmul.mubr.bf16.gmra.mrb[88].mxu1 %v1216_v28  ;;  %v1136_v43 = vmax.f32 %v956_v34, 0.0 }
 0x24b   : > { %v962_v42 = vadd.f32 %v961_v41, %v9276_v39  ;;  %v1137_v45 = vmax.f32 %v958_v36, 0.0  ;;  %2947 = vmatpush1.bf16.msra.mxu1 %v8410_v30 }
 0x24c   : > { %v1138_v44 = vmax.f32 %v960_v40, 0.0 }
 0x24d   : > { %v1139_v46 = vmax.f32 %v962_v42, 0.0 }
 0x24e   : > { %v1218_v47 = vpack.c.bf16 %v1138_v44, %v1136_v43  ;;  %v8663_v43 = vld [vmem:[#allocation8] sm:$0xff] }
 0x24f   : > { %v965_v48 = vpop.f32.mrb[96].mxu0  ;;  %v1219_v49 = vpack.c.bf16 %v1139_v46, %v1137_v45  ;;  %v9399_v44 = vrot.slane %v8663_v43, %v1270_v29  ;;  %v8664_v46 = vld [vmem:[#allocation8 + $0x8] sm:$0xff] }
 0x250   : > { %v966_v50 = vadd.f32 %v965_v48, %v9273_v38  ;;  %v967_v51 = vpop.f32.mrb[97].mxu0 }
 0x251   : > { %v968_v52 = vadd.f32 %v967_v51, %v9276_v39  ;;  %v969_v53 = vpop.f32.mrb[98].mxu0  ;;  %1698 = vmatprep.mubr.bf16.mxu1 %v1219_v49 }
 0x252   : > { %v970_v54 = vadd.f32 %v969_v53, %v9273_v38  ;;  %v971_v55 = vpop.f32.mrb[99].mxu0  ;;  %1699 = vmatmul.mubr.bf16.gmra.mrb[92].mxu1 %v1218_v47  ;;  %v1140_v57 = vmax.f32 %v966_v50, 0.0  ;;  %v9402_v47 = vrot.slane %v8664_v46, %v1270_v29 }
 0x253   : > { %v972_v56 = vadd.f32 %v971_v55, %v9276_v39  ;;  %v1141_v59 = vmax.f32 %v968_v52, 0.0 }
 0x254   : > { %v1142_v58 = vmax.f32 %v970_v54, 0.0 }
 0x255   : > { %v1143_v60 = vmax.f32 %v972_v56, 0.0 }
 0x256   : > { %v1220_v61 = vpack.c.bf16 %v1142_v58, %v1140_v57 }
 0x257   : > { %v975_v1 = vpop.f32.mrb[100].mxu0  ;;  %v1221_v2 = vpack.c.bf16 %v1143_v60, %v1141_v59 }
 0x258   : > { %v976_v3 = vadd.f32 %v975_v1, %v9273_v38  ;;  %v977_v4 = vpop.f32.mrb[101].mxu0 }
 0x259   : > { %v978_v5 = vadd.f32 %v977_v4, %v9276_v39  ;;  %v979_v6 = vpop.f32.mrb[102].mxu0  ;;  %1708 = vmatprep.mubr.bf16.mxu1 %v1221_v2 }
 0x25a   : > { %v980_v7 = vadd.f32 %v979_v6, %v9273_v38  ;;  %v981_v8 = vpop.f32.mrb[103].mxu0  ;;  %1709 = vmatmul.mubr.bf16.gmra.mrb[96].mxu1 %v1220_v61  ;;  %v1144_v10 = vmax.f32 %v976_v3, 0.0 }
 0x25b   : > { %v982_v9 = vadd.f32 %v981_v8, %v9276_v39  ;;  %v1145_v12 = vmax.f32 %v978_v5, 0.0 }
 0x25c   : > { %v1146_v11 = vmax.f32 %v980_v7, 0.0 }
 0x25d   : > { %v1147_v13 = vmax.f32 %v982_v9, 0.0 }
 0x25e   : > { %v1222_v14 = vpack.c.bf16 %v1146_v11, %v1144_v10 }
 0x25f   : > { %v985_v15 = vpop.f32.mrb[104].mxu0  ;;  %v1223_v16 = vpack.c.bf16 %v1147_v13, %v1145_v12 }
 0x260   : > { %v986_v17 = vadd.f32 %v985_v15, %v9273_v38  ;;  %v987_v18 = vpop.f32.mrb[105].mxu0 }
 0x261   : > { %v988_v19 = vadd.f32 %v987_v18, %v9276_v39  ;;  %v989_v20 = vpop.f32.mrb[106].mxu0  ;;  %1718 = vmatprep.mubr.bf16.mxu1 %v1223_v16 }
 0x262   : > { %v990_v21 = vadd.f32 %v989_v20, %v9273_v38  ;;  %v991_v22 = vpop.f32.mrb[107].mxu0  ;;  %1719 = vmatmul.mubr.bf16.gmra.mrb[100].mxu1 %v1222_v14  ;;  %v1148_v24 = vmax.f32 %v986_v17, 0.0 }
 0x263   : > { %v992_v23 = vadd.f32 %v991_v22, %v9276_v39  ;;  %v1149_v26 = vmax.f32 %v988_v19, 0.0  ;;  %v8415_v22 = vld [vmem:[#allocation7 + $0x2a4] ss:$8 sps:$4 sm:$0xff]  }
 0x264   : > { %v1150_v25 = vmax.f32 %v990_v21, 0.0  ;;  %v8413_v21 = vld [vmem:[#allocation7 + $0x2a0] ss:$8 sps:$4 sm:$0xff]   ;;  %2948 = vmatprep.subr.bf16.mxu1 %v8415_v22  ;;  %v8418_v22 = vld [vmem:[#allocation7 + $0x2b4] ss:$8 sps:$4 sm:$0xff]  }
 0x265   : > { %v1151_v27 = vmax.f32 %v992_v23, 0.0  ;;  %2949 = vmatpush1.bf16.msra.mxu1 %v8413_v21  ;;  %v8416_v21 = vld [vmem:[#allocation7 + $0x2b0] ss:$8 sps:$4 sm:$0xff]  }
 0x266   : > { %v1224_v28 = vpack.c.bf16 %v1150_v25, %v1148_v24  ;;  %2950 = vmatprep.subr.bf16.mxu1 %v8418_v22 }
 0x267   : > { %v995_v33 = vpop.f32.mrb[108].mxu0  ;;  %v1225_v34 = vpack.c.bf16 %v1151_v27, %v1149_v26 }
 0x268   : > { %v996_v35 = vadd.f32 %v995_v33, %v9273_v38  ;;  %v997_v36 = vpop.f32.mrb[109].mxu0 }
 0x269   : > { %v998_v37 = vadd.f32 %v997_v36, %v9276_v39  ;;  %v999_v40 = vpop.f32.mrb[110].mxu0  ;;  %1728 = vmatprep.mubr.bf16.mxu1 %v1225_v34  ;;  %2951 = vmatpush1.bf16.msra.mxu1 %v8416_v21 }
 0x26a   : > { %v1000_v41 = vadd.f32 %v999_v40, %v9273_v38  ;;  %v1001_v42 = vpop.f32.mrb[111].mxu0  ;;  %1729 = vmatmul.mubr.bf16.gmra.mrb[104].mxu1 %v1224_v28  ;;  %v1152_v48 = vmax.f32 %v996_v35, 0.0 }
 0x26b   : > { %v1002_v45 = vadd.f32 %v1001_v42, %v9276_v39  ;;  %v1153_v50 = vmax.f32 %v998_v37, 0.0 }
 0x26c   : > { %v1154_v49 = vmax.f32 %v1000_v41, 0.0 }
 0x26d   : > { %v1155_v51 = vmax.f32 %v1002_v45, 0.0  ;;  %v1470_v52 = vpop.f32.mrb[0].mxu1 }
 0x26e   : > { %v1471_v53 = vadd.f32 %v1470_v52, %v9399_v44  ;;  %v1472_v54 = vpop.f32.mrb[1].mxu1  ;;  %v1226_v55 = vpack.c.bf16 %v1154_v49, %v1152_v48 }
 0x26f   : > { %v1473_v56 = vadd.f32 %v1472_v54, %v9402_v47  ;;  %v1005_v57 = vpop.f32.mrb[112].mxu0  ;;  %v1474_v58 = vpop.f32.mrb[2].mxu1  ;;  %v1227_v59 = vpack.c.bf16 %v1155_v51, %v1153_v50 }
 0x270   : > { %v1006_v60 = vadd.f32 %v1005_v57, %v9273_v38  ;;  %v1475_v61 = vadd.f32 %v1474_v58, %v9399_v44  ;;  %v1007_v62 = vpop.f32.mrb[113].mxu0  ;;  %v1476_v63 = vpop.f32.mrb[3].mxu1  ;;  %v1789_v4 = vmax.f32 %v1471_v53, 0.0 }
 0x271   : > { %v1008_v1 = vadd.f32 %v1007_v62, %v9276_v39  ;;  %v1477_v2 = vadd.f32 %v1476_v63, %v9402_v47  ;;  %v1009_v3 = vpop.f32.mrb[114].mxu0  ;;  %1738 = vmatprep.mubr.bf16.mxu1 %v1227_v59  ;;  %v1790_v9 = vmax.f32 %v1473_v56, 0.0 }
 0x272   : > { %v1791_v5 = vmax.f32 %v1475_v61, 0.0  ;;  %v1010_v6 = vadd.f32 %v1009_v3, %v9273_v38  ;;  %v1011_v7 = vpop.f32.mrb[115].mxu0  ;;  %1739 = vmatmul.mubr.bf16.gmra.mrb[108].mxu1 %v1226_v55  ;;  %v1156_v11 = vmax.f32 %v1006_v60, 0.0 }
 0x273   : > { %v1012_v8 = vadd.f32 %v1011_v7, %v9276_v39  ;;  %v1792_v10 = vmax.f32 %v1477_v2, 0.0  ;;  %v1157_v14 = vmax.f32 %v1008_v1, 0.0 }
 0x274   : > { %v1917_v12 = vpack.c.bf16 %v1791_v5, %v1789_v4  ;;  %v1158_v13 = vmax.f32 %v1010_v6, 0.0 }
 0x275   : > { %v1159_v15 = vmax.f32 %v1012_v8, 0.0  ;;  %v1480_v16 = vpop.f32.mrb[4].mxu1  ;;  %v1918_v17 = vpack.c.bf16 %v1792_v10, %v1790_v9 }
 0x276   : > { %v1481_v18 = vadd.f32 %v1480_v16, %v9399_v44  ;;  %v1482_v19 = vpop.f32.mrb[5].mxu1  ;;  %v1228_v20 = vpack.c.bf16 %v1158_v13, %v1156_v11 }
 0x277   : > { %v1483_v23 = vadd.f32 %v1482_v19, %v9402_v47  ;;  %v1015_v24 = vpop.f32.mrb[116].mxu0  ;;  %v1484_v25 = vpop.f32.mrb[6].mxu1  ;;  %2214 = vmatprep.mubr.bf16.mxu0 %v1918_v17  ;;  %v1229_v26 = vpack.c.bf16 %v1159_v15, %v1157_v14 }
 0x278   : > { %v1016_v27 = vadd.f32 %v1015_v24, %v9273_v38  ;;  %v1485_v28 = vadd.f32 %v1484_v25, %v9399_v44  ;;  %v1017_v29 = vpop.f32.mrb[117].mxu0  ;;  %v1486_v30 = vpop.f32.mrb[7].mxu1  ;;  %2215 = vmatmul.mubr.bf16.vlgmr.msra.gmra.mrb[128].mxu0 %v1917_v12  ;;  %v1793_v37 = vmax.f32 %v1481_v18, 0.0 }
 0x279   : > { %v1018_v32 = vadd.f32 %v1017_v29, %v9276_v39  ;;  %v1487_v33 = vadd.f32 %v1486_v30, %v9402_v47  ;;  %v1019_v34 = vpop.f32.mrb[118].mxu0  ;;  %1748 = vmatprep.mubr.bf16.mxu1 %v1229_v26  ;;  %v1794_v42 = vmax.f32 %v1483_v23, 0.0 }
 0x27a   : > { %v1020_v35 = vadd.f32 %v1019_v34, %v9273_v38  ;;  %v1021_v36 = vpop.f32.mrb[119].mxu0  ;;  %1749 = vmatmul.mubr.bf16.gmra.mrb[112].mxu1 %v1228_v20  ;;  %v1795_v40 = vmax.f32 %v1485_v28, 0.0  ;;  %v1160_v45 = vmax.f32 %v1016_v27, 0.0 }
 0x27b   : > { %v1022_v41 = vadd.f32 %v1021_v36, %v9276_v39  ;;  %v1796_v43 = vmax.f32 %v1487_v33, 0.0  ;;  %v1161_v49 = vmax.f32 %v1018_v32, 0.0 }
 0x27c   : > { %v1162_v46 = vmax.f32 %v1020_v35, 0.0  ;;  %v1919_v48 = vpack.c.bf16 %v1795_v40, %v1793_v37 }
 0x27d   : > { %v1163_v50 = vmax.f32 %v1022_v41, 0.0  ;;  %v1490_v51 = vpop.f32.mrb[8].mxu1  ;;  %v1920_v52 = vpack.c.bf16 %v1796_v43, %v1794_v42 }
 0x27e   : > { %v1491_v53 = vadd.f32 %v1490_v51, %v9399_v44  ;;  %v1492_v54 = vpop.f32.mrb[9].mxu1  ;;  %v1230_v55 = vpack.c.bf16 %v1162_v46, %v1160_v45 }
 0x27f   : > { %v1493_v56 = vadd.f32 %v1492_v54, %v9402_v47  ;;  %v1025_v57 = vpop.f32.mrb[120].mxu0  ;;  %v1494_v58 = vpop.f32.mrb[10].mxu1  ;;  %2224 = vmatprep.mubr.bf16.mxu0 %v1920_v52  ;;  %v1231_v59 = vpack.c.bf16 %v1163_v50, %v1161_v49 }
 0x280   : > { %v1026_v60 = vadd.f32 %v1025_v57, %v9273_v38  ;;  %v1495_v61 = vadd.f32 %v1494_v58, %v9399_v44  ;;  %v1027_v62 = vpop.f32.mrb[121].mxu0  ;;  %v1496_v63 = vpop.f32.mrb[11].mxu1  ;;  %2225 = vmatmul.mubr.bf16.gmra.mrb[132].mxu0 %v1919_v48  ;;  %v1797_v6 = vmax.f32 %v1491_v53, 0.0 }
 0x281   : > { %v1028_v1 = vadd.f32 %v1027_v62, %v9276_v39  ;;  %v1497_v2 = vadd.f32 %v1496_v63, %v9402_v47  ;;  %v1029_v3 = vpop.f32.mrb[122].mxu0  ;;  %1758 = vmatprep.mubr.bf16.mxu1 %v1231_v59  ;;  %v1798_v9 = vmax.f32 %v1493_v56, 0.0 }
 0x282   : > { %v1030_v4 = vadd.f32 %v1029_v3, %v9273_v38  ;;  %v1031_v5 = vpop.f32.mrb[123].mxu0  ;;  %1759 = vmatmul.mubr.bf16.gmra.mrb[116].mxu1 %v1230_v55  ;;  %v1799_v7 = vmax.f32 %v1495_v61, 0.0  ;;  %v1164_v11 = vmax.f32 %v1026_v60, 0.0 }
 0x283   : > { %v1032_v8 = vadd.f32 %v1031_v5, %v9276_v39  ;;  %v1800_v10 = vmax.f32 %v1497_v2, 0.0  ;;  %v1165_v14 = vmax.f32 %v1028_v1, 0.0 }
 0x284   : > { %v1166_v12 = vmax.f32 %v1030_v4, 0.0  ;;  %v1921_v13 = vpack.c.bf16 %v1799_v7, %v1797_v6  ;;  %v8419_v6 = vld [vmem:[#allocation7 + $0x2c0] ss:$8 sps:$4 sm:$0xff]   ;;  %v8421_v7 = vld [vmem:[#allocation7 + $0x2c4] ss:$8 sps:$4 sm:$0xff]  }
 0x285   : > { %v1167_v15 = vmax.f32 %v1032_v8, 0.0  ;;  %v1500_v16 = vpop.f32.mrb[12].mxu1  ;;  %v1922_v17 = vpack.c.bf16 %v1800_v10, %v1798_v9  ;;  %2952 = vmatprep.subr.bf16.mxu1 %v8421_v7  ;;  %v8427_v7 = vld [vmem:[#allocation7 + $0x2e4] ss:$8 sps:$4 sm:$0xff]  }
 0x286   : > { %v1501_v18 = vadd.f32 %v1500_v16, %v9399_v44  ;;  %v1502_v19 = vpop.f32.mrb[13].mxu1  ;;  %v1232_v20 = vpack.c.bf16 %v1166_v12, %v1164_v11  ;;  %2953 = vmatpush1.bf16.msra.mxu1 %v8419_v6  ;;  %v8425_v6 = vld [vmem:[#allocation7 + $0x2e0] ss:$8 sps:$4 sm:$0xff]  }
 0x287   : > { %v1503_v23 = vadd.f32 %v1502_v19, %v9402_v47  ;;  %v1035_v24 = vpop.f32.mrb[124].mxu0  ;;  %v1504_v25 = vpop.f32.mrb[14].mxu1  ;;  %2234 = vmatprep.mubr.bf16.mxu0 %v1922_v17  ;;  %v1233_v26 = vpack.c.bf16 %v1167_v15, %v1165_v14 }
 0x288   : > { %v1036_v27 = vadd.f32 %v1035_v24, %v9273_v38  ;;  %v1505_v28 = vadd.f32 %v1504_v25, %v9399_v44  ;;  %v1037_v29 = vpop.f32.mrb[125].mxu0  ;;  %v1506_v30 = vpop.f32.mrb[15].mxu1  ;;  %2235 = vmatmul.mubr.bf16.gmra.mrb[136].mxu0 %v1921_v13  ;;  %v1801_v37 = vmax.f32 %v1501_v18, 0.0 }
 0x289   : > { %v1038_v32 = vadd.f32 %v1037_v29, %v9276_v39  ;;  %v1507_v33 = vadd.f32 %v1506_v30, %v9402_v47  ;;  %v1039_v34 = vpop.f32.mrb[126].mxu0  ;;  %1768 = vmatprep.mubr.bf16.mxu1 %v1233_v26  ;;  %v1802_v42 = vmax.f32 %v1503_v23, 0.0 }
 0x28a   : > { %v1040_v35 = vadd.f32 %v1039_v34, %v9273_v38  ;;  %v1041_v36 = vpop.f32.mrb[127].mxu0  ;;  %1769 = vmatmul.mubr.bf16.gmra.mrb[120].mxu1 %v1232_v20  ;;  %v1803_v40 = vmax.f32 %v1505_v28, 0.0  ;;  %v1168_v45 = vmax.f32 %v1036_v27, 0.0 }
 0x28b   : > { %v1042_v41 = vadd.f32 %v1041_v36, %v9276_v39  ;;  %v1804_v43 = vmax.f32 %v1507_v33, 0.0  ;;  %v1169_v49 = vmax.f32 %v1038_v32, 0.0 }
 0x28c   : > { %v1170_v46 = vmax.f32 %v1040_v35, 0.0  ;;  %v1923_v48 = vpack.c.bf16 %v1803_v40, %v1801_v37  ;;  %v8422_v37 = vld [vmem:[#allocation7 + $0x2d0] ss:$8 sps:$4 sm:$0xff]   ;;  %v8424_v40 = vld [vmem:[#allocation7 + $0x2d4] ss:$8 sps:$4 sm:$0xff]  }
 0x28d   : > { %v1171_v50 = vmax.f32 %v1042_v41, 0.0  ;;  %v1510_v51 = vpop.f32.mrb[16].mxu1  ;;  %v1924_v52 = vpack.c.bf16 %v1804_v43, %v1802_v42  ;;  %2954 = vmatprep.subr.bf16.mxu1 %v8424_v40  ;;  %v8430_v40 = vld [vmem:[#allocation7 + $0x2f4] ss:$8 sps:$4 sm:$0xff]  }
 0x28e   : > { %v1511_v53 = vadd.f32 %v1510_v51, %v9399_v44  ;;  %v1512_v54 = vpop.f32.mrb[17].mxu1  ;;  %v1234_v55 = vpack.c.bf16 %v1170_v46, %v1168_v45  ;;  %2955 = vmatpush1.bf16.msra.mxu1 %v8422_v37  ;;  %v8428_v37 = vld [vmem:[#allocation7 + $0x2f0] ss:$8 sps:$4 sm:$0xff]  }
 0x28f   : > { %v1513_v38 = vadd.f32 %v1512_v54, %v9402_v47  ;;  %v1514_v56 = vpop.f32.mrb[18].mxu1  ;;  %2244 = vmatprep.mubr.bf16.mxu0 %v1924_v52  ;;  %v1235_v57 = vpack.c.bf16 %v1171_v50, %v1169_v49  ;;  %2956 = vmatprep.subr.bf16.mxu1 %v8427_v7 }
 0x290   : > { %v1515_v39 = vadd.f32 %v1514_v56, %v9399_v44  ;;  %v1516_v58 = vpop.f32.mrb[19].mxu1  ;;  %2245 = vmatmul.mubr.bf16.gmra.mrb[140].mxu0 %v1923_v48  ;;  %v1805_v60 = vmax.f32 %v1511_v53, 0.0 }
 0x291   : > { %v1517_v59 = vadd.f32 %v1516_v58, %v9402_v47  ;;  %1778 = vmatprep.mubr.bf16.mxu1 %v1235_v57  ;;  %v1806_v62 = vmax.f32 %v1513_v38, 0.0 }
 0x292   : > { %1779 = vmatmul.mubr.bf16.gmra.mrb[124].mxu1 %v1234_v55  ;;  %v1807_v61 = vmax.f32 %v1515_v39, 0.0 }
 0x293   : > { %v1808_v63 = vmax.f32 %v1517_v59, 0.0  ;;  %2957 = vmatpush1.bf16.msra.mxu1 %v8425_v6 }
 0x294   : > { %v1925_v1 = vpack.c.bf16 %v1807_v61, %v1805_v60  ;;  %2958 = vmatprep.subr.bf16.mxu1 %v8430_v40 }
 0x295   : > { %v1520_v2 = vpop.f32.mrb[20].mxu1  ;;  %v1926_v3 = vpack.c.bf16 %v1808_v63, %v1806_v62 }
 0x296   : > { %v1521_v4 = vadd.f32 %v1520_v2, %v9399_v44  ;;  %v1522_v5 = vpop.f32.mrb[21].mxu1 }
 0x297   : > { %v1523_v8 = vadd.f32 %v1522_v5, %v9402_v47  ;;  %v1524_v9 = vpop.f32.mrb[22].mxu1  ;;  %2254 = vmatprep.mubr.bf16.mxu0 %v1926_v3  ;;  %2959 = vmatpush1.bf16.msra.mxu1 %v8428_v37 }
 0x298   : > { %v1525_v10 = vadd.f32 %v1524_v9, %v9399_v44  ;;  %v1526_v11 = vpop.f32.mrb[23].mxu1  ;;  %2255 = vmatmul.mubr.bf16.gmra.mrb[144].mxu0 %v1925_v1  ;;  %v1809_v13 = vmax.f32 %v1521_v4, 0.0 }
 0x299   : > { %v1527_v12 = vadd.f32 %v1526_v11, %v9402_v47  ;;  %v1810_v15 = vmax.f32 %v1523_v8, 0.0 }
 0x29a   : > { %v1811_v14 = vmax.f32 %v1525_v10, 0.0 }
 0x29b   : > { %v1812_v16 = vmax.f32 %v1527_v12, 0.0 }
 0x29c   : > { %v1927_v17 = vpack.c.bf16 %v1811_v14, %v1809_v13 }
 0x29d   : > { %v1530_v18 = vpop.f32.mrb[24].mxu1  ;;  %v1928_v19 = vpack.c.bf16 %v1812_v16, %v1810_v15 }
 0x29e   : > { %v1531_v20 = vadd.f32 %v1530_v18, %v9399_v44  ;;  %v1532_v21 = vpop.f32.mrb[25].mxu1 }
 0x29f   : > { %v1533_v22 = vadd.f32 %v1532_v21, %v9402_v47  ;;  %v1534_v23 = vpop.f32.mrb[26].mxu1  ;;  %2264 = vmatprep.mubr.bf16.mxu0 %v1928_v19 }
 0x2a0   : > { %v1535_v24 = vadd.f32 %v1534_v23, %v9399_v44  ;;  %v1536_v25 = vpop.f32.mrb[27].mxu1  ;;  %2265 = vmatmul.mubr.bf16.gmra.mrb[148].mxu0 %v1927_v17  ;;  %v1813_v27 = vmax.f32 %v1531_v20, 0.0 }
 0x2a1   : > { %v1537_v26 = vadd.f32 %v1536_v25, %v9402_v47  ;;  %v1814_v29 = vmax.f32 %v1533_v22, 0.0 }
 0x2a2   : > { %v1815_v28 = vmax.f32 %v1535_v24, 0.0 }
 0x2a3   : > { %v1816_v30 = vmax.f32 %v1537_v26, 0.0 }
 0x2a4   : > { %v1929_v32 = vpack.c.bf16 %v1815_v28, %v1813_v27 }
 0x2a5   : > { %v1540_v33 = vpop.f32.mrb[28].mxu1  ;;  %v1930_v34 = vpack.c.bf16 %v1816_v30, %v1814_v29 }
 0x2a6   : > { %v1541_v35 = vadd.f32 %v1540_v33, %v9399_v44  ;;  %v1542_v36 = vpop.f32.mrb[29].mxu1 }
 0x2a7   : > { %v1543_v41 = vadd.f32 %v1542_v36, %v9402_v47  ;;  %v1544_v42 = vpop.f32.mrb[30].mxu1  ;;  %2274 = vmatprep.mubr.bf16.mxu0 %v1930_v34 }
 0x2a8   : > { %v1545_v43 = vadd.f32 %v1544_v42, %v9399_v44  ;;  %v1546_v45 = vpop.f32.mrb[31].mxu1  ;;  %2275 = vmatmul.mubr.bf16.gmra.mrb[152].mxu0 %v1929_v32  ;;  %v1817_v48 = vmax.f32 %v1541_v35, 0.0 }
 0x2a9   : > { %v1547_v46 = vadd.f32 %v1546_v45, %v9402_v47  ;;  %v1818_v50 = vmax.f32 %v1543_v41, 0.0 }
 0x2aa   : > { %v1819_v49 = vmax.f32 %v1545_v43, 0.0 }
 0x2ab   : > { %v1820_v51 = vmax.f32 %v1547_v46, 0.0 }
 0x2ac   : > { %v1931_v52 = vpack.c.bf16 %v1819_v49, %v1817_v48 }
 0x2ad   : > { %v1550_v53 = vpop.f32.mrb[32].mxu1  ;;  %v1932_v54 = vpack.c.bf16 %v1820_v51, %v1818_v50 }
 0x2ae   : > { %v1551_v55 = vadd.f32 %v1550_v53, %v9399_v44  ;;  %v1552_v38 = vpop.f32.mrb[33].mxu1 }
 0x2af   : > { %v1553_v56 = vadd.f32 %v1552_v38, %v9402_v47  ;;  %v1554_v57 = vpop.f32.mrb[34].mxu1  ;;  %2284 = vmatprep.mubr.bf16.mxu0 %v1932_v54 }
 0x2b0   : > { %v1555_v39 = vadd.f32 %v1554_v57, %v9399_v44  ;;  %v1556_v58 = vpop.f32.mrb[35].mxu1  ;;  %2285 = vmatmul.mubr.bf16.gmra.mrb[156].mxu0 %v1931_v52  ;;  %v1821_v60 = vmax.f32 %v1551_v55, 0.0 }
 0x2b1   : > { %v1557_v59 = vadd.f32 %v1556_v58, %v9402_v47  ;;  %v1822_v62 = vmax.f32 %v1553_v56, 0.0 }
 0x2b2   : > { %v1823_v61 = vmax.f32 %v1555_v39, 0.0 }
 0x2b3   : > { %v1824_v63 = vmax.f32 %v1557_v59, 0.0 }
 0x2b4   : > { %v1933_v1 = vpack.c.bf16 %v1823_v61, %v1821_v60 }
 0x2b5   : > { %v1560_v2 = vpop.f32.mrb[36].mxu1  ;;  %v1934_v3 = vpack.c.bf16 %v1824_v63, %v1822_v62 }
 0x2b6   : > { %v1561_v4 = vadd.f32 %v1560_v2, %v9399_v44  ;;  %v1562_v5 = vpop.f32.mrb[37].mxu1 }
 0x2b7   : > { %v1563_v8 = vadd.f32 %v1562_v5, %v9402_v47  ;;  %v1564_v9 = vpop.f32.mrb[38].mxu1  ;;  %2294 = vmatprep.mubr.bf16.mxu0 %v1934_v3 }
 0x2b8   : > { %v1565_v10 = vadd.f32 %v1564_v9, %v9399_v44  ;;  %v1566_v11 = vpop.f32.mrb[39].mxu1  ;;  %2295 = vmatmul.mubr.bf16.gmra.mrb[160].mxu0 %v1933_v1  ;;  %v1825_v13 = vmax.f32 %v1561_v4, 0.0 }
 0x2b9   : > { %v1567_v12 = vadd.f32 %v1566_v11, %v9402_v47  ;;  %v1826_v15 = vmax.f32 %v1563_v8, 0.0 }
 0x2ba   : > { %v1827_v14 = vmax.f32 %v1565_v10, 0.0  ;;  %v8433_v10 = vld [vmem:[#allocation5 + $0x84] ss:$8 sps:$4 sm:$0xff]  }
 0x2bb   : > { %v1828_v16 = vmax.f32 %v1567_v12, 0.0  ;;  %4349 = vmatprep.subr.bf16.mxu1 %v8433_v10 }
 0x2bc   : > { %v1935_v17 = vpack.c.bf16 %v1827_v14, %v1825_v13 }
 0x2bd   : > { %v1570_v18 = vpop.f32.mrb[40].mxu1  ;;  %v1936_v19 = vpack.c.bf16 %v1828_v16, %v1826_v15 }
 0x2be   : > { %v1571_v20 = vadd.f32 %v1570_v18, %v9399_v44  ;;  %v1572_v21 = vpop.f32.mrb[41].mxu1 }
 0x2bf   : > { %v1573_v22 = vadd.f32 %v1572_v21, %v9402_v47  ;;  %v1574_v23 = vpop.f32.mrb[42].mxu1  ;;  %2304 = vmatprep.mubr.bf16.mxu0 %v1936_v19 }
 0x2c0   : > { %v1575_v24 = vadd.f32 %v1574_v23, %v9399_v44  ;;  %v1576_v25 = vpop.f32.mrb[43].mxu1  ;;  %2305 = vmatmul.mubr.bf16.gmra.mrb[164].mxu0 %v1935_v17  ;;  %v1829_v27 = vmax.f32 %v1571_v20, 0.0 }
 0x2c1   : > { %v1577_v26 = vadd.f32 %v1576_v25, %v9402_v47  ;;  %v1830_v29 = vmax.f32 %v1573_v22, 0.0 }
 0x2c2   : > { %v1831_v28 = vmax.f32 %v1575_v24, 0.0 }
 0x2c3   : > { %v1832_v30 = vmax.f32 %v1577_v26, 0.0 }
 0x2c4   : > { %v1937_v32 = vpack.c.bf16 %v1831_v28, %v1829_v27 }
 0x2c5   : > { %v1580_v33 = vpop.f32.mrb[44].mxu1  ;;  %v1938_v34 = vpack.c.bf16 %v1832_v30, %v1830_v29 }
 0x2c6   : > { %v1581_v35 = vadd.f32 %v1580_v33, %v9399_v44  ;;  %v1582_v36 = vpop.f32.mrb[45].mxu1 }
 0x2c7   : > { %v1583_v41 = vadd.f32 %v1582_v36, %v9402_v47  ;;  %v1584_v42 = vpop.f32.mrb[46].mxu1  ;;  %2314 = vmatprep.mubr.bf16.mxu0 %v1938_v34 }
 0x2c8   : > { %v1585_v43 = vadd.f32 %v1584_v42, %v9399_v44  ;;  %v1586_v45 = vpop.f32.mrb[47].mxu1  ;;  %2315 = vmatmul.mubr.bf16.gmra.mrb[168].mxu0 %v1937_v32  ;;  %v1833_v48 = vmax.f32 %v1581_v35, 0.0 }
 0x2c9   : > { %v1587_v46 = vadd.f32 %v1586_v45, %v9402_v47  ;;  %v1834_v50 = vmax.f32 %v1583_v41, 0.0 }
 0x2ca   : > { %v1835_v49 = vmax.f32 %v1585_v43, 0.0 }
 0x2cb   : > { %v1836_v51 = vmax.f32 %v1587_v46, 0.0 }
 0x2cc   : > { %v1939_v52 = vpack.c.bf16 %v1835_v49, %v1833_v48 }
 0x2cd   : > { %v1590_v53 = vpop.f32.mrb[48].mxu1  ;;  %v1940_v54 = vpack.c.bf16 %v1836_v51, %v1834_v50 }
 0x2ce   : > { %v1591_v55 = vadd.f32 %v1590_v53, %v9399_v44  ;;  %v1592_v38 = vpop.f32.mrb[49].mxu1 }
 0x2cf   : > { %v1593_v56 = vadd.f32 %v1592_v38, %v9402_v47  ;;  %v1594_v57 = vpop.f32.mrb[50].mxu1  ;;  %2324 = vmatprep.mubr.bf16.mxu0 %v1940_v54 }
 0x2d0   : > { %v1595_v39 = vadd.f32 %v1594_v57, %v9399_v44  ;;  %v1596_v58 = vpop.f32.mrb[51].mxu1  ;;  %2325 = vmatmul.mubr.bf16.gmra.mrb[172].mxu0 %v1939_v52  ;;  %v1837_v60 = vmax.f32 %v1591_v55, 0.0 }
 0x2d1   : > { %v1597_v59 = vadd.f32 %v1596_v58, %v9402_v47  ;;  %v1838_v62 = vmax.f32 %v1593_v56, 0.0 }
 0x2d2   : > { %v1839_v61 = vmax.f32 %v1595_v39, 0.0 }
 0x2d3   : > { %v1840_v63 = vmax.f32 %v1597_v59, 0.0 }
 0x2d4   : > { %v1941_v1 = vpack.c.bf16 %v1839_v61, %v1837_v60 }
 0x2d5   : > { %v1600_v2 = vpop.f32.mrb[52].mxu1  ;;  %v1942_v3 = vpack.c.bf16 %v1840_v63, %v1838_v62 }
 0x2d6   : > { %v1601_v4 = vadd.f32 %v1600_v2, %v9399_v44  ;;  %v1602_v5 = vpop.f32.mrb[53].mxu1 }
 0x2d7   : > { %v1603_v6 = vadd.f32 %v1602_v5, %v9402_v47  ;;  %v1604_v7 = vpop.f32.mrb[54].mxu1  ;;  %2334 = vmatprep.mubr.bf16.mxu0 %v1942_v3 }
 0x2d8   : > { %v1605_v8 = vadd.f32 %v1604_v7, %v9399_v44  ;;  %v1606_v9 = vpop.f32.mrb[55].mxu1  ;;  %2335 = vmatmul.mubr.bf16.gmra.mrb[176].mxu0 %v1941_v1  ;;  %v1841_v12 = vmax.f32 %v1601_v4, 0.0 }
 0x2d9   : > { %v1607_v11 = vadd.f32 %v1606_v9, %v9402_v47  ;;  %v1842_v14 = vmax.f32 %v1603_v6, 0.0  ;;  %v8439_v9 = vld [vmem:[#allocation7 + $0x304] ss:$8 sps:$4 sm:$0xff]  }
 0x2da   : > { %v1843_v13 = vmax.f32 %v1605_v8, 0.0  ;;  %v8437_v8 = vld [vmem:[#allocation7 + $0x300] ss:$8 sps:$4 sm:$0xff]   ;;  %3674 = vmatprep.subr.bf16.mxu0 %v8439_v9  ;;  %v8448_v9 = vld [vmem:[#allocation7 + $0x324] ss:$8 sps:$4 sm:$0xff]  }
 0x2db   : > { %v1844_v15 = vmax.f32 %v1607_v11, 0.0  ;;  %3675 = vmatpush1.bf16.msra.mxu0 %v8437_v8  ;;  %v8446_v8 = vld [vmem:[#allocation7 + $0x320] ss:$8 sps:$4 sm:$0xff]  }
 0x2dc   : > { %v1943_v16 = vpack.c.bf16 %v1843_v13, %v1841_v12 }
 0x2dd   : > { %v1610_v17 = vpop.f32.mrb[56].mxu1  ;;  %v1944_v18 = vpack.c.bf16 %v1844_v15, %v1842_v14 }
 0x2de   : > { %v1611_v19 = vadd.f32 %v1610_v17, %v9399_v44  ;;  %v1612_v20 = vpop.f32.mrb[57].mxu1 }
 0x2df   : > { %v1613_v21 = vadd.f32 %v1612_v20, %v9402_v47  ;;  %v1614_v22 = vpop.f32.mrb[58].mxu1  ;;  %2344 = vmatprep.mubr.bf16.mxu0 %v1944_v18 }
 0x2e0   : > { %v1615_v23 = vadd.f32 %v1614_v22, %v9399_v44  ;;  %v1616_v24 = vpop.f32.mrb[59].mxu1  ;;  %2345 = vmatmul.mubr.bf16.gmra.mrb[180].mxu0 %v1943_v16  ;;  %v1845_v26 = vmax.f32 %v1611_v19, 0.0 }
 0x2e1   : > { %v1617_v25 = vadd.f32 %v1616_v24, %v9402_v47  ;;  %v1846_v28 = vmax.f32 %v1613_v21, 0.0 }
 0x2e2   : > { %v1847_v27 = vmax.f32 %v1615_v23, 0.0 }
 0x2e3   : > { %v1848_v29 = vmax.f32 %v1617_v25, 0.0 }
 0x2e4   : > { %v1945_v30 = vpack.c.bf16 %v1847_v27, %v1845_v26 }
 0x2e5   : > { %v1620_v32 = vpop.f32.mrb[60].mxu1  ;;  %v1946_v33 = vpack.c.bf16 %v1848_v29, %v1846_v28 }
 0x2e6   : > { %v1621_v34 = vadd.f32 %v1620_v32, %v9399_v44  ;;  %v1622_v35 = vpop.f32.mrb[61].mxu1 }
 0x2e7   : > { %v1623_v36 = vadd.f32 %v1622_v35, %v9402_v47  ;;  %v1624_v37 = vpop.f32.mrb[62].mxu1  ;;  %2354 = vmatprep.mubr.bf16.mxu0 %v1946_v33 }
 0x2e8   : > { %v1625_v40 = vadd.f32 %v1624_v37, %v9399_v44  ;;  %v1626_v41 = vpop.f32.mrb[63].mxu1  ;;  %2355 = vmatmul.mubr.bf16.gmra.mrb[184].mxu0 %v1945_v30  ;;  %v1849_v43 = vmax.f32 %v1621_v34, 0.0 }
 0x2e9   : > { %v1627_v42 = vadd.f32 %v1626_v41, %v9402_v47  ;;  %v1850_v46 = vmax.f32 %v1623_v36, 0.0  ;;  %v8440_v41 = vld [vmem:[#allocation7 + $0x310] ss:$8 sps:$4 sm:$0xff]  }
 0x2ea   : > { %v1851_v45 = vmax.f32 %v1625_v40, 0.0 }
 0x2eb   : > { %v1852_v48 = vmax.f32 %v1627_v42, 0.0  ;;  %v8442_v42 = vld [vmem:[#allocation7 + $0x314] ss:$8 sps:$4 sm:$0xff]  }
 0x2ec   : > { %v1947_v49 = vpack.c.bf16 %v1851_v45, %v1849_v43  ;;  %3676 = vmatprep.subr.bf16.mxu0 %v8442_v42  ;;  %v8451_v42 = vld [vmem:[#allocation7 + $0x334] ss:$8 sps:$4 sm:$0xff]  }
 0x2ed   : > { %v1630_v50 = vpop.f32.mrb[64].mxu1  ;;  %v1948_v51 = vpack.c.bf16 %v1852_v48, %v1850_v46  ;;  %3677 = vmatpush1.bf16.msra.mxu0 %v8440_v41  ;;  %v8449_v41 = vld [vmem:[#allocation7 + $0x330] ss:$8 sps:$4 sm:$0xff]  }
 0x2ee   : > { %v1631_v52 = vadd.f32 %v1630_v50, %v9399_v44  ;;  %v1632_v53 = vpop.f32.mrb[65].mxu1  ;;  %3678 = vmatprep.subr.bf16.mxu0 %v8448_v9  ;;  %v8457_v9 = vld [vmem:[#allocation7 + $0x344] ss:$8 sps:$4 sm:$0xff]  }
 0x2ef   : > { %v1633_v54 = vadd.f32 %v1632_v53, %v9402_v47  ;;  %v1634_v55 = vpop.f32.mrb[66].mxu1  ;;  %2364 = vmatprep.mubr.bf16.mxu0 %v1948_v51 }
 0x2f0   : > { %v1635_v38 = vadd.f32 %v1634_v55, %v9399_v44  ;;  %v1636_v56 = vpop.f32.mrb[67].mxu1  ;;  %2365 = vmatmul.mubr.bf16.gmra.mrb[188].mxu0 %v1947_v49  ;;  %v1853_v39 = vmax.f32 %v1631_v52, 0.0 }
 0x2f1   : > { %v1637_v57 = vadd.f32 %v1636_v56, %v9402_v47  ;;  %v1854_v59 = vmax.f32 %v1633_v54, 0.0  ;;  %3679 = vmatpush1.bf16.msra.mxu0 %v8446_v8  ;;  %v8455_v8 = vld [vmem:[#allocation7 + $0x340] ss:$8 sps:$4 sm:$0xff]  }
 0x2f2   : > { %v1855_v58 = vmax.f32 %v1635_v38, 0.0  ;;  %3680 = vmatprep.subr.bf16.mxu0 %v8451_v42 }
 0x2f3   : > { %v1856_v60 = vmax.f32 %v1637_v57, 0.0 }
 0x2f4   : > { %v1949_v61 = vpack.c.bf16 %v1855_v58, %v1853_v39 }
 0x2f5   : > { %v1640_v62 = vpop.f32.mrb[68].mxu1  ;;  %v1950_v63 = vpack.c.bf16 %v1856_v60, %v1854_v59  ;;  %3681 = vmatpush1.bf16.msra.mxu0 %v8449_v41  ;;  %v8665_v41 = vld [vmem:[#allocation8] sm:$0xff] }
 0x2f6   : > { %v1641_v1 = vadd.f32 %v1640_v62, %v9399_v44  ;;  %v1642_v2 = vpop.f32.mrb[69].mxu1  ;;  %3682 = vmatprep.subr.bf16.mxu0 %v8457_v9 }
 0x2f7   : > { %v1643_v3 = vadd.f32 %v1642_v2, %v9402_v47  ;;  %v1644_v4 = vpop.f32.mrb[70].mxu1  ;;  %2374 = vmatprep.mubr.bf16.mxu0 %v1950_v63 }
 0x2f8   : > { %v1645_v5 = vadd.f32 %v1644_v4, %v9399_v44  ;;  %v1646_v6 = vpop.f32.mrb[71].mxu1  ;;  %2375 = vmatmul.mubr.bf16.gmra.mrb[192].mxu0 %v1949_v61  ;;  %v1857_v10 = vmax.f32 %v1641_v1, 0.0 }
 0x2f9   : > { %v1647_v7 = vadd.f32 %v1646_v6, %v9402_v47  ;;  %v1858_v12 = vmax.f32 %v1643_v3, 0.0  ;;  %3683 = vmatpush1.bf16.msra.mxu0 %v8455_v8 }
 0x2fa   : > { %v1859_v11 = vmax.f32 %v1645_v5, 0.0 }
 0x2fb   : > { %v1860_v13 = vmax.f32 %v1647_v7, 0.0 }
 0x2fc   : > { %v1951_v14 = vpack.c.bf16 %v1859_v11, %v1857_v10 }
 0x2fd   : > { %v1650_v15 = vpop.f32.mrb[72].mxu1  ;;  %v1952_v16 = vpack.c.bf16 %v1860_v13, %v1858_v12 }
 0x2fe   : > { %v1651_v17 = vadd.f32 %v1650_v15, %v9399_v44  ;;  %v1652_v18 = vpop.f32.mrb[73].mxu1 }
 0x2ff   : > { %v1653_v19 = vadd.f32 %v1652_v18, %v9402_v47  ;;  %v1654_v20 = vpop.f32.mrb[74].mxu1  ;;  %2384 = vmatprep.mubr.bf16.mxu0 %v1952_v16 }
 0x300   : > { %v1655_v21 = vadd.f32 %v1654_v20, %v9399_v44  ;;  %v1656_v22 = vpop.f32.mrb[75].mxu1  ;;  %2385 = vmatmul.mubr.bf16.gmra.mrb[196].mxu0 %v1951_v14  ;;  %v1861_v24 = vmax.f32 %v1651_v17, 0.0 }
 0x301   : > { %v1657_v23 = vadd.f32 %v1656_v22, %v9402_v47  ;;  %v1862_v26 = vmax.f32 %v1653_v19, 0.0 }
 0x302   : > { %v1863_v25 = vmax.f32 %v1655_v21, 0.0 }
 0x303   : > { %v1864_v27 = vmax.f32 %v1657_v23, 0.0 }
 0x304   : > { %v1953_v28 = vpack.c.bf16 %v1863_v25, %v1861_v24 }
 0x305   : > { %v1660_v29 = vpop.f32.mrb[76].mxu1  ;;  %v1954_v30 = vpack.c.bf16 %v1864_v27, %v1862_v26 }
 0x306   : > { %v1661_v32 = vadd.f32 %v1660_v29, %v9399_v44  ;;  %v1662_v33 = vpop.f32.mrb[77].mxu1 }
 0x307   : > { %v1663_v34 = vadd.f32 %v1662_v33, %v9402_v47  ;;  %v1664_v35 = vpop.f32.mrb[78].mxu1  ;;  %2394 = vmatprep.mubr.bf16.mxu0 %v1954_v30 }
 0x308   : > { %v1665_v36 = vadd.f32 %v1664_v35, %v9399_v44  ;;  %v1666_v37 = vpop.f32.mrb[79].mxu1  ;;  %2395 = vmatmul.mubr.bf16.gmra.mrb[200].mxu0 %v1953_v28  ;;  %v1865_v43 = vmax.f32 %v1661_v32, 0.0 }
 0x309   : > { %v1667_v40 = vadd.f32 %v1666_v37, %v9402_v47  ;;  %v1866_v46 = vmax.f32 %v1663_v34, 0.0 }
 0x30a   : > { %v1867_v45 = vmax.f32 %v1665_v36, 0.0 }
 0x30b   : > { %v1868_v48 = vmax.f32 %v1667_v40, 0.0 }
 0x30c   : > { %v1955_v49 = vpack.c.bf16 %v1867_v45, %v1865_v43 }
 0x30d   : > { %v1670_v50 = vpop.f32.mrb[80].mxu1  ;;  %v1956_v51 = vpack.c.bf16 %v1868_v48, %v1866_v46 }
 0x30e   : > { %v1671_v52 = vadd.f32 %v1670_v50, %v9399_v44  ;;  %v1672_v53 = vpop.f32.mrb[81].mxu1 }
 0x30f   : > { %v1673_v54 = vadd.f32 %v1672_v53, %v9402_v47  ;;  %v1674_v55 = vpop.f32.mrb[82].mxu1  ;;  %2404 = vmatprep.mubr.bf16.mxu0 %v1956_v51 }
 0x310   : > { %v1675_v38 = vadd.f32 %v1674_v55, %v9399_v44  ;;  %v1676_v56 = vpop.f32.mrb[83].mxu1  ;;  %2405 = vmatmul.mubr.bf16.gmra.mrb[204].mxu0 %v1955_v49  ;;  %v1869_v39 = vmax.f32 %v1671_v52, 0.0 }
 0x311   : > { %v1677_v57 = vadd.f32 %v1676_v56, %v9402_v47  ;;  %v1870_v59 = vmax.f32 %v1673_v54, 0.0 }
 0x312   : > { %v1871_v58 = vmax.f32 %v1675_v38, 0.0 }
 0x313   : > { %v1872_v60 = vmax.f32 %v1677_v57, 0.0 }
 0x314   : > { %v1957_v61 = vpack.c.bf16 %v1871_v58, %v1869_v39 }
 0x315   : > { %v1680_v62 = vpop.f32.mrb[84].mxu1  ;;  %v1958_v63 = vpack.c.bf16 %v1872_v60, %v1870_v59 }
 0x316   : > { %v1681_v1 = vadd.f32 %v1680_v62, %v9399_v44  ;;  %v1682_v2 = vpop.f32.mrb[85].mxu1 }
 0x317   : > { %v1683_v3 = vadd.f32 %v1682_v2, %v9402_v47  ;;  %v1684_v4 = vpop.f32.mrb[86].mxu1  ;;  %2414 = vmatprep.mubr.bf16.mxu0 %v1958_v63 }
 0x318   : > { %v1685_v5 = vadd.f32 %v1684_v4, %v9399_v44  ;;  %v1686_v6 = vpop.f32.mrb[87].mxu1  ;;  %2415 = vmatmul.mubr.bf16.gmra.mrb[208].mxu0 %v1957_v61  ;;  %v1873_v10 = vmax.f32 %v1681_v1, 0.0 }
 0x319   : > { %v1687_v7 = vadd.f32 %v1686_v6, %v9402_v47  ;;  %v1874_v12 = vmax.f32 %v1683_v3, 0.0 }
 0x31a   : > { %v1875_v11 = vmax.f32 %v1685_v5, 0.0 }
 0x31b   : > { %v1876_v13 = vmax.f32 %v1687_v7, 0.0 }
 0x31c   : > { %v1959_v14 = vpack.c.bf16 %v1875_v11, %v1873_v10 }
 0x31d   : > { %v1690_v15 = vpop.f32.mrb[88].mxu1  ;;  %v1960_v16 = vpack.c.bf16 %v1876_v13, %v1874_v12 }
 0x31e   : > { %v1691_v17 = vadd.f32 %v1690_v15, %v9399_v44  ;;  %v1692_v18 = vpop.f32.mrb[89].mxu1 }
 0x31f   : > { %v1693_v19 = vadd.f32 %v1692_v18, %v9402_v47  ;;  %v1694_v20 = vpop.f32.mrb[90].mxu1  ;;  %2424 = vmatprep.mubr.bf16.mxu0 %v1960_v16 }
 0x320   : > { %v1695_v21 = vadd.f32 %v1694_v20, %v9399_v44  ;;  %v1696_v22 = vpop.f32.mrb[91].mxu1  ;;  %2425 = vmatmul.mubr.bf16.gmra.mrb[212].mxu0 %v1959_v14  ;;  %v1877_v24 = vmax.f32 %v1691_v17, 0.0 }
 0x321   : > { %v1697_v23 = vadd.f32 %v1696_v22, %v9402_v47  ;;  %v1878_v26 = vmax.f32 %v1693_v19, 0.0 }
 0x322   : > { %v1879_v25 = vmax.f32 %v1695_v21, 0.0 }
 0x323   : > { %v1880_v27 = vmax.f32 %v1697_v23, 0.0 }
 0x324   : > { %v1961_v28 = vpack.c.bf16 %v1879_v25, %v1877_v24 }
 0x325   : > { %v1700_v29 = vpop.f32.mrb[92].mxu1  ;;  %v1962_v30 = vpack.c.bf16 %v1880_v27, %v1878_v26 }
 0x326   : > { %v1701_v32 = vadd.f32 %v1700_v29, %v9399_v44  ;;  %v1702_v33 = vpop.f32.mrb[93].mxu1  ;;  %v2016_v29 = vsub.s32 2, %v9268_v31 }
 0x327   : > { %v1703_v34 = vadd.f32 %v1702_v33, %v9402_v47  ;;  %v1704_v35 = vpop.f32.mrb[94].mxu1  ;;  %2434 = vmatprep.mubr.bf16.mxu0 %v1962_v30 }
 0x328   : > { %v1705_v36 = vadd.f32 %v1704_v35, %v9399_v44  ;;  %v1706_v37 = vpop.f32.mrb[95].mxu1  ;;  %2435 = vmatmul.mubr.bf16.gmra.mrb[216].mxu0 %v1961_v28  ;;  %v1881_v43 = vmax.f32 %v1701_v32, 0.0  ;;  %v9532_v42 = vrot.slane %v8665_v41, %v2016_v29 }
 0x329   : > { %v1707_v40 = vadd.f32 %v1706_v37, %v9402_v47  ;;  %v1882_v46 = vmax.f32 %v1703_v34, 0.0 }
 0x32a   : > { %v1883_v45 = vmax.f32 %v1705_v36, 0.0 }
 0x32b   : > { %v1884_v48 = vmax.f32 %v1707_v40, 0.0 }
 0x32c   : > { %v1963_v49 = vpack.c.bf16 %v1883_v45, %v1881_v43  ;;  %v8666_v45 = vld [vmem:[#allocation8 + $0x8] sm:$0xff] }
 0x32d   : > { %v1710_v50 = vpop.f32.mrb[96].mxu1  ;;  %v1964_v51 = vpack.c.bf16 %v1884_v48, %v1882_v46  ;;  %v9535_v46 = vrot.slane %v8666_v45, %v2016_v29  ;;  %v8458_v48 = vld [vmem:[#allocation7 + $0x350] ss:$8 sps:$4 sm:$0xff]  }
 0x32e   : > { %v1711_v52 = vadd.f32 %v1710_v50, %v9399_v44  ;;  %v1712_v53 = vpop.f32.mrb[97].mxu1 }
 0x32f   : > { %v1713_v54 = vadd.f32 %v1712_v53, %v9402_v47  ;;  %v1714_v55 = vpop.f32.mrb[98].mxu1  ;;  %2444 = vmatprep.mubr.bf16.mxu0 %v1964_v51 }
 0x330   : > { %v1715_v38 = vadd.f32 %v1714_v55, %v9399_v44  ;;  %v1716_v56 = vpop.f32.mrb[99].mxu1  ;;  %2445 = vmatmul.mubr.bf16.gmra.mrb[220].mxu0 %v1963_v49  ;;  %v1885_v39 = vmax.f32 %v1711_v52, 0.0  ;;  %v8460_v49 = vld [vmem:[#allocation7 + $0x354] ss:$8 sps:$4 sm:$0xff]  }
 0x331   : > { %v1717_v57 = vadd.f32 %v1716_v56, %v9402_v47  ;;  %v1886_v59 = vmax.f32 %v1713_v54, 0.0  ;;  %3684 = vmatprep.subr.bf16.mxu0 %v8460_v49 }
 0x332   : > { %v1887_v58 = vmax.f32 %v1715_v38, 0.0  ;;  %3685 = vmatpush1.bf16.msra.mxu0 %v8458_v48 }
 0x333   : > { %v1888_v60 = vmax.f32 %v1717_v57, 0.0 }
 0x334   : > { %v1965_v61 = vpack.c.bf16 %v1887_v58, %v1885_v39 }
 0x335   : > { %v1720_v62 = vpop.f32.mrb[100].mxu1  ;;  %v1966_v63 = vpack.c.bf16 %v1888_v60, %v1886_v59 }
 0x336   : > { %v1721_v1 = vadd.f32 %v1720_v62, %v9399_v44  ;;  %v1722_v2 = vpop.f32.mrb[101].mxu1 }
 0x337   : > { %v1723_v3 = vadd.f32 %v1722_v2, %v9402_v47  ;;  %v1724_v4 = vpop.f32.mrb[102].mxu1  ;;  %2454 = vmatprep.mubr.bf16.mxu0 %v1966_v63 }
 0x338   : > { %v1725_v5 = vadd.f32 %v1724_v4, %v9399_v44  ;;  %v1726_v6 = vpop.f32.mrb[103].mxu1  ;;  %2455 = vmatmul.mubr.bf16.gmra.mrb[224].mxu0 %v1965_v61  ;;  %v1889_v10 = vmax.f32 %v1721_v1, 0.0 }
 0x339   : > { %v1727_v7 = vadd.f32 %v1726_v6, %v9402_v47  ;;  %v1890_v12 = vmax.f32 %v1723_v3, 0.0 }
 0x33a   : > { %v1891_v11 = vmax.f32 %v1725_v5, 0.0 }
 0x33b   : > { %v1892_v13 = vmax.f32 %v1727_v7, 0.0 }
 0x33c   : > { %v1967_v14 = vpack.c.bf16 %v1891_v11, %v1889_v10 }
 0x33d   : > { %v1730_v15 = vpop.f32.mrb[104].mxu1  ;;  %v1968_v16 = vpack.c.bf16 %v1892_v13, %v1890_v12 }
 0x33e   : > { %v1731_v17 = vadd.f32 %v1730_v15, %v9399_v44  ;;  %v1732_v18 = vpop.f32.mrb[105].mxu1 }
 0x33f   : > { %v1733_v19 = vadd.f32 %v1732_v18, %v9402_v47  ;;  %v1734_v20 = vpop.f32.mrb[106].mxu1  ;;  %2464 = vmatprep.mubr.bf16.mxu0 %v1968_v16  ;;  %v8431_v16 = vld [vmem:[#allocation5 + $0x80] ss:$8 sps:$4 sm:$0xff]  }
 0x340   : > { %v1735_v21 = vadd.f32 %v1734_v20, %v9399_v44  ;;  %v1736_v22 = vpop.f32.mrb[107].mxu1  ;;  %2465 = vmatmul.mubr.bf16.gmra.mrb[228].mxu0 %v1967_v14  ;;  %v1893_v24 = vmax.f32 %v1731_v17, 0.0 }
 0x341   : > { %v1737_v23 = vadd.f32 %v1736_v22, %v9402_v47  ;;  %v1894_v26 = vmax.f32 %v1733_v19, 0.0  ;;  %v8436_v22 = vld [vmem:[#allocation5 + $0x94] ss:$8 sps:$4 sm:$0xff]  }
 0x342   : > { %v1895_v25 = vmax.f32 %v1735_v21, 0.0 }
 0x343   : > { %v1896_v27 = vmax.f32 %v1737_v23, 0.0 }
 0x344   : > { %v1969_v28 = vpack.c.bf16 %v1895_v25, %v1893_v24 }
 0x345   : > { %v1740_v30 = vpop.f32.mrb[108].mxu1  ;;  %v1970_v32 = vpack.c.bf16 %v1896_v27, %v1894_v26 }
 0x346   : > { %v1741_v33 = vadd.f32 %v1740_v30, %v9399_v44  ;;  %v1742_v34 = vpop.f32.mrb[109].mxu1 }
 0x347   : > { %v1743_v35 = vadd.f32 %v1742_v34, %v9402_v47  ;;  %v1744_v36 = vpop.f32.mrb[110].mxu1  ;;  %2474 = vmatprep.mubr.bf16.mxu0 %v1970_v32 }
 0x348   : > { %v1745_v37 = vadd.f32 %v1744_v36, %v9399_v44  ;;  %v1746_v40 = vpop.f32.mrb[111].mxu1  ;;  %2475 = vmatmul.mubr.bf16.gmra.mrb[232].mxu0 %v1969_v28  ;;  %v1897_v50 = vmax.f32 %v1741_v33, 0.0 }
 0x349   : > { %v1747_v43 = vadd.f32 %v1746_v40, %v9402_v47  ;;  %v1898_v53 = vmax.f32 %v1743_v35, 0.0  ;;  %v8434_v35 = vld [vmem:[#allocation5 + $0x90] ss:$8 sps:$4 sm:$0xff]  }
 0x34a   : > { %v1899_v51 = vmax.f32 %v1745_v37, 0.0 }
 0x34b   : > { %v2216_v52 = vpop.f32.mrb[128].mxu0  ;;  %v1900_v54 = vmax.f32 %v1747_v43, 0.0  ;;  %v8445_v43 = vld [vmem:[#allocation5 + $0xa4] ss:$8 sps:$4 sm:$0xff]  }
 0x34c   : > { %v2217_v55 = vadd.f32 %v2216_v52, %v9532_v42  ;;  %v2218_v38 = vpop.f32.mrb[129].mxu0  ;;  %v1971_v56 = vpack.c.bf16 %v1899_v51, %v1897_v50  ;;  %v8464_v50 = vld [vmem:[#allocation7 + $0x360] ss:$8 sps:$4 sm:$0xff]  }
 0x34d   : > { %v2219_v57 = vadd.f32 %v2218_v38, %v9535_v46  ;;  %v1750_v39 = vpop.f32.mrb[112].mxu1  ;;  %v2220_v58 = vpop.f32.mrb[130].mxu0  ;;  %v1972_v59 = vpack.c.bf16 %v1900_v54, %v1898_v53  ;;  %v8466_v54 = vld [vmem:[#allocation7 + $0x364] ss:$8 sps:$4 sm:$0xff]  }
 0x34e   : > { %v1751_v60 = vadd.f32 %v1750_v39, %v9399_v44  ;;  %v2221_v61 = vadd.f32 %v2220_v58, %v9532_v42  ;;  %v1752_v62 = vpop.f32.mrb[113].mxu1  ;;  %v2222_v63 = vpop.f32.mrb[131].mxu0  ;;  %v2535_v4 = vmax.f32 %v2217_v55, 0.0  ;;  %v8443_v39 = vld [vmem:[#allocation5 + $0xa0] ss:$8 sps:$4 sm:$0xff]   ;;  %3686 = vmatprep.subr.bf16.mxu0 %v8466_v54 }
 0x34f   : > { %v1753_v1 = vadd.f32 %v1752_v62, %v9402_v47  ;;  %v2223_v2 = vadd.f32 %v2222_v63, %v9535_v46  ;;  %v1754_v3 = vpop.f32.mrb[114].mxu1  ;;  %2484 = vmatprep.mubr.bf16.mxu0 %v1972_v59  ;;  %v2536_v8 = vmax.f32 %v2219_v57, 0.0  ;;  %3687 = vmatpush1.bf16.msra.mxu0 %v8464_v50 }
 0x350   : > { %v2537_v5 = vmax.f32 %v2221_v61, 0.0  ;;  %v1755_v6 = vadd.f32 %v1754_v3, %v9399_v44  ;;  %v1756_v7 = vpop.f32.mrb[115].mxu1  ;;  %2485 = vmatmul.mubr.bf16.gmra.mrb[236].mxu0 %v1971_v56  ;;  %v1901_v12 = vmax.f32 %v1751_v60, 0.0  ;;  %v8454_v61 = vld [vmem:[#allocation5 + $0xb4] ss:$8 sps:$4 sm:$0xff]  }
 0x351   : > { %v2538_v9 = vmax.f32 %v2223_v2, 0.0  ;;  %v1757_v10 = vadd.f32 %v1756_v7, %v9402_v47  ;;  %v1902_v17 = vmax.f32 %v1753_v1, 0.0 }
 0x352   : > { %v2663_v11 = vpack.c.bf16 %v2537_v5, %v2535_v4  ;;  %v1903_v13 = vmax.f32 %v1755_v6, 0.0 }
 0x353   : > { %v2226_v14 = vpop.f32.mrb[132].mxu0  ;;  %v2664_v15 = vpack.c.bf16 %v2538_v9, %v2536_v8  ;;  %v1904_v18 = vmax.f32 %v1757_v10, 0.0  ;;  %v8452_v10 = vld [vmem:[#allocation5 + $0xb0] ss:$8 sps:$4 sm:$0xff]  }
 0x354   : > { %v2227_v19 = vadd.f32 %v2226_v14, %v9532_v42  ;;  %v2228_v20 = vpop.f32.mrb[133].mxu0  ;;  %v1973_v21 = vpack.c.bf16 %v1903_v13, %v1901_v12 }
 0x355   : > { %v2229_v23 = vadd.f32 %v2228_v20, %v9535_v46  ;;  %v1760_v24 = vpop.f32.mrb[116].mxu1  ;;  %v2230_v25 = vpop.f32.mrb[134].mxu0  ;;  %2960 = vmatprep.mubr.bf16.mxu1 %v2664_v15  ;;  %v1974_v26 = vpack.c.bf16 %v1904_v18, %v1902_v17  ;;  %v8463_v15 = vld [vmem:[#allocation5 + $0xc4] ss:$8 sps:$4 sm:$0xff]  }
 0x356   : > { %v1761_v27 = vadd.f32 %v1760_v24, %v9399_v44  ;;  %v2231_v28 = vadd.f32 %v2230_v25, %v9532_v42  ;;  %v1762_v29 = vpop.f32.mrb[117].mxu1  ;;  %v2232_v30 = vpop.f32.mrb[135].mxu0  ;;  %2961 = vmatmul.mubr.bf16.vlgmr.msra.gmra.mrb[128].mxu1 %v2663_v11  ;;  %v2539_v36 = vmax.f32 %v2227_v19, 0.0 }
 0x357   : > { %v1763_v32 = vadd.f32 %v1762_v29, %v9402_v47  ;;  %v2233_v33 = vadd.f32 %v2232_v30, %v9535_v46  ;;  %4350 = vmatpush1.bf16.msra.mxu1 %v8431_v16  ;;  %v1764_v34 = vpop.f32.mrb[118].mxu1  ;;  %2494 = vmatprep.mubr.bf16.mxu0 %v1974_v26  ;;  %v2540_v45 = vmax.f32 %v2229_v23, 0.0  ;;  %v8461_v26 = vld [vmem:[#allocation5 + $0xc0] ss:$8 sps:$4 sm:$0xff]  }
 0x358   : > { %v2541_v37 = vmax.f32 %v2231_v28, 0.0  ;;  %v1765_v40 = vadd.f32 %v1764_v34, %v9399_v44  ;;  %v1766_v41 = vpop.f32.mrb[119].mxu1  ;;  %2495 = vmatmul.mubr.bf16.gmra.mrb[240].mxu0 %v1973_v21  ;;  %4351 = vmatprep.subr.bf16.mxu1 %v8436_v22  ;;  %v1905_v52 = vmax.f32 %v1761_v27, 0.0 }
 0x359   : > { %v2542_v48 = vmax.f32 %v2233_v33, 0.0  ;;  %v1767_v49 = vadd.f32 %v1766_v41, %v9402_v47  ;;  %v1906_v56 = vmax.f32 %v1763_v32, 0.0 }
 0x35a   : > { %v2665_v51 = vpack.c.bf16 %v2541_v37, %v2539_v36  ;;  %v1907_v53 = vmax.f32 %v1765_v40, 0.0 }
 0x35b   : > { %v2236_v55 = vpop.f32.mrb[136].mxu0  ;;  %v2666_v38 = vpack.c.bf16 %v2542_v48, %v2540_v45  ;;  %v1908_v57 = vmax.f32 %v1767_v49, 0.0  ;;  %4352 = vmatpush1.bf16.msra.mxu1 %v8434_v35 }
 0x35c   : > { %v2237_v58 = vadd.f32 %v2236_v55, %v9532_v42  ;;  %v2238_v59 = vpop.f32.mrb[137].mxu0  ;;  %v1975_v60 = vpack.c.bf16 %v1907_v53, %v1905_v52  ;;  %4353 = vmatprep.subr.bf16.mxu1 %v8445_v43  ;;  %v8467_v55 = vld [vmem:[#allocation7 + $0x370] ss:$8 sps:$4 sm:$0xff]  }
 0x35d   : > { %v2239_v62 = vadd.f32 %v2238_v59, %v9535_v46  ;;  %v1770_v63 = vpop.f32.mrb[120].mxu1  ;;  %v2240_v1 = vpop.f32.mrb[138].mxu0  ;;  %2970 = vmatprep.mubr.bf16.mxu1 %v2666_v38  ;;  %v1976_v2 = vpack.c.bf16 %v1908_v57, %v1906_v56  ;;  %v8469_v38 = vld [vmem:[#allocation7 + $0x374] ss:$8 sps:$4 sm:$0xff]  }
 0x35e   : > { %v1771_v3 = vadd.f32 %v1770_v63, %v9399_v44  ;;  %v2241_v4 = vadd.f32 %v2240_v1, %v9532_v42  ;;  %v1772_v5 = vpop.f32.mrb[121].mxu1  ;;  %v2242_v6 = vpop.f32.mrb[139].mxu0  ;;  %2971 = vmatmul.mubr.bf16.gmra.mrb[132].mxu1 %v2665_v51  ;;  %v2543_v11 = vmax.f32 %v2237_v58, 0.0  ;;  %3688 = vmatprep.subr.bf16.mxu0 %v8469_v38 }
 0x35f   : > { %v1773_v7 = vadd.f32 %v1772_v5, %v9402_v47  ;;  %v2243_v8 = vadd.f32 %v2242_v6, %v9535_v46  ;;  %v1774_v9 = vpop.f32.mrb[122].mxu1  ;;  %2504 = vmatprep.mubr.bf16.mxu0 %v1976_v2  ;;  %4354 = vmatpush1.bf16.msra.mxu1 %v8443_v39  ;;  %v2544_v16 = vmax.f32 %v2239_v62, 0.0 }
 0x360   : > { %v2545_v12 = vmax.f32 %v2241_v4, 0.0  ;;  %v1775_v13 = vadd.f32 %v1774_v9, %v9399_v44  ;;  %v1776_v14 = vpop.f32.mrb[123].mxu1  ;;  %2505 = vmatmul.mubr.bf16.gmra.mrb[244].mxu0 %v1975_v60  ;;  %4355 = vmatprep.subr.bf16.mxu1 %v8454_v61  ;;  %v1909_v20 = vmax.f32 %v1771_v3, 0.0 }
 0x361   : > { %v2546_v17 = vmax.f32 %v2243_v8, 0.0  ;;  %v1777_v18 = vadd.f32 %v1776_v14, %v9402_v47  ;;  %v1910_v24 = vmax.f32 %v1773_v7, 0.0  ;;  %3689 = vmatpush1.bf16.msra.mxu0 %v8467_v55 }
 0x362   : > { %v2667_v19 = vpack.c.bf16 %v2545_v12, %v2543_v11  ;;  %v1911_v21 = vmax.f32 %v1775_v13, 0.0 }
 0x363   : > { %v2246_v22 = vpop.f32.mrb[140].mxu0  ;;  %v2668_v23 = vpack.c.bf16 %v2546_v17, %v2544_v16  ;;  %v1912_v25 = vmax.f32 %v1777_v18, 0.0  ;;  %4356 = vmatpush1.bf16.msra.mxu1 %v8452_v10 }
 0x364   : > { %v2247_v27 = vadd.f32 %v2246_v22, %v9532_v42  ;;  %v2248_v28 = vpop.f32.mrb[141].mxu0  ;;  %v1977_v29 = vpack.c.bf16 %v1911_v21, %v1909_v20  ;;  %4357 = vmatprep.subr.bf16.mxu1 %v8463_v15  ;;  %v8470_v22 = vld [vmem:[#allocation5 + $0xd0] ss:$8 sps:$4 sm:$0xff]  }
 0x365   : > { %v2249_v30 = vadd.f32 %v2248_v28, %v9535_v46  ;;  %v1780_v32 = vpop.f32.mrb[124].mxu1  ;;  %v2250_v33 = vpop.f32.mrb[142].mxu0  ;;  %2980 = vmatprep.mubr.bf16.mxu1 %v2668_v23  ;;  %v1978_v34 = vpack.c.bf16 %v1912_v25, %v1910_v24  ;;  %v8472_v23 = vld [vmem:[#allocation5 + $0xd4] ss:$8 sps:$4 sm:$0xff]  }
 0x366   : > { %v1781_v35 = vadd.f32 %v1780_v32, %v9399_v44  ;;  %v2251_v36 = vadd.f32 %v2250_v33, %v9532_v42  ;;  %v1782_v37 = vpop.f32.mrb[125].mxu1  ;;  %v2252_v40 = vpop.f32.mrb[143].mxu0  ;;  %2981 = vmatmul.mubr.bf16.gmra.mrb[136].mxu1 %v2667_v19  ;;  %v2547_v48 = vmax.f32 %v2247_v27, 0.0  ;;  %v8475_v27 = vld [vmem:[#allocation7 + $0x384] ss:$8 sps:$4 sm:$0xff]  }
 0x367   : > { %v1783_v41 = vadd.f32 %v1782_v37, %v9402_v47  ;;  %v2253_v43 = vadd.f32 %v2252_v40, %v9535_v46  ;;  %v1784_v45 = vpop.f32.mrb[126].mxu1  ;;  %2514 = vmatprep.mubr.bf16.mxu0 %v1978_v34  ;;  %4358 = vmatpush1.bf16.msra.mxu1 %v8461_v26  ;;  %v2548_v52 = vmax.f32 %v2249_v30, 0.0  ;;  %v8473_v26 = vld [vmem:[#allocation7 + $0x380] ss:$8 sps:$4 sm:$0xff]  }
 0x368   : > { %v2549_v49 = vmax.f32 %v2251_v36, 0.0  ;;  %v1785_v50 = vadd.f32 %v1784_v45, %v9399_v44  ;;  %v1786_v51 = vpop.f32.mrb[127].mxu1  ;;  %2515 = vmatmul.mubr.bf16.gmra.mrb[248].mxu0 %v1977_v29  ;;  %v1913_v57 = vmax.f32 %v1781_v35, 0.0  ;;  %4359 = vmatprep.subr.bf16.mxu1 %v8472_v23 }
 0x369   : > { %v2550_v53 = vmax.f32 %v2253_v43, 0.0  ;;  %v1787_v54 = vadd.f32 %v1786_v51, %v9402_v47  ;;  %v1914_v60 = vmax.f32 %v1783_v41, 0.0  ;;  %3690 = vmatprep.subr.bf16.mxu0 %v8475_v27 }
 0x36a   : > { %v2669_v56 = vpack.c.bf16 %v2549_v49, %v2547_v48  ;;  %v1915_v39 = vmax.f32 %v1785_v50, 0.0  ;;  %3691 = vmatpush1.bf16.msra.mxu0 %v8473_v26 }
 0x36b   : > { %v2256_v58 = vpop.f32.mrb[144].mxu0  ;;  %v2670_v59 = vpack.c.bf16 %v2550_v53, %v2548_v52  ;;  %v1916_v61 = vmax.f32 %v1787_v54, 0.0  ;;  %4360 = vmatpush1.bf16.msra.mxu1 %v8470_v22 }
 0x36c   : > { %v2257_v62 = vadd.f32 %v2256_v58, %v9532_v42  ;;  %v2258_v63 = vpop.f32.mrb[145].mxu0  ;;  %v1979_v44 = vpack.c.bf16 %v1915_v39, %v1913_v57 }
 0x36d   : > { %v2259_v1 = vadd.f32 %v2258_v63, %v9535_v46  ;;  %v2260_v2 = vpop.f32.mrb[146].mxu0  ;;  %2990 = vmatprep.mubr.bf16.mxu1 %v2670_v59  ;;  %v1980_v47 = vpack.c.bf16 %v1916_v61, %v1914_v60  ;;  %v8476_v61 = vld [vmem:[#allocation7 + $0x390] ss:$8 sps:$4 sm:$0xff]  }
 0x36e   : > { %v2261_v3 = vadd.f32 %v2260_v2, %v9532_v42  ;;  %v2262_v4 = vpop.f32.mrb[147].mxu0  ;;  %2991 = vmatmul.mubr.bf16.gmra.mrb[140].mxu1 %v2669_v56  ;;  %v2551_v6 = vmax.f32 %v2257_v62, 0.0  ;;  %v8478_v62 = vld [vmem:[#allocation7 + $0x394] ss:$8 sps:$4 sm:$0xff]  }
 0x36f   : > { %v2263_v5 = vadd.f32 %v2262_v4, %v9535_v46  ;;  %2524 = vmatprep.mubr.bf16.mxu0 %v1980_v47  ;;  %v2552_v8 = vmax.f32 %v2259_v1, 0.0  ;;  %3692 = vmatprep.subr.bf16.mxu0 %v8478_v62  ;;  %v8493_v62 = vld [vmem:[#allocation7 + $0x3d4] ss:$8 sps:$4 sm:$0xff]  }
 0x370   : > { %v2553_v7 = vmax.f32 %v2261_v3, 0.0  ;;  %2525 = vmatmul.mubr.bf16.gmra.mrb[252].mxu0 %v1979_v44 }
 0x371   : > { %v2554_v9 = vmax.f32 %v2263_v5, 0.0  ;;  %3693 = vmatpush1.bf16.msra.mxu0 %v8476_v61 }
 0x372   : > { %v2671_v10 = vpack.c.bf16 %v2553_v7, %v2551_v6 }
 0x373   : > { %v2266_v11 = vpop.f32.mrb[148].mxu0  ;;  %v2672_v12 = vpack.c.bf16 %v2554_v9, %v2552_v8 }
 0x374   : > { %v2267_v13 = vadd.f32 %v2266_v11, %v9532_v42  ;;  %v2268_v14 = vpop.f32.mrb[149].mxu0 }
 0x375   : > { %v2269_v15 = vadd.f32 %v2268_v14, %v9535_v46  ;;  %v2270_v16 = vpop.f32.mrb[150].mxu0  ;;  %3000 = vmatprep.mubr.bf16.mxu1 %v2672_v12 }
 0x376   : > { %v2271_v17 = vadd.f32 %v2270_v16, %v9532_v42  ;;  %v2272_v18 = vpop.f32.mrb[151].mxu0  ;;  %3001 = vmatmul.mubr.bf16.gmra.mrb[144].mxu1 %v2671_v10  ;;  %v2555_v20 = vmax.f32 %v2267_v13, 0.0 }
 0x377   : > { %v2273_v19 = vadd.f32 %v2272_v18, %v9535_v46  ;;  %v2556_v24 = vmax.f32 %v2269_v15, 0.0 }
 0x378   : > { %v2557_v21 = vmax.f32 %v2271_v17, 0.0 }
 0x379   : > { %v2558_v25 = vmax.f32 %v2273_v19, 0.0 }
 0x37a   : > { %v2673_v28 = vpack.c.bf16 %v2557_v21, %v2555_v20 }
 0x37b   : > { %v2276_v29 = vpop.f32.mrb[152].mxu0  ;;  %v2674_v30 = vpack.c.bf16 %v2558_v25, %v2556_v24  ;;  %v8479_v24 = vld [vmem:[#allocation5 + $0xe0] ss:$8 sps:$4 sm:$0xff]   ;;  %v8481_v25 = vld [vmem:[#allocation5 + $0xe4] ss:$8 sps:$4 sm:$0xff]  }
 0x37c   : > { %v2277_v32 = vadd.f32 %v2276_v29, %v9532_v42  ;;  %v2278_v33 = vpop.f32.mrb[153].mxu0  ;;  %v8484_v29 = vld [vmem:[#allocation7 + $0x3a4] ss:$8 sps:$4 sm:$0xff]   ;;  %4361 = vmatprep.subr.bf16.mxu1 %v8481_v25 }
 0x37d   : > { %v2279_v34 = vadd.f32 %v2278_v33, %v9535_v46  ;;  %v2280_v35 = vpop.f32.mrb[154].mxu0  ;;  %3010 = vmatprep.mubr.bf16.mxu1 %v2674_v30  ;;  %4362 = vmatpush1.bf16.msra.mxu1 %v8479_v24 }
 0x37e   : > { %v2281_v36 = vadd.f32 %v2280_v35, %v9532_v42  ;;  %v2282_v37 = vpop.f32.mrb[155].mxu0  ;;  %3011 = vmatmul.mubr.bf16.gmra.mrb[148].mxu1 %v2673_v28  ;;  %v2559_v41 = vmax.f32 %v2277_v32, 0.0  ;;  %v8482_v28 = vld [vmem:[#allocation7 + $0x3a0] ss:$8 sps:$4 sm:$0xff]   ;;  %3694 = vmatprep.subr.bf16.mxu0 %v8484_v29 }
 0x37f   : > { %v2283_v40 = vadd.f32 %v2282_v37, %v9535_v46  ;;  %v2560_v45 = vmax.f32 %v2279_v34, 0.0  ;;  %3695 = vmatpush1.bf16.msra.mxu0 %v8482_v28 }
 0x380   : > { %v2561_v43 = vmax.f32 %v2281_v36, 0.0 }
 0x381   : > { %v2562_v48 = vmax.f32 %v2283_v40, 0.0 }
 0x382   : > { %v2675_v49 = vpack.c.bf16 %v2561_v43, %v2559_v41  ;;  %v8487_v43 = vld [vmem:[#allocation7 + $0x3b4] ss:$8 sps:$4 sm:$0xff]  }
 0x383   : > { %v2286_v50 = vpop.f32.mrb[156].mxu0  ;;  %v2676_v51 = vpack.c.bf16 %v2562_v48, %v2560_v45  ;;  %v8485_v48 = vld [vmem:[#allocation7 + $0x3b0] ss:$8 sps:$4 sm:$0xff]   ;;  %3696 = vmatprep.subr.bf16.mxu0 %v8487_v43 }
 0x384   : > { %v2287_v52 = vadd.f32 %v2286_v50, %v9532_v42  ;;  %v2288_v53 = vpop.f32.mrb[157].mxu0  ;;  %3697 = vmatpush1.bf16.msra.mxu0 %v8485_v48 }
 0x385   : > { %v2289_v54 = vadd.f32 %v2288_v53, %v9535_v46  ;;  %v2290_v55 = vpop.f32.mrb[158].mxu0  ;;  %3020 = vmatprep.mubr.bf16.mxu1 %v2676_v51 }
 0x386   : > { %v2291_v38 = vadd.f32 %v2290_v55, %v9532_v42  ;;  %v2292_v56 = vpop.f32.mrb[159].mxu0  ;;  %3021 = vmatmul.mubr.bf16.gmra.mrb[152].mxu1 %v2675_v49  ;;  %v2563_v39 = vmax.f32 %v2287_v52, 0.0 }
 0x387   : > { %v2293_v57 = vadd.f32 %v2292_v56, %v9535_v46  ;;  %v2564_v59 = vmax.f32 %v2289_v54, 0.0  ;;  %v8490_v54 = vld [vmem:[#allocation7 + $0x3c4] ss:$8 sps:$4 sm:$0xff]   ;;  %v8488_v56 = vld [vmem:[#allocation7 + $0x3c0] ss:$8 sps:$4 sm:$0xff]  }
 0x388   : > { %v2565_v58 = vmax.f32 %v2291_v38, 0.0  ;;  %3698 = vmatprep.subr.bf16.mxu0 %v8490_v54 }
 0x389   : > { %v2566_v60 = vmax.f32 %v2293_v57, 0.0  ;;  %3699 = vmatpush1.bf16.msra.mxu0 %v8488_v56 }
 0x38a   : > { %v2677_v63 = vpack.c.bf16 %v2565_v58, %v2563_v39  ;;  %3700 = vmatprep.subr.bf16.mxu0 %v8493_v62 }
 0x38b   : > { %v2296_v44 = vpop.f32.mrb[160].mxu0  ;;  %v2678_v1 = vpack.c.bf16 %v2566_v60, %v2564_v59 }
 0x38c   : > { %v2297_v2 = vadd.f32 %v2296_v44, %v9532_v42  ;;  %v2298_v47 = vpop.f32.mrb[161].mxu0  ;;  %v8491_v44 = vld [vmem:[#allocation7 + $0x3d0] ss:$8 sps:$4 sm:$0xff]  }
 0x38d   : > { %v2299_v3 = vadd.f32 %v2298_v47, %v9535_v46  ;;  %v2300_v4 = vpop.f32.mrb[162].mxu0  ;;  %3030 = vmatprep.mubr.bf16.mxu1 %v2678_v1  ;;  %3701 = vmatpush1.bf16.msra.mxu0 %v8491_v44 }
 0x38e   : > { %v2301_v5 = vadd.f32 %v2300_v4, %v9532_v42  ;;  %v2302_v6 = vpop.f32.mrb[163].mxu0  ;;  %3031 = vmatmul.mubr.bf16.gmra.mrb[156].mxu1 %v2677_v63  ;;  %v2567_v8 = vmax.f32 %v2297_v2, 0.0 }
 0x38f   : > { %v2303_v7 = vadd.f32 %v2302_v6, %v9535_v46  ;;  %v2568_v10 = vmax.f32 %v2299_v3, 0.0 }
 0x390   : > { %v2569_v9 = vmax.f32 %v2301_v5, 0.0  ;;  %v8496_v5 = vld [vmem:[#allocation7 + $0x3e4] ss:$8 sps:$4 sm:$0xff]  }
 0x391   : > { %v2570_v11 = vmax.f32 %v2303_v7, 0.0  ;;  %3702 = vmatprep.subr.bf16.mxu0 %v8496_v5 }
 0x392   : > { %v2679_v12 = vpack.c.bf16 %v2569_v9, %v2567_v8  ;;  %v8494_v8 = vld [vmem:[#allocation7 + $0x3e0] ss:$8 sps:$4 sm:$0xff]  }
 0x393   : > { %v2306_v13 = vpop.f32.mrb[164].mxu0  ;;  %v2680_v14 = vpack.c.bf16 %v2570_v11, %v2568_v10  ;;  %3703 = vmatpush1.bf16.msra.mxu0 %v8494_v8 }
 0x394   : > { %v2307_v15 = vadd.f32 %v2306_v13, %v9532_v42  ;;  %v2308_v16 = vpop.f32.mrb[165].mxu0 }
 0x395   : > { %v2309_v17 = vadd.f32 %v2308_v16, %v9535_v46  ;;  %v2310_v18 = vpop.f32.mrb[166].mxu0  ;;  %3040 = vmatprep.mubr.bf16.mxu1 %v2680_v14 }
 0x396   : > { %v2311_v19 = vadd.f32 %v2310_v18, %v9532_v42  ;;  %v2312_v20 = vpop.f32.mrb[167].mxu0  ;;  %3041 = vmatmul.mubr.bf16.gmra.mrb[160].mxu1 %v2679_v12  ;;  %v2571_v22 = vmax.f32 %v2307_v15, 0.0  ;;  %v8499_v15 = vld [vmem:[#allocation7 + $0x3f4] ss:$8 sps:$4 sm:$0xff]  }
 0x397   : > { %v2313_v21 = vadd.f32 %v2312_v20, %v9535_v46  ;;  %v2572_v26 = vmax.f32 %v2309_v17, 0.0  ;;  %v8497_v17 = vld [vmem:[#allocation7 + $0x3f0] ss:$8 sps:$4 sm:$0xff]   ;;  %3704 = vmatprep.subr.bf16.mxu0 %v8499_v15 }
 0x398   : > { %v2573_v23 = vmax.f32 %v2311_v19, 0.0  ;;  %3705 = vmatpush1.bf16.msra.mxu0 %v8497_v17 }
 0x399   : > { %v2574_v27 = vmax.f32 %v2313_v21, 0.0 }
 0x39a   : > { %v2681_v30 = vpack.c.bf16 %v2573_v23, %v2571_v22 }
 0x39b   : > { %v2316_v32 = vpop.f32.mrb[168].mxu0  ;;  %v2682_v33 = vpack.c.bf16 %v2574_v27, %v2572_v26 }
 0x39c   : > { %v2317_v34 = vadd.f32 %v2316_v32, %v9532_v42  ;;  %v2318_v35 = vpop.f32.mrb[169].mxu0 }
 0x39d   : > { %v2319_v36 = vadd.f32 %v2318_v35, %v9535_v46  ;;  %v2320_v37 = vpop.f32.mrb[170].mxu0  ;;  %3050 = vmatprep.mubr.bf16.mxu1 %v2682_v33  ;;  %v8500_v35 = vld [vmem:[#allocation5 + $0xf0] ss:$8 sps:$4 sm:$0xff]  }
 0x39e   : > { %v2321_v40 = vadd.f32 %v2320_v37, %v9532_v42  ;;  %v2322_v41 = vpop.f32.mrb[171].mxu0  ;;  %3051 = vmatmul.mubr.bf16.gmra.mrb[164].mxu1 %v2681_v30  ;;  %v2575_v49 = vmax.f32 %v2317_v34, 0.0 }
 0x39f   : > { %v2323_v45 = vadd.f32 %v2322_v41, %v9535_v46  ;;  %v2576_v51 = vmax.f32 %v2319_v36, 0.0  ;;  %v8502_v36 = vld [vmem:[#allocation5 + $0xf4] ss:$8 sps:$4 sm:$0xff]  }
 0x3a0   : > { %v2577_v50 = vmax.f32 %v2321_v40, 0.0  ;;  %4363 = vmatprep.subr.bf16.mxu1 %v8502_v36 }
 0x3a1   : > { %v2578_v52 = vmax.f32 %v2323_v45, 0.0  ;;  %4364 = vmatpush1.bf16.msra.mxu1 %v8500_v35 }
 0x3a2   : > { %v2683_v53 = vpack.c.bf16 %v2577_v50, %v2575_v49 }
 0x3a3   : > { %v2326_v55 = vpop.f32.mrb[172].mxu0  ;;  %v2684_v38 = vpack.c.bf16 %v2578_v52, %v2576_v51 }
 0x3a4   : > { %v2327_v57 = vadd.f32 %v2326_v55, %v9532_v42  ;;  %v2328_v39 = vpop.f32.mrb[173].mxu0 }
 0x3a5   : > { %v2329_v58 = vadd.f32 %v2328_v39, %v9535_v46  ;;  %v2330_v59 = vpop.f32.mrb[174].mxu0  ;;  %3060 = vmatprep.mubr.bf16.mxu1 %v2684_v38 }
 0x3a6   : > { %v2331_v60 = vadd.f32 %v2330_v59, %v9532_v42  ;;  %v2332_v61 = vpop.f32.mrb[175].mxu0  ;;  %3061 = vmatmul.mubr.bf16.gmra.mrb[168].mxu1 %v2683_v53  ;;  %v2579_v1 = vmax.f32 %v2327_v57, 0.0 }
 0x3a7   : > { %v2333_v63 = vadd.f32 %v2332_v61, %v9535_v46  ;;  %v2580_v47 = vmax.f32 %v2329_v58, 0.0 }
 0x3a8   : > { %v2581_v2 = vmax.f32 %v2331_v60, 0.0 }
 0x3a9   : > { %v2582_v3 = vmax.f32 %v2333_v63, 0.0 }
 0x3aa   : > { %v2685_v4 = vpack.c.bf16 %v2581_v2, %v2579_v1 }
 0x3ab   : > { %v2336_v6 = vpop.f32.mrb[176].mxu0  ;;  %v2686_v7 = vpack.c.bf16 %v2582_v3, %v2580_v47 }
 0x3ac   : > { %v2337_v9 = vadd.f32 %v2336_v6, %v9532_v42  ;;  %v2338_v10 = vpop.f32.mrb[177].mxu0 }
 0x3ad   : > { %v2339_v11 = vadd.f32 %v2338_v10, %v9535_v46  ;;  %v2340_v12 = vpop.f32.mrb[178].mxu0  ;;  %3070 = vmatprep.mubr.bf16.mxu1 %v2686_v7 }
 0x3ae   : > { %v2341_v13 = vadd.f32 %v2340_v12, %v9532_v42  ;;  %v2342_v14 = vpop.f32.mrb[179].mxu0  ;;  %3071 = vmatmul.mubr.bf16.gmra.mrb[172].mxu1 %v2685_v4  ;;  %v2583_v18 = vmax.f32 %v2337_v9, 0.0 }
 0x3af   : > { %v2343_v16 = vadd.f32 %v2342_v14, %v9535_v46  ;;  %v2584_v20 = vmax.f32 %v2339_v11, 0.0 }
 0x3b0   : > { %v2585_v19 = vmax.f32 %v2341_v13, 0.0 }
 0x3b1   : > { %v2586_v21 = vmax.f32 %v2343_v16, 0.0 }
 0x3b2   : > { %v2687_v22 = vpack.c.bf16 %v2585_v19, %v2583_v18 }
 0x3b3   : > { %v2346_v23 = vpop.f32.mrb[180].mxu0  ;;  %v2688_v24 = vpack.c.bf16 %v2586_v21, %v2584_v20 }
 0x3b4   : > { %v2347_v25 = vadd.f32 %v2346_v23, %v9532_v42  ;;  %v2348_v26 = vpop.f32.mrb[181].mxu0 }
 0x3b5   : > { %v2349_v27 = vadd.f32 %v2348_v26, %v9535_v46  ;;  %v2350_v28 = vpop.f32.mrb[182].mxu0  ;;  %3080 = vmatprep.mubr.bf16.mxu1 %v2688_v24 }
 0x3b6   : > { %v2351_v29 = vadd.f32 %v2350_v28, %v9532_v42  ;;  %v2352_v30 = vpop.f32.mrb[183].mxu0  ;;  %3081 = vmatmul.mubr.bf16.gmra.mrb[176].mxu1 %v2687_v22  ;;  %v2587_v33 = vmax.f32 %v2347_v25, 0.0 }
 0x3b7   : > { %v2353_v32 = vadd.f32 %v2352_v30, %v9535_v46  ;;  %v2588_v37 = vmax.f32 %v2349_v27, 0.0 }
 0x3b8   : > { %v2589_v34 = vmax.f32 %v2351_v29, 0.0 }
 0x3b9   : > { %v2590_v40 = vmax.f32 %v2353_v32, 0.0 }
 0x3ba   : > { %v2689_v41 = vpack.c.bf16 %v2589_v34, %v2587_v33  ;;  %v8505_v33 = vld [vmem:[#allocation7 + $0x404] ss:$8 sps:$4 sm:$0xff]  }
 0x3bb   : > { %v2356_v43 = vpop.f32.mrb[184].mxu0  ;;  %v2690_v45 = vpack.c.bf16 %v2590_v40, %v2588_v37  ;;  %4862 = vmatprep.subr.bf16.mxu1 %v8505_v33 }
 0x3bc   : > { %v2357_v48 = vadd.f32 %v2356_v43, %v9532_v42  ;;  %v2358_v49 = vpop.f32.mrb[185].mxu0 }
 0x3bd   : > { %v2359_v50 = vadd.f32 %v2358_v49, %v9535_v46  ;;  %v2360_v51 = vpop.f32.mrb[186].mxu0  ;;  %3090 = vmatprep.mubr.bf16.mxu1 %v2690_v45 }
 0x3be   : > { %v2361_v52 = vadd.f32 %v2360_v51, %v9532_v42  ;;  %v2362_v53 = vpop.f32.mrb[187].mxu0  ;;  %3091 = vmatmul.mubr.bf16.gmra.mrb[180].mxu1 %v2689_v41  ;;  %v2591_v55 = vmax.f32 %v2357_v48, 0.0 }
 0x3bf   : > { %v2363_v54 = vadd.f32 %v2362_v53, %v9535_v46  ;;  %v2592_v56 = vmax.f32 %v2359_v50, 0.0 }
 0x3c0   : > { %v2593_v38 = vmax.f32 %v2361_v52, 0.0 }
 0x3c1   : > { %v2594_v57 = vmax.f32 %v2363_v54, 0.0 }
 0x3c2   : > { %v2691_v39 = vpack.c.bf16 %v2593_v38, %v2591_v55 }
 0x3c3   : > { %v2366_v58 = vpop.f32.mrb[188].mxu0  ;;  %v2692_v59 = vpack.c.bf16 %v2594_v57, %v2592_v56 }
 0x3c4   : > { %v2367_v60 = vadd.f32 %v2366_v58, %v9532_v42  ;;  %v2368_v61 = vpop.f32.mrb[189].mxu0 }
 0x3c5   : > { %v2369_v62 = vadd.f32 %v2368_v61, %v9535_v46  ;;  %v2370_v63 = vpop.f32.mrb[190].mxu0  ;;  %3100 = vmatprep.mubr.bf16.mxu1 %v2692_v59 }
 0x3c6   : > { %v2371_v44 = vadd.f32 %v2370_v63, %v9532_v42  ;;  %v2372_v1 = vpop.f32.mrb[191].mxu0  ;;  %3101 = vmatmul.mubr.bf16.gmra.mrb[184].mxu1 %v2691_v39  ;;  %v2595_v47 = vmax.f32 %v2367_v60, 0.0 }
 0x3c7   : > { %v2373_v2 = vadd.f32 %v2372_v1, %v9535_v46  ;;  %v2596_v4 = vmax.f32 %v2369_v62, 0.0 }
 0x3c8   : > { %v2597_v3 = vmax.f32 %v2371_v44, 0.0 }
 0x3c9   : > { %v2598_v5 = vmax.f32 %v2373_v2, 0.0 }
 0x3ca   : > { %v2693_v6 = vpack.c.bf16 %v2597_v3, %v2595_v47 }
 0x3cb   : > { %v2376_v7 = vpop.f32.mrb[192].mxu0  ;;  %v2694_v8 = vpack.c.bf16 %v2598_v5, %v2596_v4 }
 0x3cc   : > { %v2377_v9 = vadd.f32 %v2376_v7, %v9532_v42  ;;  %v2378_v10 = vpop.f32.mrb[193].mxu0 }
 0x3cd   : > { %v2379_v11 = vadd.f32 %v2378_v10, %v9535_v46  ;;  %v2380_v12 = vpop.f32.mrb[194].mxu0  ;;  %3110 = vmatprep.mubr.bf16.mxu1 %v2694_v8 }
 0x3ce   : > { %v2381_v13 = vadd.f32 %v2380_v12, %v9532_v42  ;;  %v2382_v14 = vpop.f32.mrb[195].mxu0  ;;  %3111 = vmatmul.mubr.bf16.gmra.mrb[188].mxu1 %v2693_v6  ;;  %v2599_v16 = vmax.f32 %v2377_v9, 0.0 }
 0x3cf   : > { %v2383_v15 = vadd.f32 %v2382_v14, %v9535_v46  ;;  %v2600_v18 = vmax.f32 %v2379_v11, 0.0 }
 0x3d0   : > { %v2601_v17 = vmax.f32 %v2381_v13, 0.0 }
 0x3d1   : > { %v2602_v19 = vmax.f32 %v2383_v15, 0.0 }
 0x3d2   : > { %v2695_v20 = vpack.c.bf16 %v2601_v17, %v2599_v16 }
 0x3d3   : > { %v2386_v21 = vpop.f32.mrb[196].mxu0  ;;  %v2696_v22 = vpack.c.bf16 %v2602_v19, %v2600_v18 }
 0x3d4   : > { %v2387_v23 = vadd.f32 %v2386_v21, %v9532_v42  ;;  %v2388_v24 = vpop.f32.mrb[197].mxu0 }
 0x3d5   : > { %v2389_v25 = vadd.f32 %v2388_v24, %v9535_v46  ;;  %v2390_v26 = vpop.f32.mrb[198].mxu0  ;;  %3120 = vmatprep.mubr.bf16.mxu1 %v2696_v22 }
 0x3d6   : > { %v2391_v27 = vadd.f32 %v2390_v26, %v9532_v42  ;;  %v2392_v28 = vpop.f32.mrb[199].mxu0  ;;  %3121 = vmatmul.mubr.bf16.gmra.mrb[192].mxu1 %v2695_v20  ;;  %v2603_v30 = vmax.f32 %v2387_v23, 0.0 }
 0x3d7   : > { %v2393_v29 = vadd.f32 %v2392_v28, %v9535_v46  ;;  %v2604_v34 = vmax.f32 %v2389_v25, 0.0 }
 0x3d8   : > { %v2605_v32 = vmax.f32 %v2391_v27, 0.0 }
 0x3d9   : > { %v2606_v35 = vmax.f32 %v2393_v29, 0.0 }
 0x3da   : > { %v2697_v36 = vpack.c.bf16 %v2605_v32, %v2603_v30 }
 0x3db   : > { %v2396_v37 = vpop.f32.mrb[200].mxu0  ;;  %v2698_v40 = vpack.c.bf16 %v2606_v35, %v2604_v34 }
 0x3dc   : > { %v2397_v41 = vadd.f32 %v2396_v37, %v9532_v42  ;;  %v2398_v43 = vpop.f32.mrb[201].mxu0 }
 0x3dd   : > { %v2399_v45 = vadd.f32 %v2398_v43, %v9535_v46  ;;  %v2400_v48 = vpop.f32.mrb[202].mxu0  ;;  %3130 = vmatprep.mubr.bf16.mxu1 %v2698_v40 }
 0x3de   : > { %v2401_v49 = vadd.f32 %v2400_v48, %v9532_v42  ;;  %v2402_v50 = vpop.f32.mrb[203].mxu0  ;;  %3131 = vmatmul.mubr.bf16.gmra.mrb[196].mxu1 %v2697_v36  ;;  %v2607_v52 = vmax.f32 %v2397_v41, 0.0 }
 0x3df   : > { %v2403_v51 = vadd.f32 %v2402_v50, %v9535_v46  ;;  %v2608_v54 = vmax.f32 %v2399_v45, 0.0 }
 0x3e0   : > { %v2609_v53 = vmax.f32 %v2401_v49, 0.0 }
 0x3e1   : > { %v2610_v55 = vmax.f32 %v2403_v51, 0.0 }
 0x3e2   : > { %v2699_v38 = vpack.c.bf16 %v2609_v53, %v2607_v52 }
 0x3e3   : > { %v2406_v56 = vpop.f32.mrb[204].mxu0  ;;  %v2700_v57 = vpack.c.bf16 %v2610_v55, %v2608_v54 }
 0x3e4   : > { %v2407_v39 = vadd.f32 %v2406_v56, %v9532_v42  ;;  %v2408_v58 = vpop.f32.mrb[205].mxu0 }
 0x3e5   : > { %v2409_v59 = vadd.f32 %v2408_v58, %v9535_v46  ;;  %v2410_v60 = vpop.f32.mrb[206].mxu0  ;;  %3140 = vmatprep.mubr.bf16.mxu1 %v2700_v57 }
 0x3e6   : > { %v2411_v61 = vadd.f32 %v2410_v60, %v9532_v42  ;;  %v2412_v62 = vpop.f32.mrb[207].mxu0  ;;  %3141 = vmatmul.mubr.bf16.gmra.mrb[200].mxu1 %v2699_v38  ;;  %v2611_v44 = vmax.f32 %v2407_v39, 0.0 }
 0x3e7   : > { %v2413_v63 = vadd.f32 %v2412_v62, %v9535_v46  ;;  %v2612_v2 = vmax.f32 %v2409_v59, 0.0 }
 0x3e8   : > { %v2613_v1 = vmax.f32 %v2411_v61, 0.0 }
 0x3e9   : > { %v2614_v47 = vmax.f32 %v2413_v63, 0.0 }
 0x3ea   : > { %v2701_v3 = vpack.c.bf16 %v2613_v1, %v2611_v44 }
 0x3eb   : > { %v2416_v4 = vpop.f32.mrb[208].mxu0  ;;  %v2702_v5 = vpack.c.bf16 %v2614_v47, %v2612_v2 }
 0x3ec   : > { %v2417_v6 = vadd.f32 %v2416_v4, %v9532_v42  ;;  %v2418_v7 = vpop.f32.mrb[209].mxu0 }
 0x3ed   : > { %v2419_v8 = vadd.f32 %v2418_v7, %v9535_v46  ;;  %v2420_v9 = vpop.f32.mrb[210].mxu0  ;;  %3150 = vmatprep.mubr.bf16.mxu1 %v2702_v5 }
 0x3ee   : > { %v2421_v10 = vadd.f32 %v2420_v9, %v9532_v42  ;;  %v2422_v11 = vpop.f32.mrb[211].mxu0  ;;  %3151 = vmatmul.mubr.bf16.gmra.mrb[204].mxu1 %v2701_v3  ;;  %v2615_v13 = vmax.f32 %v2417_v6, 0.0 }
 0x3ef   : > { %v2423_v12 = vadd.f32 %v2422_v11, %v9535_v46  ;;  %v2616_v15 = vmax.f32 %v2419_v8, 0.0 }
 0x3f0   : > { %v2617_v14 = vmax.f32 %v2421_v10, 0.0 }
 0x3f1   : > { %v2618_v16 = vmax.f32 %v2423_v12, 0.0 }
 0x3f2   : > { %v2703_v17 = vpack.c.bf16 %v2617_v14, %v2615_v13 }
 0x3f3   : > { %v2426_v18 = vpop.f32.mrb[212].mxu0  ;;  %v2704_v19 = vpack.c.bf16 %v2618_v16, %v2616_v15 }
 0x3f4   : > { %v2427_v20 = vadd.f32 %v2426_v18, %v9532_v42  ;;  %v2428_v21 = vpop.f32.mrb[213].mxu0 }
 0x3f5   : > { %v2429_v22 = vadd.f32 %v2428_v21, %v9535_v46  ;;  %v2430_v23 = vpop.f32.mrb[214].mxu0  ;;  %3160 = vmatprep.mubr.bf16.mxu1 %v2704_v19 }
 0x3f6   : > { %v2431_v24 = vadd.f32 %v2430_v23, %v9532_v42  ;;  %v2432_v25 = vpop.f32.mrb[215].mxu0  ;;  %3161 = vmatmul.mubr.bf16.gmra.mrb[208].mxu1 %v2703_v17  ;;  %v2619_v27 = vmax.f32 %v2427_v20, 0.0 }
 0x3f7   : > { %v2433_v26 = vadd.f32 %v2432_v25, %v9535_v46  ;;  %v2620_v29 = vmax.f32 %v2429_v22, 0.0 }
 0x3f8   : > { %v2621_v28 = vmax.f32 %v2431_v24, 0.0 }
 0x3f9   : > { %v2622_v30 = vmax.f32 %v2433_v26, 0.0 }
 0x3fa   : > { %v2705_v32 = vpack.c.bf16 %v2621_v28, %v2619_v27 }
 0x3fb   : > { %v2436_v33 = vpop.f32.mrb[216].mxu0  ;;  %v2706_v34 = vpack.c.bf16 %v2622_v30, %v2620_v29 }
 0x3fc   : > { %v2437_v35 = vadd.f32 %v2436_v33, %v9532_v42  ;;  %v2438_v36 = vpop.f32.mrb[217].mxu0 }
 0x3fd   : > { %v2439_v37 = vadd.f32 %v2438_v36, %v9535_v46  ;;  %v2440_v40 = vpop.f32.mrb[218].mxu0  ;;  %3170 = vmatprep.mubr.bf16.mxu1 %v2706_v34 }
 0x3fe   : > { %v2441_v41 = vadd.f32 %v2440_v40, %v9532_v42  ;;  %v2442_v43 = vpop.f32.mrb[219].mxu0  ;;  %3171 = vmatmul.mubr.bf16.gmra.mrb[212].mxu1 %v2705_v32  ;;  %v2623_v48 = vmax.f32 %v2437_v35, 0.0 }
 0x3ff   : > { %v2443_v45 = vadd.f32 %v2442_v43, %v9535_v46  ;;  %v2624_v50 = vmax.f32 %v2439_v37, 0.0 }
 0x400   : > { %v2625_v49 = vmax.f32 %v2441_v41, 0.0 }
 0x401   : > { %v2626_v51 = vmax.f32 %v2443_v45, 0.0 }
 0x402   : > { %v2707_v52 = vpack.c.bf16 %v2625_v49, %v2623_v48  ;;  %v2762_v49 = vsub.s32 3, %v9268_v31 }
 0x403   : > { %v2446_v53 = vpop.f32.mrb[220].mxu0  ;;  %v2708_v54 = vpack.c.bf16 %v2626_v51, %v2624_v50 }
 0x404   : > { %v2447_v55 = vadd.f32 %v2446_v53, %v9532_v42  ;;  %v2448_v38 = vpop.f32.mrb[221].mxu0 }
 0x405   : > { %v2449_v56 = vadd.f32 %v2448_v38, %v9535_v46  ;;  %v2450_v57 = vpop.f32.mrb[222].mxu0  ;;  %3180 = vmatprep.mubr.bf16.mxu1 %v2708_v54 }
 0x406   : > { %v2451_v39 = vadd.f32 %v2450_v57, %v9532_v42  ;;  %v2452_v58 = vpop.f32.mrb[223].mxu0  ;;  %3181 = vmatmul.mubr.bf16.gmra.mrb[216].mxu1 %v2707_v52  ;;  %v2627_v60 = vmax.f32 %v2447_v55, 0.0  ;;  %v8667_v57 = vld [vmem:[#allocation8] sm:$0xff] }
 0x407   : > { %v2453_v59 = vadd.f32 %v2452_v58, %v9535_v46  ;;  %v2628_v62 = vmax.f32 %v2449_v56, 0.0 }
 0x408   : > { %v2629_v61 = vmax.f32 %v2451_v39, 0.0  ;;  %v9665_v39 = vrot.slane %v8667_v57, %v2762_v49 }
 0x409   : > { %v2630_v63 = vmax.f32 %v2453_v59, 0.0  ;;  %v8668_v59 = vld [vmem:[#allocation8 + $0x8] sm:$0xff] }
 0x40a   : > { %v2709_v44 = vpack.c.bf16 %v2629_v61, %v2627_v60  ;;  %v9668_v60 = vrot.slane %v8668_v59, %v2762_v49 }
 0x40b   : > { %v2456_v1 = vpop.f32.mrb[224].mxu0  ;;  %v2710_v2 = vpack.c.bf16 %v2630_v63, %v2628_v62 }
 0x40c   : > { %v2457_v47 = vadd.f32 %v2456_v1, %v9532_v42  ;;  %v2458_v3 = vpop.f32.mrb[225].mxu0 }
 0x40d   : > { %v2459_v4 = vadd.f32 %v2458_v3, %v9535_v46  ;;  %v2460_v5 = vpop.f32.mrb[226].mxu0  ;;  %3190 = vmatprep.mubr.bf16.mxu1 %v2710_v2 }
 0x40e   : > { %v2461_v6 = vadd.f32 %v2460_v5, %v9532_v42  ;;  %v2462_v7 = vpop.f32.mrb[227].mxu0  ;;  %3191 = vmatmul.mubr.bf16.gmra.mrb[220].mxu1 %v2709_v44  ;;  %v2631_v9 = vmax.f32 %v2457_v47, 0.0 }
 0x40f   : > { %v2463_v8 = vadd.f32 %v2462_v7, %v9535_v46  ;;  %v2632_v11 = vmax.f32 %v2459_v4, 0.0 }
 0x410   : > { %v2633_v10 = vmax.f32 %v2461_v6, 0.0 }
 0x411   : > { %v2634_v12 = vmax.f32 %v2463_v8, 0.0 }
 0x412   : > { %v2711_v13 = vpack.c.bf16 %v2633_v10, %v2631_v9 }
 0x413   : > { %v2466_v14 = vpop.f32.mrb[228].mxu0  ;;  %v2712_v15 = vpack.c.bf16 %v2634_v12, %v2632_v11 }
 0x414   : > { %v2467_v16 = vadd.f32 %v2466_v14, %v9532_v42  ;;  %v2468_v17 = vpop.f32.mrb[229].mxu0 }
 0x415   : > { %v2469_v18 = vadd.f32 %v2468_v17, %v9535_v46  ;;  %v2470_v19 = vpop.f32.mrb[230].mxu0  ;;  %3200 = vmatprep.mubr.bf16.mxu1 %v2712_v15 }
 0x416   : > { %v2471_v20 = vadd.f32 %v2470_v19, %v9532_v42  ;;  %v2472_v21 = vpop.f32.mrb[231].mxu0  ;;  %3201 = vmatmul.mubr.bf16.gmra.mrb[224].mxu1 %v2711_v13  ;;  %v2635_v23 = vmax.f32 %v2467_v16, 0.0 }
 0x417   : > { %v2473_v22 = vadd.f32 %v2472_v21, %v9535_v46  ;;  %v2636_v25 = vmax.f32 %v2469_v18, 0.0 }
 0x418   : > { %v2637_v24 = vmax.f32 %v2471_v20, 0.0 }
 0x419   : > { %v2638_v26 = vmax.f32 %v2473_v22, 0.0 }
 0x41a   : > { %v2713_v27 = vpack.c.bf16 %v2637_v24, %v2635_v23 }
 0x41b   : > { %v2476_v28 = vpop.f32.mrb[232].mxu0  ;;  %v2714_v29 = vpack.c.bf16 %v2638_v26, %v2636_v25 }
 0x41c   : > { %v2477_v30 = vadd.f32 %v2476_v28, %v9532_v42  ;;  %v2478_v32 = vpop.f32.mrb[233].mxu0 }
 0x41d   : > { %v2479_v33 = vadd.f32 %v2478_v32, %v9535_v46  ;;  %v2480_v34 = vpop.f32.mrb[234].mxu0  ;;  %3210 = vmatprep.mubr.bf16.mxu1 %v2714_v29 }
 0x41e   : > { %v2481_v35 = vadd.f32 %v2480_v34, %v9532_v42  ;;  %v2482_v36 = vpop.f32.mrb[235].mxu0  ;;  %3211 = vmatmul.mubr.bf16.gmra.mrb[228].mxu1 %v2713_v27  ;;  %v2639_v40 = vmax.f32 %v2477_v30, 0.0 }
 0x41f   : > { %v2483_v37 = vadd.f32 %v2482_v36, %v9535_v46  ;;  %v2640_v43 = vmax.f32 %v2479_v33, 0.0 }
 0x420   : > { %v2641_v41 = vmax.f32 %v2481_v35, 0.0 }
 0x421   : > { %v2642_v45 = vmax.f32 %v2483_v37, 0.0 }
 0x422   : > { %v2715_v48 = vpack.c.bf16 %v2641_v41, %v2639_v40 }
 0x423   : > { %v2486_v50 = vpop.f32.mrb[236].mxu0  ;;  %v2716_v51 = vpack.c.bf16 %v2642_v45, %v2640_v43 }
 0x424   : > { %v2487_v52 = vadd.f32 %v2486_v50, %v9532_v42  ;;  %v2488_v53 = vpop.f32.mrb[237].mxu0 }
 0x425   : > { %v2489_v54 = vadd.f32 %v2488_v53, %v9535_v46  ;;  %v2490_v55 = vpop.f32.mrb[238].mxu0  ;;  %3220 = vmatprep.mubr.bf16.mxu1 %v2716_v51 }
 0x426   : > { %v2491_v38 = vadd.f32 %v2490_v55, %v9532_v42  ;;  %v2492_v56 = vpop.f32.mrb[239].mxu0  ;;  %3221 = vmatmul.mubr.bf16.gmra.mrb[232].mxu1 %v2715_v48  ;;  %v2643_v61 = vmax.f32 %v2487_v52, 0.0 }
 0x427   : > { %v2493_v58 = vadd.f32 %v2492_v56, %v9535_v46  ;;  %v2644_v63 = vmax.f32 %v2489_v54, 0.0 }
 0x428   : > { %v2645_v62 = vmax.f32 %v2491_v38, 0.0 }
 0x429   : > { %v2646_v44 = vmax.f32 %v2493_v58, 0.0  ;;  %v2962_v1 = vpop.f32.mrb[128].mxu1 }
 0x42a   : > { %v2963_v2 = vadd.f32 %v2962_v1, %v9665_v39  ;;  %v2964_v47 = vpop.f32.mrb[129].mxu1  ;;  %v2717_v3 = vpack.c.bf16 %v2645_v62, %v2643_v61 }
 0x42b   : > { %v2965_v4 = vadd.f32 %v2964_v47, %v9668_v60  ;;  %v2496_v5 = vpop.f32.mrb[240].mxu0  ;;  %v2966_v6 = vpop.f32.mrb[130].mxu1  ;;  %v2718_v7 = vpack.c.bf16 %v2646_v44, %v2644_v63 }
 0x42c   : > { %v2497_v8 = vadd.f32 %v2496_v5, %v9532_v42  ;;  %v2967_v9 = vadd.f32 %v2966_v6, %v9665_v39  ;;  %v2498_v10 = vpop.f32.mrb[241].mxu0  ;;  %v2968_v11 = vpop.f32.mrb[131].mxu1  ;;  %v3281_v15 = vmax.f32 %v2963_v2, 0.0 }
 0x42d   : > { %v2499_v12 = vadd.f32 %v2498_v10, %v9535_v46  ;;  %v2969_v13 = vadd.f32 %v2968_v11, %v9668_v60  ;;  %v2500_v14 = vpop.f32.mrb[242].mxu0  ;;  %3230 = vmatprep.mubr.bf16.mxu1 %v2718_v7  ;;  %v3282_v19 = vmax.f32 %v2965_v4, 0.0 }
 0x42e   : > { %v3283_v16 = vmax.f32 %v2967_v9, 0.0  ;;  %v2501_v17 = vadd.f32 %v2500_v14, %v9532_v42  ;;  %v2502_v18 = vpop.f32.mrb[243].mxu0  ;;  %3231 = vmatmul.mubr.bf16.gmra.mrb[236].mxu1 %v2717_v3  ;;  %v2647_v22 = vmax.f32 %v2497_v8, 0.0 }
 0x42f   : > { %v3284_v20 = vmax.f32 %v2969_v13, 0.0  ;;  %v2503_v21 = vadd.f32 %v2502_v18, %v9535_v46  ;;  %v2648_v25 = vmax.f32 %v2499_v12, 0.0 }
 0x430   : > { %v3409_v23 = vpack.c.bf16 %v3283_v16, %v3281_v15  ;;  %v2649_v24 = vmax.f32 %v2501_v17, 0.0 }
 0x431   : > { %v2650_v26 = vmax.f32 %v2503_v21, 0.0  ;;  %v2972_v27 = vpop.f32.mrb[132].mxu1  ;;  %v3410_v28 = vpack.c.bf16 %v3284_v20, %v3282_v19 }
 0x432   : > { %v2973_v29 = vadd.f32 %v2972_v27, %v9665_v39  ;;  %v2974_v30 = vpop.f32.mrb[133].mxu1  ;;  %v2719_v32 = vpack.c.bf16 %v2649_v24, %v2647_v22 }
 0x433   : > { %v2975_v33 = vadd.f32 %v2974_v30, %v9668_v60  ;;  %v2506_v34 = vpop.f32.mrb[244].mxu0  ;;  %v2976_v35 = vpop.f32.mrb[134].mxu1  ;;  %3706 = vmatprep.mubr.bf16.mxu0 %v3410_v28  ;;  %v2720_v36 = vpack.c.bf16 %v2650_v26, %v2648_v25 }
 0x434   : > { %v2507_v37 = vadd.f32 %v2506_v34, %v9532_v42  ;;  %v2977_v40 = vadd.f32 %v2976_v35, %v9665_v39  ;;  %v2508_v41 = vpop.f32.mrb[245].mxu0  ;;  %v2978_v43 = vpop.f32.mrb[135].mxu1  ;;  %3707 = vmatmul.mubr.bf16.vlgmr.msra.gmra.mrb[0].mxu0 %v3409_v23  ;;  %v3285_v50 = vmax.f32 %v2973_v29, 0.0 }
 0x435   : > { %v2509_v45 = vadd.f32 %v2508_v41, %v9535_v46  ;;  %v2979_v48 = vadd.f32 %v2978_v43, %v9668_v60  ;;  %v2510_v49 = vpop.f32.mrb[246].mxu0  ;;  %3240 = vmatprep.mubr.bf16.mxu1 %v2720_v36  ;;  %v3286_v54 = vmax.f32 %v2975_v33, 0.0 }
 0x436   : > { %v3287_v51 = vmax.f32 %v2977_v40, 0.0  ;;  %v2511_v52 = vadd.f32 %v2510_v49, %v9532_v42  ;;  %v2512_v53 = vpop.f32.mrb[247].mxu0  ;;  %3241 = vmatmul.mubr.bf16.gmra.mrb[240].mxu1 %v2719_v32  ;;  %v2651_v56 = vmax.f32 %v2507_v37, 0.0 }
 0x437   : > { %v3288_v55 = vmax.f32 %v2979_v48, 0.0  ;;  %v2513_v38 = vadd.f32 %v2512_v53, %v9535_v46  ;;  %v2652_v59 = vmax.f32 %v2509_v45, 0.0 }
 0x438   : > { %v3411_v57 = vpack.c.bf16 %v3287_v51, %v3285_v50  ;;  %v2653_v58 = vmax.f32 %v2511_v52, 0.0 }
 0x439   : > { %v2654_v61 = vmax.f32 %v2513_v38, 0.0  ;;  %v2982_v62 = vpop.f32.mrb[136].mxu1  ;;  %v3412_v63 = vpack.c.bf16 %v3288_v55, %v3286_v54 }
 0x43a   : > { %v2983_v44 = vadd.f32 %v2982_v62, %v9665_v39  ;;  %v2984_v1 = vpop.f32.mrb[137].mxu1  ;;  %v2721_v2 = vpack.c.bf16 %v2653_v58, %v2651_v56 }
 0x43b   : > { %v2985_v47 = vadd.f32 %v2984_v1, %v9668_v60  ;;  %v2516_v3 = vpop.f32.mrb[248].mxu0  ;;  %v2986_v4 = vpop.f32.mrb[138].mxu1  ;;  %3716 = vmatprep.mubr.bf16.mxu0 %v3412_v63  ;;  %v2722_v5 = vpack.c.bf16 %v2654_v61, %v2652_v59 }
 0x43c   : > { %v2517_v6 = vadd.f32 %v2516_v3, %v9532_v42  ;;  %v2987_v7 = vadd.f32 %v2986_v4, %v9665_v39  ;;  %v2518_v8 = vpop.f32.mrb[249].mxu0  ;;  %v2988_v9 = vpop.f32.mrb[139].mxu1  ;;  %3717 = vmatmul.mubr.bf16.gmra.mrb[4].mxu0 %v3411_v57  ;;  %v3289_v13 = vmax.f32 %v2983_v44, 0.0 }
 0x43d   : > { %v2519_v10 = vadd.f32 %v2518_v8, %v9535_v46  ;;  %v2989_v11 = vadd.f32 %v2988_v9, %v9668_v60  ;;  %v2520_v12 = vpop.f32.mrb[250].mxu0  ;;  %3250 = vmatprep.mubr.bf16.mxu1 %v2722_v5  ;;  %v3290_v17 = vmax.f32 %v2985_v47, 0.0 }
 0x43e   : > { %v3291_v14 = vmax.f32 %v2987_v7, 0.0  ;;  %v2521_v15 = vadd.f32 %v2520_v12, %v9532_v42  ;;  %v2522_v16 = vpop.f32.mrb[251].mxu0  ;;  %3251 = vmatmul.mubr.bf16.gmra.mrb[244].mxu1 %v2721_v2  ;;  %v2655_v20 = vmax.f32 %v2517_v6, 0.0 }
 0x43f   : > { %v3292_v18 = vmax.f32 %v2989_v11, 0.0  ;;  %v2523_v19 = vadd.f32 %v2522_v16, %v9535_v46  ;;  %v2656_v23 = vmax.f32 %v2519_v10, 0.0 }
 0x440   : > { %v3413_v21 = vpack.c.bf16 %v3291_v14, %v3289_v13  ;;  %v2657_v22 = vmax.f32 %v2521_v15, 0.0  ;;  %v8503_v15 = vld [vmem:[#allocation7 + $0x400] ss:$8 sps:$4 sm:$0xff]  }
 0x441   : > { %v2658_v24 = vmax.f32 %v2523_v19, 0.0  ;;  %v2992_v25 = vpop.f32.mrb[140].mxu1  ;;  %v3414_v26 = vpack.c.bf16 %v3292_v18, %v3290_v17  ;;  %v8508_v18 = vld [vmem:[#allocation7 + $0x414] ss:$8 sps:$4 sm:$0xff]  }
 0x442   : > { %v2993_v27 = vadd.f32 %v2992_v25, %v9665_v39  ;;  %v2994_v28 = vpop.f32.mrb[141].mxu1  ;;  %v2723_v29 = vpack.c.bf16 %v2657_v22, %v2655_v20  ;;  %v8669_v22 = vld [vmem:[%s9202_s17] sm:$0xff]   ;;  %v8506_v25 = vld [vmem:[#allocation7 + $0x410] ss:$8 sps:$4 sm:$0xff]  }
 0x443   : > { %v2995_v30 = vadd.f32 %v2994_v28, %v9668_v60  ;;  %v2526_v32 = vpop.f32.mrb[252].mxu0  ;;  %v2996_v33 = vpop.f32.mrb[142].mxu1  ;;  %3726 = vmatprep.mubr.bf16.mxu0 %v3414_v26  ;;  %v2724_v34 = vpack.c.bf16 %v2658_v24, %v2656_v23 }
 0x444   : > { %v2527_v35 = vadd.f32 %v2526_v32, %v9532_v42  ;;  %v2997_v36 = vadd.f32 %v2996_v33, %v9665_v39  ;;  %v2528_v37 = vpop.f32.mrb[253].mxu0  ;;  %v2998_v40 = vpop.f32.mrb[143].mxu1  ;;  %3727 = vmatmul.mubr.bf16.gmra.mrb[8].mxu0 %v3413_v21  ;;  %v3293_v48 = vmax.f32 %v2993_v27, 0.0  ;;  %v8511_v27 = vld [vmem:[#allocation7 + $0x424] ss:$8 sps:$4 sm:$0xff]  }
 0x445   : > { %v2529_v41 = vadd.f32 %v2528_v37, %v9535_v46  ;;  %v2999_v43 = vadd.f32 %v2998_v40, %v9668_v60  ;;  %v2530_v45 = vpop.f32.mrb[254].mxu0  ;;  %3260 = vmatprep.mubr.bf16.mxu1 %v2724_v34  ;;  %v3294_v52 = vmax.f32 %v2995_v30, 0.0  ;;  %v8514_v40 = vld [vmem:[#allocation7 + $0x434] ss:$8 sps:$4 sm:$0xff]  }
 0x446   : > { %v3295_v49 = vmax.f32 %v2997_v36, 0.0  ;;  %v2531_v50 = vadd.f32 %v2530_v45, %v9532_v42  ;;  %v2532_v51 = vpop.f32.mrb[255].mxu0  ;;  %3261 = vmatmul.mubr.bf16.gmra.mrb[248].mxu1 %v2723_v29  ;;  %v2659_v55 = vmax.f32 %v2527_v35, 0.0  ;;  %v8509_v35 = vld [vmem:[#allocation7 + $0x420] ss:$8 sps:$4 sm:$0xff]  }
 0x447   : > { %v3296_v53 = vmax.f32 %v2999_v43, 0.0  ;;  %v2533_v54 = vadd.f32 %v2532_v51, %v9535_v46  ;;  %v2660_v57 = vmax.f32 %v2529_v41, 0.0  ;;  %v8512_v51 = vld [vmem:[#allocation7 + $0x430] ss:$8 sps:$4 sm:$0xff]  }
 0x448   : > { %v3415_v38 = vpack.c.bf16 %v3295_v49, %v3293_v48  ;;  %v2661_v56 = vmax.f32 %v2531_v50, 0.0  ;;  %v8670_v48 = vld [vmem:[%s9202_s17 + $0x8] sm:$0xff]  }
 0x449   : > { %v2662_v58 = vmax.f32 %v2533_v54, 0.0  ;;  %v3002_v59 = vpop.f32.mrb[144].mxu1  ;;  %v3416_v61 = vpack.c.bf16 %v3296_v53, %v3294_v52  ;;  %v8517_v53 = vld [vmem:[#allocation7 + $0x444] ss:$8 sps:$4 sm:$0xff]  }
 0x44a   : > { %v3003_v62 = vadd.f32 %v3002_v59, %v9665_v39  ;;  %v3004_v63 = vpop.f32.mrb[145].mxu1  ;;  %v2725_v44 = vpack.c.bf16 %v2661_v56, %v2659_v55  ;;  %v8515_v59 = vld [vmem:[#allocation7 + $0x440] ss:$8 sps:$4 sm:$0xff]  }
 0x44b   : > { %v3005_v1 = vadd.f32 %v3004_v63, %v9668_v60  ;;  %v3006_v42 = vpop.f32.mrb[146].mxu1  ;;  %3736 = vmatprep.mubr.bf16.mxu0 %v3416_v61  ;;  %v2726_v2 = vpack.c.bf16 %v2662_v58, %v2660_v57  ;;  %v8520_v63 = vld [vmem:[#allocation7 + $0x454] ss:$8 sps:$4 sm:$0xff]  }
 0x44c   : > { %v3007_v47 = vadd.f32 %v3006_v42, %v9665_v39  ;;  %v3008_v3 = vpop.f32.mrb[147].mxu1  ;;  %3737 = vmatmul.mubr.bf16.gmra.mrb[12].mxu0 %v3415_v38  ;;  %v3297_v4 = vmax.f32 %v3003_v62, 0.0 }
 0x44d   : > { %v3009_v46 = vadd.f32 %v3008_v3, %v9668_v60  ;;  %3270 = vmatprep.mubr.bf16.mxu1 %v2726_v2  ;;  %v3298_v6 = vmax.f32 %v3005_v1, 0.0  ;;  %v8671_v2 = vld [vmem:[%s9202_s17 + $0x10] sm:$0xff]  }
 0x44e   : > { %v3299_v5 = vmax.f32 %v3007_v47, 0.0  ;;  %3271 = vmatmul.mubr.bf16.gmra.mrb[252].mxu1 %v2725_v44 }
 0x44f   : > { %v3300_v7 = vmax.f32 %v3009_v46, 0.0  ;;  %4381 = vmatprep.mubr.bf16.mxu1 %v8936_v0  ;;  %v8518_v46 = vld [vmem:[#allocation7 + $0x450] ss:$8 sps:$4 sm:$0xff]  }
 0x450   : > { %v3417_v8 = vpack.c.bf16 %v3299_v5, %v3297_v4  ;;  %v8523_v5 = vld [vmem:[#allocation7 + $0x464] ss:$8 sps:$4 sm:$0xff]  }
 0x451   : > { %v3012_v9 = vpop.f32.mrb[148].mxu1  ;;  %v3418_v10 = vpack.c.bf16 %v3300_v7, %v3298_v6 }
 0x452   : > { %v3013_v11 = vadd.f32 %v3012_v9, %v9665_v39  ;;  %v3014_v12 = vpop.f32.mrb[149].mxu1 }
 0x453   : > { %v3015_v13 = vadd.f32 %v3014_v12, %v9668_v60  ;;  %v3016_v14 = vpop.f32.mrb[150].mxu1  ;;  %3746 = vmatprep.mubr.bf16.mxu0 %v3418_v10  ;;  %v8521_v12 = vld [vmem:[#allocation7 + $0x460] ss:$8 sps:$4 sm:$0xff]  }
 0x454   : > { %v3017_v16 = vadd.f32 %v3016_v14, %v9665_v39  ;;  %v3018_v17 = vpop.f32.mrb[151].mxu1  ;;  %3747 = vmatmul.mubr.bf16.gmra.mrb[16].mxu0 %v3417_v8  ;;  %v3301_v20 = vmax.f32 %v3013_v11, 0.0 }
 0x455   : > { %v3019_v19 = vadd.f32 %v3018_v17, %v9668_v60  ;;  %v3302_v23 = vmax.f32 %v3015_v13, 0.0 }
 0x456   : > { %v3303_v21 = vmax.f32 %v3017_v16, 0.0  ;;  %4382 = vmatmul.mubr.bf16.vlgmr.msra.gmra.mrb[0].mxu1 %v8669_v22  ;;  %v8524_v22 = vld [vmem:[#allocation7 + $0x470] ss:$8 sps:$4 sm:$0xff]  }
 0x457   : > { %v3304_v24 = vmax.f32 %v3019_v19, 0.0  ;;  %4863 = vmatpush1.bf16.msra.mxu1 %v8503_v15  ;;  %4391 = vmatprep.mubr.bf16.mxu1 %v8936_v0  ;;  %v8526_v15 = vld [vmem:[#allocation7 + $0x474] ss:$8 sps:$4 sm:$0xff]  }
 0x458   : > { %v3419_v26 = vpack.c.bf16 %v3303_v21, %v3301_v20  ;;  %4864 = vmatprep.subr.bf16.mxu1 %v8508_v18  ;;  %v8672_v19 = vld [vmem:[%s9202_s17 + $0x18] sm:$0xff]  }
 0x459   : > { %v3022_v28 = vpop.f32.mrb[152].mxu1  ;;  %v3420_v29 = vpack.c.bf16 %v3304_v24, %v3302_v23  ;;  %v8529_v24 = vld [vmem:[#allocation7 + $0x484] ss:$8 sps:$4 sm:$0xff]  }
 0x45a   : > { %v3023_v30 = vadd.f32 %v3022_v28, %v9665_v39  ;;  %v3024_v32 = vpop.f32.mrb[153].mxu1 }
 0x45b   : > { %v3025_v33 = vadd.f32 %v3024_v32, %v9668_v60  ;;  %v3026_v34 = vpop.f32.mrb[154].mxu1  ;;  %3756 = vmatprep.mubr.bf16.mxu0 %v3420_v29  ;;  %4865 = vmatpush1.bf16.msra.mxu1 %v8506_v25  ;;  %v8527_v32 = vld [vmem:[#allocation7 + $0x480] ss:$8 sps:$4 sm:$0xff]  }
 0x45c   : > { %v3027_v36 = vadd.f32 %v3026_v34, %v9665_v39  ;;  %v3028_v37 = vpop.f32.mrb[155].mxu1  ;;  %3757 = vmatmul.mubr.bf16.gmra.mrb[20].mxu0 %v3419_v26  ;;  %4866 = vmatprep.subr.bf16.mxu1 %v8511_v27  ;;  %v3305_v43 = vmax.f32 %v3023_v30, 0.0 }
 0x45d   : > { %v3029_v41 = vadd.f32 %v3028_v37, %v9668_v60  ;;  %v3306_v49 = vmax.f32 %v3025_v33, 0.0 }
 0x45e   : > { %v3307_v45 = vmax.f32 %v3027_v36, 0.0  ;;  %4392 = vmatmul.mubr.bf16.gmra.mrb[4].mxu1 %v8670_v48  ;;  %v8530_v48 = vld [vmem:[#allocation7 + $0x490] ss:$8 sps:$4 sm:$0xff]  }
 0x45f   : > { %v3308_v50 = vmax.f32 %v3029_v41, 0.0  ;;  %4401 = vmatprep.mubr.bf16.mxu1 %v8936_v0  ;;  %4867 = vmatpush1.bf16.msra.mxu1 %v8509_v35  ;;  %v8532_v35 = vld [vmem:[#allocation7 + $0x494] ss:$8 sps:$4 sm:$0xff]   ;;  %v8673_v41 = vld [vmem:[%s9202_s17 + $0x20] sm:$0xff]  }
 0x460   : > { %v3421_v52 = vpack.c.bf16 %v3307_v45, %v3305_v43  ;;  %4868 = vmatprep.subr.bf16.mxu1 %v8514_v40 }
 0x461   : > { %v3032_v54 = vpop.f32.mrb[156].mxu1  ;;  %v3422_v55 = vpack.c.bf16 %v3308_v50, %v3306_v49  ;;  %v8535_v50 = vld [vmem:[#allocation7 + $0x4a4] ss:$8 sps:$4 sm:$0xff]  }
 0x462   : > { %v3033_v38 = vadd.f32 %v3032_v54, %v9665_v39  ;;  %v3034_v56 = vpop.f32.mrb[157].mxu1 }
 0x463   : > { %v3035_v57 = vadd.f32 %v3034_v56, %v9668_v60  ;;  %v3036_v58 = vpop.f32.mrb[158].mxu1  ;;  %3766 = vmatprep.mubr.bf16.mxu0 %v3422_v55  ;;  %4869 = vmatpush1.bf16.msra.mxu1 %v8512_v51  ;;  %v8533_v56 = vld [vmem:[#allocation7 + $0x4a0] ss:$8 sps:$4 sm:$0xff]  }
 0x464   : > { %v3037_v61 = vadd.f32 %v3036_v58, %v9665_v39  ;;  %v3038_v62 = vpop.f32.mrb[159].mxu1  ;;  %3767 = vmatmul.mubr.bf16.gmra.mrb[24].mxu0 %v3421_v52  ;;  %4870 = vmatprep.subr.bf16.mxu1 %v8517_v53  ;;  %v3309_v1 = vmax.f32 %v3033_v38, 0.0 }
 0x465   : > { %v3039_v44 = vadd.f32 %v3038_v62, %v9668_v60  ;;  %v3310_v47 = vmax.f32 %v3035_v57, 0.0 }
 0x466   : > { %v3311_v42 = vmax.f32 %v3037_v61, 0.0  ;;  %4402 = vmatmul.mubr.bf16.gmra.mrb[8].mxu1 %v8671_v2 }
 0x467   : > { %v3312_v3 = vmax.f32 %v3039_v44, 0.0  ;;  %4411 = vmatprep.mubr.bf16.mxu1 %v8936_v0  ;;  %4871 = vmatpush1.bf16.msra.mxu1 %v8515_v59 }
 0x468   : > { %v3423_v4 = vpack.c.bf16 %v3311_v42, %v3309_v1  ;;  %4872 = vmatprep.subr.bf16.mxu1 %v8520_v63  ;;  %v8674_v63 = vld [vmem:[%s9202_s17 + $0x28] sm:$0xff]  }
 0x469   : > { %v3042_v6 = vpop.f32.mrb[160].mxu1  ;;  %v3424_v7 = vpack.c.bf16 %v3312_v3, %v3310_v47 }
 0x46a   : > { %v3043_v8 = vadd.f32 %v3042_v6, %v9665_v39  ;;  %v3044_v9 = vpop.f32.mrb[161].mxu1 }
 0x46b   : > { %v3045_v10 = vadd.f32 %v3044_v9, %v9668_v60  ;;  %v3046_v11 = vpop.f32.mrb[162].mxu1  ;;  %3776 = vmatprep.mubr.bf16.mxu0 %v3424_v7  ;;  %4873 = vmatpush1.bf16.msra.mxu1 %v8518_v46 }
 0x46c   : > { %v3047_v13 = vadd.f32 %v3046_v11, %v9665_v39  ;;  %v3048_v14 = vpop.f32.mrb[163].mxu1  ;;  %3777 = vmatmul.mubr.bf16.gmra.mrb[28].mxu0 %v3423_v4  ;;  %4874 = vmatprep.subr.bf16.mxu1 %v8523_v5  ;;  %v3313_v17 = vmax.f32 %v3043_v8, 0.0  ;;  %v8675_v11 = vld [vmem:[%s9202_s17 + $0x30] sm:$0xff]  }
 0x46d   : > { %v3049_v16 = vadd.f32 %v3048_v14, %v9668_v60  ;;  %v3314_v20 = vmax.f32 %v3045_v10, 0.0 }
 0x46e   : > { %v3315_v18 = vmax.f32 %v3047_v13, 0.0  ;;  %4412 = vmatmul.mubr.bf16.gmra.mrb[12].mxu1 %v8672_v19 }
 0x46f   : > { %v3316_v21 = vmax.f32 %v3049_v16, 0.0  ;;  %4421 = vmatprep.mubr.bf16.mxu1 %v8936_v0  ;;  %4875 = vmatpush1.bf16.msra.mxu1 %v8521_v12  ;;  %v8538_v16 = vld [vmem:[#allocation7 + $0x4b4] ss:$8 sps:$4 sm:$0xff]  }
 0x470   : > { %v3425_v23 = vpack.c.bf16 %v3315_v18, %v3313_v17  ;;  %4876 = vmatprep.subr.bf16.mxu1 %v8526_v15  ;;  %v8536_v15 = vld [vmem:[#allocation7 + $0x4b0] ss:$8 sps:$4 sm:$0xff]  }
 0x471   : > { %v3052_v25 = vpop.f32.mrb[164].mxu1  ;;  %v3426_v26 = vpack.c.bf16 %v3316_v21, %v3314_v20 }
 0x472   : > { %v3053_v27 = vadd.f32 %v3052_v25, %v9665_v39  ;;  %v3054_v28 = vpop.f32.mrb[165].mxu1 }
 0x473   : > { %v3055_v29 = vadd.f32 %v3054_v28, %v9668_v60  ;;  %v3056_v30 = vpop.f32.mrb[166].mxu1  ;;  %3786 = vmatprep.mubr.bf16.mxu0 %v3426_v26  ;;  %4877 = vmatpush1.bf16.msra.mxu1 %v8524_v22  ;;  %v8676_v28 = vld [vmem:[%s9202_s17 + $0x38] sm:$0xff]  }
 0x474   : > { %v3057_v33 = vadd.f32 %v3056_v30, %v9665_v39  ;;  %v3058_v34 = vpop.f32.mrb[167].mxu1  ;;  %3787 = vmatmul.mubr.bf16.gmra.mrb[32].mxu0 %v3425_v23  ;;  %4878 = vmatprep.subr.bf16.mxu1 %v8529_v24  ;;  %v3317_v37 = vmax.f32 %v3053_v27, 0.0 }
 0x475   : > { %v3059_v36 = vadd.f32 %v3058_v34, %v9668_v60  ;;  %v3318_v43 = vmax.f32 %v3055_v29, 0.0 }
 0x476   : > { %v3319_v40 = vmax.f32 %v3057_v33, 0.0  ;;  %4422 = vmatmul.mubr.bf16.gmra.mrb[16].mxu1 %v8673_v41 }
 0x477   : > { %v3320_v45 = vmax.f32 %v3059_v36, 0.0  ;;  %4431 = vmatprep.mubr.bf16.mxu1 %v8936_v0  ;;  %4879 = vmatpush1.bf16.msra.mxu1 %v8527_v32 }
 0x478   : > { %v3427_v49 = vpack.c.bf16 %v3319_v40, %v3317_v37  ;;  %4880 = vmatprep.subr.bf16.mxu1 %v8532_v35 }
 0x479   : > { %v3062_v51 = vpop.f32.mrb[168].mxu1  ;;  %v3428_v52 = vpack.c.bf16 %v3320_v45, %v3318_v43 }
 0x47a   : > { %v3063_v53 = vadd.f32 %v3062_v51, %v9665_v39  ;;  %v3064_v54 = vpop.f32.mrb[169].mxu1 }
 0x47b   : > { %v3065_v55 = vadd.f32 %v3064_v54, %v9668_v60  ;;  %v3066_v38 = vpop.f32.mrb[170].mxu1  ;;  %3796 = vmatprep.mubr.bf16.mxu0 %v3428_v52  ;;  %4881 = vmatpush1.bf16.msra.mxu1 %v8530_v48  ;;  %v8539_v54 = vld [vmem:[#allocation7 + $0x4c0] ss:$8 sps:$4 sm:$0xff]  }
 0x47c   : > { %v3067_v57 = vadd.f32 %v3066_v38, %v9665_v39  ;;  %v3068_v58 = vpop.f32.mrb[171].mxu1  ;;  %3797 = vmatmul.mubr.bf16.gmra.mrb[36].mxu0 %v3427_v49  ;;  %4882 = vmatprep.subr.bf16.mxu1 %v8535_v50  ;;  %v3321_v61 = vmax.f32 %v3063_v53, 0.0  ;;  %v8677_v50 = vld [vmem:[%s9202_s17 + $0x40] sm:$0xff]  }
 0x47d   : > { %v3069_v59 = vadd.f32 %v3068_v58, %v9668_v60  ;;  %v3322_v44 = vmax.f32 %v3065_v55, 0.0  ;;  %v8541_v55 = vld [vmem:[#allocation7 + $0x4c4] ss:$8 sps:$4 sm:$0xff]  }
 0x47e   : > { %v3323_v62 = vmax.f32 %v3067_v57, 0.0  ;;  %4432 = vmatmul.mubr.bf16.gmra.mrb[20].mxu1 %v8674_v63 }
 0x47f   : > { %v3324_v1 = vmax.f32 %v3069_v59, 0.0  ;;  %4441 = vmatprep.mubr.bf16.mxu1 %v8936_v0  ;;  %4883 = vmatpush1.bf16.msra.mxu1 %v8533_v56 }
 0x480   : > { %v3429_v42 = vpack.c.bf16 %v3323_v62, %v3321_v61  ;;  %4884 = vmatprep.subr.bf16.mxu1 %v8538_v16 }
 0x481   : > { %v3072_v2 = vpop.f32.mrb[172].mxu1  ;;  %v3430_v47 = vpack.c.bf16 %v3324_v1, %v3322_v44 }
 0x482   : > { %v3073_v3 = vadd.f32 %v3072_v2, %v9665_v39  ;;  %v3074_v46 = vpop.f32.mrb[173].mxu1  ;;  %v8678_v2 = vld [vmem:[%s9202_s17 + $0x48] sm:$0xff]  }
 0x483   : > { %v3075_v4 = vadd.f32 %v3074_v46, %v9668_v60  ;;  %v3076_v5 = vpop.f32.mrb[174].mxu1  ;;  %3806 = vmatprep.mubr.bf16.mxu0 %v3430_v47  ;;  %4885 = vmatpush1.bf16.msra.mxu1 %v8536_v15  ;;  %v8679_v15 = vld [vmem:[%s9202_s17 + $0x50] sm:$0xff]  }
 0x484   : > { %v3077_v6 = vadd.f32 %v3076_v5, %v9665_v39  ;;  %v3078_v7 = vpop.f32.mrb[175].mxu1  ;;  %3807 = vmatmul.mubr.bf16.gmra.mrb[40].mxu0 %v3429_v42  ;;  %v3325_v9 = vmax.f32 %v3073_v3, 0.0  ;;  %4886 = vmatprep.subr.bf16.mxu1 %v8541_v55  ;;  %v8545_v55 = vld [vmem:[#allocation7 + $0x500] ss:$8 sps:$4 sm:$0xff]  }
 0x485   : > { %v3079_v8 = vadd.f32 %v3078_v7, %v9668_v60  ;;  %v3326_v12 = vmax.f32 %v3075_v4, 0.0 }
 0x486   : > { %v3327_v10 = vmax.f32 %v3077_v6, 0.0  ;;  %4442 = vmatmul.mubr.bf16.gmra.mrb[24].mxu1 %v8675_v11 }
 0x487   : > { %v3328_v13 = vmax.f32 %v3079_v8, 0.0  ;;  %4451 = vmatprep.mubr.bf16.mxu1 %v8936_v0  ;;  %4887 = vmatpush1.bf16.msra.mxu1 %v8539_v54  ;;  %v8681_v54 = vld [vmem:[%s9202_s17 + $0x60] sm:$0xff]  }
 0x488   : > { %v3431_v14 = vpack.c.bf16 %v3327_v10, %v3325_v9 }
 0x489   : > { %v3082_v17 = vpop.f32.mrb[176].mxu1  ;;  %v3432_v18 = vpack.c.bf16 %v3328_v13, %v3326_v12 }
 0x48a   : > { %v3083_v19 = vadd.f32 %v3082_v17, %v9665_v39  ;;  %v3084_v20 = vpop.f32.mrb[177].mxu1 }
 0x48b   : > { %v3085_v21 = vadd.f32 %v3084_v20, %v9668_v60  ;;  %v3086_v22 = vpop.f32.mrb[178].mxu1  ;;  %3816 = vmatprep.mubr.bf16.mxu0 %v3432_v18 }
 0x48c   : > { %v3087_v23 = vadd.f32 %v3086_v22, %v9665_v39  ;;  %v3088_v24 = vpop.f32.mrb[179].mxu1  ;;  %3817 = vmatmul.mubr.bf16.gmra.mrb[44].mxu0 %v3431_v14  ;;  %v3329_v26 = vmax.f32 %v3083_v19, 0.0  ;;  %v8544_v22 = vld [vmem:[#allocation7 + $0x4d4] ss:$8 sps:$4 sm:$0xff]  }
 0x48d   : > { %v3089_v25 = vadd.f32 %v3088_v24, %v9668_v60  ;;  %v3330_v29 = vmax.f32 %v3085_v21, 0.0  ;;  %v8542_v21 = vld [vmem:[#allocation7 + $0x4d0] ss:$8 sps:$4 sm:$0xff]   ;;  %4888 = vmatprep.subr.bf16.mxu1 %v8544_v22 }
 0x48e   : > { %v3331_v27 = vmax.f32 %v3087_v23, 0.0  ;;  %4452 = vmatmul.mubr.bf16.gmra.mrb[28].mxu1 %v8676_v28  ;;  %v8551_v22 = vld [vmem:[#allocation7 + $0x510] ss:$8 sps:$4 sm:$0xff]  }
 0x48f   : > { %v3332_v30 = vmax.f32 %v3089_v25, 0.0  ;;  %4461 = vmatprep.mubr.bf16.mxu1 %v8936_v0  ;;  %4889 = vmatpush1.bf16.msra.mxu1 %v8542_v21  ;;  %v8683_v21 = vld [vmem:[%s9202_s17 + $0x70] sm:$0xff]  }
 0x490   : > { %v3433_v32 = vpack.c.bf16 %v3331_v27, %v3329_v26 }
 0x491   : > { %v3092_v33 = vpop.f32.mrb[180].mxu1  ;;  %v3434_v34 = vpack.c.bf16 %v3332_v30, %v3330_v29 }
 0x492   : > { %v3093_v35 = vadd.f32 %v3092_v33, %v9665_v39  ;;  %v3094_v36 = vpop.f32.mrb[181].mxu1  ;;  %v8680_v33 = vld [vmem:[%s9202_s17 + $0x58] sm:$0xff]  }
 0x493   : > { %v3095_v37 = vadd.f32 %v3094_v36, %v9668_v60  ;;  %v3096_v40 = vpop.f32.mrb[182].mxu1  ;;  %3826 = vmatprep.mubr.bf16.mxu0 %v3434_v34 }
 0x494   : > { %v3097_v41 = vadd.f32 %v3096_v40, %v9665_v39  ;;  %v3098_v43 = vpop.f32.mrb[183].mxu1  ;;  %3827 = vmatmul.mubr.bf16.gmra.mrb[48].mxu0 %v3433_v32  ;;  %v3333_v48 = vmax.f32 %v3093_v35, 0.0 }
 0x495   : > { %v3099_v45 = vadd.f32 %v3098_v43, %v9668_v60  ;;  %v3334_v51 = vmax.f32 %v3095_v37, 0.0 }
 0x496   : > { %v3335_v49 = vmax.f32 %v3097_v41, 0.0  ;;  %4462 = vmatmul.mubr.bf16.gmra.mrb[32].mxu1 %v8677_v50 }
 0x497   : > { %v3336_v52 = vmax.f32 %v3099_v45, 0.0  ;;  %4471 = vmatprep.mubr.bf16.mxu1 %v8936_v0 }
 0x498   : > { %v3435_v53 = vpack.c.bf16 %v3335_v49, %v3333_v48 }
 0x499   : > { %v3102_v38 = vpop.f32.mrb[184].mxu1  ;;  %v3436_v56 = vpack.c.bf16 %v3336_v52, %v3334_v51 }
 0x49a   : > { %v3103_v57 = vadd.f32 %v3102_v38, %v9665_v39  ;;  %v3104_v58 = vpop.f32.mrb[185].mxu1  ;;  %v8547_v38 = vld [vmem:[#allocation7 + $0x504] ss:$8 sps:$4 sm:$0xff]  }
 0x49b   : > { %v3105_v59 = vadd.f32 %v3104_v58, %v9668_v60  ;;  %v3106_v61 = vpop.f32.mrb[186].mxu1  ;;  %3836 = vmatprep.mubr.bf16.mxu0 %v3436_v56  ;;  %v8548_v58 = vld [vmem:[#allocation7 + $0x4e0] ss:$8 sps:$4 sm:$0xff]   ;;  %5744 = vmatprep.subr.bf16.mxu0 %v8547_v38 }
 0x49c   : > { %v3107_v62 = vadd.f32 %v3106_v61, %v9665_v39  ;;  %v3108_v63 = vpop.f32.mrb[187].mxu1  ;;  %3837 = vmatmul.mubr.bf16.gmra.mrb[52].mxu0 %v3435_v53  ;;  %v3337_v1 = vmax.f32 %v3103_v57, 0.0 }
 0x49d   : > { %v3109_v44 = vadd.f32 %v3108_v63, %v9668_v60  ;;  %v3338_v47 = vmax.f32 %v3105_v59, 0.0  ;;  %v8550_v59 = vld [vmem:[#allocation7 + $0x4e4] ss:$8 sps:$4 sm:$0xff]   ;;  %5745 = vmatpush1.bf16.msra.mxu0 %v8545_v55 }
 0x49e   : > { %v3339_v42 = vmax.f32 %v3107_v62, 0.0  ;;  %4472 = vmatmul.mubr.bf16.gmra.mrb[36].mxu1 %v8678_v2  ;;  %4890 = vmatprep.subr.bf16.mxu1 %v8550_v59 }
 0x49f   : > { %v3340_v3 = vmax.f32 %v3109_v44, 0.0  ;;  %4481 = vmatprep.mubr.bf16.mxu1 %v8936_v0  ;;  %4891 = vmatpush1.bf16.msra.mxu1 %v8548_v58 }
 0x4a0   : > { %v3437_v46 = vpack.c.bf16 %v3339_v42, %v3337_v1 }
 0x4a1   : > { %v3112_v4 = vpop.f32.mrb[188].mxu1  ;;  %v3438_v5 = vpack.c.bf16 %v3340_v3, %v3338_v47 }
 0x4a2   : > { %v3113_v6 = vadd.f32 %v3112_v4, %v9665_v39  ;;  %v3114_v7 = vpop.f32.mrb[189].mxu1 }
 0x4a3   : > { %v3115_v8 = vadd.f32 %v3114_v7, %v9668_v60  ;;  %v3116_v9 = vpop.f32.mrb[190].mxu1  ;;  %3846 = vmatprep.mubr.bf16.mxu0 %v3438_v5 }
 0x4a4   : > { %v3117_v10 = vadd.f32 %v3116_v9, %v9665_v39  ;;  %v3118_v11 = vpop.f32.mrb[191].mxu1  ;;  %3847 = vmatmul.mubr.bf16.gmra.mrb[56].mxu0 %v3437_v46  ;;  %v3341_v13 = vmax.f32 %v3113_v6, 0.0  ;;  %v8682_v6 = vld [vmem:[%s9202_s17 + $0x68] sm:$0xff]  }
 0x4a5   : > { %v3119_v12 = vadd.f32 %v3118_v11, %v9668_v60  ;;  %v3342_v16 = vmax.f32 %v3115_v8, 0.0 }
 0x4a6   : > { %v3343_v14 = vmax.f32 %v3117_v10, 0.0  ;;  %4482 = vmatmul.mubr.bf16.gmra.mrb[40].mxu1 %v8679_v15 }
 0x4a7   : > { %v3344_v17 = vmax.f32 %v3119_v12, 0.0  ;;  %4491 = vmatprep.mubr.bf16.mxu1 %v8936_v0 }
 0x4a8   : > { %v3439_v18 = vpack.c.bf16 %v3343_v14, %v3341_v13 }
 0x4a9   : > { %v3122_v19 = vpop.f32.mrb[192].mxu1  ;;  %v3440_v20 = vpack.c.bf16 %v3344_v17, %v3342_v16 }
 0x4aa   : > { %v3123_v23 = vadd.f32 %v3122_v19, %v9665_v39  ;;  %v3124_v24 = vpop.f32.mrb[193].mxu1 }
 0x4ab   : > { %v3125_v25 = vadd.f32 %v3124_v24, %v9668_v60  ;;  %v3126_v26 = vpop.f32.mrb[194].mxu1  ;;  %3856 = vmatprep.mubr.bf16.mxu0 %v3440_v20 }
 0x4ac   : > { %v3127_v27 = vadd.f32 %v3126_v26, %v9665_v39  ;;  %v3128_v28 = vpop.f32.mrb[195].mxu1  ;;  %3857 = vmatmul.mubr.bf16.gmra.mrb[60].mxu0 %v3439_v18  ;;  %v3345_v30 = vmax.f32 %v3123_v23, 0.0  ;;  %v8553_v23 = vld [vmem:[#allocation7 + $0x514] ss:$8 sps:$4 sm:$0xff]   ;;  %v8554_v26 = vld [vmem:[#allocation7 + $0x4f0] ss:$8 sps:$4 sm:$0xff]  }
 0x4ad   : > { %v3129_v29 = vadd.f32 %v3128_v28, %v9668_v60  ;;  %v3346_v34 = vmax.f32 %v3125_v25, 0.0  ;;  %5746 = vmatprep.subr.bf16.mxu0 %v8553_v23 }
 0x4ae   : > { %v3347_v32 = vmax.f32 %v3127_v27, 0.0  ;;  %4492 = vmatmul.mubr.bf16.gmra.mrb[44].mxu1 %v8680_v33  ;;  %v8556_v27 = vld [vmem:[#allocation7 + $0x4f4] ss:$8 sps:$4 sm:$0xff]   ;;  %5747 = vmatpush1.bf16.msra.mxu0 %v8551_v22 }
 0x4af   : > { %v3348_v35 = vmax.f32 %v3129_v29, 0.0  ;;  %4501 = vmatprep.mubr.bf16.mxu1 %v8936_v0  ;;  %4892 = vmatprep.subr.bf16.mxu1 %v8556_v27  ;;  %v8687_v27 = vld [vmem:[%s9202_s17 + $0x90] sm:$0xff]  }
 0x4b0   : > { %v3441_v36 = vpack.c.bf16 %v3347_v32, %v3345_v30  ;;  %4893 = vmatpush1.bf16.msra.mxu1 %v8554_v26 }
 0x4b1   : > { %v3132_v37 = vpop.f32.mrb[196].mxu1  ;;  %v3442_v40 = vpack.c.bf16 %v3348_v35, %v3346_v34  ;;  %7977 = vmatprep.subr.bf16.mxu1 %v8936_v0 }
 0x4b2   : > { %v3133_v41 = vadd.f32 %v3132_v37, %v9665_v39  ;;  %v3134_v43 = vpop.f32.mrb[197].mxu1 }
 0x4b3   : > { %v3135_v45 = vadd.f32 %v3134_v43, %v9668_v60  ;;  %v3136_v48 = vpop.f32.mrb[198].mxu1  ;;  %3866 = vmatprep.mubr.bf16.mxu0 %v3442_v40 }
 0x4b4   : > { %v3137_v49 = vadd.f32 %v3136_v48, %v9665_v39  ;;  %v3138_v50 = vpop.f32.mrb[199].mxu1  ;;  %3867 = vmatmul.mubr.bf16.gmra.mrb[64].mxu0 %v3441_v36  ;;  %v3349_v52 = vmax.f32 %v3133_v41, 0.0 }
 0x4b5   : > { %v3139_v51 = vadd.f32 %v3138_v50, %v9668_v60  ;;  %v3350_v56 = vmax.f32 %v3135_v45, 0.0  ;;  %v8684_v45 = vld [vmem:[%s9202_s17 + $0x78] sm:$0xff]  }
 0x4b6   : > { %v3351_v53 = vmax.f32 %v3137_v49, 0.0  ;;  %4502 = vmatmul.mubr.bf16.gmra.mrb[48].mxu1 %v8681_v54 }
 0x4b7   : > { %v3352_v57 = vmax.f32 %v3139_v51, 0.0  ;;  %4511 = vmatprep.mubr.bf16.mxu1 %v8936_v0 }
 0x4b8   : > { %v3443_v61 = vpack.c.bf16 %v3351_v53, %v3349_v52 }
 0x4b9   : > { %v3142_v62 = vpop.f32.mrb[200].mxu1  ;;  %v3444_v63 = vpack.c.bf16 %v3352_v57, %v3350_v56 }
 0x4ba   : > { %v3143_v44 = vadd.f32 %v3142_v62, %v9665_v39  ;;  %v3144_v1 = vpop.f32.mrb[201].mxu1  ;;  %v8685_v62 = vld [vmem:[%s9202_s17 + $0x80] sm:$0xff]  }
 0x4bb   : > { %v3145_v42 = vadd.f32 %v3144_v1, %v9668_v60  ;;  %v3146_v2 = vpop.f32.mrb[202].mxu1  ;;  %3876 = vmatprep.mubr.bf16.mxu0 %v3444_v63  ;;  %v8557_v63 = vld [vmem:[#allocation7 + $0x520] ss:$8 sps:$4 sm:$0xff]  }
 0x4bc   : > { %v3147_v47 = vadd.f32 %v3146_v2, %v9665_v39  ;;  %v3148_v3 = vpop.f32.mrb[203].mxu1  ;;  %3877 = vmatmul.mubr.bf16.gmra.mrb[68].mxu0 %v3443_v61  ;;  %v3353_v4 = vmax.f32 %v3143_v44, 0.0  ;;  %v8559_v44 = vld [vmem:[#allocation7 + $0x524] ss:$8 sps:$4 sm:$0xff]  }
 0x4bd   : > { %v3149_v46 = vadd.f32 %v3148_v3, %v9668_v60  ;;  %v3354_v7 = vmax.f32 %v3145_v42, 0.0  ;;  %5748 = vmatprep.subr.bf16.mxu0 %v8559_v44 }
 0x4be   : > { %v3355_v5 = vmax.f32 %v3147_v47, 0.0  ;;  %4512 = vmatmul.mubr.bf16.gmra.mrb[52].mxu1 %v8682_v6  ;;  %5749 = vmatpush1.bf16.msra.mxu0 %v8557_v63 }
 0x4bf   : > { %v3356_v8 = vmax.f32 %v3149_v46, 0.0  ;;  %4521 = vmatprep.mubr.bf16.mxu1 %v8936_v0 }
 0x4c0   : > { %v3445_v9 = vpack.c.bf16 %v3355_v5, %v3353_v4 }
 0x4c1   : > { %v3152_v10 = vpop.f32.mrb[204].mxu1  ;;  %v3446_v11 = vpack.c.bf16 %v3356_v8, %v3354_v7 }
 0x4c2   : > { %v3153_v12 = vadd.f32 %v3152_v10, %v9665_v39  ;;  %v3154_v13 = vpop.f32.mrb[205].mxu1 }
 0x4c3   : > { %v3155_v14 = vadd.f32 %v3154_v13, %v9668_v60  ;;  %v3156_v15 = vpop.f32.mrb[206].mxu1  ;;  %3886 = vmatprep.mubr.bf16.mxu0 %v3446_v11 }
 0x4c4   : > { %v3157_v16 = vadd.f32 %v3156_v15, %v9665_v39  ;;  %v3158_v17 = vpop.f32.mrb[207].mxu1  ;;  %3887 = vmatmul.mubr.bf16.gmra.mrb[72].mxu0 %v3445_v9  ;;  %v3357_v19 = vmax.f32 %v3153_v12, 0.0  ;;  %v8686_v12 = vld [vmem:[%s9202_s17 + $0x88] sm:$0xff]  }
 0x4c5   : > { %v3159_v18 = vadd.f32 %v3158_v17, %v9668_v60  ;;  %v3358_v24 = vmax.f32 %v3155_v14, 0.0 }
 0x4c6   : > { %v3359_v20 = vmax.f32 %v3157_v16, 0.0  ;;  %4522 = vmatmul.mubr.bf16.gmra.mrb[56].mxu1 %v8683_v21 }
 0x4c7   : > { %v3360_v25 = vmax.f32 %v3159_v18, 0.0  ;;  %4531 = vmatprep.mubr.bf16.mxu1 %v8936_v0 }
 0x4c8   : > { %v3447_v28 = vpack.c.bf16 %v3359_v20, %v3357_v19 }
 0x4c9   : > { %v3162_v29 = vpop.f32.mrb[208].mxu1  ;;  %v3448_v30 = vpack.c.bf16 %v3360_v25, %v3358_v24 }
 0x4ca   : > { %v3163_v32 = vadd.f32 %v3162_v29, %v9665_v39  ;;  %v3164_v33 = vpop.f32.mrb[209].mxu1  ;;  %v8562_v29 = vld [vmem:[#allocation7 + $0x534] ss:$8 sps:$4 sm:$0xff]  }
 0x4cb   : > { %v3165_v34 = vadd.f32 %v3164_v33, %v9668_v60  ;;  %v3166_v35 = vpop.f32.mrb[210].mxu1  ;;  %3896 = vmatprep.mubr.bf16.mxu0 %v3448_v30  ;;  %5750 = vmatprep.subr.bf16.mxu0 %v8562_v29  ;;  %v8691_v29 = vld [vmem:[#allocation8] sm:$0xff] }
 0x4cc   : > { %v3167_v36 = vadd.f32 %v3166_v35, %v9665_v39  ;;  %v3168_v37 = vpop.f32.mrb[211].mxu1  ;;  %3897 = vmatmul.mubr.bf16.gmra.mrb[76].mxu0 %v3447_v28  ;;  %v3361_v41 = vmax.f32 %v3163_v32, 0.0  ;;  %v8560_v28 = vld [vmem:[#allocation7 + $0x530] ss:$8 sps:$4 sm:$0xff]  }
 0x4cd   : > { %v3169_v40 = vadd.f32 %v3168_v37, %v9668_v60  ;;  %v3362_v48 = vmax.f32 %v3165_v34, 0.0  ;;  %5751 = vmatpush1.bf16.msra.mxu0 %v8560_v28 }
 0x4ce   : > { %v3363_v43 = vmax.f32 %v3167_v36, 0.0  ;;  %4532 = vmatmul.mubr.bf16.gmra.mrb[60].mxu1 %v8684_v45 }
 0x4cf   : > { %v3364_v49 = vmax.f32 %v3169_v40, 0.0  ;;  %4541 = vmatprep.mubr.bf16.mxu1 %v8936_v0 }
 0x4d0   : > { %v3449_v50 = vpack.c.bf16 %v3363_v43, %v3361_v41 }
 0x4d1   : > { %v3172_v51 = vpop.f32.mrb[212].mxu1  ;;  %v3450_v52 = vpack.c.bf16 %v3364_v49, %v3362_v48 }
 0x4d2   : > { %v3173_v53 = vadd.f32 %v3172_v51, %v9665_v39  ;;  %v3174_v54 = vpop.f32.mrb[213].mxu1  ;;  %v8688_v51 = vld [vmem:[%s9202_s17 + $0x98] sm:$0xff]  }
 0x4d3   : > { %v3175_v55 = vadd.f32 %v3174_v54, %v9668_v60  ;;  %v3176_v38 = vpop.f32.mrb[214].mxu1  ;;  %3906 = vmatprep.mubr.bf16.mxu0 %v3450_v52 }
 0x4d4   : > { %v3177_v56 = vadd.f32 %v3176_v38, %v9665_v39  ;;  %v3178_v57 = vpop.f32.mrb[215].mxu1  ;;  %3907 = vmatmul.mubr.bf16.gmra.mrb[80].mxu0 %v3449_v50  ;;  %v3365_v59 = vmax.f32 %v3173_v53, 0.0 }
 0x4d5   : > { %v3179_v58 = vadd.f32 %v3178_v57, %v9668_v60  ;;  %v3366_v1 = vmax.f32 %v3175_v55, 0.0 }
 0x4d6   : > { %v3367_v61 = vmax.f32 %v3177_v56, 0.0  ;;  %4542 = vmatmul.mubr.bf16.gmra.mrb[64].mxu1 %v8685_v62 }
 0x4d7   : > { %v3368_v42 = vmax.f32 %v3179_v58, 0.0  ;;  %4551 = vmatprep.mubr.bf16.mxu1 %v8936_v0 }
 0x4d8   : > { %v3451_v2 = vpack.c.bf16 %v3367_v61, %v3365_v59 }
 0x4d9   : > { %v3182_v47 = vpop.f32.mrb[216].mxu1  ;;  %v3452_v3 = vpack.c.bf16 %v3368_v42, %v3366_v1  ;;  %v8689_v42 = vld [vmem:[%s9202_s17 + $0xa0] sm:$0xff]  }
 0x4da   : > { %v3183_v46 = vadd.f32 %v3182_v47, %v9665_v39  ;;  %v3184_v4 = vpop.f32.mrb[217].mxu1  ;;  %v8565_v47 = vld [vmem:[#allocation7 + $0x544] ss:$8 sps:$4 sm:$0xff]  }
 0x4db   : > { %v3185_v5 = vadd.f32 %v3184_v4, %v9668_v60  ;;  %v3186_v6 = vpop.f32.mrb[218].mxu1  ;;  %3916 = vmatprep.mubr.bf16.mxu0 %v3452_v3  ;;  %5752 = vmatprep.subr.bf16.mxu0 %v8565_v47 }
 0x4dc   : > { %v3187_v7 = vadd.f32 %v3186_v6, %v9665_v39  ;;  %v3188_v8 = vpop.f32.mrb[219].mxu1  ;;  %3917 = vmatmul.mubr.bf16.gmra.mrb[84].mxu0 %v3451_v2  ;;  %v3369_v10 = vmax.f32 %v3183_v46, 0.0  ;;  %v8563_v2 = vld [vmem:[#allocation7 + $0x540] ss:$8 sps:$4 sm:$0xff]  }
 0x4dd   : > { %v3189_v9 = vadd.f32 %v3188_v8, %v9668_v60  ;;  %v3370_v13 = vmax.f32 %v3185_v5, 0.0  ;;  %5753 = vmatpush1.bf16.msra.mxu0 %v8563_v2 }
 0x4de   : > { %v3371_v11 = vmax.f32 %v3187_v7, 0.0  ;;  %4552 = vmatmul.mubr.bf16.gmra.mrb[68].mxu1 %v8686_v12 }
 0x4df   : > { %v3372_v14 = vmax.f32 %v3189_v9, 0.0  ;;  %4561 = vmatprep.mubr.bf16.mxu1 %v8936_v0 }
 0x4e0   : > { %v3453_v15 = vpack.c.bf16 %v3371_v11, %v3369_v10 }
 0x4e1   : > { %v3192_v16 = vpop.f32.mrb[220].mxu1  ;;  %v3454_v17 = vpack.c.bf16 %v3372_v14, %v3370_v13 }
 0x4e2   : > { %v3193_v18 = vadd.f32 %v3192_v16, %v9665_v39  ;;  %v3194_v19 = vpop.f32.mrb[221].mxu1  ;;  %v8690_v16 = vld [vmem:[%s9202_s17 + $0xa8] sm:$0xff]  }
 0x4e3   : > { %v3195_v20 = vadd.f32 %v3194_v19, %v9668_v60  ;;  %v3196_v21 = vpop.f32.mrb[222].mxu1  ;;  %3926 = vmatprep.mubr.bf16.mxu0 %v3454_v17 }
 0x4e4   : > { %v3197_v22 = vadd.f32 %v3196_v21, %v9665_v39  ;;  %v3198_v23 = vpop.f32.mrb[223].mxu1  ;;  %3927 = vmatmul.mubr.bf16.gmra.mrb[88].mxu0 %v3453_v15  ;;  %v3373_v25 = vmax.f32 %v3193_v18, 0.0 }
 0x4e5   : > { %v3199_v24 = vadd.f32 %v3198_v23, %v9668_v60  ;;  %v3374_v30 = vmax.f32 %v3195_v20, 0.0  ;;  %v3508_v20 = vsub.s32 4, %v9268_v31 }
 0x4e6   : > { %v3375_v26 = vmax.f32 %v3197_v22, 0.0  ;;  %4562 = vmatmul.mubr.bf16.gmra.mrb[72].mxu1 %v8687_v27 }
 0x4e7   : > { %v3376_v32 = vmax.f32 %v3199_v24, 0.0  ;;  %4571 = vmatprep.mubr.bf16.mxu1 %v8936_v0 }
 0x4e8   : > { %v3455_v33 = vpack.c.bf16 %v3375_v26, %v3373_v25 }
 0x4e9   : > { %v3202_v34 = vpop.f32.mrb[224].mxu1  ;;  %v3456_v35 = vpack.c.bf16 %v3376_v32, %v3374_v30  ;;  %v9844_v30 = vrot.slane %v8691_v29, %v3508_v20 }
 0x4ea   : > { %v3203_v36 = vadd.f32 %v3202_v34, %v9665_v39  ;;  %v3204_v37 = vpop.f32.mrb[225].mxu1 }
 0x4eb   : > { %v3205_v40 = vadd.f32 %v3204_v37, %v9668_v60  ;;  %v3206_v41 = vpop.f32.mrb[226].mxu1  ;;  %3936 = vmatprep.mubr.bf16.mxu0 %v3456_v35  ;;  %v8693_v37 = vld [vmem:[%s9202_s17 + $0xb0] sm:$0xff]  }
 0x4ec   : > { %v3207_v43 = vadd.f32 %v3206_v41, %v9665_v39  ;;  %v3208_v45 = vpop.f32.mrb[227].mxu1  ;;  %3937 = vmatmul.mubr.bf16.gmra.mrb[92].mxu0 %v3455_v33  ;;  %v3377_v49 = vmax.f32 %v3203_v36, 0.0  ;;  %v8692_v33 = vld [vmem:[#allocation8 + $0x8] sm:$0xff]  ;;  %v8568_v41 = vld [vmem:[#allocation7 + $0x554] ss:$8 sps:$4 sm:$0xff]  }
 0x4ed   : > { %v3209_v48 = vadd.f32 %v3208_v45, %v9668_v60  ;;  %v3378_v52 = vmax.f32 %v3205_v40, 0.0  ;;  %v9847_v34 = vrot.slane %v8692_v33, %v3508_v20  ;;  %v8566_v40 = vld [vmem:[#allocation7 + $0x550] ss:$8 sps:$4 sm:$0xff]   ;;  %5754 = vmatprep.subr.bf16.mxu0 %v8568_v41  ;;  %v8569_v41 = vld [vmem:[#allocation7 + $0x560] ss:$8 sps:$4 sm:$0xff]  }
 0x4ee   : > { %v3379_v50 = vmax.f32 %v3207_v43, 0.0  ;;  %4572 = vmatmul.mubr.bf16.gmra.mrb[76].mxu1 %v8688_v51  ;;  %5755 = vmatpush1.bf16.msra.mxu0 %v8566_v40  ;;  %v8695_v40 = vld [vmem:[%s9202_s17 + $0xc0] sm:$0xff]  }
 0x4ef   : > { %v3380_v53 = vmax.f32 %v3209_v48, 0.0  ;;  %4581 = vmatprep.mubr.bf16.mxu1 %v8936_v0 }
 0x4f0   : > { %v3457_v54 = vpack.c.bf16 %v3379_v50, %v3377_v49 }
 0x4f1   : > { %v3212_v55 = vpop.f32.mrb[228].mxu1  ;;  %v3458_v38 = vpack.c.bf16 %v3380_v53, %v3378_v52 }
 0x4f2   : > { %v3213_v56 = vadd.f32 %v3212_v55, %v9665_v39  ;;  %v3214_v57 = vpop.f32.mrb[229].mxu1 }
 0x4f3   : > { %v3215_v58 = vadd.f32 %v3214_v57, %v9668_v60  ;;  %v3216_v59 = vpop.f32.mrb[230].mxu1  ;;  %3946 = vmatprep.mubr.bf16.mxu0 %v3458_v38 }
 0x4f4   : > { %v3217_v61 = vadd.f32 %v3216_v59, %v9665_v39  ;;  %v3218_v62 = vpop.f32.mrb[231].mxu1  ;;  %3947 = vmatmul.mubr.bf16.gmra.mrb[96].mxu0 %v3457_v54  ;;  %v3381_v44 = vmax.f32 %v3213_v56, 0.0 }
 0x4f5   : > { %v3219_v63 = vadd.f32 %v3218_v62, %v9668_v60  ;;  %v3382_v3 = vmax.f32 %v3215_v58, 0.0 }
 0x4f6   : > { %v3383_v1 = vmax.f32 %v3217_v61, 0.0  ;;  %4582 = vmatmul.mubr.bf16.gmra.mrb[80].mxu1 %v8689_v42 }
 0x4f7   : > { %v3384_v46 = vmax.f32 %v3219_v63, 0.0  ;;  %4591 = vmatprep.mubr.bf16.mxu1 %v8936_v0 }
 0x4f8   : > { %v3459_v4 = vpack.c.bf16 %v3383_v1, %v3381_v44 }
 0x4f9   : > { %v3222_v5 = vpop.f32.mrb[232].mxu1  ;;  %v3460_v6 = vpack.c.bf16 %v3384_v46, %v3382_v3 }
 0x4fa   : > { %v3223_v7 = vadd.f32 %v3222_v5, %v9665_v39  ;;  %v3224_v8 = vpop.f32.mrb[233].mxu1 }
 0x4fb   : > { %v3225_v9 = vadd.f32 %v3224_v8, %v9668_v60  ;;  %v3226_v10 = vpop.f32.mrb[234].mxu1  ;;  %3956 = vmatprep.mubr.bf16.mxu0 %v3460_v6  ;;  %v8694_v6 = vld [vmem:[%s9202_s17 + $0xb8] sm:$0xff]  }
 0x4fc   : > { %v3227_v11 = vadd.f32 %v3226_v10, %v9665_v39  ;;  %v3228_v12 = vpop.f32.mrb[235].mxu1  ;;  %3957 = vmatmul.mubr.bf16.gmra.mrb[100].mxu0 %v3459_v4  ;;  %v3385_v14 = vmax.f32 %v3223_v7, 0.0 }
 0x4fd   : > { %v3229_v13 = vadd.f32 %v3228_v12, %v9668_v60  ;;  %v3386_v17 = vmax.f32 %v3225_v9, 0.0 }
 0x4fe   : > { %v3387_v15 = vmax.f32 %v3227_v11, 0.0  ;;  %4592 = vmatmul.mubr.bf16.gmra.mrb[84].mxu1 %v8690_v16 }
 0x4ff   : > { %v3388_v18 = vmax.f32 %v3229_v13, 0.0  ;;  %4601 = vmatprep.mubr.bf16.mxu1 %v8936_v0 }
 0x500   : > { %v3461_v19 = vpack.c.bf16 %v3387_v15, %v3385_v14 }
 0x501   : > { %v3232_v21 = vpop.f32.mrb[236].mxu1  ;;  %v3462_v22 = vpack.c.bf16 %v3388_v18, %v3386_v17 }
 0x502   : > { %v3233_v23 = vadd.f32 %v3232_v21, %v9665_v39  ;;  %v3234_v24 = vpop.f32.mrb[237].mxu1 }
 0x503   : > { %v3235_v25 = vadd.f32 %v3234_v24, %v9668_v60  ;;  %v3236_v26 = vpop.f32.mrb[238].mxu1  ;;  %3966 = vmatprep.mubr.bf16.mxu0 %v3462_v22 }
 0x504   : > { %v3237_v27 = vadd.f32 %v3236_v26, %v9665_v39  ;;  %v3238_v28 = vpop.f32.mrb[239].mxu1  ;;  %3967 = vmatmul.mubr.bf16.gmra.mrb[104].mxu0 %v3461_v19  ;;  %v3389_v35 = vmax.f32 %v3233_v23, 0.0 }
 0x505   : > { %v3239_v32 = vadd.f32 %v3238_v28, %v9668_v60  ;;  %v3390_v43 = vmax.f32 %v3235_v25, 0.0 }
 0x506   : > { %v3391_v36 = vmax.f32 %v3237_v27, 0.0  ;;  %4602 = vmatmul.mubr.bf16.gmra.mrb[88].mxu1 %v8693_v37 }
 0x507   : > { %v3392_v45 = vmax.f32 %v3239_v32, 0.0  ;;  %v3708_v48 = vpop.f32.mrb[0].mxu0  ;;  %4611 = vmatprep.mubr.bf16.mxu1 %v8936_v0 }
 0x508   : > { %v3463_v49 = vpack.c.bf16 %v3391_v36, %v3389_v35  ;;  %v3709_v50 = vadd.f32 %v3708_v48, %v9844_v30  ;;  %v3710_v51 = vpop.f32.mrb[1].mxu0 }
 0x509   : > { %v3711_v52 = vadd.f32 %v3710_v51, %v9847_v34  ;;  %v3242_v53 = vpop.f32.mrb[240].mxu1  ;;  %v3712_v54 = vpop.f32.mrb[2].mxu0  ;;  %v3464_v55 = vpack.c.bf16 %v3392_v45, %v3390_v43  ;;  %v8571_v43 = vld [vmem:[#allocation7 + $0x564] ss:$8 sps:$4 sm:$0xff]  }
 0x50a   : > { %v3243_v38 = vadd.f32 %v3242_v53, %v9665_v39  ;;  %v3713_v56 = vadd.f32 %v3712_v54, %v9844_v30  ;;  %v3244_v57 = vpop.f32.mrb[241].mxu1  ;;  %v3714_v58 = vpop.f32.mrb[3].mxu0  ;;  %v4027_v63 = vmax.f32 %v3709_v50, 0.0  ;;  %5756 = vmatprep.subr.bf16.mxu0 %v8571_v43 }
 0x50b   : > { %v3245_v59 = vadd.f32 %v3244_v57, %v9668_v60  ;;  %v3715_v61 = vadd.f32 %v3714_v58, %v9847_v34  ;;  %v3246_v62 = vpop.f32.mrb[242].mxu1  ;;  %3976 = vmatprep.mubr.bf16.mxu0 %v3464_v55  ;;  %v4028_v2 = vmax.f32 %v3711_v52, 0.0  ;;  %5757 = vmatpush1.bf16.msra.mxu0 %v8569_v41 }
 0x50c   : > { %v4029_v44 = vmax.f32 %v3713_v56, 0.0  ;;  %v3247_v1 = vadd.f32 %v3246_v62, %v9665_v39  ;;  %v3248_v42 = vpop.f32.mrb[243].mxu1  ;;  %3977 = vmatmul.mubr.bf16.gmra.mrb[108].mxu0 %v3463_v49  ;;  %v3393_v46 = vmax.f32 %v3243_v38, 0.0 }
 0x50d   : > { %v4030_v47 = vmax.f32 %v3715_v61, 0.0  ;;  %v3249_v3 = vadd.f32 %v3248_v42, %v9668_v60  ;;  %v3394_v7 = vmax.f32 %v3245_v59, 0.0 }
 0x50e   : > { %v9859_v4 = vpack.c.bf16 %v4029_v44, %v4027_v63  ;;  %v3395_v5 = vmax.f32 %v3247_v1, 0.0  ;;  %4612 = vmatmul.mubr.bf16.gmra.mrb[92].mxu1 %v8694_v6 }
 0x50f   : > { %v3396_v8 = vmax.f32 %v3249_v3, 0.0  ;;  %v3718_v9 = vpop.f32.mrb[4].mxu0  ;;  %4621 = vmatprep.mubr.bf16.mxu1 %v8936_v0  ;;  %v9863_v10 = vpack.c.bf16 %v4030_v47, %v4028_v2 }
 0x510   : > { %v3465_v11 = vpack.c.bf16 %v3395_v5, %v3393_v46  ;;  %v3719_v12 = vadd.f32 %v3718_v9, %v9844_v30  ;;  %v3720_v13 = vpop.f32.mrb[5].mxu0  ;;  %v8696_v9 = vld [vmem:[%s9202_s17 + $0xc8] sm:$0xff]  }
 0x511   : > { %v3721_v14 = vadd.f32 %v3720_v13, %v9847_v34  ;;  %v3252_v15 = vpop.f32.mrb[244].mxu1  ;;  %v3722_v16 = vpop.f32.mrb[6].mxu0  ;;  %v3466_v17 = vpack.c.bf16 %v3396_v8, %v3394_v7 }
 0x512   : > { %v3253_v18 = vadd.f32 %v3252_v15, %v9665_v39  ;;  %v3723_v19 = vadd.f32 %v3722_v16, %v9844_v30  ;;  %v3254_v20 = vpop.f32.mrb[245].mxu1  ;;  %v3724_v21 = vpop.f32.mrb[7].mxu0  ;;  %v4031_v25 = vmax.f32 %v3719_v12, 0.0 }
 0x513   : > { %v3255_v22 = vadd.f32 %v3254_v20, %v9668_v60  ;;  %v3725_v23 = vadd.f32 %v3724_v21, %v9847_v34  ;;  %v3256_v24 = vpop.f32.mrb[246].mxu1  ;;  %3986 = vmatprep.mubr.bf16.mxu0 %v3466_v17  ;;  %v4032_v29 = vmax.f32 %v3721_v14, 0.0 }
 0x514   : > { %v4033_v26 = vmax.f32 %v3723_v19, 0.0  ;;  %v3257_v27 = vadd.f32 %v3256_v24, %v9665_v39  ;;  %v3258_v28 = vpop.f32.mrb[247].mxu1  ;;  %3987 = vmatmul.mubr.bf16.gmra.mrb[112].mxu0 %v3465_v11  ;;  %v3397_v35 = vmax.f32 %v3253_v18, 0.0 }
 0x515   : > { %v4034_v32 = vmax.f32 %v3725_v23, 0.0  ;;  %v3259_v33 = vadd.f32 %v3258_v28, %v9668_v60  ;;  %v3398_v45 = vmax.f32 %v3255_v22, 0.0 }
 0x516   : > { %v9873_v36 = vpack.c.bf16 %v4033_v26, %v4031_v25  ;;  %v3399_v37 = vmax.f32 %v3257_v27, 0.0  ;;  %4622 = vmatmul.mubr.bf16.gmra.mrb[96].mxu1 %v8695_v40 }
 0x517   : > { %v3400_v48 = vmax.f32 %v3259_v33, 0.0  ;;  %v3728_v49 = vpop.f32.mrb[8].mxu0  ;;  %4631 = vmatprep.mubr.bf16.mxu1 %v8936_v0  ;;  %v9877_v50 = vpack.c.bf16 %v4034_v32, %v4032_v29 }
 0x518   : > { %v3467_v51 = vpack.c.bf16 %v3399_v37, %v3397_v35  ;;  %v3729_v52 = vadd.f32 %v3728_v49, %v9844_v30  ;;  %v3730_v53 = vpop.f32.mrb[9].mxu0  ;;  %v8697_v49 = vld [vmem:[%s9202_s17 + $0xd0] sm:$0xff]  }
 0x519   : > { %v3731_v54 = vadd.f32 %v3730_v53, %v9847_v34  ;;  %v3262_v55 = vpop.f32.mrb[248].mxu1  ;;  %v3732_v38 = vpop.f32.mrb[10].mxu0  ;;  %v3468_v56 = vpack.c.bf16 %v3400_v48, %v3398_v45 }
 0x51a   : > { %v3263_v57 = vadd.f32 %v3262_v55, %v9665_v39  ;;  %v3733_v58 = vadd.f32 %v3732_v38, %v9844_v30  ;;  %v3264_v59 = vpop.f32.mrb[249].mxu1  ;;  %v3734_v61 = vpop.f32.mrb[11].mxu0  ;;  %v4035_v1 = vmax.f32 %v3729_v52, 0.0  ;;  %v8574_v52 = vld [vmem:[#allocation7 + $0x574] ss:$8 sps:$4 sm:$0xff]  }
 0x51b   : > { %v3265_v62 = vadd.f32 %v3264_v59, %v9668_v60  ;;  %v3735_v63 = vadd.f32 %v3734_v61, %v9847_v34  ;;  %v3266_v44 = vpop.f32.mrb[250].mxu1  ;;  %3996 = vmatprep.mubr.bf16.mxu0 %v3468_v56  ;;  %v4036_v3 = vmax.f32 %v3731_v54, 0.0  ;;  %5758 = vmatprep.subr.bf16.mxu0 %v8574_v52 }
 0x51c   : > { %v4037_v42 = vmax.f32 %v3733_v58, 0.0  ;;  %v3267_v2 = vadd.f32 %v3266_v44, %v9665_v39  ;;  %v3268_v47 = vpop.f32.mrb[251].mxu1  ;;  %3997 = vmatmul.mubr.bf16.gmra.mrb[116].mxu0 %v3467_v51  ;;  %v3401_v6 = vmax.f32 %v3263_v57, 0.0  ;;  %v8572_v51 = vld [vmem:[#allocation7 + $0x570] ss:$8 sps:$4 sm:$0xff]  }
 0x51d   : > { %v4038_v46 = vmax.f32 %v3735_v63, 0.0  ;;  %v3269_v5 = vadd.f32 %v3268_v47, %v9668_v60  ;;  %v3402_v11 = vmax.f32 %v3265_v62, 0.0  ;;  %5759 = vmatpush1.bf16.msra.mxu0 %v8572_v51 }
 0x51e   : > { %v9887_v7 = vpack.c.bf16 %v4037_v42, %v4035_v1  ;;  %v3403_v8 = vmax.f32 %v3267_v2, 0.0  ;;  %4632 = vmatmul.mubr.bf16.gmra.mrb[100].mxu1 %v8696_v9 }
 0x51f   : > { %v3404_v12 = vmax.f32 %v3269_v5, 0.0  ;;  %v3738_v13 = vpop.f32.mrb[12].mxu0  ;;  %4641 = vmatprep.mubr.bf16.mxu1 %v8936_v0  ;;  %v9891_v14 = vpack.c.bf16 %v4038_v46, %v4036_v3  ;;  %v8698_v3 = vld [vmem:[%s9202_s17 + $0xd8] sm:$0xff]  }
 0x520   : > { %v3469_v15 = vpack.c.bf16 %v3403_v8, %v3401_v6  ;;  %v3739_v16 = vadd.f32 %v3738_v13, %v9844_v30  ;;  %v3740_v17 = vpop.f32.mrb[13].mxu0 }
 0x521   : > { %v3470_v18 = vpack.c.bf16 %v3404_v12, %v3402_v11  ;;  %v3741_v19 = vadd.f32 %v3740_v17, %v9847_v34  ;;  %v3272_v20 = vpop.f32.mrb[252].mxu1  ;;  %v3742_v21 = vpop.f32.mrb[14].mxu0 }
 0x522   : > { %v3273_v22 = vadd.f32 %v3272_v20, %v9665_v39  ;;  %v3743_v23 = vadd.f32 %v3742_v21, %v9844_v30  ;;  %v3274_v24 = vpop.f32.mrb[253].mxu1  ;;  %v3744_v25 = vpop.f32.mrb[15].mxu0  ;;  %v4039_v29 = vmax.f32 %v3739_v16, 0.0  ;;  %v8699_v21 = vld [vmem:[%s9202_s17 + $0xe0] sm:$0xff]  }
 0x523   : > { %v3275_v26 = vadd.f32 %v3274_v24, %v9668_v60  ;;  %v3745_v27 = vadd.f32 %v3744_v25, %v9847_v34  ;;  %v3276_v28 = vpop.f32.mrb[254].mxu1  ;;  %4006 = vmatprep.mubr.bf16.mxu0 %v3470_v18  ;;  %v4040_v37 = vmax.f32 %v3741_v19, 0.0 }
 0x524   : > { %v4041_v32 = vmax.f32 %v3743_v23, 0.0  ;;  %v3277_v33 = vadd.f32 %v3276_v28, %v9665_v39  ;;  %v3278_v35 = vpop.f32.mrb[255].mxu1  ;;  %4007 = vmatmul.mubr.bf16.gmra.mrb[120].mxu0 %v3469_v15  ;;  %v3405_v43 = vmax.f32 %v3273_v22, 0.0  ;;  %v8575_v22 = vld [vmem:[#allocation7 + $0x580] ss:$8 sps:$4 sm:$0xff]  }
 0x525   : > { %v4042_v40 = vmax.f32 %v3745_v27, 0.0  ;;  %v3279_v41 = vadd.f32 %v3278_v35, %v9668_v60  ;;  %v3406_v53 = vmax.f32 %v3275_v26, 0.0  ;;  %v8577_v23 = vld [vmem:[#allocation7 + $0x584] ss:$8 sps:$4 sm:$0xff]  }
 0x526   : > { %v9901_v45 = vpack.c.bf16 %v4041_v32, %v4039_v29  ;;  %v3407_v48 = vmax.f32 %v3277_v33, 0.0  ;;  %4642 = vmatmul.mubr.bf16.gmra.mrb[104].mxu1 %v8697_v49  ;;  %5760 = vmatprep.subr.bf16.mxu0 %v8577_v23  ;;  %v8700_v49 = vld [vmem:[%s9202_s17 + $0xe8] sm:$0xff]  }
 0x527   : > { %v3408_v54 = vmax.f32 %v3279_v41, 0.0  ;;  %v3748_v55 = vpop.f32.mrb[16].mxu0  ;;  %4651 = vmatprep.mubr.bf16.mxu1 %v8936_v0  ;;  %v9905_v39 = vpack.c.bf16 %v4042_v40, %v4040_v37  ;;  %5761 = vmatpush1.bf16.msra.mxu0 %v8575_v22 }
 0x528   : > { %v3471_v38 = vpack.c.bf16 %v3407_v48, %v3405_v43  ;;  %v3749_v56 = vadd.f32 %v3748_v55, %v9844_v30  ;;  %v3750_v57 = vpop.f32.mrb[17].mxu0 }
 0x529   : > { %v3472_v60 = vpack.c.bf16 %v3408_v54, %v3406_v53  ;;  %v3751_v58 = vadd.f32 %v3750_v57, %v9847_v34  ;;  %v3752_v59 = vpop.f32.mrb[18].mxu0 }
 0x52a   : > { %v3753_v61 = vadd.f32 %v3752_v59, %v9844_v30  ;;  %v3754_v62 = vpop.f32.mrb[19].mxu0  ;;  %v4043_v44 = vmax.f32 %v3749_v56, 0.0 }
 0x52b   : > { %v3755_v63 = vadd.f32 %v3754_v62, %v9847_v34  ;;  %4016 = vmatprep.mubr.bf16.mxu0 %v3472_v60  ;;  %v4044_v42 = vmax.f32 %v3751_v58, 0.0 }
 0x52c   : > { %v4045_v1 = vmax.f32 %v3753_v61, 0.0  ;;  %4017 = vmatmul.mubr.bf16.gmra.mrb[124].mxu0 %v3471_v38 }
 0x52d   : > { %v4046_v2 = vmax.f32 %v3755_v63, 0.0 }
 0x52e   : > { %v9911_v47 = vpack.c.bf16 %v4045_v1, %v4043_v44  ;;  %4652 = vmatmul.mubr.bf16.gmra.mrb[108].mxu1 %v8698_v3  ;;  %v8701_v44 = vld [vmem:[%s9202_s17 + $0xf0] sm:$0xff]  }
 0x52f   : > { %v3758_v46 = vpop.f32.mrb[20].mxu0  ;;  %4661 = vmatprep.mubr.bf16.mxu1 %v8936_v0  ;;  %v9915_v5 = vpack.c.bf16 %v4046_v2, %v4044_v42  ;;  %v8578_v1 = vld [vmem:[#allocation7 + $0x590] ss:$8 sps:$4 sm:$0xff]   ;;  %v8580_v42 = vld [vmem:[#allocation7 + $0x594] ss:$8 sps:$4 sm:$0xff]  }
 0x530   : > { %v3759_v6 = vadd.f32 %v3758_v46, %v9844_v30  ;;  %v3760_v8 = vpop.f32.mrb[21].mxu0  ;;  %5762 = vmatprep.subr.bf16.mxu0 %v8580_v42 }
 0x531   : > { %v3761_v9 = vadd.f32 %v3760_v8, %v9847_v34  ;;  %v3762_v11 = vpop.f32.mrb[22].mxu0  ;;  %5763 = vmatpush1.bf16.msra.mxu0 %v8578_v1 }
 0x532   : > { %v3763_v12 = vadd.f32 %v3762_v11, %v9844_v30  ;;  %v3764_v13 = vpop.f32.mrb[23].mxu0  ;;  %v4047_v16 = vmax.f32 %v3759_v6, 0.0 }
 0x533   : > { %v3765_v15 = vadd.f32 %v3764_v13, %v9847_v34  ;;  %v4048_v18 = vmax.f32 %v3761_v9, 0.0 }
 0x534   : > { %v4049_v17 = vmax.f32 %v3763_v12, 0.0 }
 0x535   : > { %v4050_v19 = vmax.f32 %v3765_v15, 0.0 }
 0x536   : > { %v9921_v20 = vpack.c.bf16 %v4049_v17, %v4047_v16  ;;  %4662 = vmatmul.mubr.bf16.gmra.mrb[112].mxu1 %v8699_v21  ;;  %v8702_v21 = vld [vmem:[%s9202_s17 + $0xf8] sm:$0xff]  }
 0x537   : > { %v3768_v24 = vpop.f32.mrb[24].mxu0  ;;  %4671 = vmatprep.mubr.bf16.mxu1 %v8936_v0  ;;  %v9925_v25 = vpack.c.bf16 %v4050_v19, %v4048_v18 }
 0x538   : > { %v3769_v26 = vadd.f32 %v3768_v24, %v9844_v30  ;;  %v3770_v27 = vpop.f32.mrb[25].mxu0 }
 0x539   : > { %v3771_v28 = vadd.f32 %v3770_v27, %v9847_v34  ;;  %v3772_v29 = vpop.f32.mrb[26].mxu0 }
 0x53a   : > { %v3773_v32 = vadd.f32 %v3772_v29, %v9844_v30  ;;  %v3774_v33 = vpop.f32.mrb[27].mxu0  ;;  %v4051_v37 = vmax.f32 %v3769_v26, 0.0 }
 0x53b   : > { %v3775_v35 = vadd.f32 %v3774_v33, %v9847_v34  ;;  %v4052_v41 = vmax.f32 %v3771_v28, 0.0 }
 0x53c   : > { %v4053_v40 = vmax.f32 %v3773_v32, 0.0 }
 0x53d   : > { %v4054_v43 = vmax.f32 %v3775_v35, 0.0 }
 0x53e   : > { %v9931_v48 = vpack.c.bf16 %v4053_v40, %v4051_v37  ;;  %4672 = vmatmul.mubr.bf16.gmra.mrb[116].mxu1 %v8700_v49  ;;  %v8583_v49 = vld [vmem:[#allocation7 + $0x5a4] ss:$8 sps:$4 sm:$0xff]  }
 0x53f   : > { %v3778_v51 = vpop.f32.mrb[28].mxu0  ;;  %4681 = vmatprep.mubr.bf16.mxu1 %v8936_v0  ;;  %v9935_v52 = vpack.c.bf16 %v4054_v43, %v4052_v41  ;;  %5764 = vmatprep.subr.bf16.mxu0 %v8583_v49 }
 0x540   : > { %v3779_v53 = vadd.f32 %v3778_v51, %v9844_v30  ;;  %v3780_v54 = vpop.f32.mrb[29].mxu0 }
 0x541   : > { %v3781_v55 = vadd.f32 %v3780_v54, %v9847_v34  ;;  %v3782_v38 = vpop.f32.mrb[30].mxu0 }
 0x542   : > { %v3783_v56 = vadd.f32 %v3782_v38, %v9844_v30  ;;  %v3784_v57 = vpop.f32.mrb[31].mxu0  ;;  %v4055_v58 = vmax.f32 %v3779_v53, 0.0 }
 0x543   : > { %v3785_v60 = vadd.f32 %v3784_v57, %v9847_v34  ;;  %v4056_v61 = vmax.f32 %v3781_v55, 0.0 }
 0x544   : > { %v4057_v59 = vmax.f32 %v3783_v56, 0.0 }
 0x545   : > { %v4058_v62 = vmax.f32 %v3785_v60, 0.0 }
 0x546   : > { %v9941_v63 = vpack.c.bf16 %v4057_v59, %v4055_v58  ;;  %4682 = vmatmul.mubr.bf16.gmra.mrb[120].mxu1 %v8701_v44 }
 0x547   : > { %v3788_v2 = vpop.f32.mrb[32].mxu0  ;;  %4691 = vmatprep.mubr.bf16.mxu1 %v8936_v0  ;;  %v9945_v3 = vpack.c.bf16 %v4058_v62, %v4056_v61 }
 0x548   : > { %v3789_v46 = vadd.f32 %v3788_v2, %v9844_v30  ;;  %v3790_v6 = vpop.f32.mrb[33].mxu0 }
 0x549   : > { %v3791_v8 = vadd.f32 %v3790_v6, %v9847_v34  ;;  %v3792_v9 = vpop.f32.mrb[34].mxu0 }
 0x54a   : > { %v3793_v11 = vadd.f32 %v3792_v9, %v9844_v30  ;;  %v3794_v12 = vpop.f32.mrb[35].mxu0  ;;  %v4059_v15 = vmax.f32 %v3789_v46, 0.0 }
 0x54b   : > { %v3795_v13 = vadd.f32 %v3794_v12, %v9847_v34  ;;  %v4060_v17 = vmax.f32 %v3791_v8, 0.0 }
 0x54c   : > { %v4061_v16 = vmax.f32 %v3793_v11, 0.0 }
 0x54d   : > { %v4062_v18 = vmax.f32 %v3795_v13, 0.0 }
 0x54e   : > { %v9951_v19 = vpack.c.bf16 %v4061_v16, %v4059_v15  ;;  %4692 = vmatmul.mubr.bf16.gmra.mrb[124].mxu1 %v8702_v21 }
 0x54f   : > { %v3798_v22 = vpop.f32.mrb[36].mxu0  ;;  %4894 = vmatprep.mubr.bf16.mxu1 %v9863_v10  ;;  %v9955_v23 = vpack.c.bf16 %v4062_v18, %v4060_v17  ;;  %v8581_v10 = vld [vmem:[#allocation7 + $0x5a0] ss:$8 sps:$4 sm:$0xff]   ;;  %v8586_v17 = vld [vmem:[#allocation7 + $0x5b4] ss:$8 sps:$4 sm:$0xff]  }
 0x550   : > { %v3799_v24 = vadd.f32 %v3798_v22, %v9844_v30  ;;  %v3800_v26 = vpop.f32.mrb[37].mxu0  ;;  %5765 = vmatpush1.bf16.msra.mxu0 %v8581_v10 }
 0x551   : > { %v3801_v27 = vadd.f32 %v3800_v26, %v9847_v34  ;;  %v3802_v28 = vpop.f32.mrb[38].mxu0  ;;  %5766 = vmatprep.subr.bf16.mxu0 %v8586_v17 }
 0x552   : > { %v3803_v29 = vadd.f32 %v3802_v28, %v9844_v30  ;;  %v3804_v32 = vpop.f32.mrb[39].mxu0  ;;  %v4063_v35 = vmax.f32 %v3799_v24, 0.0 }
 0x553   : > { %v3805_v33 = vadd.f32 %v3804_v32, %v9847_v34  ;;  %v4064_v40 = vmax.f32 %v3801_v27, 0.0 }
 0x554   : > { %v4065_v37 = vmax.f32 %v3803_v29, 0.0 }
 0x555   : > { %v4066_v41 = vmax.f32 %v3805_v33, 0.0 }
 0x556   : > { %v9961_v43 = vpack.c.bf16 %v4065_v37, %v4063_v35  ;;  %4895 = vmatmul.mubr.bf16.vlgmr.msra.gmra.mrb[0].mxu1 %v9859_v4 }
 0x557   : > { %v3808_v51 = vpop.f32.mrb[40].mxu0  ;;  %4904 = vmatprep.mubr.bf16.mxu1 %v9877_v50  ;;  %v9965_v53 = vpack.c.bf16 %v4066_v41, %v4064_v40 }
 0x558   : > { %v3809_v54 = vadd.f32 %v3808_v51, %v9844_v30  ;;  %v3810_v55 = vpop.f32.mrb[41].mxu0 }
 0x559   : > { %v3811_v38 = vadd.f32 %v3810_v55, %v9847_v34  ;;  %v3812_v56 = vpop.f32.mrb[42].mxu0 }
 0x55a   : > { %v3813_v57 = vadd.f32 %v3812_v56, %v9844_v30  ;;  %v3814_v60 = vpop.f32.mrb[43].mxu0  ;;  %v4067_v58 = vmax.f32 %v3809_v54, 0.0 }
 0x55b   : > { %v3815_v4 = vadd.f32 %v3814_v60, %v9847_v34  ;;  %v4068_v61 = vmax.f32 %v3811_v38, 0.0 }
 0x55c   : > { %v4069_v59 = vmax.f32 %v3813_v57, 0.0 }
 0x55d   : > { %v4070_v62 = vmax.f32 %v3815_v4, 0.0 }
 0x55e   : > { %v9971_v50 = vpack.c.bf16 %v4069_v59, %v4067_v58  ;;  %4905 = vmatmul.mubr.bf16.gmra.mrb[4].mxu1 %v9873_v36  ;;  %v8589_v59 = vld [vmem:[#allocation7 + $0x5c4] ss:$8 sps:$4 sm:$0xff]  }
 0x55f   : > { %v3818_v44 = vpop.f32.mrb[44].mxu0  ;;  %4914 = vmatprep.mubr.bf16.mxu1 %v9891_v14  ;;  %v9975_v1 = vpack.c.bf16 %v4070_v62, %v4068_v61  ;;  %v8584_v14 = vld [vmem:[#allocation7 + $0x5b0] ss:$8 sps:$4 sm:$0xff]  }
 0x560   : > { %v3819_v42 = vadd.f32 %v3818_v44, %v9844_v30  ;;  %v3820_v2 = vpop.f32.mrb[45].mxu0  ;;  %5767 = vmatpush1.bf16.msra.mxu0 %v8584_v14 }
 0x561   : > { %v3821_v46 = vadd.f32 %v3820_v2, %v9847_v34  ;;  %v3822_v6 = vpop.f32.mrb[46].mxu0  ;;  %5768 = vmatprep.subr.bf16.mxu0 %v8589_v59  ;;  %v8595_v59 = vld [vmem:[#allocation7 + $0x5e4] ss:$8 sps:$4 sm:$0xff]  }
 0x562   : > { %v3823_v8 = vadd.f32 %v3822_v6, %v9844_v30  ;;  %v3824_v9 = vpop.f32.mrb[47].mxu0  ;;  %v4071_v12 = vmax.f32 %v3819_v42, 0.0 }
 0x563   : > { %v3825_v11 = vadd.f32 %v3824_v9, %v9847_v34  ;;  %v4072_v15 = vmax.f32 %v3821_v46, 0.0 }
 0x564   : > { %v4073_v13 = vmax.f32 %v3823_v8, 0.0 }
 0x565   : > { %v4074_v36 = vmax.f32 %v3825_v11, 0.0 }
 0x566   : > { %v9981_v16 = vpack.c.bf16 %v4073_v13, %v4071_v12  ;;  %4915 = vmatmul.mubr.bf16.gmra.mrb[8].mxu1 %v9887_v7 }
 0x567   : > { %v3828_v18 = vpop.f32.mrb[48].mxu0  ;;  %4924 = vmatprep.mubr.bf16.mxu1 %v9905_v39  ;;  %v9985_v21 = vpack.c.bf16 %v4074_v36, %v4072_v15 }
 0x568   : > { %v3829_v22 = vadd.f32 %v3828_v18, %v9844_v30  ;;  %v3830_v24 = vpop.f32.mrb[49].mxu0 }
 0x569   : > { %v3831_v26 = vadd.f32 %v3830_v24, %v9847_v34  ;;  %v3832_v27 = vpop.f32.mrb[50].mxu0 }
 0x56a   : > { %v3833_v28 = vadd.f32 %v3832_v27, %v9844_v30  ;;  %v3834_v29 = vpop.f32.mrb[51].mxu0  ;;  %v4075_v32 = vmax.f32 %v3829_v22, 0.0 }
 0x56b   : > { %v3835_v7 = vadd.f32 %v3834_v29, %v9847_v34  ;;  %v4076_v35 = vmax.f32 %v3831_v26, 0.0 }
 0x56c   : > { %v4077_v33 = vmax.f32 %v3833_v28, 0.0 }
 0x56d   : > { %v4078_v37 = vmax.f32 %v3835_v7, 0.0 }
 0x56e   : > { %v9991_v39 = vpack.c.bf16 %v4077_v33, %v4075_v32  ;;  %4925 = vmatmul.mubr.bf16.gmra.mrb[12].mxu1 %v9901_v45  ;;  %v8592_v33 = vld [vmem:[#allocation7 + $0x5d4] ss:$8 sps:$4 sm:$0xff]  }
 0x56f   : > { %v3838_v40 = vpop.f32.mrb[52].mxu0  ;;  %4934 = vmatprep.mubr.bf16.mxu1 %v9915_v5  ;;  %v9995_v41 = vpack.c.bf16 %v4078_v37, %v4076_v35  ;;  %v8587_v5 = vld [vmem:[#allocation7 + $0x5c0] ss:$8 sps:$4 sm:$0xff]  }
 0x570   : > { %v3839_v10 = vadd.f32 %v3838_v40, %v9844_v30  ;;  %v3840_v49 = vpop.f32.mrb[53].mxu0  ;;  %5769 = vmatpush1.bf16.msra.mxu0 %v8587_v5  ;;  %v8593_v5 = vld [vmem:[#allocation7 + $0x5e0] ss:$8 sps:$4 sm:$0xff]  }
 0x571   : > { %v3841_v51 = vadd.f32 %v3840_v49, %v9847_v34  ;;  %v3842_v54 = vpop.f32.mrb[54].mxu0  ;;  %5770 = vmatprep.subr.bf16.mxu0 %v8592_v33  ;;  %v8598_v33 = vld [vmem:[#allocation7 + $0x5f4] ss:$8 sps:$4 sm:$0xff]  }
 0x572   : > { %v3843_v55 = vadd.f32 %v3842_v54, %v9844_v30  ;;  %v3844_v38 = vpop.f32.mrb[55].mxu0  ;;  %v4079_v57 = vmax.f32 %v3839_v10, 0.0 }
 0x573   : > { %v3845_v56 = vadd.f32 %v3844_v38, %v9847_v34  ;;  %v4080_v4 = vmax.f32 %v3841_v51, 0.0 }
 0x574   : > { %v4081_v60 = vmax.f32 %v3843_v55, 0.0 }
 0x575   : > { %v4082_v45 = vmax.f32 %v3845_v56, 0.0 }
 0x576   : > { %v10001_v58 = vpack.c.bf16 %v4081_v60, %v4079_v57  ;;  %4935 = vmatmul.mubr.bf16.gmra.mrb[16].mxu1 %v9911_v47 }
 0x577   : > { %v3848_v61 = vpop.f32.mrb[56].mxu0  ;;  %4944 = vmatprep.mubr.bf16.mxu1 %v9925_v25  ;;  %v10005_v62 = vpack.c.bf16 %v4082_v45, %v4080_v4 }
 0x578   : > { %v3849_v44 = vadd.f32 %v3848_v61, %v9844_v30  ;;  %v3850_v42 = vpop.f32.mrb[57].mxu0 }
 0x579   : > { %v3851_v2 = vadd.f32 %v3850_v42, %v9847_v34  ;;  %v3852_v46 = vpop.f32.mrb[58].mxu0 }
 0x57a   : > { %v3853_v6 = vadd.f32 %v3852_v46, %v9844_v30  ;;  %v3854_v8 = vpop.f32.mrb[59].mxu0  ;;  %v4083_v9 = vmax.f32 %v3849_v44, 0.0 }
 0x57b   : > { %v3855_v47 = vadd.f32 %v3854_v8, %v9847_v34  ;;  %v4084_v12 = vmax.f32 %v3851_v2, 0.0 }
 0x57c   : > { %v4085_v11 = vmax.f32 %v3853_v6, 0.0 }
 0x57d   : > { %v4086_v13 = vmax.f32 %v3855_v47, 0.0 }
 0x57e   : > { %v10011_v25 = vpack.c.bf16 %v4085_v11, %v4083_v9  ;;  %4945 = vmatmul.mubr.bf16.gmra.mrb[20].mxu1 %v9921_v20 }
 0x57f   : > { %v3858_v15 = vpop.f32.mrb[60].mxu0  ;;  %4954 = vmatprep.mubr.bf16.mxu1 %v9935_v52  ;;  %v10015_v36 = vpack.c.bf16 %v4086_v13, %v4084_v12  ;;  %v8590_v52 = vld [vmem:[#allocation7 + $0x5d0] ss:$8 sps:$4 sm:$0xff]  }
 0x580   : > { %v3859_v14 = vadd.f32 %v3858_v15, %v9844_v30  ;;  %v3860_v17 = vpop.f32.mrb[61].mxu0  ;;  %5771 = vmatpush1.bf16.msra.mxu0 %v8590_v52  ;;  %v8596_v52 = vld [vmem:[#allocation7 + $0x5f0] ss:$8 sps:$4 sm:$0xff]  }
 0x581   : > { %v3861_v18 = vadd.f32 %v3860_v17, %v9847_v34  ;;  %v3862_v22 = vpop.f32.mrb[62].mxu0  ;;  %5772 = vmatprep.subr.bf16.mxu0 %v8595_v59 }
 0x582   : > { %v3863_v24 = vadd.f32 %v3862_v22, %v9844_v30  ;;  %v3864_v26 = vpop.f32.mrb[63].mxu0  ;;  %v4087_v28 = vmax.f32 %v3859_v14, 0.0 }
 0x583   : > { %v3865_v27 = vadd.f32 %v3864_v26, %v9847_v34  ;;  %v4088_v7 = vmax.f32 %v3861_v18, 0.0 }
 0x584   : > { %v4089_v29 = vmax.f32 %v3863_v24, 0.0  ;;  %5773 = vmatpush1.bf16.msra.mxu0 %v8593_v5 }
 0x585   : > { %v4090_v20 = vmax.f32 %v3865_v27, 0.0  ;;  %5774 = vmatprep.subr.bf16.mxu0 %v8598_v33 }
 0x586   : > { %v10021_v32 = vpack.c.bf16 %v4089_v29, %v4087_v28  ;;  %4955 = vmatmul.mubr.bf16.gmra.mrb[24].mxu1 %v9931_v48 }
 0x587   : > { %v3868_v35 = vpop.f32.mrb[64].mxu0  ;;  %4964 = vmatprep.mubr.bf16.mxu1 %v9945_v3  ;;  %v10025_v37 = vpack.c.bf16 %v4090_v20, %v4088_v7 }
 0x588   : > { %v3869_v40 = vadd.f32 %v3868_v35, %v9844_v30  ;;  %v3870_v10 = vpop.f32.mrb[65].mxu0  ;;  %5775 = vmatpush1.bf16.msra.mxu0 %v8596_v52 }
 0x589   : > { %v3871_v49 = vadd.f32 %v3870_v10, %v9847_v34  ;;  %v3872_v51 = vpop.f32.mrb[66].mxu0 }
 0x58a   : > { %v3873_v54 = vadd.f32 %v3872_v51, %v9844_v30  ;;  %v3874_v55 = vpop.f32.mrb[67].mxu0  ;;  %v4091_v38 = vmax.f32 %v3869_v40, 0.0 }
 0x58b   : > { %v3875_v48 = vadd.f32 %v3874_v55, %v9847_v34  ;;  %v4092_v57 = vmax.f32 %v3871_v49, 0.0 }
 0x58c   : > { %v4093_v56 = vmax.f32 %v3873_v54, 0.0 }
 0x58d   : > { %v4094_v60 = vmax.f32 %v3875_v48, 0.0 }
 0x58e   : > { %v10031_v3 = vpack.c.bf16 %v4093_v56, %v4091_v38  ;;  %4965 = vmatmul.mubr.bf16.gmra.mrb[28].mxu1 %v9941_v63 }
 0x58f   : > { %v3878_v4 = vpop.f32.mrb[68].mxu0  ;;  %4974 = vmatprep.mubr.bf16.mxu1 %v9955_v23  ;;  %v10035_v45 = vpack.c.bf16 %v4094_v60, %v4092_v57 }
 0x590   : > { %v3879_v61 = vadd.f32 %v3878_v4, %v9844_v30  ;;  %v3880_v44 = vpop.f32.mrb[69].mxu0 }
 0x591   : > { %v3881_v42 = vadd.f32 %v3880_v44, %v9847_v34  ;;  %v3882_v2 = vpop.f32.mrb[70].mxu0 }
 0x592   : > { %v3883_v46 = vadd.f32 %v3882_v2, %v9844_v30  ;;  %v3884_v6 = vpop.f32.mrb[71].mxu0  ;;  %v4095_v8 = vmax.f32 %v3879_v61, 0.0 }
 0x593   : > { %v3885_v63 = vadd.f32 %v3884_v6, %v9847_v34  ;;  %v4096_v23 = vmax.f32 %v3881_v42, 0.0 }
 0x594   : > { %v4097_v47 = vmax.f32 %v3883_v46, 0.0 }
 0x595   : > { %v4098_v9 = vmax.f32 %v3885_v63, 0.0 }
 0x596   : > { %v10041_v11 = vpack.c.bf16 %v4097_v47, %v4095_v8  ;;  %4975 = vmatmul.mubr.bf16.gmra.mrb[32].mxu1 %v9951_v19 }
 0x597   : > { %v3888_v12 = vpop.f32.mrb[72].mxu0  ;;  %4984 = vmatprep.mubr.bf16.mxu1 %v9965_v53  ;;  %v10045_v13 = vpack.c.bf16 %v4098_v9, %v4096_v23 }
 0x598   : > { %v3889_v15 = vadd.f32 %v3888_v12, %v9844_v30  ;;  %v3890_v14 = vpop.f32.mrb[73].mxu0 }
 0x599   : > { %v3891_v17 = vadd.f32 %v3890_v14, %v9847_v34  ;;  %v3892_v18 = vpop.f32.mrb[74].mxu0 }
 0x59a   : > { %v3893_v22 = vadd.f32 %v3892_v18, %v9844_v30  ;;  %v3894_v24 = vpop.f32.mrb[75].mxu0  ;;  %v4099_v27 = vmax.f32 %v3889_v15, 0.0 }
 0x59b   : > { %v3895_v26 = vadd.f32 %v3894_v24, %v9847_v34  ;;  %v4100_v29 = vmax.f32 %v3891_v17, 0.0 }
 0x59c   : > { %v4101_v28 = vmax.f32 %v3893_v22, 0.0 }
 0x59d   : > { %v4102_v19 = vmax.f32 %v3895_v26, 0.0 }
 0x59e   : > { %v10051_v7 = vpack.c.bf16 %v4101_v28, %v4099_v27  ;;  %4985 = vmatmul.mubr.bf16.gmra.mrb[36].mxu1 %v9961_v43 }
 0x59f   : > { %v3898_v53 = vpop.f32.mrb[76].mxu0  ;;  %4994 = vmatprep.mubr.bf16.mxu1 %v9975_v1  ;;  %v10055_v20 = vpack.c.bf16 %v4102_v19, %v4100_v29 }
 0x5a0   : > { %v3899_v35 = vadd.f32 %v3898_v53, %v9844_v30  ;;  %v3900_v40 = vpop.f32.mrb[77].mxu0  ;;  %v8601_v53 = vld [vmem:[#allocation7 + $0x604] ss:$8 sps:$4 sm:$0xff]  }
 0x5a1   : > { %v3901_v10 = vadd.f32 %v3900_v40, %v9847_v34  ;;  %v3902_v49 = vpop.f32.mrb[78].mxu0  ;;  %6490 = vmatprep.subr.bf16.mxu0 %v8601_v53 }
 0x5a2   : > { %v3903_v51 = vadd.f32 %v3902_v49, %v9844_v30  ;;  %v3904_v54 = vpop.f32.mrb[79].mxu0  ;;  %v4103_v55 = vmax.f32 %v3899_v35, 0.0 }
 0x5a3   : > { %v3905_v43 = vadd.f32 %v3904_v54, %v9847_v34  ;;  %v4104_v1 = vmax.f32 %v3901_v10, 0.0 }
 0x5a4   : > { %v4105_v48 = vmax.f32 %v3903_v51, 0.0 }
 0x5a5   : > { %v4106_v38 = vmax.f32 %v3905_v43, 0.0 }
 0x5a6   : > { %v10061_v56 = vpack.c.bf16 %v4105_v48, %v4103_v55  ;;  %4995 = vmatmul.mubr.bf16.gmra.mrb[40].mxu1 %v9971_v50 }
 0x5a7   : > { %v3908_v57 = vpop.f32.mrb[80].mxu0  ;;  %5004 = vmatprep.mubr.bf16.mxu1 %v9985_v21  ;;  %v10065_v60 = vpack.c.bf16 %v4106_v38, %v4104_v1 }
 0x5a8   : > { %v3909_v4 = vadd.f32 %v3908_v57, %v9844_v30  ;;  %v3910_v5 = vpop.f32.mrb[81].mxu0 }
 0x5a9   : > { %v3911_v59 = vadd.f32 %v3910_v5, %v9847_v34  ;;  %v3912_v61 = vpop.f32.mrb[82].mxu0 }
 0x5aa   : > { %v3913_v44 = vadd.f32 %v3912_v61, %v9844_v30  ;;  %v3914_v42 = vpop.f32.mrb[83].mxu0  ;;  %v4107_v46 = vmax.f32 %v3909_v4, 0.0 }
 0x5ab   : > { %v3915_v2 = vadd.f32 %v3914_v42, %v9847_v34  ;;  %v4108_v63 = vmax.f32 %v3911_v59, 0.0 }
 0x5ac   : > { %v4109_v6 = vmax.f32 %v3913_v44, 0.0 }
 0x5ad   : > { %v4110_v50 = vmax.f32 %v3915_v2, 0.0 }
 0x5ae   : > { %v10071_v8 = vpack.c.bf16 %v4109_v6, %v4107_v46  ;;  %5005 = vmatmul.mubr.bf16.gmra.mrb[44].mxu1 %v9981_v16 }
 0x5af   : > { %v3918_v21 = vpop.f32.mrb[84].mxu0  ;;  %5014 = vmatprep.mubr.bf16.mxu1 %v9995_v41  ;;  %v10075_v47 = vpack.c.bf16 %v4110_v50, %v4108_v63 }
 0x5b0   : > { %v3919_v23 = vadd.f32 %v3918_v21, %v9844_v30  ;;  %v3920_v9 = vpop.f32.mrb[85].mxu0 }
 0x5b1   : > { %v3921_v12 = vadd.f32 %v3920_v9, %v9847_v34  ;;  %v3922_v15 = vpop.f32.mrb[86].mxu0 }
 0x5b2   : > { %v3923_v14 = vadd.f32 %v3922_v15, %v9844_v30  ;;  %v3924_v17 = vpop.f32.mrb[87].mxu0  ;;  %v4111_v22 = vmax.f32 %v3919_v23, 0.0 }
 0x5b3   : > { %v3925_v18 = vadd.f32 %v3924_v17, %v9847_v34  ;;  %v4112_v26 = vmax.f32 %v3921_v12, 0.0 }
 0x5b4   : > { %v4113_v24 = vmax.f32 %v3923_v14, 0.0 }
 0x5b5   : > { %v4114_v16 = vmax.f32 %v3925_v18, 0.0 }
 0x5b6   : > { %v10081_v27 = vpack.c.bf16 %v4113_v24, %v4111_v22  ;;  %5015 = vmatmul.mubr.bf16.gmra.mrb[48].mxu1 %v9991_v39 }
 0x5b7   : > { %v3928_v41 = vpop.f32.mrb[88].mxu0  ;;  %5024 = vmatprep.mubr.bf16.mxu1 %v10005_v62  ;;  %v10085_v28 = vpack.c.bf16 %v4114_v16, %v4112_v26 }
 0x5b8   : > { %v3929_v29 = vadd.f32 %v3928_v41, %v9844_v30  ;;  %v3930_v19 = vpop.f32.mrb[89].mxu0 }
 0x5b9   : > { %v3931_v52 = vadd.f32 %v3930_v19, %v9847_v34  ;;  %v3932_v33 = vpop.f32.mrb[90].mxu0 }
 0x5ba   : > { %v3933_v35 = vadd.f32 %v3932_v33, %v9844_v30  ;;  %v3934_v40 = vpop.f32.mrb[91].mxu0  ;;  %v4115_v49 = vmax.f32 %v3929_v29, 0.0 }
 0x5bb   : > { %v3935_v10 = vadd.f32 %v3934_v40, %v9847_v34  ;;  %v4116_v51 = vmax.f32 %v3931_v52, 0.0 }
 0x5bc   : > { %v4117_v39 = vmax.f32 %v3933_v35, 0.0 }
 0x5bd   : > { %v4118_v54 = vmax.f32 %v3935_v10, 0.0 }
 0x5be   : > { %v10091_v62 = vpack.c.bf16 %v4117_v39, %v4115_v49  ;;  %5025 = vmatmul.mubr.bf16.gmra.mrb[52].mxu1 %v10001_v58 }
 0x5bf   : > { %v3938_v43 = vpop.f32.mrb[92].mxu0  ;;  %5034 = vmatprep.mubr.bf16.mxu1 %v10015_v36  ;;  %v10095_v55 = vpack.c.bf16 %v4118_v54, %v4116_v51 }
 0x5c0   : > { %v3939_v48 = vadd.f32 %v3938_v43, %v9844_v30  ;;  %v3940_v1 = vpop.f32.mrb[93].mxu0 }
 0x5c1   : > { %v3941_v38 = vadd.f32 %v3940_v1, %v9847_v34  ;;  %v3942_v57 = vpop.f32.mrb[94].mxu0 }
 0x5c2   : > { %v3943_v4 = vadd.f32 %v3942_v57, %v9844_v30  ;;  %v3944_v5 = vpop.f32.mrb[95].mxu0  ;;  %v4119_v61 = vmax.f32 %v3939_v48, 0.0 }
 0x5c3   : > { %v3945_v59 = vadd.f32 %v3944_v5, %v9847_v34  ;;  %v4120_v42 = vmax.f32 %v3941_v38, 0.0 }
 0x5c4   : > { %v4121_v44 = vmax.f32 %v3943_v4, 0.0 }
 0x5c5   : > { %v4122_v58 = vmax.f32 %v3945_v59, 0.0 }
 0x5c6   : > { %v10101_v2 = vpack.c.bf16 %v4121_v44, %v4119_v61  ;;  %5035 = vmatmul.mubr.bf16.gmra.mrb[56].mxu1 %v10011_v25 }
 0x5c7   : > { %v3948_v36 = vpop.f32.mrb[96].mxu0  ;;  %5044 = vmatprep.mubr.bf16.mxu1 %v10025_v37  ;;  %v10105_v46 = vpack.c.bf16 %v4122_v58, %v4120_v42 }
 0x5c8   : > { %v3949_v6 = vadd.f32 %v3948_v36, %v9844_v30  ;;  %v3950_v63 = vpop.f32.mrb[97].mxu0 }
 0x5c9   : > { %v3951_v50 = vadd.f32 %v3950_v63, %v9847_v34  ;;  %v3952_v21 = vpop.f32.mrb[98].mxu0 }
 0x5ca   : > { %v3953_v23 = vadd.f32 %v3952_v21, %v9844_v30  ;;  %v3954_v9 = vpop.f32.mrb[99].mxu0  ;;  %v4123_v15 = vmax.f32 %v3949_v6, 0.0 }
 0x5cb   : > { %v3955_v12 = vadd.f32 %v3954_v9, %v9847_v34  ;;  %v4124_v17 = vmax.f32 %v3951_v50, 0.0 }
 0x5cc   : > { %v4125_v14 = vmax.f32 %v3953_v23, 0.0 }
 0x5cd   : > { %v4126_v25 = vmax.f32 %v3955_v12, 0.0 }
 0x5ce   : > { %v10111_v18 = vpack.c.bf16 %v4125_v14, %v4123_v15  ;;  %5045 = vmatmul.mubr.bf16.gmra.mrb[60].mxu1 %v10021_v32 }
 0x5cf   : > { %v3958_v37 = vpop.f32.mrb[100].mxu0  ;;  %5054 = vmatprep.mubr.bf16.mxu1 %v10035_v45  ;;  %v10115_v22 = vpack.c.bf16 %v4126_v25, %v4124_v17 }
 0x5d0   : > { %v3959_v24 = vadd.f32 %v3958_v37, %v9844_v30  ;;  %v3960_v26 = vpop.f32.mrb[101].mxu0 }
 0x5d1   : > { %v3961_v16 = vadd.f32 %v3960_v26, %v9847_v34  ;;  %v3962_v41 = vpop.f32.mrb[102].mxu0 }
 0x5d2   : > { %v3963_v29 = vadd.f32 %v3962_v41, %v9844_v30  ;;  %v3964_v19 = vpop.f32.mrb[103].mxu0  ;;  %v4127_v52 = vmax.f32 %v3959_v24, 0.0 }
 0x5d3   : > { %v3965_v53 = vadd.f32 %v3964_v19, %v9847_v34  ;;  %v4128_v35 = vmax.f32 %v3961_v16, 0.0 }
 0x5d4   : > { %v4129_v33 = vmax.f32 %v3963_v29, 0.0 }
 0x5d5   : > { %v4130_v32 = vmax.f32 %v3965_v53, 0.0 }
 0x5d6   : > { %v10121_v40 = vpack.c.bf16 %v4129_v33, %v4127_v52  ;;  %5055 = vmatmul.mubr.bf16.gmra.mrb[64].mxu1 %v10031_v3 }
 0x5d7   : > { %v3968_v45 = vpop.f32.mrb[104].mxu0  ;;  %5064 = vmatprep.mubr.bf16.mxu1 %v10045_v13  ;;  %v10125_v10 = vpack.c.bf16 %v4130_v32, %v4128_v35 }
 0x5d8   : > { %v3969_v49 = vadd.f32 %v3968_v45, %v9844_v30  ;;  %v3970_v39 = vpop.f32.mrb[105].mxu0 }
 0x5d9   : > { %v3971_v51 = vadd.f32 %v3970_v39, %v9847_v34  ;;  %v3972_v54 = vpop.f32.mrb[106].mxu0 }
 0x5da   : > { %v3973_v43 = vadd.f32 %v3972_v54, %v9844_v30  ;;  %v3974_v48 = vpop.f32.mrb[107].mxu0  ;;  %v4131_v38 = vmax.f32 %v3969_v49, 0.0 }
 0x5db   : > { %v3975_v1 = vadd.f32 %v3974_v48, %v9847_v34  ;;  %v4132_v4 = vmax.f32 %v3971_v51, 0.0 }
 0x5dc   : > { %v4133_v57 = vmax.f32 %v3973_v43, 0.0 }
 0x5dd   : > { %v4134_v3 = vmax.f32 %v3975_v1, 0.0 }
 0x5de   : > { %v10131_v5 = vpack.c.bf16 %v4133_v57, %v4131_v38  ;;  %5065 = vmatmul.mubr.bf16.gmra.mrb[68].mxu1 %v10041_v11 }
 0x5df   : > { %v3978_v13 = vpop.f32.mrb[108].mxu0  ;;  %5074 = vmatprep.mubr.bf16.mxu1 %v10055_v20  ;;  %v10135_v59 = vpack.c.bf16 %v4134_v3, %v4132_v4 }
 0x5e0   : > { %v3979_v61 = vadd.f32 %v3978_v13, %v9844_v30  ;;  %v3980_v44 = vpop.f32.mrb[109].mxu0 }
 0x5e1   : > { %v3981_v42 = vadd.f32 %v3980_v44, %v9847_v34  ;;  %v3982_v58 = vpop.f32.mrb[110].mxu0 }
 0x5e2   : > { %v3983_v36 = vadd.f32 %v3982_v58, %v9844_v30  ;;  %v3984_v6 = vpop.f32.mrb[111].mxu0  ;;  %v4135_v50 = vmax.f32 %v3979_v61, 0.0 }
 0x5e3   : > { %v3985_v63 = vadd.f32 %v3984_v6, %v9847_v34  ;;  %v4136_v23 = vmax.f32 %v3981_v42, 0.0 }
 0x5e4   : > { %v4137_v21 = vmax.f32 %v3983_v36, 0.0 }
 0x5e5   : > { %v4138_v11 = vmax.f32 %v3985_v63, 0.0 }
 0x5e6   : > { %v10141_v9 = vpack.c.bf16 %v4137_v21, %v4135_v50  ;;  %5075 = vmatmul.mubr.bf16.gmra.mrb[72].mxu1 %v10051_v7 }
 0x5e7   : > { %v3988_v20 = vpop.f32.mrb[112].mxu0  ;;  %5084 = vmatprep.mubr.bf16.mxu1 %v10065_v60  ;;  %v10145_v12 = vpack.c.bf16 %v4138_v11, %v4136_v23 }
 0x5e8   : > { %v3989_v15 = vadd.f32 %v3988_v20, %v9844_v30  ;;  %v3990_v14 = vpop.f32.mrb[113].mxu0 }
 0x5e9   : > { %v3991_v17 = vadd.f32 %v3990_v14, %v9847_v34  ;;  %v3992_v25 = vpop.f32.mrb[114].mxu0 }
 0x5ea   : > { %v3993_v37 = vadd.f32 %v3992_v25, %v9844_v30  ;;  %v3994_v24 = vpop.f32.mrb[115].mxu0  ;;  %v4139_v16 = vmax.f32 %v3989_v15, 0.0 }
 0x5eb   : > { %v3995_v26 = vadd.f32 %v3994_v24, %v9847_v34  ;;  %v4140_v29 = vmax.f32 %v3991_v17, 0.0 }
 0x5ec   : > { %v4141_v41 = vmax.f32 %v3993_v37, 0.0 }
 0x5ed   : > { %v4142_v7 = vmax.f32 %v3995_v26, 0.0 }
 0x5ee   : > { %v10151_v19 = vpack.c.bf16 %v4141_v41, %v4139_v16  ;;  %5085 = vmatmul.mubr.bf16.gmra.mrb[76].mxu1 %v10061_v56 }
 0x5ef   : > { %v3998_v60 = vpop.f32.mrb[116].mxu0  ;;  %5094 = vmatprep.mubr.bf16.mxu1 %v10075_v47  ;;  %v10155_v53 = vpack.c.bf16 %v4142_v7, %v4140_v29 }
 0x5f0   : > { %v3999_v52 = vadd.f32 %v3998_v60, %v9844_v30  ;;  %v4000_v33 = vpop.f32.mrb[117].mxu0 }
 0x5f1   : > { %v4001_v35 = vadd.f32 %v4000_v33, %v9847_v34  ;;  %v4002_v32 = vpop.f32.mrb[118].mxu0 }
 0x5f2   : > { %v4003_v45 = vadd.f32 %v4002_v32, %v9844_v30  ;;  %v4004_v49 = vpop.f32.mrb[119].mxu0  ;;  %v4143_v51 = vmax.f32 %v3999_v52, 0.0 }
 0x5f3   : > { %v4005_v39 = vadd.f32 %v4004_v49, %v9847_v34  ;;  %v4144_v43 = vmax.f32 %v4001_v35, 0.0  ;;  %v8599_v35 = vld [vmem:[#allocation7 + $0x600] ss:$8 sps:$4 sm:$0xff]   ;;  %v8604_v49 = vld [vmem:[#allocation7 + $0x614] ss:$8 sps:$4 sm:$0xff]  }
 0x5f4   : > { %v4145_v54 = vmax.f32 %v4003_v45, 0.0 }
 0x5f5   : > { %v4146_v56 = vmax.f32 %v4005_v39, 0.0 }
 0x5f6   : > { %v10161_v48 = vpack.c.bf16 %v4145_v54, %v4143_v51  ;;  %5095 = vmatmul.mubr.bf16.gmra.mrb[80].mxu1 %v10071_v8 }
 0x5f7   : > { %v4008_v47 = vpop.f32.mrb[120].mxu0  ;;  %5104 = vmatprep.mubr.bf16.mxu1 %v10085_v28  ;;  %v10165_v1 = vpack.c.bf16 %v4146_v56, %v4144_v43 }
 0x5f8   : > { %v4009_v38 = vadd.f32 %v4008_v47, %v9844_v30  ;;  %v4010_v57 = vpop.f32.mrb[121].mxu0 }
 0x5f9   : > { %v4011_v4 = vadd.f32 %v4010_v57, %v9847_v34  ;;  %v4012_v3 = vpop.f32.mrb[122].mxu0 }
 0x5fa   : > { %v4013_v13 = vadd.f32 %v4012_v3, %v9844_v30  ;;  %v4014_v61 = vpop.f32.mrb[123].mxu0  ;;  %v4147_v42 = vmax.f32 %v4009_v38, 0.0  ;;  %v8607_v38 = vld [vmem:[#allocation7 + $0x624] ss:$8 sps:$4 sm:$0xff]  }
 0x5fb   : > { %v4015_v44 = vadd.f32 %v4014_v61, %v9847_v34  ;;  %v4148_v36 = vmax.f32 %v4011_v4, 0.0 }
 0x5fc   : > { %v4149_v58 = vmax.f32 %v4013_v13, 0.0 }
 0x5fd   : > { %v4150_v8 = vmax.f32 %v4015_v44, 0.0  ;;  %v8605_v44 = vld [vmem:[#allocation7 + $0x620] ss:$8 sps:$4 sm:$0xff]  }
 0x5fe   : > { %v10171_v6 = vpack.c.bf16 %v4149_v58, %v4147_v42  ;;  %5105 = vmatmul.mubr.bf16.gmra.mrb[84].mxu1 %v10081_v27 }
 0x5ff   : > { %v4018_v28 = vpop.f32.mrb[124].mxu0  ;;  %5114 = vmatprep.mubr.bf16.mxu1 %v10095_v55  ;;  %v10175_v63 = vpack.c.bf16 %v4150_v8, %v4148_v36  ;;  %v8610_v36 = vld [vmem:[#allocation7 + $0x634] ss:$8 sps:$4 sm:$0xff]  }
 0x600   : > { %v4019_v50 = vadd.f32 %v4018_v28, %v9844_v30  ;;  %v4020_v21 = vpop.f32.mrb[125].mxu0 }
 0x601   : > { %v4021_v23 = vadd.f32 %v4020_v21, %v9847_v34  ;;  %v4022_v11 = vpop.f32.mrb[126].mxu0  ;;  %v8608_v21 = vld [vmem:[#allocation7 + $0x630] ss:$8 sps:$4 sm:$0xff]  }
 0x602   : > { %v4023_v20 = vadd.f32 %v4022_v11, %v9844_v30  ;;  %v4024_v15 = vpop.f32.mrb[127].mxu0  ;;  %v4151_v17 = vmax.f32 %v4019_v50, 0.0  ;;  %v5217_v30 = vsub.s32 5, %v9268_v31 }
 0x603   : > { %v4025_v14 = vadd.f32 %v4024_v15, %v9847_v34  ;;  %v4152_v37 = vmax.f32 %v4021_v23, 0.0  ;;  %v8703_v34 = vld [vmem:[#allocation8] sm:$0xff] }
 0x604   : > { %v4153_v25 = vmax.f32 %v4023_v20, 0.0  ;;  %v8613_v20 = vld [vmem:[#allocation7 + $0x644] ss:$8 sps:$4 sm:$0xff]  }
 0x605   : > { %v4154_v27 = vmax.f32 %v4025_v14, 0.0 }
 0x606   : > { %v10181_v24 = vpack.c.bf16 %v4153_v25, %v4151_v17  ;;  %5115 = vmatmul.mubr.bf16.gmra.mrb[88].mxu1 %v10091_v62  ;;  %v10195_v62 = vrot.slane %v8703_v34, %v5217_v30 }
 0x607   : > { %5124 = vmatprep.mubr.bf16.mxu1 %v10105_v46  ;;  %v10185_v55 = vpack.c.bf16 %v4154_v27, %v4152_v37  ;;  %v8611_v27 = vld [vmem:[#allocation7 + $0x640] ss:$8 sps:$4 sm:$0xff]  }
 0x60e   : > { %5125 = vmatmul.mubr.bf16.gmra.mrb[92].mxu1 %v10101_v2  ;;  %v8704_v2 = vld [vmem:[#allocation8 + $0x8] sm:$0xff] }
 0x60f   : > { %5134 = vmatprep.mubr.bf16.mxu1 %v10115_v22  ;;  %v10198_v46 = vrot.slane %v8704_v2, %v5217_v30  ;;  %v8616_v2 = vld [vmem:[#allocation7 + $0x654] ss:$8 sps:$4 sm:$0xff]  }
 0x616   : > { %5135 = vmatmul.mubr.bf16.gmra.mrb[96].mxu1 %v10111_v18 }
 0x617   : > { %5144 = vmatprep.mubr.bf16.mxu1 %v10125_v10 }
 0x61e   : > { %5145 = vmatmul.mubr.bf16.gmra.mrb[100].mxu1 %v10121_v40 }
 0x61f   : > { %5154 = vmatprep.mubr.bf16.mxu1 %v10135_v59 }
 0x626   : > { %5155 = vmatmul.mubr.bf16.gmra.mrb[104].mxu1 %v10131_v5 }
 0x627   : > { %5164 = vmatprep.mubr.bf16.mxu1 %v10145_v12 }
 0x629   : > { %v4896_v22 = vpop.f32.mrb[0].mxu1 }
 0x62a   : > { %v5223_v18 = vadd.f32 %v10195_v62, %v4896_v22  ;;  %v4898_v10 = vpop.f32.mrb[1].mxu1 }
 0x62b   : > { %v5224_v40 = vadd.f32 %v10198_v46, %v4898_v10  ;;  %v4900_v26 = vpop.f32.mrb[2].mxu1 }
 0x62c   : > { %v5225_v59 = vadd.f32 %v10195_v62, %v4900_v26  ;;  %v4902_v16 = vpop.f32.mrb[3].mxu1  ;;  %v5351_v41 = vmax.f32 %v5223_v18, 0.0 }
 0x62d   : > { %v5226_v5 = vadd.f32 %v10198_v46, %v4902_v16  ;;  %v5352_v12 = vmax.f32 %v5224_v40, 0.0  ;;  %v8614_v40 = vld [vmem:[#allocation7 + $0x650] ss:$8 sps:$4 sm:$0xff]   ;;  %v8619_v16 = vld [vmem:[#allocation7 + $0x664] ss:$8 sps:$4 sm:$0xff]  }
 0x62e   : > { %v5353_v29 = vmax.f32 %v5225_v59, 0.0  ;;  %5165 = vmatmul.mubr.bf16.gmra.mrb[108].mxu1 %v10141_v9 }
 0x62f   : > { %v5354_v7 = vmax.f32 %v5226_v5, 0.0  ;;  %5174 = vmatprep.mubr.bf16.mxu1 %v10155_v53  ;;  %v8602_v53 = vld [vmem:[#allocation7 + $0x610] ss:$8 sps:$4 sm:$0xff]  }
 0x630   : > { %v5479_v60 = vpack.c.bf16 %v5353_v29, %v5351_v41 }
 0x631   : > { %v5480_v52 = vpack.c.bf16 %v5354_v7, %v5352_v12  ;;  %v4906_v33 = vpop.f32.mrb[4].mxu1 }
 0x632   : > { %v5227_v32 = vadd.f32 %v10195_v62, %v4906_v33  ;;  %v4908_v45 = vpop.f32.mrb[5].mxu1 }
 0x633   : > { %v5228_v39 = vadd.f32 %v10198_v46, %v4908_v45  ;;  %v4910_v51 = vpop.f32.mrb[6].mxu1  ;;  %5776 = vmatprep.mubr.bf16.mxu0 %v5480_v52 }
 0x634   : > { %v5229_v54 = vadd.f32 %v10195_v62, %v4910_v51  ;;  %v4912_v43 = vpop.f32.mrb[7].mxu1  ;;  %5777 = vmatmul.mubr.bf16.vlgmr.msra.gmra.mrb[128].mxu0 %v5479_v60  ;;  %v5355_v56 = vmax.f32 %v5227_v32, 0.0  ;;  %v8617_v60 = vld [vmem:[#allocation7 + $0x660] ss:$8 sps:$4 sm:$0xff]  }
 0x635   : > { %v5230_v9 = vadd.f32 %v10198_v46, %v4912_v43  ;;  %6491 = vmatpush1.bf16.msra.mxu0 %v8599_v35  ;;  %v5356_v57 = vmax.f32 %v5228_v39, 0.0  ;;  %v8622_v35 = vld [vmem:[#allocation7 + $0x674] ss:$8 sps:$4 sm:$0xff]   ;;  %v8620_v39 = vld [vmem:[#allocation7 + $0x670] ss:$8 sps:$4 sm:$0xff]  }
 0x636   : > { %v5357_v47 = vmax.f32 %v5229_v54, 0.0  ;;  %5175 = vmatmul.mubr.bf16.gmra.mrb[112].mxu1 %v10151_v19  ;;  %6492 = vmatprep.subr.bf16.mxu0 %v8604_v49  ;;  %v8625_v43 = vld [vmem:[#allocation7 + $0x684] ss:$8 sps:$4 sm:$0xff]  }
 0x637   : > { %v5358_v4 = vmax.f32 %v5230_v9, 0.0  ;;  %5184 = vmatprep.mubr.bf16.mxu1 %v10165_v1 }
 0x638   : > { %v5481_v3 = vpack.c.bf16 %v5357_v47, %v5355_v56 }
 0x639   : > { %v5482_v13 = vpack.c.bf16 %v5358_v4, %v5356_v57  ;;  %v4916_v61 = vpop.f32.mrb[8].mxu1  ;;  %6493 = vmatpush1.bf16.msra.mxu0 %v8602_v53  ;;  %v8623_v57 = vld [vmem:[#allocation7 + $0x680] ss:$8 sps:$4 sm:$0xff]  }
 0x63a   : > { %v5231_v42 = vadd.f32 %v10195_v62, %v4916_v61  ;;  %v4918_v58 = vpop.f32.mrb[9].mxu1  ;;  %6494 = vmatprep.subr.bf16.mxu0 %v8607_v38 }
 0x63b   : > { %v5232_v8 = vadd.f32 %v10198_v46, %v4918_v58  ;;  %v4920_v28 = vpop.f32.mrb[10].mxu1  ;;  %5786 = vmatprep.mubr.bf16.mxu0 %v5482_v13  ;;  %v8628_v13 = vld [vmem:[#allocation7 + $0x694] ss:$8 sps:$4 sm:$0xff]  }
 0x63c   : > { %v5233_v19 = vadd.f32 %v10195_v62, %v4920_v28  ;;  %v4922_v50 = vpop.f32.mrb[11].mxu1  ;;  %5787 = vmatmul.mubr.bf16.gmra.mrb[132].mxu0 %v5481_v3  ;;  %v5359_v23 = vmax.f32 %v5231_v42, 0.0 }
 0x63d   : > { %v5234_v1 = vadd.f32 %v10198_v46, %v4922_v50  ;;  %6495 = vmatpush1.bf16.msra.mxu0 %v8605_v44  ;;  %v5360_v15 = vmax.f32 %v5232_v8, 0.0 }
 0x63e   : > { %v5361_v11 = vmax.f32 %v5233_v19, 0.0  ;;  %5185 = vmatmul.mubr.bf16.gmra.mrb[116].mxu1 %v10161_v48  ;;  %6496 = vmatprep.subr.bf16.mxu0 %v8610_v36  ;;  %v8626_v36 = vld [vmem:[#allocation7 + $0x690] ss:$8 sps:$4 sm:$0xff]  }
 0x63f   : > { %v5362_v14 = vmax.f32 %v5234_v1, 0.0  ;;  %5194 = vmatprep.mubr.bf16.mxu1 %v10175_v63 }
 0x640   : > { %v5483_v17 = vpack.c.bf16 %v5361_v11, %v5359_v23 }
 0x641   : > { %v5484_v25 = vpack.c.bf16 %v5362_v14, %v5360_v15  ;;  %v4926_v37 = vpop.f32.mrb[12].mxu1  ;;  %6497 = vmatpush1.bf16.msra.mxu0 %v8608_v21  ;;  %v8631_v21 = vld [vmem:[#allocation7 + $0x6a4] ss:$8 sps:$4 sm:$0xff]  }
 0x642   : > { %v5235_v30 = vadd.f32 %v10195_v62, %v4926_v37  ;;  %v4928_v34 = vpop.f32.mrb[13].mxu1  ;;  %6498 = vmatprep.subr.bf16.mxu0 %v8613_v20  ;;  %v8629_v20 = vld [vmem:[#allocation7 + $0x6a0] ss:$8 sps:$4 sm:$0xff]  }
 0x643   : > { %v5236_v22 = vadd.f32 %v10198_v46, %v4928_v34  ;;  %v4930_v18 = vpop.f32.mrb[14].mxu1  ;;  %5796 = vmatprep.mubr.bf16.mxu0 %v5484_v25 }
 0x644   : > { %v5237_v48 = vadd.f32 %v10195_v62, %v4930_v18  ;;  %v4932_v10 = vpop.f32.mrb[15].mxu1  ;;  %5797 = vmatmul.mubr.bf16.gmra.mrb[136].mxu0 %v5483_v17  ;;  %v5363_v26 = vmax.f32 %v5235_v30, 0.0 }
 0x645   : > { %v5238_v63 = vadd.f32 %v10198_v46, %v4932_v10  ;;  %6499 = vmatpush1.bf16.msra.mxu0 %v8611_v27  ;;  %v5364_v5 = vmax.f32 %v5236_v22, 0.0 }
 0x646   : > { %v5365_v59 = vmax.f32 %v5237_v48, 0.0  ;;  %5195 = vmatmul.mubr.bf16.gmra.mrb[120].mxu1 %v10171_v6  ;;  %6500 = vmatprep.subr.bf16.mxu0 %v8616_v2 }
 0x647   : > { %v5366_v41 = vmax.f32 %v5238_v63, 0.0  ;;  %5204 = vmatprep.mubr.bf16.mxu1 %v10185_v55 }
 0x648   : > { %v5485_v29 = vpack.c.bf16 %v5365_v59, %v5363_v26 }
 0x649   : > { %v5486_v12 = vpack.c.bf16 %v5366_v41, %v5364_v5  ;;  %v4936_v7 = vpop.f32.mrb[16].mxu1  ;;  %6501 = vmatpush1.bf16.msra.mxu0 %v8614_v40 }
 0x64a   : > { %v5239_v52 = vadd.f32 %v10195_v62, %v4936_v7  ;;  %v4938_v33 = vpop.f32.mrb[17].mxu1  ;;  %6502 = vmatprep.subr.bf16.mxu0 %v8619_v16 }
 0x64b   : > { %v5240_v32 = vadd.f32 %v10198_v46, %v4938_v33  ;;  %v4940_v45 = vpop.f32.mrb[18].mxu1  ;;  %5806 = vmatprep.mubr.bf16.mxu0 %v5486_v12 }
 0x64c   : > { %v5241_v6 = vadd.f32 %v10195_v62, %v4940_v45  ;;  %v4942_v49 = vpop.f32.mrb[19].mxu1  ;;  %5807 = vmatmul.mubr.bf16.gmra.mrb[140].mxu0 %v5485_v29  ;;  %v5367_v51 = vmax.f32 %v5239_v52, 0.0 }
 0x64d   : > { %v5242_v55 = vadd.f32 %v10198_v46, %v4942_v49  ;;  %6503 = vmatpush1.bf16.msra.mxu0 %v8617_v60  ;;  %v5368_v9 = vmax.f32 %v5240_v32, 0.0  ;;  %v8634_v32 = vld [vmem:[#allocation7 + $0x6b4] ss:$8 sps:$4 sm:$0xff]  }
 0x64e   : > { %v5369_v54 = vmax.f32 %v5241_v6, 0.0  ;;  %5205 = vmatmul.mubr.bf16.gmra.mrb[124].mxu1 %v10181_v24  ;;  %6504 = vmatprep.subr.bf16.mxu0 %v8622_v35  ;;  %v8632_v35 = vld [vmem:[#allocation7 + $0x6b0] ss:$8 sps:$4 sm:$0xff]  }
 0x64f   : > { %v5370_v53 = vmax.f32 %v5242_v55, 0.0 }
 0x650   : > { %v5487_v56 = vpack.c.bf16 %v5369_v54, %v5367_v51 }
 0x651   : > { %v5488_v47 = vpack.c.bf16 %v5370_v53, %v5368_v9  ;;  %v4946_v38 = vpop.f32.mrb[20].mxu1  ;;  %6505 = vmatpush1.bf16.msra.mxu0 %v8620_v39 }
 0x652   : > { %v5243_v4 = vadd.f32 %v10195_v62, %v4946_v38  ;;  %v4948_v3 = vpop.f32.mrb[21].mxu1  ;;  %6506 = vmatprep.subr.bf16.mxu0 %v8625_v43 }
 0x653   : > { %v5244_v61 = vadd.f32 %v10198_v46, %v4948_v3  ;;  %v4950_v44 = vpop.f32.mrb[22].mxu1  ;;  %5816 = vmatprep.mubr.bf16.mxu0 %v5488_v47 }
 0x654   : > { %v5245_v24 = vadd.f32 %v10195_v62, %v4950_v44  ;;  %v4952_v42 = vpop.f32.mrb[23].mxu1  ;;  %5817 = vmatmul.mubr.bf16.gmra.mrb[144].mxu0 %v5487_v56  ;;  %v5371_v8 = vmax.f32 %v5243_v4, 0.0 }
 0x655   : > { %v5246_v58 = vadd.f32 %v10198_v46, %v4952_v42  ;;  %6507 = vmatpush1.bf16.msra.mxu0 %v8623_v57  ;;  %v5372_v19 = vmax.f32 %v5244_v61, 0.0 }
 0x656   : > { %v5373_v28 = vmax.f32 %v5245_v24, 0.0  ;;  %6508 = vmatprep.subr.bf16.mxu0 %v8628_v13 }
 0x657   : > { %v5374_v50 = vmax.f32 %v5246_v58, 0.0 }
 0x658   : > { %v5489_v1 = vpack.c.bf16 %v5373_v28, %v5371_v8 }
 0x659   : > { %v5490_v23 = vpack.c.bf16 %v5374_v50, %v5372_v19  ;;  %v4956_v11 = vpop.f32.mrb[24].mxu1  ;;  %6509 = vmatpush1.bf16.msra.mxu0 %v8626_v36 }
 0x65a   : > { %v5247_v15 = vadd.f32 %v10195_v62, %v4956_v11  ;;  %v4958_v14 = vpop.f32.mrb[25].mxu1  ;;  %6510 = vmatprep.subr.bf16.mxu0 %v8631_v21  ;;  %v8635_v21 = vld [vmem:[#allocation7 + $0x6c0] ss:$8 sps:$4 sm:$0xff]  }
 0x65b   : > { %v5248_v17 = vadd.f32 %v10198_v46, %v4958_v14  ;;  %v4960_v25 = vpop.f32.mrb[26].mxu1  ;;  %5826 = vmatprep.mubr.bf16.mxu0 %v5490_v23  ;;  %v8637_v23 = vld [vmem:[#allocation7 + $0x6c4] ss:$8 sps:$4 sm:$0xff]  }
 0x65c   : > { %v5249_v37 = vadd.f32 %v10195_v62, %v4960_v25  ;;  %v4962_v27 = vpop.f32.mrb[27].mxu1  ;;  %5827 = vmatmul.mubr.bf16.gmra.mrb[148].mxu0 %v5489_v1  ;;  %v5375_v34 = vmax.f32 %v5247_v15, 0.0 }
 0x65d   : > { %v5250_v30 = vadd.f32 %v10198_v46, %v4962_v27  ;;  %6511 = vmatpush1.bf16.msra.mxu0 %v8629_v20  ;;  %v5376_v22 = vmax.f32 %v5248_v17, 0.0 }
 0x65e   : > { %v5377_v2 = vmax.f32 %v5249_v37, 0.0  ;;  %6512 = vmatprep.subr.bf16.mxu0 %v8634_v32  ;;  %v8640_v32 = vld [vmem:[#allocation7 + $0x6d4] ss:$8 sps:$4 sm:$0xff]  }
 0x65f   : > { %v5378_v18 = vmax.f32 %v5250_v30, 0.0 }
 0x660   : > { %v5491_v48 = vpack.c.bf16 %v5377_v2, %v5375_v34 }
 0x661   : > { %v5492_v10 = vpack.c.bf16 %v5378_v18, %v5376_v22  ;;  %v4966_v63 = vpop.f32.mrb[28].mxu1  ;;  %6513 = vmatpush1.bf16.msra.mxu0 %v8632_v35  ;;  %v8638_v35 = vld [vmem:[#allocation7 + $0x6d0] ss:$8 sps:$4 sm:$0xff]  }
 0x662   : > { %v5251_v40 = vadd.f32 %v10195_v62, %v4966_v63  ;;  %v4968_v26 = vpop.f32.mrb[29].mxu1  ;;  %6514 = vmatprep.subr.bf16.mxu0 %v8637_v23  ;;  %v8643_v23 = vld [vmem:[#allocation7 + $0x6e4] ss:$8 sps:$4 sm:$0xff]  }
 0x663   : > { %v5252_v59 = vadd.f32 %v10198_v46, %v4968_v26  ;;  %v4970_v16 = vpop.f32.mrb[30].mxu1  ;;  %5836 = vmatprep.mubr.bf16.mxu0 %v5492_v10 }
 0x664   : > { %v5253_v5 = vadd.f32 %v10195_v62, %v4970_v16  ;;  %v4972_v41 = vpop.f32.mrb[31].mxu1  ;;  %5837 = vmatmul.mubr.bf16.gmra.mrb[152].mxu0 %v5491_v48  ;;  %v5379_v12 = vmax.f32 %v5251_v40, 0.0 }
 0x665   : > { %v5254_v29 = vadd.f32 %v10198_v46, %v4972_v41  ;;  %v5380_v60 = vmax.f32 %v5252_v59, 0.0  ;;  %6515 = vmatpush1.bf16.msra.mxu0 %v8635_v21  ;;  %v8641_v21 = vld [vmem:[#allocation7 + $0x6e0] ss:$8 sps:$4 sm:$0xff]  }
 0x666   : > { %v5381_v7 = vmax.f32 %v5253_v5, 0.0  ;;  %6516 = vmatprep.subr.bf16.mxu0 %v8640_v32  ;;  %v8645_v32 = vld [vmem:[#allocation7 + $0x6f0] ss:$8 sps:$4 sm:$0xff]  }
 0x667   : > { %v5382_v52 = vmax.f32 %v5254_v29, 0.0 }
 0x668   : > { %v5493_v33 = vpack.c.bf16 %v5381_v7, %v5379_v12 }
 0x669   : > { %v5494_v45 = vpack.c.bf16 %v5382_v52, %v5380_v60  ;;  %v4976_v6 = vpop.f32.mrb[32].mxu1  ;;  %6517 = vmatpush1.bf16.msra.mxu0 %v8638_v35 }
 0x66a   : > { %v5255_v49 = vadd.f32 %v10195_v62, %v4976_v6  ;;  %v4978_v55 = vpop.f32.mrb[33].mxu1  ;;  %6518 = vmatprep.subr.bf16.mxu0 %v8643_v23 }
 0x66b   : > { %v5256_v39 = vadd.f32 %v10198_v46, %v4978_v55  ;;  %v4980_v51 = vpop.f32.mrb[34].mxu1  ;;  %5846 = vmatprep.mubr.bf16.mxu0 %v5494_v45 }
 0x66c   : > { %v5257_v54 = vadd.f32 %v10195_v62, %v4980_v51  ;;  %v4982_v43 = vpop.f32.mrb[35].mxu1  ;;  %5847 = vmatmul.mubr.bf16.gmra.mrb[156].mxu0 %v5493_v33  ;;  %v5383_v53 = vmax.f32 %v5255_v49, 0.0 }
 0x66d   : > { %v5258_v9 = vadd.f32 %v10198_v46, %v4982_v43  ;;  %v5384_v47 = vmax.f32 %v5256_v39, 0.0  ;;  %6519 = vmatpush1.bf16.msra.mxu0 %v8641_v21  ;;  %v10286_v21 = vld [vmem:[#allocation10 + $0x8] sm:$0xff]  }
 0x66e   : > { %v5385_v56 = vmax.f32 %v5257_v54, 0.0 }
 0x66f   : > { %v5386_v38 = vmax.f32 %v5258_v9, 0.0 }
 0x670   : > { %v5495_v57 = vpack.c.bf16 %v5385_v56, %v5383_v53 }
 0x671   : > { %v5496_v4 = vpack.c.bf16 %v5386_v38, %v5384_v47  ;;  %v4986_v3 = vpop.f32.mrb[36].mxu1 }
 0x672   : > { %v5259_v13 = vadd.f32 %v10195_v62, %v4986_v3  ;;  %v4988_v61 = vpop.f32.mrb[37].mxu1 }
 0x673   : > { %v5260_v44 = vadd.f32 %v10198_v46, %v4988_v61  ;;  %v4990_v24 = vpop.f32.mrb[38].mxu1  ;;  %5856 = vmatprep.mubr.bf16.mxu0 %v5496_v4 }
 0x674   : > { %v5261_v42 = vadd.f32 %v10195_v62, %v4990_v24  ;;  %v4992_v58 = vpop.f32.mrb[39].mxu1  ;;  %5857 = vmatmul.mubr.bf16.gmra.mrb[160].mxu0 %v5495_v57  ;;  %v5387_v8 = vmax.f32 %v5259_v13, 0.0 }
 0x675   : > { %v5262_v36 = vadd.f32 %v10198_v46, %v4992_v58  ;;  %v5388_v19 = vmax.f32 %v5260_v44, 0.0 }
 0x676   : > { %v5389_v28 = vmax.f32 %v5261_v42, 0.0 }
 0x677   : > { %v5390_v50 = vmax.f32 %v5262_v36, 0.0 }
 0x678   : > { %v5497_v1 = vpack.c.bf16 %v5389_v28, %v5387_v8 }
 0x679   : > { %v5498_v11 = vpack.c.bf16 %v5390_v50, %v5388_v19  ;;  %v4996_v20 = vpop.f32.mrb[40].mxu1 }
 0x67a   : > { %v5263_v15 = vadd.f32 %v10195_v62, %v4996_v20  ;;  %v4998_v14 = vpop.f32.mrb[41].mxu1 }
 0x67b   : > { %v5264_v17 = vadd.f32 %v10198_v46, %v4998_v14  ;;  %v5000_v25 = vpop.f32.mrb[42].mxu1  ;;  %5866 = vmatprep.mubr.bf16.mxu0 %v5498_v11 }
 0x67c   : > { %v5265_v37 = vadd.f32 %v10195_v62, %v5000_v25  ;;  %v5002_v27 = vpop.f32.mrb[43].mxu1  ;;  %5867 = vmatmul.mubr.bf16.gmra.mrb[164].mxu0 %v5497_v1  ;;  %v5391_v34 = vmax.f32 %v5263_v15, 0.0 }
 0x67d   : > { %v5266_v30 = vadd.f32 %v10198_v46, %v5002_v27  ;;  %v5392_v22 = vmax.f32 %v5264_v17, 0.0 }
 0x67e   : > { %v5393_v2 = vmax.f32 %v5265_v37, 0.0 }
 0x67f   : > { %v5394_v18 = vmax.f32 %v5266_v30, 0.0 }
 0x680   : > { %v5499_v48 = vpack.c.bf16 %v5393_v2, %v5391_v34 }
 0x681   : > { %v5500_v10 = vpack.c.bf16 %v5394_v18, %v5392_v22  ;;  %v5006_v63 = vpop.f32.mrb[44].mxu1 }
 0x682   : > { %v5267_v40 = vadd.f32 %v10195_v62, %v5006_v63  ;;  %v5008_v26 = vpop.f32.mrb[45].mxu1 }
 0x683   : > { %v5268_v59 = vadd.f32 %v10198_v46, %v5008_v26  ;;  %v5010_v16 = vpop.f32.mrb[46].mxu1  ;;  %5876 = vmatprep.mubr.bf16.mxu0 %v5500_v10 }
 0x684   : > { %v5269_v5 = vadd.f32 %v10195_v62, %v5010_v16  ;;  %v5012_v41 = vpop.f32.mrb[47].mxu1  ;;  %5877 = vmatmul.mubr.bf16.gmra.mrb[168].mxu0 %v5499_v48  ;;  %v5395_v12 = vmax.f32 %v5267_v40, 0.0 }
 0x685   : > { %v5270_v29 = vadd.f32 %v10198_v46, %v5012_v41  ;;  %v5396_v60 = vmax.f32 %v5268_v59, 0.0 }
 0x686   : > { %v5397_v7 = vmax.f32 %v5269_v5, 0.0 }
 0x687   : > { %v5398_v52 = vmax.f32 %v5270_v29, 0.0 }
 0x688   : > { %v5501_v33 = vpack.c.bf16 %v5397_v7, %v5395_v12 }
 0x689   : > { %v5502_v45 = vpack.c.bf16 %v5398_v52, %v5396_v60  ;;  %v5016_v6 = vpop.f32.mrb[48].mxu1 }
 0x68a   : > { %v5271_v49 = vadd.f32 %v10195_v62, %v5016_v6  ;;  %v5018_v55 = vpop.f32.mrb[49].mxu1 }
 0x68b   : > { %v5272_v39 = vadd.f32 %v10198_v46, %v5018_v55  ;;  %v5020_v51 = vpop.f32.mrb[50].mxu1  ;;  %5886 = vmatprep.mubr.bf16.mxu0 %v5502_v45  ;;  %v8647_v45 = vld [vmem:[#allocation7 + $0x6f4] ss:$8 sps:$4 sm:$0xff]  }
 0x68c   : > { %v5273_v54 = vadd.f32 %v10195_v62, %v5020_v51  ;;  %v5022_v43 = vpop.f32.mrb[51].mxu1  ;;  %5887 = vmatmul.mubr.bf16.gmra.mrb[172].mxu0 %v5501_v33  ;;  %v5399_v53 = vmax.f32 %v5271_v49, 0.0  ;;  %v10273_v33 = vld [vmem:[#allocation10] sm:$0xff]   ;;  %6520 = vmatprep.subr.bf16.mxu0 %v8647_v45 }
 0x68d   : > { %v5274_v9 = vadd.f32 %v10198_v46, %v5022_v43  ;;  %v5400_v47 = vmax.f32 %v5272_v39, 0.0  ;;  %7993 = vmatpush1.bf16.msra.mxu1 %v10273_v33  ;;  %6521 = vmatpush1.bf16.msra.mxu0 %v8645_v32 }
 0x68e   : > { %v5401_v56 = vmax.f32 %v5273_v54, 0.0  ;;  %7978 = vmatprep.subr.bf16.mxu1 %v8936_v0  ;;  %7170 = vmatprep.subr.bf16.mxu0 %v8936_v0 }
 0x68f   : > { %v5402_v38 = vmax.f32 %v5274_v9, 0.0 }
 0x690   : > { %v5503_v57 = vpack.c.bf16 %v5401_v56, %v5399_v53 }
 0x691   : > { %v5504_v4 = vpack.c.bf16 %v5402_v38, %v5400_v47  ;;  %v5026_v3 = vpop.f32.mrb[52].mxu1  ;;  %7994 = vmatpush1.bf16.msra.mxu1 %v10286_v21 }
 0x692   : > { %v5275_v13 = vadd.f32 %v10195_v62, %v5026_v3  ;;  %v5028_v61 = vpop.f32.mrb[53].mxu1  ;;  %7979 = vmatprep.subr.bf16.mxu1 %v8936_v0 }
 0x693   : > { %v5276_v44 = vadd.f32 %v10198_v46, %v5028_v61  ;;  %v5030_v24 = vpop.f32.mrb[54].mxu1  ;;  %5896 = vmatprep.mubr.bf16.mxu0 %v5504_v4 }
 0x694   : > { %v5277_v42 = vadd.f32 %v10195_v62, %v5030_v24  ;;  %v5032_v58 = vpop.f32.mrb[55].mxu1  ;;  %5897 = vmatmul.mubr.bf16.gmra.mrb[176].mxu0 %v5503_v57  ;;  %v5403_v8 = vmax.f32 %v5275_v13, 0.0 }
 0x695   : > { %v5278_v36 = vadd.f32 %v10198_v46, %v5032_v58  ;;  %v5404_v19 = vmax.f32 %v5276_v44, 0.0 }
 0x696   : > { %v5405_v28 = vmax.f32 %v5277_v42, 0.0 }
 0x697   : > { %v5406_v50 = vmax.f32 %v5278_v36, 0.0 }
 0x698   : > { %v5505_v1 = vpack.c.bf16 %v5405_v28, %v5403_v8 }
 0x699   : > { %v5506_v11 = vpack.c.bf16 %v5406_v50, %v5404_v19  ;;  %v5036_v20 = vpop.f32.mrb[56].mxu1 }
 0x69a   : > { %v5279_v15 = vadd.f32 %v10195_v62, %v5036_v20  ;;  %v5038_v14 = vpop.f32.mrb[57].mxu1 }
 0x69b   : > { %v5280_v17 = vadd.f32 %v10198_v46, %v5038_v14  ;;  %v5040_v25 = vpop.f32.mrb[58].mxu1  ;;  %5906 = vmatprep.mubr.bf16.mxu0 %v5506_v11 }
 0x69c   : > { %v5281_v37 = vadd.f32 %v10195_v62, %v5040_v25  ;;  %v5042_v27 = vpop.f32.mrb[59].mxu1  ;;  %5907 = vmatmul.mubr.bf16.gmra.mrb[180].mxu0 %v5505_v1  ;;  %v5407_v34 = vmax.f32 %v5279_v15, 0.0 }
 0x69d   : > { %v5282_v30 = vadd.f32 %v10198_v46, %v5042_v27  ;;  %v5408_v22 = vmax.f32 %v5280_v17, 0.0 }
 0x69e   : > { %v5409_v2 = vmax.f32 %v5281_v37, 0.0 }
 0x69f   : > { %v5410_v18 = vmax.f32 %v5282_v30, 0.0 }
 0x6a0   : > { %v5507_v48 = vpack.c.bf16 %v5409_v2, %v5407_v34 }
 0x6a1   : > { %v5508_v10 = vpack.c.bf16 %v5410_v18, %v5408_v22  ;;  %v5046_v63 = vpop.f32.mrb[60].mxu1 }
 0x6a2   : > { %v5283_v40 = vadd.f32 %v10195_v62, %v5046_v63  ;;  %v5048_v26 = vpop.f32.mrb[61].mxu1 }
 0x6a3   : > { %v5284_v59 = vadd.f32 %v10198_v46, %v5048_v26  ;;  %v5050_v16 = vpop.f32.mrb[62].mxu1  ;;  %5916 = vmatprep.mubr.bf16.mxu0 %v5508_v10 }
 0x6a4   : > { %v5285_v5 = vadd.f32 %v10195_v62, %v5050_v16  ;;  %v5052_v41 = vpop.f32.mrb[63].mxu1  ;;  %5917 = vmatmul.mubr.bf16.gmra.mrb[184].mxu0 %v5507_v48  ;;  %v5411_v12 = vmax.f32 %v5283_v40, 0.0 }
 0x6a5   : > { %v5286_v29 = vadd.f32 %v10198_v46, %v5052_v41  ;;  %v5412_v60 = vmax.f32 %v5284_v59, 0.0 }
 0x6a6   : > { %v5413_v7 = vmax.f32 %v5285_v5, 0.0 }
 0x6a7   : > { %v5414_v52 = vmax.f32 %v5286_v29, 0.0 }
 0x6a8   : > { %v5509_v35 = vpack.c.bf16 %v5413_v7, %v5411_v12 }
 0x6a9   : > { %v5510_v6 = vpack.c.bf16 %v5414_v52, %v5412_v60  ;;  %v5056_v49 = vpop.f32.mrb[64].mxu1 }
 0x6aa   : > { %v5287_v55 = vadd.f32 %v10195_v62, %v5056_v49  ;;  %v5058_v39 = vpop.f32.mrb[65].mxu1 }
 0x6ab   : > { %v5288_v51 = vadd.f32 %v10198_v46, %v5058_v39  ;;  %v5060_v54 = vpop.f32.mrb[66].mxu1  ;;  %5926 = vmatprep.mubr.bf16.mxu0 %v5510_v6 }
 0x6ac   : > { %v5289_v43 = vadd.f32 %v10195_v62, %v5060_v54  ;;  %v5062_v9 = vpop.f32.mrb[67].mxu1  ;;  %5927 = vmatmul.mubr.bf16.gmra.mrb[188].mxu0 %v5509_v35  ;;  %v5415_v56 = vmax.f32 %v5287_v55, 0.0  ;;  %v10298_v35 = vld [vmem:[#allocation10 + $0x10] sm:$0xff]  }
 0x6ad   : > { %v5290_v53 = vadd.f32 %v10198_v46, %v5062_v9  ;;  %v5416_v38 = vmax.f32 %v5288_v51, 0.0  ;;  %7995 = vmatpush1.bf16.msra.mxu1 %v10298_v35 }
 0x6ae   : > { %v5417_v47 = vmax.f32 %v5289_v43, 0.0  ;;  %7980 = vmatprep.subr.bf16.mxu1 %v8936_v0 }
 0x6af   : > { %v5418_v57 = vmax.f32 %v5290_v53, 0.0 }
 0x6b0   : > { %v5511_v4 = vpack.c.bf16 %v5417_v47, %v5415_v56 }
 0x6b1   : > { %v5512_v3 = vpack.c.bf16 %v5418_v57, %v5416_v38  ;;  %v5066_v13 = vpop.f32.mrb[68].mxu1 }
 0x6b2   : > { %v5291_v61 = vadd.f32 %v10195_v62, %v5066_v13  ;;  %v5068_v44 = vpop.f32.mrb[69].mxu1 }
 0x6b3   : > { %v5292_v24 = vadd.f32 %v10198_v46, %v5068_v44  ;;  %v5070_v42 = vpop.f32.mrb[70].mxu1  ;;  %5936 = vmatprep.mubr.bf16.mxu0 %v5512_v3 }
 0x6b4   : > { %v5293_v58 = vadd.f32 %v10195_v62, %v5070_v42  ;;  %v5072_v36 = vpop.f32.mrb[71].mxu1  ;;  %5937 = vmatmul.mubr.bf16.gmra.mrb[192].mxu0 %v5511_v4  ;;  %v5419_v28 = vmax.f32 %v5291_v61, 0.0 }
 0x6b5   : > { %v5294_v8 = vadd.f32 %v10198_v46, %v5072_v36  ;;  %v5420_v50 = vmax.f32 %v5292_v24, 0.0 }
 0x6b6   : > { %v5421_v19 = vmax.f32 %v5293_v58, 0.0 }
 0x6b7   : > { %v5422_v1 = vmax.f32 %v5294_v8, 0.0 }
 0x6b8   : > { %v5513_v23 = vpack.c.bf16 %v5421_v19, %v5419_v28 }
 0x6b9   : > { %v5514_v11 = vpack.c.bf16 %v5422_v1, %v5420_v50  ;;  %v5076_v20 = vpop.f32.mrb[72].mxu1  ;;  %v10310_v1 = vld [vmem:[#allocation10 + $0x18] sm:$0xff]  }
 0x6ba   : > { %v5295_v15 = vadd.f32 %v10195_v62, %v5076_v20  ;;  %v5078_v14 = vpop.f32.mrb[73].mxu1  ;;  %7996 = vmatpush1.bf16.msra.mxu1 %v10310_v1 }
 0x6bb   : > { %v5296_v17 = vadd.f32 %v10198_v46, %v5078_v14  ;;  %v5080_v25 = vpop.f32.mrb[74].mxu1  ;;  %5946 = vmatprep.mubr.bf16.mxu0 %v5514_v11  ;;  %7981 = vmatprep.subr.bf16.mxu1 %v8936_v0 }
 0x6bc   : > { %v5297_v37 = vadd.f32 %v10195_v62, %v5080_v25  ;;  %v5082_v27 = vpop.f32.mrb[75].mxu1  ;;  %5947 = vmatmul.mubr.bf16.gmra.mrb[196].mxu0 %v5513_v23  ;;  %v5423_v34 = vmax.f32 %v5295_v15, 0.0 }
 0x6bd   : > { %v5298_v30 = vadd.f32 %v10198_v46, %v5082_v27  ;;  %v5424_v22 = vmax.f32 %v5296_v17, 0.0 }
 0x6be   : > { %v5425_v2 = vmax.f32 %v5297_v37, 0.0 }
 0x6bf   : > { %v5426_v18 = vmax.f32 %v5298_v30, 0.0 }
 0x6c0   : > { %v5515_v48 = vpack.c.bf16 %v5425_v2, %v5423_v34 }
 0x6c1   : > { %v5516_v10 = vpack.c.bf16 %v5426_v18, %v5424_v22  ;;  %v5086_v63 = vpop.f32.mrb[76].mxu1 }
 0x6c2   : > { %v5299_v40 = vadd.f32 %v10195_v62, %v5086_v63  ;;  %v5088_v26 = vpop.f32.mrb[77].mxu1 }
 0x6c3   : > { %v5300_v59 = vadd.f32 %v10198_v46, %v5088_v26  ;;  %v5090_v16 = vpop.f32.mrb[78].mxu1  ;;  %5956 = vmatprep.mubr.bf16.mxu0 %v5516_v10 }
 0x6c4   : > { %v5301_v5 = vadd.f32 %v10195_v62, %v5090_v16  ;;  %v5092_v41 = vpop.f32.mrb[79].mxu1  ;;  %5957 = vmatmul.mubr.bf16.gmra.mrb[200].mxu0 %v5515_v48  ;;  %v5427_v12 = vmax.f32 %v5299_v40, 0.0 }
 0x6c5   : > { %v5302_v29 = vadd.f32 %v10198_v46, %v5092_v41  ;;  %v5428_v60 = vmax.f32 %v5300_v59, 0.0 }
 0x6c6   : > { %v5429_v7 = vmax.f32 %v5301_v5, 0.0 }
 0x6c7   : > { %v5430_v52 = vmax.f32 %v5302_v29, 0.0 }
 0x6c8   : > { %v5517_v32 = vpack.c.bf16 %v5429_v7, %v5427_v12 }
 0x6c9   : > { %v5518_v45 = vpack.c.bf16 %v5430_v52, %v5428_v60  ;;  %v5096_v6 = vpop.f32.mrb[80].mxu1 }
 0x6ca   : > { %v5303_v49 = vadd.f32 %v10195_v62, %v5096_v6  ;;  %v5098_v55 = vpop.f32.mrb[81].mxu1 }
 0x6cb   : > { %v5304_v39 = vadd.f32 %v10198_v46, %v5098_v55  ;;  %v5100_v51 = vpop.f32.mrb[82].mxu1  ;;  %5966 = vmatprep.mubr.bf16.mxu0 %v5518_v45 }
 0x6cc   : > { %v5305_v54 = vadd.f32 %v10195_v62, %v5100_v51  ;;  %v5102_v43 = vpop.f32.mrb[83].mxu1  ;;  %5967 = vmatmul.mubr.bf16.gmra.mrb[204].mxu0 %v5517_v32  ;;  %v5431_v53 = vmax.f32 %v5303_v49, 0.0  ;;  %v10322_v32 = vld [vmem:[#allocation10 + $0x20] sm:$0xff]  }
 0x6cd   : > { %v5306_v9 = vadd.f32 %v10198_v46, %v5102_v43  ;;  %v5432_v47 = vmax.f32 %v5304_v39, 0.0  ;;  %7997 = vmatpush1.bf16.msra.mxu1 %v10322_v32 }
 0x6ce   : > { %v5433_v56 = vmax.f32 %v5305_v54, 0.0  ;;  %7982 = vmatprep.subr.bf16.mxu1 %v8936_v0 }
 0x6cf   : > { %v5434_v38 = vmax.f32 %v5306_v9, 0.0 }
 0x6d0   : > { %v5519_v57 = vpack.c.bf16 %v5433_v56, %v5431_v53 }
 0x6d1   : > { %v5520_v4 = vpack.c.bf16 %v5434_v38, %v5432_v47  ;;  %v5106_v3 = vpop.f32.mrb[84].mxu1 }
 0x6d2   : > { %v5307_v13 = vadd.f32 %v10195_v62, %v5106_v3  ;;  %v5108_v61 = vpop.f32.mrb[85].mxu1 }
 0x6d3   : > { %v5308_v44 = vadd.f32 %v10198_v46, %v5108_v61  ;;  %v5110_v24 = vpop.f32.mrb[86].mxu1  ;;  %5976 = vmatprep.mubr.bf16.mxu0 %v5520_v4 }
 0x6d4   : > { %v5309_v42 = vadd.f32 %v10195_v62, %v5110_v24  ;;  %v5112_v58 = vpop.f32.mrb[87].mxu1  ;;  %5977 = vmatmul.mubr.bf16.gmra.mrb[208].mxu0 %v5519_v57  ;;  %v5435_v8 = vmax.f32 %v5307_v13, 0.0 }
 0x6d5   : > { %v5310_v36 = vadd.f32 %v10198_v46, %v5112_v58  ;;  %v5436_v19 = vmax.f32 %v5308_v44, 0.0 }
 0x6d6   : > { %v5437_v28 = vmax.f32 %v5309_v42, 0.0 }
 0x6d7   : > { %v5438_v50 = vmax.f32 %v5310_v36, 0.0 }
 0x6d8   : > { %v5521_v23 = vpack.c.bf16 %v5437_v28, %v5435_v8 }
 0x6d9   : > { %v5522_v11 = vpack.c.bf16 %v5438_v50, %v5436_v19  ;;  %v5116_v20 = vpop.f32.mrb[88].mxu1 }
 0x6da   : > { %v5311_v15 = vadd.f32 %v10195_v62, %v5116_v20  ;;  %v5118_v14 = vpop.f32.mrb[89].mxu1 }
 0x6db   : > { %v5312_v17 = vadd.f32 %v10198_v46, %v5118_v14  ;;  %v5120_v25 = vpop.f32.mrb[90].mxu1  ;;  %5986 = vmatprep.mubr.bf16.mxu0 %v5522_v11  ;;  %v10334_v11 = vld [vmem:[#allocation10 + $0x28] sm:$0xff]  }
 0x6dc   : > { %v5313_v37 = vadd.f32 %v10195_v62, %v5120_v25  ;;  %v5122_v27 = vpop.f32.mrb[91].mxu1  ;;  %5987 = vmatmul.mubr.bf16.gmra.mrb[212].mxu0 %v5521_v23  ;;  %v5439_v34 = vmax.f32 %v5311_v15, 0.0  ;;  %7998 = vmatpush1.bf16.msra.mxu1 %v10334_v11 }
 0x6dd   : > { %v5314_v30 = vadd.f32 %v10198_v46, %v5122_v27  ;;  %v5440_v22 = vmax.f32 %v5312_v17, 0.0  ;;  %7983 = vmatprep.subr.bf16.mxu1 %v8936_v0 }
 0x6de   : > { %v5441_v2 = vmax.f32 %v5313_v37, 0.0 }
 0x6df   : > { %v5442_v18 = vmax.f32 %v5314_v30, 0.0 }
 0x6e0   : > { %v5523_v48 = vpack.c.bf16 %v5441_v2, %v5439_v34 }
 0x6e1   : > { %v5524_v10 = vpack.c.bf16 %v5442_v18, %v5440_v22  ;;  %v5126_v63 = vpop.f32.mrb[92].mxu1 }
 0x6e2   : > { %v5315_v40 = vadd.f32 %v10195_v62, %v5126_v63  ;;  %v5128_v26 = vpop.f32.mrb[93].mxu1 }
 0x6e3   : > { %v5316_v59 = vadd.f32 %v10198_v46, %v5128_v26  ;;  %v5130_v16 = vpop.f32.mrb[94].mxu1  ;;  %5996 = vmatprep.mubr.bf16.mxu0 %v5524_v10 }
 0x6e4   : > { %v5317_v5 = vadd.f32 %v10195_v62, %v5130_v16  ;;  %v5132_v41 = vpop.f32.mrb[95].mxu1  ;;  %5997 = vmatmul.mubr.bf16.gmra.mrb[216].mxu0 %v5523_v48  ;;  %v5443_v12 = vmax.f32 %v5315_v40, 0.0  ;;  %v5578_v40 = vsub.s32 6, %v9268_v31 }
 0x6e5   : > { %v5318_v29 = vadd.f32 %v10198_v46, %v5132_v41  ;;  %v5444_v60 = vmax.f32 %v5316_v59, 0.0 }
 0x6e6   : > { %v5445_v7 = vmax.f32 %v5317_v5, 0.0 }
 0x6e7   : > { %v5446_v52 = vmax.f32 %v5318_v29, 0.0 }
 0x6e8   : > { %v5525_v45 = vpack.c.bf16 %v5445_v7, %v5443_v12 }
 0x6e9   : > { %v5526_v6 = vpack.c.bf16 %v5446_v52, %v5444_v60  ;;  %v5136_v49 = vpop.f32.mrb[96].mxu1  ;;  %v8705_v60 = vld [vmem:[#allocation8] sm:$0xff] }
 0x6ea   : > { %v5319_v55 = vadd.f32 %v10195_v62, %v5136_v49  ;;  %v5138_v39 = vpop.f32.mrb[97].mxu1  ;;  %v10346_v52 = vrot.slane %v8705_v60, %v5578_v40 }
 0x6eb   : > { %v5320_v51 = vadd.f32 %v10198_v46, %v5138_v39  ;;  %v5140_v54 = vpop.f32.mrb[98].mxu1  ;;  %6006 = vmatprep.mubr.bf16.mxu0 %v5526_v6  ;;  %v8706_v6 = vld [vmem:[#allocation8 + $0x8] sm:$0xff] }
 0x6ec   : > { %v5321_v43 = vadd.f32 %v10195_v62, %v5140_v54  ;;  %v5142_v9 = vpop.f32.mrb[99].mxu1  ;;  %6007 = vmatmul.mubr.bf16.gmra.mrb[220].mxu0 %v5525_v45  ;;  %v5447_v56 = vmax.f32 %v5319_v55, 0.0  ;;  %v10349_v49 = vrot.slane %v8706_v6, %v5578_v40 }
 0x6ed   : > { %v5322_v53 = vadd.f32 %v10198_v46, %v5142_v9  ;;  %v5448_v38 = vmax.f32 %v5320_v51, 0.0  ;;  %v10351_v9 = vld [vmem:[#allocation10 + $0x30] sm:$0xff]  }
 0x6ee   : > { %v5449_v47 = vmax.f32 %v5321_v43, 0.0  ;;  %7999 = vmatpush1.bf16.msra.mxu1 %v10351_v9 }
 0x6ef   : > { %v5450_v57 = vmax.f32 %v5322_v53, 0.0  ;;  %7984 = vmatprep.subr.bf16.mxu1 %v8936_v0 }
 0x6f0   : > { %v5527_v4 = vpack.c.bf16 %v5449_v47, %v5447_v56 }
 0x6f1   : > { %v5528_v3 = vpack.c.bf16 %v5450_v57, %v5448_v38  ;;  %v5146_v13 = vpop.f32.mrb[100].mxu1 }
 0x6f2   : > { %v5323_v61 = vadd.f32 %v10195_v62, %v5146_v13  ;;  %v5148_v44 = vpop.f32.mrb[101].mxu1 }
 0x6f3   : > { %v5324_v24 = vadd.f32 %v10198_v46, %v5148_v44  ;;  %v5150_v42 = vpop.f32.mrb[102].mxu1  ;;  %6016 = vmatprep.mubr.bf16.mxu0 %v5528_v3 }
 0x6f4   : > { %v5325_v58 = vadd.f32 %v10195_v62, %v5150_v42  ;;  %v5152_v36 = vpop.f32.mrb[103].mxu1  ;;  %6017 = vmatmul.mubr.bf16.gmra.mrb[224].mxu0 %v5527_v4  ;;  %v5451_v28 = vmax.f32 %v5323_v61, 0.0 }
 0x6f5   : > { %v5326_v8 = vadd.f32 %v10198_v46, %v5152_v36  ;;  %v5452_v50 = vmax.f32 %v5324_v24, 0.0 }
 0x6f6   : > { %v5453_v19 = vmax.f32 %v5325_v58, 0.0 }
 0x6f7   : > { %v5454_v23 = vmax.f32 %v5326_v8, 0.0 }
 0x6f8   : > { %v5529_v20 = vpack.c.bf16 %v5453_v19, %v5451_v28 }
 0x6f9   : > { %v5530_v15 = vpack.c.bf16 %v5454_v23, %v5452_v50  ;;  %v5156_v14 = vpop.f32.mrb[104].mxu1 }
 0x6fa   : > { %v5327_v17 = vadd.f32 %v10195_v62, %v5156_v14  ;;  %v5158_v25 = vpop.f32.mrb[105].mxu1 }
 0x6fb   : > { %v5328_v37 = vadd.f32 %v10198_v46, %v5158_v25  ;;  %v5160_v27 = vpop.f32.mrb[106].mxu1  ;;  %6026 = vmatprep.mubr.bf16.mxu0 %v5530_v15 }
 0x6fc   : > { %v5329_v30 = vadd.f32 %v10195_v62, %v5160_v27  ;;  %v5162_v34 = vpop.f32.mrb[107].mxu1  ;;  %6027 = vmatmul.mubr.bf16.gmra.mrb[228].mxu0 %v5529_v20  ;;  %v5455_v22 = vmax.f32 %v5327_v17, 0.0 }
 0x6fd   : > { %v5330_v2 = vadd.f32 %v10198_v46, %v5162_v34  ;;  %v5456_v48 = vmax.f32 %v5328_v37, 0.0 }
 0x6fe   : > { %v5457_v18 = vmax.f32 %v5329_v30, 0.0 }
 0x6ff   : > { %v5458_v10 = vmax.f32 %v5330_v2, 0.0 }
 0x700   : > { %v5531_v63 = vpack.c.bf16 %v5457_v18, %v5455_v22 }
 0x701   : > { %v5532_v26 = vpack.c.bf16 %v5458_v10, %v5456_v48  ;;  %v5166_v59 = vpop.f32.mrb[108].mxu1 }
 0x702   : > { %v5331_v16 = vadd.f32 %v10195_v62, %v5166_v59  ;;  %v5168_v5 = vpop.f32.mrb[109].mxu1 }
 0x703   : > { %v5332_v41 = vadd.f32 %v10198_v46, %v5168_v5  ;;  %v5170_v29 = vpop.f32.mrb[110].mxu1  ;;  %6036 = vmatprep.mubr.bf16.mxu0 %v5532_v26 }
 0x704   : > { %v5333_v12 = vadd.f32 %v10195_v62, %v5170_v29  ;;  %v5172_v7 = vpop.f32.mrb[111].mxu1  ;;  %6037 = vmatmul.mubr.bf16.gmra.mrb[232].mxu0 %v5531_v63  ;;  %v5459_v55 = vmax.f32 %v5331_v16, 0.0 }
 0x705   : > { %v5334_v45 = vadd.f32 %v10198_v46, %v5172_v7  ;;  %v5460_v51 = vmax.f32 %v5332_v41, 0.0 }
 0x706   : > { %v5461_v39 = vmax.f32 %v5333_v12, 0.0 }
 0x707   : > { %v5462_v54 = vmax.f32 %v5334_v45, 0.0  ;;  %v5778_v43 = vpop.f32.mrb[128].mxu0 }
 0x708   : > { %v5533_v53 = vpack.c.bf16 %v5461_v39, %v5459_v55  ;;  %v5779_v56 = vadd.f32 %v5778_v43, %v10346_v52  ;;  %v5780_v47 = vpop.f32.mrb[129].mxu0 }
 0x709   : > { %v5534_v38 = vpack.c.bf16 %v5462_v54, %v5460_v51  ;;  %v5781_v57 = vadd.f32 %v5780_v47, %v10349_v49  ;;  %v5176_v4 = vpop.f32.mrb[112].mxu1  ;;  %v5782_v3 = vpop.f32.mrb[130].mxu0 }
 0x70a   : > { %v5335_v13 = vadd.f32 %v10195_v62, %v5176_v4  ;;  %v5783_v61 = vadd.f32 %v5782_v3, %v10346_v52  ;;  %v5178_v44 = vpop.f32.mrb[113].mxu1  ;;  %v5784_v24 = vpop.f32.mrb[131].mxu0  ;;  %v6097_v8 = vmax.f32 %v5779_v56, 0.0  ;;  %v10379_v4 = vld [vmem:[#allocation10 + $0x38] sm:$0xff]  }
 0x70b   : > { %v5336_v42 = vadd.f32 %v10198_v46, %v5178_v44  ;;  %v5785_v58 = vadd.f32 %v5784_v24, %v10349_v49  ;;  %v5180_v36 = vpop.f32.mrb[114].mxu1  ;;  %6046 = vmatprep.mubr.bf16.mxu0 %v5534_v38  ;;  %v6098_v23 = vmax.f32 %v5781_v57, 0.0  ;;  %8000 = vmatpush1.bf16.msra.mxu1 %v10379_v4 }
 0x70c   : > { %v6099_v28 = vmax.f32 %v5783_v61, 0.0  ;;  %v5337_v19 = vadd.f32 %v10195_v62, %v5180_v36  ;;  %v5182_v50 = vpop.f32.mrb[115].mxu1  ;;  %6047 = vmatmul.mubr.bf16.gmra.mrb[236].mxu0 %v5533_v53  ;;  %v5463_v14 = vmax.f32 %v5335_v13, 0.0  ;;  %7985 = vmatprep.subr.bf16.mxu1 %v8936_v0 }
 0x70d   : > { %v6100_v20 = vmax.f32 %v5785_v58, 0.0  ;;  %v5338_v15 = vadd.f32 %v10198_v46, %v5182_v50  ;;  %v5464_v37 = vmax.f32 %v5336_v42, 0.0 }
 0x70e   : > { %v10363_v17 = vpack.c.bf16 %v6099_v28, %v6097_v8  ;;  %v5465_v25 = vmax.f32 %v5337_v19, 0.0 }
 0x70f   : > { %v5466_v27 = vmax.f32 %v5338_v15, 0.0  ;;  %v5788_v30 = vpop.f32.mrb[132].mxu0  ;;  %v10365_v34 = vpack.c.bf16 %v6100_v20, %v6098_v23 }
 0x710   : > { %v5535_v2 = vpack.c.bf16 %v5465_v25, %v5463_v14  ;;  %v5789_v22 = vadd.f32 %v5788_v30, %v10346_v52  ;;  %v5790_v18 = vpop.f32.mrb[133].mxu0 }
 0x711   : > { %v5536_v48 = vpack.c.bf16 %v5466_v27, %v5464_v37  ;;  %v5791_v10 = vadd.f32 %v5790_v18, %v10349_v49  ;;  %v5186_v63 = vpop.f32.mrb[116].mxu1  ;;  %v5792_v40 = vpop.f32.mrb[134].mxu0 }
 0x712   : > { %v5339_v26 = vadd.f32 %v10195_v62, %v5186_v63  ;;  %v5793_v59 = vadd.f32 %v5792_v40, %v10346_v52  ;;  %v5188_v16 = vpop.f32.mrb[117].mxu1  ;;  %v5794_v5 = vpop.f32.mrb[135].mxu0  ;;  %v6101_v7 = vmax.f32 %v5789_v22, 0.0 }
 0x713   : > { %v5340_v41 = vadd.f32 %v10198_v46, %v5188_v16  ;;  %v5795_v29 = vadd.f32 %v5794_v5, %v10349_v49  ;;  %v5190_v12 = vpop.f32.mrb[118].mxu1  ;;  %6056 = vmatprep.mubr.bf16.mxu0 %v5536_v48  ;;  %v6102_v55 = vmax.f32 %v5791_v10, 0.0 }
 0x714   : > { %v6103_v60 = vmax.f32 %v5793_v59, 0.0  ;;  %v5341_v45 = vadd.f32 %v10195_v62, %v5190_v12  ;;  %v5192_v6 = vpop.f32.mrb[119].mxu1  ;;  %6057 = vmatmul.mubr.bf16.gmra.mrb[240].mxu0 %v5535_v2  ;;  %v5467_v54 = vmax.f32 %v5339_v26, 0.0 }
 0x715   : > { %v6104_v39 = vmax.f32 %v5795_v29, 0.0  ;;  %v5342_v51 = vadd.f32 %v10198_v46, %v5192_v6  ;;  %v5468_v56 = vmax.f32 %v5340_v41, 0.0 }
 0x716   : > { %v10375_v43 = vpack.c.bf16 %v6103_v60, %v6101_v7  ;;  %v5469_v53 = vmax.f32 %v5341_v45, 0.0 }
 0x717   : > { %v5470_v47 = vmax.f32 %v5342_v51, 0.0  ;;  %v5798_v38 = vpop.f32.mrb[136].mxu0  ;;  %v10377_v57 = vpack.c.bf16 %v6104_v39, %v6102_v55 }
 0x718   : > { %v5537_v3 = vpack.c.bf16 %v5469_v53, %v5467_v54  ;;  %v5799_v13 = vadd.f32 %v5798_v38, %v10346_v52  ;;  %v5800_v61 = vpop.f32.mrb[137].mxu0 }
 0x719   : > { %v5538_v44 = vpack.c.bf16 %v5470_v47, %v5468_v56  ;;  %v5801_v24 = vadd.f32 %v5800_v61, %v10349_v49  ;;  %v5196_v42 = vpop.f32.mrb[120].mxu1  ;;  %v5802_v58 = vpop.f32.mrb[138].mxu0 }
 0x71a   : > { %v5343_v36 = vadd.f32 %v10195_v62, %v5196_v42  ;;  %v5803_v8 = vadd.f32 %v5802_v58, %v10346_v52  ;;  %v5198_v28 = vpop.f32.mrb[121].mxu1  ;;  %v5804_v19 = vpop.f32.mrb[139].mxu0  ;;  %v6105_v15 = vmax.f32 %v5799_v13, 0.0 }
 0x71b   : > { %v5344_v50 = vadd.f32 %v10198_v46, %v5198_v28  ;;  %v5805_v23 = vadd.f32 %v5804_v19, %v10349_v49  ;;  %v5200_v20 = vpop.f32.mrb[122].mxu1  ;;  %6066 = vmatprep.mubr.bf16.mxu0 %v5538_v44  ;;  %v6106_v27 = vmax.f32 %v5801_v24, 0.0  ;;  %v10407_v19 = vld [vmem:[#allocation10 + $0x40] sm:$0xff]  }
 0x71c   : > { %v6107_v14 = vmax.f32 %v5803_v8, 0.0  ;;  %v5345_v25 = vadd.f32 %v10195_v62, %v5200_v20  ;;  %v5202_v37 = vpop.f32.mrb[123].mxu1  ;;  %6067 = vmatmul.mubr.bf16.gmra.mrb[244].mxu0 %v5537_v3  ;;  %v5471_v22 = vmax.f32 %v5343_v36, 0.0  ;;  %8001 = vmatpush1.bf16.msra.mxu1 %v10407_v19 }
 0x71d   : > { %v6108_v30 = vmax.f32 %v5805_v23, 0.0  ;;  %v5346_v2 = vadd.f32 %v10198_v46, %v5202_v37  ;;  %v5472_v10 = vmax.f32 %v5344_v50, 0.0  ;;  %7986 = vmatprep.subr.bf16.mxu1 %v8936_v0 }
 0x71e   : > { %v10391_v18 = vpack.c.bf16 %v6107_v14, %v6105_v15  ;;  %v5473_v48 = vmax.f32 %v5345_v25, 0.0 }
 0x71f   : > { %v10393_v63 = vpack.c.bf16 %v6108_v30, %v6106_v27  ;;  %v5474_v40 = vmax.f32 %v5346_v2, 0.0  ;;  %v5808_v26 = vpop.f32.mrb[140].mxu0 }
 0x720   : > { %v5539_v59 = vpack.c.bf16 %v5473_v48, %v5471_v22  ;;  %v5809_v16 = vadd.f32 %v5808_v26, %v10346_v52  ;;  %v5810_v5 = vpop.f32.mrb[141].mxu0 }
 0x721   : > { %v5540_v41 = vpack.c.bf16 %v5474_v40, %v5472_v10  ;;  %v5811_v29 = vadd.f32 %v5810_v5, %v10349_v49  ;;  %v5206_v12 = vpop.f32.mrb[124].mxu1  ;;  %v5812_v7 = vpop.f32.mrb[142].mxu0 }
 0x722   : > { %v5347_v60 = vadd.f32 %v10195_v62, %v5206_v12  ;;  %v5813_v45 = vadd.f32 %v5812_v7, %v10346_v52  ;;  %v5208_v6 = vpop.f32.mrb[125].mxu1  ;;  %v5814_v55 = vpop.f32.mrb[143].mxu0  ;;  %v6109_v53 = vmax.f32 %v5809_v16, 0.0 }
 0x723   : > { %v5348_v39 = vadd.f32 %v10198_v46, %v5208_v6  ;;  %v5815_v51 = vadd.f32 %v5814_v55, %v10349_v49  ;;  %v5210_v54 = vpop.f32.mrb[126].mxu1  ;;  %6076 = vmatprep.mubr.bf16.mxu0 %v5540_v41  ;;  %v6110_v3 = vmax.f32 %v5811_v29, 0.0 }
 0x724   : > { %v6111_v56 = vmax.f32 %v5813_v45, 0.0  ;;  %v5349_v47 = vadd.f32 %v10195_v62, %v5210_v54  ;;  %v5212_v38 = vpop.f32.mrb[127].mxu1  ;;  %6077 = vmatmul.mubr.bf16.gmra.mrb[248].mxu0 %v5539_v59  ;;  %v5475_v44 = vmax.f32 %v5347_v60, 0.0 }
 0x725   : > { %v6112_v13 = vmax.f32 %v5815_v51, 0.0  ;;  %v5350_v61 = vadd.f32 %v10198_v46, %v5212_v38  ;;  %v5476_v58 = vmax.f32 %v5348_v39, 0.0  ;;  %v10432_v51 = vld [vmem:[#allocation10 + $0x48] sm:$0xff]  }
 0x726   : > { %v10403_v24 = vpack.c.bf16 %v6111_v56, %v6109_v53  ;;  %v5477_v42 = vmax.f32 %v5349_v47, 0.0  ;;  %8002 = vmatpush1.bf16.msra.mxu1 %v10432_v51 }
 0x727   : > { %v10405_v36 = vpack.c.bf16 %v6112_v13, %v6110_v3  ;;  %v5478_v8 = vmax.f32 %v5350_v61, 0.0  ;;  %v5818_v28 = vpop.f32.mrb[144].mxu0  ;;  %7987 = vmatprep.subr.bf16.mxu1 %v8936_v0 }
 0x728   : > { %v5541_v50 = vpack.c.bf16 %v5477_v42, %v5475_v44  ;;  %v5819_v62 = vadd.f32 %v5818_v28, %v10346_v52  ;;  %v5820_v23 = vpop.f32.mrb[145].mxu0 }
 0x729   : > { %v5542_v20 = vpack.c.bf16 %v5478_v8, %v5476_v58  ;;  %v5821_v15 = vadd.f32 %v5820_v23, %v10349_v49  ;;  %v5822_v14 = vpop.f32.mrb[146].mxu0 }
 0x72a   : > { %v5823_v46 = vadd.f32 %v5822_v14, %v10346_v52  ;;  %v5824_v25 = vpop.f32.mrb[147].mxu0  ;;  %v6113_v27 = vmax.f32 %v5819_v62, 0.0 }
 0x72b   : > { %v5825_v37 = vadd.f32 %v5824_v25, %v10349_v49  ;;  %6086 = vmatprep.mubr.bf16.mxu0 %v5542_v20  ;;  %v6114_v2 = vmax.f32 %v5821_v15, 0.0  ;;  %v8657_v25 = vld [vmem:[#allocation10 + $0x50] sm:$0xff]  }
 0x72c   : > { %v6115_v30 = vmax.f32 %v5823_v46, 0.0  ;;  %6087 = vmatmul.mubr.bf16.gmra.mrb[252].mxu0 %v5541_v50  ;;  %8003 = vmatpush1.bf16.msra.mxu1 %v8657_v25 }
 0x72d   : > { %v6116_v22 = vmax.f32 %v5825_v37, 0.0  ;;  %6522 = vmatprep.mubr.bf16.mxu0 %v10365_v34  ;;  %7988 = vmatprep.subr.bf16.mxu1 %v8936_v0 }
 0x72e   : > { %v10416_v48 = vpack.c.bf16 %v6115_v30, %v6113_v27 }
 0x72f   : > { %v10418_v10 = vpack.c.bf16 %v6116_v22, %v6114_v2  ;;  %v5828_v40 = vpop.f32.mrb[148].mxu0 }
 0x730   : > { %v5829_v26 = vadd.f32 %v5828_v40, %v10346_v52  ;;  %v5830_v59 = vpop.f32.mrb[149].mxu0 }
 0x731   : > { %v5831_v16 = vadd.f32 %v5830_v59, %v10349_v49  ;;  %v5832_v5 = vpop.f32.mrb[150].mxu0 }
 0x732   : > { %v5833_v41 = vadd.f32 %v5832_v5, %v10346_v52  ;;  %v5834_v29 = vpop.f32.mrb[151].mxu0  ;;  %v6117_v7 = vmax.f32 %v5829_v26, 0.0 }
 0x733   : > { %v5835_v12 = vadd.f32 %v5834_v29, %v10349_v49  ;;  %v6118_v34 = vmax.f32 %v5831_v16, 0.0 }
 0x734   : > { %v6119_v60 = vmax.f32 %v5833_v41, 0.0  ;;  %6523 = vmatmul.mubr.bf16.vlgmr.msra.gmra.mrb[0].mxu0 %v10363_v17 }
 0x735   : > { %v6120_v45 = vmax.f32 %v5835_v12, 0.0  ;;  %6532 = vmatprep.mubr.bf16.mxu0 %v10377_v57  ;;  %7171 = vmatpush1.bf16.msra.mxu0 %v10273_v33 }
 0x736   : > { %v10427_v6 = vpack.c.bf16 %v6119_v60, %v6117_v7  ;;  %7172 = vmatprep.subr.bf16.mxu0 %v8936_v0 }
 0x737   : > { %v10430_v55 = vpack.c.bf16 %v6120_v45, %v6118_v34  ;;  %v5838_v39 = vpop.f32.mrb[152].mxu0 }
 0x738   : > { %v5839_v54 = vadd.f32 %v5838_v39, %v10346_v52  ;;  %v5840_v53 = vpop.f32.mrb[153].mxu0 }
 0x739   : > { %v5841_v17 = vadd.f32 %v5840_v53, %v10349_v49  ;;  %v5842_v56 = vpop.f32.mrb[154].mxu0  ;;  %7173 = vmatpush1.bf16.msra.mxu0 %v10286_v21 }
 0x73a   : > { %v5843_v33 = vadd.f32 %v5842_v56, %v10346_v52  ;;  %v5844_v57 = vpop.f32.mrb[155].mxu0  ;;  %7174 = vmatprep.subr.bf16.mxu0 %v8936_v0  ;;  %v6121_v38 = vmax.f32 %v5839_v54, 0.0 }
 0x73b   : > { %v5845_v47 = vadd.f32 %v5844_v57, %v10349_v49  ;;  %v6122_v13 = vmax.f32 %v5841_v17, 0.0  ;;  %v8658_v17 = vld [vmem:[#allocation10 + $0x58] sm:$0xff]  }
 0x73c   : > { %v6123_v3 = vmax.f32 %v5843_v33, 0.0  ;;  %6533 = vmatmul.mubr.bf16.gmra.mrb[4].mxu0 %v10375_v43  ;;  %8004 = vmatpush1.bf16.msra.mxu1 %v8658_v17 }
 0x73d   : > { %v6124_v61 = vmax.f32 %v5845_v47, 0.0  ;;  %6542 = vmatprep.mubr.bf16.mxu0 %v10393_v63  ;;  %7175 = vmatpush1.bf16.msra.mxu0 %v10298_v35 }
 0x73e   : > { %v10445_v21 = vpack.c.bf16 %v6123_v3, %v6121_v38  ;;  %7176 = vmatprep.subr.bf16.mxu0 %v8936_v0  ;;  %7989 = vmatprep.subr.bf16.mxu1 %v8936_v0 }
 0x73f   : > { %v10448_v44 = vpack.c.bf16 %v6124_v61, %v6122_v13  ;;  %v5848_v42 = vpop.f32.mrb[156].mxu0 }
 0x740   : > { %v5849_v58 = vadd.f32 %v5848_v42, %v10346_v52  ;;  %v5850_v8 = vpop.f32.mrb[157].mxu0 }
 0x741   : > { %v5851_v28 = vadd.f32 %v5850_v8, %v10349_v49  ;;  %v5852_v50 = vpop.f32.mrb[158].mxu0  ;;  %7177 = vmatpush1.bf16.msra.mxu0 %v10310_v1 }
 0x742   : > { %v5853_v43 = vadd.f32 %v5852_v50, %v10346_v52  ;;  %v5854_v63 = vpop.f32.mrb[159].mxu0  ;;  %7178 = vmatprep.subr.bf16.mxu0 %v8936_v0  ;;  %v6125_v62 = vmax.f32 %v5849_v58, 0.0 }
 0x743   : > { %v5855_v35 = vadd.f32 %v5854_v63, %v10349_v49  ;;  %v6126_v20 = vmax.f32 %v5851_v28, 0.0 }
 0x744   : > { %v6127_v23 = vmax.f32 %v5853_v43, 0.0  ;;  %6543 = vmatmul.mubr.bf16.gmra.mrb[8].mxu0 %v10391_v18 }
 0x745   : > { %v6128_v15 = vmax.f32 %v5855_v35, 0.0  ;;  %6552 = vmatprep.mubr.bf16.mxu0 %v10405_v36  ;;  %7179 = vmatpush1.bf16.msra.mxu0 %v10322_v32 }
 0x746   : > { %v10459_v14 = vpack.c.bf16 %v6127_v23, %v6125_v62  ;;  %7180 = vmatprep.subr.bf16.mxu0 %v8936_v0 }
 0x747   : > { %v10462_v1 = vpack.c.bf16 %v6128_v15, %v6126_v20  ;;  %v5858_v46 = vpop.f32.mrb[160].mxu0 }
 0x748   : > { %v5859_v37 = vadd.f32 %v5858_v46, %v10346_v52  ;;  %v5860_v27 = vpop.f32.mrb[161].mxu0 }
 0x749   : > { %v5861_v30 = vadd.f32 %v5860_v27, %v10349_v49  ;;  %v5862_v18 = vpop.f32.mrb[162].mxu0  ;;  %7181 = vmatpush1.bf16.msra.mxu0 %v10334_v11 }
 0x74a   : > { %v5863_v36 = vadd.f32 %v5862_v18, %v10346_v52  ;;  %v5864_v32 = vpop.f32.mrb[163].mxu0  ;;  %7182 = vmatprep.subr.bf16.mxu0 %v8936_v0  ;;  %v6129_v22 = vmax.f32 %v5859_v37, 0.0  ;;  %v8659_v37 = vld [vmem:[#allocation10 + $0x60] sm:$0xff]  }
 0x74b   : > { %v5865_v2 = vadd.f32 %v5864_v32, %v10349_v49  ;;  %v6130_v26 = vmax.f32 %v5861_v30, 0.0  ;;  %8005 = vmatpush1.bf16.msra.mxu1 %v8659_v37 }
 0x74c   : > { %v6131_v40 = vmax.f32 %v5863_v36, 0.0  ;;  %6553 = vmatmul.mubr.bf16.gmra.mrb[12].mxu0 %v10403_v24  ;;  %7990 = vmatprep.subr.bf16.mxu1 %v8936_v0 }
 0x74d   : > { %v6132_v59 = vmax.f32 %v5865_v2, 0.0  ;;  %6562 = vmatprep.mubr.bf16.mxu0 %v10418_v10  ;;  %7183 = vmatpush1.bf16.msra.mxu0 %v10351_v9 }
 0x74e   : > { %v10474_v11 = vpack.c.bf16 %v6131_v40, %v6129_v22  ;;  %7184 = vmatprep.subr.bf16.mxu0 %v8936_v0 }
 0x74f   : > { %v10477_v16 = vpack.c.bf16 %v6132_v59, %v6130_v26  ;;  %v5868_v5 = vpop.f32.mrb[164].mxu0 }
 0x750   : > { %v5869_v41 = vadd.f32 %v5868_v5, %v10346_v52  ;;  %v5870_v29 = vpop.f32.mrb[165].mxu0 }
 0x751   : > { %v5871_v12 = vadd.f32 %v5870_v29, %v10349_v49  ;;  %v5872_v7 = vpop.f32.mrb[166].mxu0  ;;  %7185 = vmatpush1.bf16.msra.mxu0 %v10379_v4 }
 0x752   : > { %v5873_v24 = vadd.f32 %v5872_v7, %v10346_v52  ;;  %v5874_v10 = vpop.f32.mrb[167].mxu0  ;;  %7186 = vmatprep.subr.bf16.mxu0 %v8936_v0  ;;  %v6133_v60 = vmax.f32 %v5869_v41, 0.0 }
 0x753   : > { %v5875_v9 = vadd.f32 %v5874_v10, %v10349_v49  ;;  %v6134_v45 = vmax.f32 %v5871_v12, 0.0 }
 0x754   : > { %v6135_v34 = vmax.f32 %v5873_v24, 0.0  ;;  %6563 = vmatmul.mubr.bf16.gmra.mrb[16].mxu0 %v10416_v48 }
 0x755   : > { %v6136_v39 = vmax.f32 %v5875_v9, 0.0  ;;  %6572 = vmatprep.mubr.bf16.mxu0 %v10430_v55  ;;  %7187 = vmatpush1.bf16.msra.mxu0 %v10407_v19 }
 0x756   : > { %v10488_v54 = vpack.c.bf16 %v6135_v34, %v6133_v60  ;;  %7188 = vmatprep.subr.bf16.mxu0 %v8936_v0 }
 0x757   : > { %v10491_v4 = vpack.c.bf16 %v6136_v39, %v6134_v45  ;;  %v5878_v53 = vpop.f32.mrb[168].mxu0 }
 0x758   : > { %v5879_v56 = vadd.f32 %v5878_v53, %v10346_v52  ;;  %v5880_v33 = vpop.f32.mrb[169].mxu0 }
 0x759   : > { %v5881_v57 = vadd.f32 %v5880_v33, %v10349_v49  ;;  %v5882_v48 = vpop.f32.mrb[170].mxu0  ;;  %7189 = vmatpush1.bf16.msra.mxu0 %v10432_v51 }
 0x75a   : > { %v5883_v55 = vadd.f32 %v5882_v48, %v10346_v52  ;;  %v5884_v19 = vpop.f32.mrb[171].mxu0  ;;  %7190 = vmatprep.subr.bf16.mxu0 %v8936_v0  ;;  %v6137_v38 = vmax.f32 %v5879_v56, 0.0  ;;  %v8660_v56 = vld [vmem:[#allocation10 + $0x68] sm:$0xff]  }
 0x75b   : > { %v5885_v47 = vadd.f32 %v5884_v19, %v10349_v49  ;;  %v6138_v13 = vmax.f32 %v5881_v57, 0.0  ;;  %8006 = vmatpush1.bf16.msra.mxu1 %v8660_v56 }
 0x75c   : > { %v6139_v3 = vmax.f32 %v5883_v55, 0.0  ;;  %6573 = vmatmul.mubr.bf16.gmra.mrb[20].mxu0 %v10427_v6  ;;  %7991 = vmatprep.subr.bf16.mxu1 %v8936_v0 }
 0x75d   : > { %v6140_v61 = vmax.f32 %v5885_v47, 0.0  ;;  %6582 = vmatprep.mubr.bf16.mxu0 %v10448_v44  ;;  %7191 = vmatpush1.bf16.msra.mxu0 %v8657_v25 }
 0x75e   : > { %v10502_v42 = vpack.c.bf16 %v6139_v3, %v6137_v38  ;;  %7192 = vmatprep.subr.bf16.mxu0 %v8936_v0 }
 0x75f   : > { %v10505_v51 = vpack.c.bf16 %v6140_v61, %v6138_v13  ;;  %v5888_v58 = vpop.f32.mrb[172].mxu0 }
 0x760   : > { %v5889_v8 = vadd.f32 %v5888_v58, %v10346_v52  ;;  %v5890_v28 = vpop.f32.mrb[173].mxu0 }
 0x761   : > { %v5891_v50 = vadd.f32 %v5890_v28, %v10349_v49  ;;  %v5892_v43 = vpop.f32.mrb[174].mxu0  ;;  %7193 = vmatpush1.bf16.msra.mxu0 %v8658_v17 }
 0x762   : > { %v5893_v6 = vadd.f32 %v5892_v43, %v10346_v52  ;;  %v5894_v63 = vpop.f32.mrb[175].mxu0  ;;  %7194 = vmatprep.subr.bf16.mxu0 %v8936_v0  ;;  %v6141_v35 = vmax.f32 %v5889_v8, 0.0 }
 0x763   : > { %v5895_v44 = vadd.f32 %v5894_v63, %v10349_v49  ;;  %v6142_v23 = vmax.f32 %v5891_v50, 0.0 }
 0x764   : > { %v6143_v62 = vmax.f32 %v5893_v6, 0.0  ;;  %6583 = vmatmul.mubr.bf16.gmra.mrb[24].mxu0 %v10445_v21 }
 0x765   : > { %v6144_v20 = vmax.f32 %v5895_v44, 0.0  ;;  %6592 = vmatprep.mubr.bf16.mxu0 %v10462_v1  ;;  %7195 = vmatpush1.bf16.msra.mxu0 %v8659_v37 }
 0x766   : > { %v10514_v15 = vpack.c.bf16 %v6143_v62, %v6141_v35  ;;  %7196 = vmatprep.subr.bf16.mxu0 %v8936_v0 }
 0x767   : > { %v10516_v46 = vpack.c.bf16 %v6144_v20, %v6142_v23  ;;  %v5898_v25 = vpop.f32.mrb[176].mxu0 }
 0x768   : > { %v5899_v27 = vadd.f32 %v5898_v25, %v10346_v52  ;;  %v5900_v30 = vpop.f32.mrb[177].mxu0 }
 0x769   : > { %v5901_v18 = vadd.f32 %v5900_v30, %v10349_v49  ;;  %v5902_v36 = vpop.f32.mrb[178].mxu0  ;;  %7197 = vmatpush1.bf16.msra.mxu0 %v8660_v56  ;;  %v8662_v56 = vld [vmem:[#allocation10 + $0x78] sm:$0xff]  }
 0x76a   : > { %v5903_v21 = vadd.f32 %v5902_v36, %v10346_v52  ;;  %v5904_v32 = vpop.f32.mrb[179].mxu0  ;;  %v6145_v2 = vmax.f32 %v5899_v27, 0.0  ;;  %7198 = vmatprep.subr.bf16.mxu0 %v8936_v0  ;;  %v8661_v27 = vld [vmem:[#allocation10 + $0x70] sm:$0xff]  }
 0x76b   : > { %v5905_v1 = vadd.f32 %v5904_v32, %v10349_v49  ;;  %v6146_v40 = vmax.f32 %v5901_v18, 0.0  ;;  %8007 = vmatpush1.bf16.msra.mxu1 %v8661_v27 }
 0x76c   : > { %v6147_v22 = vmax.f32 %v5903_v21, 0.0  ;;  %6593 = vmatmul.mubr.bf16.gmra.mrb[28].mxu0 %v10459_v14  ;;  %7992 = vmatprep.subr.bf16.mxu1 %v8936_v0 }
 0x76d   : > { %v6148_v26 = vmax.f32 %v5905_v1, 0.0  ;;  %6602 = vmatprep.mubr.bf16.mxu0 %v10477_v16  ;;  %7199 = vmatpush1.bf16.msra.mxu0 %v8661_v27 }
 0x76e   : > { %v10526_v59 = vpack.c.bf16 %v6147_v22, %v6145_v2  ;;  %7200 = vmatprep.subr.bf16.mxu0 %v8936_v0 }
 0x76f   : > { %v10528_v5 = vpack.c.bf16 %v6148_v26, %v6146_v40  ;;  %v5908_v41 = vpop.f32.mrb[180].mxu0  ;;  %8008 = vmatpush1.bf16.msra.mxu1 %v8662_v56 }
 0x770   : > { %v5909_v29 = vadd.f32 %v5908_v41, %v10346_v52  ;;  %v5910_v12 = vpop.f32.mrb[181].mxu0 }
 0x771   : > { %v5911_v7 = vadd.f32 %v5910_v12, %v10349_v49  ;;  %v5912_v24 = vpop.f32.mrb[182].mxu0  ;;  %7201 = vmatpush1.bf16.msra.mxu0 %v8662_v56 }
 0x772   : > { %v5913_v10 = vadd.f32 %v5912_v24, %v10346_v52  ;;  %v5914_v9 = vpop.f32.mrb[183].mxu0  ;;  %v6149_v60 = vmax.f32 %v5909_v29, 0.0 }
 0x773   : > { %v5915_v14 = vadd.f32 %v5914_v9, %v10349_v49  ;;  %v6150_v16 = vmax.f32 %v5911_v7, 0.0 }
 0x774   : > { %v6151_v34 = vmax.f32 %v5913_v10, 0.0  ;;  %6603 = vmatmul.mubr.bf16.gmra.mrb[32].mxu0 %v10474_v11 }
 0x775   : > { %v6152_v45 = vmax.f32 %v5915_v14, 0.0  ;;  %6612 = vmatprep.mubr.bf16.mxu0 %v10491_v4 }
 0x776   : > { %v10536_v39 = vpack.c.bf16 %v6151_v34, %v6149_v60 }
 0x777   : > { %v10538_v53 = vpack.c.bf16 %v6152_v45, %v6150_v16  ;;  %v5918_v17 = vpop.f32.mrb[184].mxu0 }
 0x778   : > { %v5919_v33 = vadd.f32 %v5918_v17, %v10346_v52  ;;  %v5920_v57 = vpop.f32.mrb[185].mxu0 }
 0x779   : > { %v5921_v48 = vadd.f32 %v5920_v57, %v10349_v49  ;;  %v5922_v55 = vpop.f32.mrb[186].mxu0 }
 0x77a   : > { %v5923_v11 = vadd.f32 %v5922_v55, %v10346_v52  ;;  %v5924_v19 = vpop.f32.mrb[187].mxu0  ;;  %v6153_v47 = vmax.f32 %v5919_v33, 0.0 }
 0x77b   : > { %v5925_v4 = vadd.f32 %v5924_v19, %v10349_v49  ;;  %v6154_v3 = vmax.f32 %v5921_v48, 0.0 }
 0x77c   : > { %v6155_v38 = vmax.f32 %v5923_v11, 0.0  ;;  %6613 = vmatmul.mubr.bf16.gmra.mrb[36].mxu0 %v10488_v54 }
 0x77d   : > { %v6156_v13 = vmax.f32 %v5925_v4, 0.0  ;;  %6622 = vmatprep.mubr.bf16.mxu0 %v10505_v51 }
 0x77e   : > { %v10548_v61 = vpack.c.bf16 %v6155_v38, %v6153_v47 }
 0x77f   : > { %v10550_v58 = vpack.c.bf16 %v6156_v13, %v6154_v3  ;;  %v5928_v8 = vpop.f32.mrb[188].mxu0 }
 0x780   : > { %v5929_v28 = vadd.f32 %v5928_v8, %v10346_v52  ;;  %v5930_v50 = vpop.f32.mrb[189].mxu0 }
 0x781   : > { %v5931_v43 = vadd.f32 %v5930_v50, %v10349_v49  ;;  %v5932_v6 = vpop.f32.mrb[190].mxu0 }
 0x782   : > { %v5933_v63 = vadd.f32 %v5932_v6, %v10346_v52  ;;  %v5934_v44 = vpop.f32.mrb[191].mxu0  ;;  %v6157_v35 = vmax.f32 %v5929_v28, 0.0 }
 0x783   : > { %v5935_v54 = vadd.f32 %v5934_v44, %v10349_v49  ;;  %v6158_v51 = vmax.f32 %v5931_v43, 0.0 }
 0x784   : > { %v6159_v62 = vmax.f32 %v5933_v63, 0.0  ;;  %6623 = vmatmul.mubr.bf16.gmra.mrb[40].mxu0 %v10502_v42 }
 0x785   : > { %v6160_v23 = vmax.f32 %v5935_v54, 0.0  ;;  %6632 = vmatprep.mubr.bf16.mxu0 %v10516_v46 }
 0x786   : > { %v10558_v20 = vpack.c.bf16 %v6159_v62, %v6157_v35 }
 0x787   : > { %v10560_v25 = vpack.c.bf16 %v6160_v23, %v6158_v51  ;;  %v5938_v37 = vpop.f32.mrb[192].mxu0 }
 0x788   : > { %v5939_v30 = vadd.f32 %v5938_v37, %v10346_v52  ;;  %v5940_v18 = vpop.f32.mrb[193].mxu0 }
 0x789   : > { %v5941_v36 = vadd.f32 %v5940_v18, %v10349_v49  ;;  %v5942_v21 = vpop.f32.mrb[194].mxu0 }
 0x78a   : > { %v5943_v42 = vadd.f32 %v5942_v21, %v10346_v52  ;;  %v5944_v32 = vpop.f32.mrb[195].mxu0  ;;  %v6161_v1 = vmax.f32 %v5939_v30, 0.0 }
 0x78b   : > { %v5945_v46 = vadd.f32 %v5944_v32, %v10349_v49  ;;  %v6162_v22 = vmax.f32 %v5941_v36, 0.0 }
 0x78c   : > { %v6163_v2 = vmax.f32 %v5943_v42, 0.0  ;;  %6633 = vmatmul.mubr.bf16.gmra.mrb[44].mxu0 %v10514_v15 }
 0x78d   : > { %v6164_v40 = vmax.f32 %v5945_v46, 0.0  ;;  %6642 = vmatprep.mubr.bf16.mxu0 %v10528_v5 }
 0x78e   : > { %v10570_v26 = vpack.c.bf16 %v6163_v2, %v6161_v1 }
 0x78f   : > { %v10572_v41 = vpack.c.bf16 %v6164_v40, %v6162_v22  ;;  %v5948_v29 = vpop.f32.mrb[196].mxu0 }
 0x790   : > { %v5949_v12 = vadd.f32 %v5948_v29, %v10346_v52  ;;  %v5950_v7 = vpop.f32.mrb[197].mxu0 }
 0x791   : > { %v5951_v0 = vadd.f32 %v5950_v7, %v10349_v49  ;;  %v5952_v24 = vpop.f32.mrb[198].mxu0 }
 0x792   : > { %v5953_v10 = vadd.f32 %v5952_v24, %v10346_v52  ;;  %v5954_v9 = vpop.f32.mrb[199].mxu0  ;;  %v6165_v14 = vmax.f32 %v5949_v12, 0.0 }
 0x793   : > { %v5955_v15 = vadd.f32 %v5954_v9, %v10349_v49  ;;  %v6166_v5 = vmax.f32 %v5951_v0, 0.0 }
 0x794   : > { %v6167_v60 = vmax.f32 %v5953_v10, 0.0  ;;  %6643 = vmatmul.mubr.bf16.gmra.mrb[48].mxu0 %v10526_v59 }
 0x795   : > { %v6168_v34 = vmax.f32 %v5955_v15, 0.0  ;;  %6652 = vmatprep.mubr.bf16.mxu0 %v10538_v53 }
 0x796   : > { %v10580_v16 = vpack.c.bf16 %v6167_v60, %v6165_v14 }
 0x797   : > { %v10582_v45 = vpack.c.bf16 %v6168_v34, %v6166_v5  ;;  %v5958_v17 = vpop.f32.mrb[200].mxu0 }
 0x798   : > { %v5959_v33 = vadd.f32 %v5958_v17, %v10346_v52  ;;  %v5960_v57 = vpop.f32.mrb[201].mxu0 }
 0x799   : > { %v5961_v48 = vadd.f32 %v5960_v57, %v10349_v49  ;;  %v5962_v55 = vpop.f32.mrb[202].mxu0 }
 0x79a   : > { %v5963_v59 = vadd.f32 %v5962_v55, %v10346_v52  ;;  %v5964_v11 = vpop.f32.mrb[203].mxu0  ;;  %v6169_v53 = vmax.f32 %v5959_v33, 0.0 }
 0x79b   : > { %v5965_v19 = vadd.f32 %v5964_v11, %v10349_v49  ;;  %v6170_v47 = vmax.f32 %v5961_v48, 0.0 }
 0x79c   : > { %v6171_v4 = vmax.f32 %v5963_v59, 0.0  ;;  %6653 = vmatmul.mubr.bf16.gmra.mrb[52].mxu0 %v10536_v39 }
 0x79d   : > { %v6172_v38 = vmax.f32 %v5965_v19, 0.0  ;;  %6662 = vmatprep.mubr.bf16.mxu0 %v10550_v58 }
 0x79e   : > { %v10590_v3 = vpack.c.bf16 %v6171_v4, %v6169_v53 }
 0x79f   : > { %v6262_v13 = vpack.c.bf16 %v6172_v38, %v6170_v47  ;;  %v5968_v8 = vpop.f32.mrb[204].mxu0 }
 0x7a0   : > { %v5969_v28 = vadd.f32 %v5968_v8, %v10346_v52  ;;  %v5970_v50 = vpop.f32.mrb[205].mxu0 }
 0x7a1   : > { %v5971_v43 = vadd.f32 %v5970_v50, %v10349_v49  ;;  %v5972_v6 = vpop.f32.mrb[206].mxu0 }
 0x7a2   : > { %v5973_v63 = vadd.f32 %v5972_v6, %v10346_v52  ;;  %v5974_v44 = vpop.f32.mrb[207].mxu0  ;;  %v6173_v39 = vmax.f32 %v5969_v28, 0.0 }
 0x7a3   : > { %v5975_v54 = vadd.f32 %v5974_v44, %v10349_v49  ;;  %v6174_v58 = vmax.f32 %v5971_v43, 0.0 }
 0x7a4   : > { %v6175_v35 = vmax.f32 %v5973_v63, 0.0  ;;  %6663 = vmatmul.mubr.bf16.gmra.mrb[56].mxu0 %v10548_v61 }
 0x7a5   : > { %v6176_v62 = vmax.f32 %v5975_v54, 0.0  ;;  %6672 = vmatprep.mubr.bf16.mxu0 %v10560_v25 }
 0x7a6   : > { %v10598_v51 = vpack.c.bf16 %v6175_v35, %v6173_v39 }
 0x7a7   : > { %v6264_v23 = vpack.c.bf16 %v6176_v62, %v6174_v58  ;;  %v5978_v37 = vpop.f32.mrb[208].mxu0 }
 0x7a8   : > { %v5979_v27 = vadd.f32 %v5978_v37, %v10346_v52  ;;  %v5980_v30 = vpop.f32.mrb[209].mxu0 }
 0x7a9   : > { %v5981_v18 = vadd.f32 %v5980_v30, %v10349_v49  ;;  %v5982_v36 = vpop.f32.mrb[210].mxu0 }
 0x7aa   : > { %v5983_v21 = vadd.f32 %v5982_v36, %v10346_v52  ;;  %v5984_v42 = vpop.f32.mrb[211].mxu0  ;;  %v6177_v61 = vmax.f32 %v5979_v27, 0.0 }
 0x7ab   : > { %v5985_v32 = vadd.f32 %v5984_v42, %v10349_v49  ;;  %v6178_v25 = vmax.f32 %v5981_v18, 0.0 }
 0x7ac   : > { %v6179_v46 = vmax.f32 %v5983_v21, 0.0  ;;  %6673 = vmatmul.mubr.bf16.gmra.mrb[60].mxu0 %v10558_v20 }
 0x7ad   : > { %v6180_v1 = vmax.f32 %v5985_v32, 0.0  ;;  %6682 = vmatprep.mubr.bf16.mxu0 %v10572_v41 }
 0x7ae   : > { %v10606_v2 = vpack.c.bf16 %v6179_v46, %v6177_v61 }
 0x7af   : > { %v6266_v22 = vpack.c.bf16 %v6180_v1, %v6178_v25  ;;  %v5988_v40 = vpop.f32.mrb[212].mxu0 }
 0x7b0   : > { %v5989_v29 = vadd.f32 %v5988_v40, %v10346_v52  ;;  %v5990_v12 = vpop.f32.mrb[213].mxu0 }
 0x7b1   : > { %v5991_v7 = vadd.f32 %v5990_v12, %v10349_v49  ;;  %v5992_v0 = vpop.f32.mrb[214].mxu0 }
 0x7b2   : > { %v5993_v24 = vadd.f32 %v5992_v0, %v10346_v52  ;;  %v5994_v10 = vpop.f32.mrb[215].mxu0  ;;  %v6181_v20 = vmax.f32 %v5989_v29, 0.0 }
 0x7b3   : > { %v5995_v9 = vadd.f32 %v5994_v10, %v10349_v49  ;;  %v6182_v41 = vmax.f32 %v5991_v7, 0.0 }
 0x7b4   : > { %v6183_v15 = vmax.f32 %v5993_v24, 0.0  ;;  %6683 = vmatmul.mubr.bf16.gmra.mrb[64].mxu0 %v10570_v26 }
 0x7b5   : > { %v6184_v14 = vmax.f32 %v5995_v9, 0.0  ;;  %6692 = vmatprep.mubr.bf16.mxu0 %v10582_v45 }
 0x7b6   : > { %v10614_v60 = vpack.c.bf16 %v6183_v15, %v6181_v20 }
 0x7b7   : > { %v6268_v5 = vpack.c.bf16 %v6184_v14, %v6182_v41  ;;  %v5998_v34 = vpop.f32.mrb[216].mxu0 }
 0x7b8   : > { %v5999_v17 = vadd.f32 %v5998_v34, %v10346_v52  ;;  %v6000_v56 = vpop.f32.mrb[217].mxu0 }
 0x7b9   : > { %v6001_v33 = vadd.f32 %v6000_v56, %v10349_v49  ;;  %v6002_v57 = vpop.f32.mrb[218].mxu0 }
 0x7ba   : > { %v6003_v48 = vadd.f32 %v6002_v57, %v10346_v52  ;;  %v6004_v55 = vpop.f32.mrb[219].mxu0  ;;  %v6185_v26 = vmax.f32 %v5999_v17, 0.0 }
 0x7bb   : > { %v6005_v59 = vadd.f32 %v6004_v55, %v10349_v49  ;;  %v6186_v45 = vmax.f32 %v6001_v33, 0.0 }
 0x7bc   : > { %v6187_v11 = vmax.f32 %v6003_v48, 0.0  ;;  %6693 = vmatmul.mubr.bf16.gmra.mrb[68].mxu0 %v10580_v16 }
 0x7bd   : > { %v6188_v19 = vmax.f32 %v6005_v59, 0.0  ;;  %6702 = vmatprep.mubr.bf16.mxu0 %v6262_v13 }
 0x7be   : > { %v10621_v53 = vpack.c.bf16 %v6187_v11, %v6185_v26 }
 0x7bf   : > { %v6270_v4 = vpack.c.bf16 %v6188_v19, %v6186_v45  ;;  %v6008_v47 = vpop.f32.mrb[220].mxu0 }
 0x7c0   : > { %v6009_v38 = vadd.f32 %v6008_v47, %v10346_v52  ;;  %v6010_v8 = vpop.f32.mrb[221].mxu0 }
 0x7c1   : > { %v6011_v28 = vadd.f32 %v6010_v8, %v10349_v49  ;;  %v6012_v50 = vpop.f32.mrb[222].mxu0 }
 0x7c2   : > { %v6013_v43 = vadd.f32 %v6012_v50, %v10346_v52  ;;  %v6014_v6 = vpop.f32.mrb[223].mxu0  ;;  %v6189_v44 = vmax.f32 %v6009_v38, 0.0 }
 0x7c3   : > { %v6015_v63 = vadd.f32 %v6014_v6, %v10349_v49  ;;  %v6190_v13 = vmax.f32 %v6011_v28, 0.0 }
 0x7c4   : > { %v6191_v16 = vmax.f32 %v6013_v43, 0.0  ;;  %6703 = vmatmul.mubr.bf16.gmra.mrb[72].mxu0 %v10590_v3 }
 0x7c5   : > { %v6192_v54 = vmax.f32 %v6015_v63, 0.0  ;;  %6712 = vmatprep.mubr.bf16.mxu0 %v6264_v23 }
 0x7c6   : > { %v10628_v39 = vpack.c.bf16 %v6191_v16, %v6189_v44 }
 0x7c7   : > { %v6272_v35 = vpack.c.bf16 %v6192_v54, %v6190_v13  ;;  %v6018_v58 = vpop.f32.mrb[224].mxu0 }
 0x7c8   : > { %v6019_v62 = vadd.f32 %v6018_v58, %v10346_v52  ;;  %v6020_v37 = vpop.f32.mrb[225].mxu0 }
 0x7c9   : > { %v6021_v27 = vadd.f32 %v6020_v37, %v10349_v49  ;;  %v6022_v30 = vpop.f32.mrb[226].mxu0 }
 0x7ca   : > { %v6023_v18 = vadd.f32 %v6022_v30, %v10346_v52  ;;  %v6024_v36 = vpop.f32.mrb[227].mxu0  ;;  %v6193_v42 = vmax.f32 %v6019_v62, 0.0 }
 0x7cb   : > { %v6025_v21 = vadd.f32 %v6024_v36, %v10349_v49  ;;  %v6194_v23 = vmax.f32 %v6021_v27, 0.0 }
 0x7cc   : > { %v6195_v3 = vmax.f32 %v6023_v18, 0.0  ;;  %6713 = vmatmul.mubr.bf16.gmra.mrb[76].mxu0 %v10598_v51 }
 0x7cd   : > { %v6196_v32 = vmax.f32 %v6025_v21, 0.0  ;;  %6722 = vmatprep.mubr.bf16.mxu0 %v6266_v22 }
 0x7ce   : > { %v10635_v61 = vpack.c.bf16 %v6195_v3, %v6193_v42 }
 0x7cf   : > { %v6274_v46 = vpack.c.bf16 %v6196_v32, %v6194_v23  ;;  %v6028_v25 = vpop.f32.mrb[228].mxu0 }
 0x7d0   : > { %v6029_v1 = vadd.f32 %v6028_v25, %v10346_v52  ;;  %v6030_v40 = vpop.f32.mrb[229].mxu0 }
 0x7d1   : > { %v6031_v29 = vadd.f32 %v6030_v40, %v10349_v49  ;;  %v6032_v12 = vpop.f32.mrb[230].mxu0 }
 0x7d2   : > { %v6033_v7 = vadd.f32 %v6032_v12, %v10346_v52  ;;  %v6034_v0 = vpop.f32.mrb[231].mxu0  ;;  %v6197_v10 = vmax.f32 %v6029_v1, 0.0 }
 0x7d3   : > { %v6035_v24 = vadd.f32 %v6034_v0, %v10349_v49  ;;  %v6198_v22 = vmax.f32 %v6031_v29, 0.0 }
 0x7d4   : > { %v6199_v51 = vmax.f32 %v6033_v7, 0.0  ;;  %6723 = vmatmul.mubr.bf16.gmra.mrb[80].mxu0 %v10606_v2 }
 0x7d5   : > { %v6200_v9 = vmax.f32 %v6035_v24, 0.0  ;;  %6732 = vmatprep.mubr.bf16.mxu0 %v6268_v5 }
 0x7d6   : > { %v10642_v20 = vpack.c.bf16 %v6199_v51, %v6197_v10 }
 0x7d7   : > { %v6276_v15 = vpack.c.bf16 %v6200_v9, %v6198_v22  ;;  %v6038_v41 = vpop.f32.mrb[232].mxu0 }
 0x7d8   : > { %v6039_v14 = vadd.f32 %v6038_v41, %v10346_v52  ;;  %v6040_v34 = vpop.f32.mrb[233].mxu0 }
 0x7d9   : > { %v6041_v17 = vadd.f32 %v6040_v34, %v10349_v49  ;;  %v6042_v56 = vpop.f32.mrb[234].mxu0 }
 0x7da   : > { %v6043_v33 = vadd.f32 %v6042_v56, %v10346_v52  ;;  %v6044_v57 = vpop.f32.mrb[235].mxu0  ;;  %v6201_v55 = vmax.f32 %v6039_v14, 0.0 }
 0x7db   : > { %v6045_v48 = vadd.f32 %v6044_v57, %v10349_v49  ;;  %v6202_v5 = vmax.f32 %v6041_v17, 0.0 }
 0x7dc   : > { %v6203_v2 = vmax.f32 %v6043_v33, 0.0  ;;  %6733 = vmatmul.mubr.bf16.gmra.mrb[84].mxu0 %v10614_v60 }
 0x7dd   : > { %v6204_v59 = vmax.f32 %v6045_v48, 0.0  ;;  %6742 = vmatprep.mubr.bf16.mxu0 %v6270_v4 }
 0x7de   : > { %v10649_v26 = vpack.c.bf16 %v6203_v2, %v6201_v55 }
 0x7df   : > { %v6278_v11 = vpack.c.bf16 %v6204_v59, %v6202_v5  ;;  %v6048_v45 = vpop.f32.mrb[236].mxu0 }
 0x7e0   : > { %v6049_v19 = vadd.f32 %v6048_v45, %v10346_v52  ;;  %v6050_v47 = vpop.f32.mrb[237].mxu0 }
 0x7e1   : > { %v6051_v38 = vadd.f32 %v6050_v47, %v10349_v49  ;;  %v6052_v8 = vpop.f32.mrb[238].mxu0 }
 0x7e2   : > { %v6053_v28 = vadd.f32 %v6052_v8, %v10346_v52  ;;  %v6054_v50 = vpop.f32.mrb[239].mxu0  ;;  %v6205_v6 = vmax.f32 %v6049_v19, 0.0  ;;  %v6324_v19 = vsub.s32 7, %v9268_v31  ;;  %v8708_v31 = vld [vmem:[#allocation8 + $0x8] sm:$0xff] }
 0x7e3   : > { %v6055_v43 = vadd.f32 %v6054_v50, %v10349_v49  ;;  %v6206_v4 = vmax.f32 %v6051_v38, 0.0 }
 0x7e4   : > { %v6207_v60 = vmax.f32 %v6053_v28, 0.0  ;;  %6743 = vmatmul.mubr.bf16.gmra.mrb[88].mxu0 %v10621_v53 }
 0x7e5   : > { %v6208_v63 = vmax.f32 %v6055_v43, 0.0  ;;  %6752 = vmatprep.mubr.bf16.mxu0 %v6272_v35  ;;  %v8707_v43 = vld [vmem:[#allocation8] sm:$0xff] }
 0x7e6   : > { %v10656_v44 = vpack.c.bf16 %v6207_v60, %v6205_v6  ;;  %v10693_v6 = vrot.slane %v8707_v43, %v6324_v19 }
 0x7e7   : > { %v10658_v16 = vpack.c.bf16 %v6208_v63, %v6206_v4  ;;  %v6058_v13 = vpop.f32.mrb[240].mxu0  ;;  %v10696_v63 = vrot.slane %v8708_v31, %v6324_v19 }
 0x7e8   : > { %v6059_v54 = vadd.f32 %v6058_v13, %v10346_v52  ;;  %v6060_v58 = vpop.f32.mrb[241].mxu0 }
 0x7e9   : > { %v6061_v62 = vadd.f32 %v6060_v58, %v10349_v49  ;;  %v6062_v37 = vpop.f32.mrb[242].mxu0 }
 0x7ea   : > { %v6063_v27 = vadd.f32 %v6062_v37, %v10346_v52  ;;  %v6064_v30 = vpop.f32.mrb[243].mxu0  ;;  %v6209_v53 = vmax.f32 %v6059_v54, 0.0 }
 0x7eb   : > { %v6065_v18 = vadd.f32 %v6064_v30, %v10349_v49  ;;  %v6210_v35 = vmax.f32 %v6061_v62, 0.0 }
 0x7ec   : > { %v6211_v36 = vmax.f32 %v6063_v27, 0.0  ;;  %6753 = vmatmul.mubr.bf16.gmra.mrb[92].mxu0 %v10628_v39 }
 0x7ed   : > { %v6212_v21 = vmax.f32 %v6065_v18, 0.0  ;;  %6762 = vmatprep.mubr.bf16.mxu0 %v6274_v46 }
 0x7ee   : > { %v10665_v42 = vpack.c.bf16 %v6211_v36, %v6209_v53 }
 0x7ef   : > { %v10667_v3 = vpack.c.bf16 %v6212_v21, %v6210_v35  ;;  %v6068_v23 = vpop.f32.mrb[244].mxu0 }
 0x7f0   : > { %v6069_v32 = vadd.f32 %v6068_v23, %v10346_v52  ;;  %v6070_v25 = vpop.f32.mrb[245].mxu0 }
 0x7f1   : > { %v6071_v1 = vadd.f32 %v6070_v25, %v10349_v49  ;;  %v6072_v40 = vpop.f32.mrb[246].mxu0 }
 0x7f2   : > { %v6073_v29 = vadd.f32 %v6072_v40, %v10346_v52  ;;  %v6074_v12 = vpop.f32.mrb[247].mxu0  ;;  %v6213_v39 = vmax.f32 %v6069_v32, 0.0 }
 0x7f3   : > { %v6075_v7 = vadd.f32 %v6074_v12, %v10349_v49  ;;  %v6214_v46 = vmax.f32 %v6071_v1, 0.0 }
 0x7f4   : > { %v6215_v0 = vmax.f32 %v6073_v29, 0.0  ;;  %6763 = vmatmul.mubr.bf16.gmra.mrb[96].mxu0 %v10635_v61 }
 0x7f5   : > { %v6216_v24 = vmax.f32 %v6075_v7, 0.0  ;;  %6772 = vmatprep.mubr.bf16.mxu0 %v6276_v15 }
 0x7f6   : > { %v10674_v10 = vpack.c.bf16 %v6215_v0, %v6213_v39 }
 0x7f7   : > { %v10676_v51 = vpack.c.bf16 %v6216_v24, %v6214_v46  ;;  %v6078_v22 = vpop.f32.mrb[248].mxu0 }
 0x7f8   : > { %v6079_v9 = vadd.f32 %v6078_v22, %v10346_v52  ;;  %v6080_v41 = vpop.f32.mrb[249].mxu0 }
 0x7f9   : > { %v6081_v14 = vadd.f32 %v6080_v41, %v10349_v49  ;;  %v6082_v34 = vpop.f32.mrb[250].mxu0 }
 0x7fa   : > { %v6083_v17 = vadd.f32 %v6082_v34, %v10346_v52  ;;  %v6084_v56 = vpop.f32.mrb[251].mxu0  ;;  %v6217_v61 = vmax.f32 %v6079_v9, 0.0 }
 0x7fb   : > { %v6085_v33 = vadd.f32 %v6084_v56, %v10349_v49  ;;  %v6218_v15 = vmax.f32 %v6081_v14, 0.0 }
 0x7fc   : > { %v6219_v57 = vmax.f32 %v6083_v17, 0.0  ;;  %6773 = vmatmul.mubr.bf16.gmra.mrb[100].mxu0 %v10642_v20 }
 0x7fd   : > { %v6220_v48 = vmax.f32 %v6085_v33, 0.0  ;;  %6782 = vmatprep.mubr.bf16.mxu0 %v6278_v11 }
 0x7fe   : > { %v10683_v55 = vpack.c.bf16 %v6219_v57, %v6217_v61 }
 0x7ff   : > { %v10685_v2 = vpack.c.bf16 %v6220_v48, %v6218_v15  ;;  %v6088_v5 = vpop.f32.mrb[252].mxu0 }
 0x800   : > { %v6089_v59 = vadd.f32 %v6088_v5, %v10346_v52  ;;  %v6090_v45 = vpop.f32.mrb[253].mxu0 }
 0x801   : > { %v6091_v47 = vadd.f32 %v6090_v45, %v10349_v49  ;;  %v6092_v38 = vpop.f32.mrb[254].mxu0 }
 0x802   : > { %v6093_v8 = vadd.f32 %v6092_v38, %v10346_v52  ;;  %v6094_v28 = vpop.f32.mrb[255].mxu0  ;;  %v6221_v50 = vmax.f32 %v6089_v59, 0.0 }
 0x803   : > { %v6095_v20 = vadd.f32 %v6094_v28, %v10349_v49  ;;  %v6222_v60 = vmax.f32 %v6091_v47, 0.0 }
 0x804   : > { %v6223_v11 = vmax.f32 %v6093_v8, 0.0  ;;  %6783 = vmatmul.mubr.bf16.gmra.mrb[104].mxu0 %v10649_v26 }
 0x805   : > { %v6224_v4 = vmax.f32 %v6095_v20, 0.0  ;;  %6792 = vmatprep.mubr.bf16.mxu0 %v10658_v16 }
 0x806   : > { %v10698_v13 = vpack.c.bf16 %v6223_v11, %v6221_v50 }
 0x807   : > { %v10700_v52 = vpack.c.bf16 %v6224_v4, %v6222_v60  ;;  %v6524_v54 = vpop.f32.mrb[0].mxu0 }
 0x808   : > { %v6525_v49 = vadd.f32 %v6524_v54, %v10693_v6  ;;  %v6526_v58 = vpop.f32.mrb[1].mxu0 }
 0x809   : > { %v6527_v26 = vadd.f32 %v6526_v58, %v10696_v63  ;;  %v6528_v62 = vpop.f32.mrb[2].mxu0 }
 0x80a   : > { %v6529_v37 = vadd.f32 %v6528_v62, %v10693_v6  ;;  %v6530_v27 = vpop.f32.mrb[3].mxu0  ;;  %v6843_v16 = vmax.f32 %v6525_v49, 0.0 }
 0x80b   : > { %v6531_v30 = vadd.f32 %v6530_v27, %v10696_v63  ;;  %v6844_v53 = vmax.f32 %v6527_v26, 0.0 }
 0x80c   : > { %v6845_v18 = vmax.f32 %v6529_v37, 0.0  ;;  %6793 = vmatmul.mubr.bf16.gmra.mrb[108].mxu0 %v10656_v44 }
 0x80d   : > { %v6846_v36 = vmax.f32 %v6531_v30, 0.0  ;;  %6802 = vmatprep.mubr.bf16.mxu0 %v10667_v3 }
 0x80e   : > { %v10708_v35 = vpack.c.bf16 %v6845_v18, %v6843_v16 }
 0x80f   : > { %v10710_v21 = vpack.c.bf16 %v6846_v36, %v6844_v53  ;;  %v6534_v23 = vpop.f32.mrb[4].mxu0 }
 0x810   : > { %v6535_v32 = vadd.f32 %v6534_v23, %v10693_v6  ;;  %v6536_v25 = vpop.f32.mrb[5].mxu0 }
 0x811   : > { %v6537_v1 = vadd.f32 %v6536_v25, %v10696_v63  ;;  %v6538_v40 = vpop.f32.mrb[6].mxu0 }
 0x812   : > { %v6539_v29 = vadd.f32 %v6538_v40, %v10693_v6  ;;  %v6540_v12 = vpop.f32.mrb[7].mxu0  ;;  %v6847_v7 = vmax.f32 %v6535_v32, 0.0 }
 0x813   : > { %v6541_v44 = vadd.f32 %v6540_v12, %v10696_v63  ;;  %v6848_v3 = vmax.f32 %v6537_v1, 0.0 }
 0x814   : > { %v6849_v39 = vmax.f32 %v6539_v29, 0.0  ;;  %6803 = vmatmul.mubr.bf16.gmra.mrb[112].mxu0 %v10665_v42 }
 0x815   : > { %v6850_v0 = vmax.f32 %v6541_v44, 0.0  ;;  %6812 = vmatprep.mubr.bf16.mxu0 %v10676_v51 }
 0x816   : > { %v10718_v46 = vpack.c.bf16 %v6849_v39, %v6847_v7 }
 0x817   : > { %v10720_v24 = vpack.c.bf16 %v6850_v0, %v6848_v3  ;;  %v6544_v22 = vpop.f32.mrb[8].mxu0 }
 0x818   : > { %v6545_v9 = vadd.f32 %v6544_v22, %v10693_v6  ;;  %v6546_v41 = vpop.f32.mrb[9].mxu0 }
 0x819   : > { %v6547_v14 = vadd.f32 %v6546_v41, %v10696_v63  ;;  %v6548_v34 = vpop.f32.mrb[10].mxu0 }
 0x81a   : > { %v6549_v17 = vadd.f32 %v6548_v34, %v10693_v6  ;;  %v6550_v56 = vpop.f32.mrb[11].mxu0  ;;  %v6851_v33 = vmax.f32 %v6545_v9, 0.0 }
 0x81b   : > { %v6551_v42 = vadd.f32 %v6550_v56, %v10696_v63  ;;  %v6852_v51 = vmax.f32 %v6547_v14, 0.0 }
 0x81c   : > { %v6853_v61 = vmax.f32 %v6549_v17, 0.0  ;;  %6813 = vmatmul.mubr.bf16.gmra.mrb[116].mxu0 %v10674_v10 }
 0x81d   : > { %v6854_v57 = vmax.f32 %v6551_v42, 0.0  ;;  %6822 = vmatprep.mubr.bf16.mxu0 %v10685_v2 }
 0x81e   : > { %v6975_v15 = vpack.c.bf16 %v6853_v61, %v6851_v33 }
 0x81f   : > { %v6976_v48 = vpack.c.bf16 %v6854_v57, %v6852_v51  ;;  %v6554_v5 = vpop.f32.mrb[12].mxu0 }
 0x820   : > { %v6555_v59 = vadd.f32 %v6554_v5, %v10693_v6  ;;  %v6556_v45 = vpop.f32.mrb[13].mxu0 }
 0x821   : > { %v6557_v19 = vadd.f32 %v6556_v45, %v10696_v63  ;;  %v6558_v47 = vpop.f32.mrb[14].mxu0  ;;  %7218 = vmatprep.mubr.bf16.mxu1 %v6976_v48 }
 0x822   : > { %v6559_v38 = vadd.f32 %v6558_v47, %v10693_v6  ;;  %v6560_v8 = vpop.f32.mrb[15].mxu0  ;;  %7219 = vmatmul.mubr.bf16.vlgmr.msra.gmra.mrb[128].mxu1 %v6975_v15  ;;  %v6855_v28 = vmax.f32 %v6555_v59, 0.0 }
 0x823   : > { %v6561_v10 = vadd.f32 %v6560_v8, %v10696_v63  ;;  %v6856_v2 = vmax.f32 %v6557_v19, 0.0 }
 0x824   : > { %v6857_v20 = vmax.f32 %v6559_v38, 0.0  ;;  %6823 = vmatmul.mubr.bf16.gmra.mrb[120].mxu0 %v10683_v55 }
 0x825   : > { %v6858_v50 = vmax.f32 %v6561_v10, 0.0  ;;  %6832 = vmatprep.mubr.bf16.mxu0 %v10700_v52 }
 0x826   : > { %v6977_v11 = vpack.c.bf16 %v6857_v20, %v6855_v28 }
 0x827   : > { %v6978_v43 = vpack.c.bf16 %v6858_v50, %v6856_v2  ;;  %v6564_v60 = vpop.f32.mrb[16].mxu0 }
 0x828   : > { %v6565_v4 = vadd.f32 %v6564_v60, %v10693_v6  ;;  %v6566_v31 = vpop.f32.mrb[17].mxu0 }
 0x829   : > { %v6567_v54 = vadd.f32 %v6566_v31, %v10696_v63  ;;  %v6568_v49 = vpop.f32.mrb[18].mxu0  ;;  %7226 = vmatprep.mubr.bf16.mxu1 %v6978_v43 }
 0x82a   : > { %v6569_v58 = vadd.f32 %v6568_v49, %v10693_v6  ;;  %v6570_v26 = vpop.f32.mrb[19].mxu0  ;;  %7227 = vmatmul.mubr.bf16.gmra.mrb[132].mxu1 %v6977_v11  ;;  %v6859_v62 = vmax.f32 %v6565_v4, 0.0 }
 0x82b   : > { %v6571_v55 = vadd.f32 %v6570_v26, %v10696_v63  ;;  %v6860_v52 = vmax.f32 %v6567_v54, 0.0 }
 0x82c   : > { %v6861_v37 = vmax.f32 %v6569_v58, 0.0  ;;  %6833 = vmatmul.mubr.bf16.gmra.mrb[124].mxu0 %v10698_v13 }
 0x82d   : > { %v6862_v27 = vmax.f32 %v6571_v55, 0.0  ;;  %7202 = vmatprep.mubr.bf16.mxu0 %v10710_v21 }
 0x82e   : > { %v6979_v30 = vpack.c.bf16 %v6861_v37, %v6859_v62 }
 0x82f   : > { %v6980_v16 = vpack.c.bf16 %v6862_v27, %v6860_v52  ;;  %v6574_v18 = vpop.f32.mrb[20].mxu0 }
 0x830   : > { %v6575_v53 = vadd.f32 %v6574_v18, %v10693_v6  ;;  %v6576_v36 = vpop.f32.mrb[21].mxu0 }
 0x831   : > { %v6577_v23 = vadd.f32 %v6576_v36, %v10696_v63  ;;  %v6578_v32 = vpop.f32.mrb[22].mxu0  ;;  %7234 = vmatprep.mubr.bf16.mxu1 %v6980_v16 }
 0x832   : > { %v6579_v25 = vadd.f32 %v6578_v32, %v10693_v6  ;;  %v6580_v1 = vpop.f32.mrb[23].mxu0  ;;  %7235 = vmatmul.mubr.bf16.gmra.mrb[136].mxu1 %v6979_v30  ;;  %v6863_v40 = vmax.f32 %v6575_v53, 0.0 }
 0x833   : > { %v6581_v13 = vadd.f32 %v6580_v1, %v10696_v63  ;;  %v6864_v21 = vmax.f32 %v6577_v23, 0.0 }
 0x834   : > { %v6865_v29 = vmax.f32 %v6579_v25, 0.0  ;;  %7203 = vmatmul.mubr.bf16.vlgmr.msra.gmra.mrb[128].mxu0 %v10708_v35 }
 0x835   : > { %v6866_v12 = vmax.f32 %v6581_v13, 0.0  ;;  %7210 = vmatprep.mubr.bf16.mxu0 %v10720_v24 }
 0x836   : > { %v6981_v44 = vpack.c.bf16 %v6865_v29, %v6863_v40 }
 0x837   : > { %v6982_v7 = vpack.c.bf16 %v6866_v12, %v6864_v21  ;;  %v6584_v39 = vpop.f32.mrb[24].mxu0 }
 0x838   : > { %v6585_v3 = vadd.f32 %v6584_v39, %v10693_v6  ;;  %v6586_v0 = vpop.f32.mrb[25].mxu0 }
 0x839   : > { %v6587_v22 = vadd.f32 %v6586_v0, %v10696_v63  ;;  %v6588_v9 = vpop.f32.mrb[26].mxu0  ;;  %7242 = vmatprep.mubr.bf16.mxu1 %v6982_v7 }
 0x83a   : > { %v6589_v41 = vadd.f32 %v6588_v9, %v10693_v6  ;;  %v6590_v14 = vpop.f32.mrb[27].mxu0  ;;  %7243 = vmatmul.mubr.bf16.gmra.mrb[140].mxu1 %v6981_v44  ;;  %v6867_v34 = vmax.f32 %v6585_v3, 0.0 }
 0x83b   : > { %v6591_v35 = vadd.f32 %v6590_v14, %v10696_v63  ;;  %v6868_v24 = vmax.f32 %v6587_v22, 0.0 }
 0x83c   : > { %v6869_v17 = vmax.f32 %v6589_v41, 0.0  ;;  %7211 = vmatmul.mubr.bf16.gmra.mrb[132].mxu0 %v10718_v46 }
 0x83d   : > { %v6870_v56 = vmax.f32 %v6591_v35, 0.0 }
 0x83e   : > { %v6983_v42 = vpack.c.bf16 %v6869_v17, %v6867_v34 }
 0x83f   : > { %v6984_v33 = vpack.c.bf16 %v6870_v56, %v6868_v24  ;;  %v6594_v61 = vpop.f32.mrb[28].mxu0 }
 0x840   : > { %v6595_v51 = vadd.f32 %v6594_v61, %v10693_v6  ;;  %v6596_v57 = vpop.f32.mrb[29].mxu0 }
 0x841   : > { %v6597_v15 = vadd.f32 %v6596_v57, %v10696_v63  ;;  %v6598_v48 = vpop.f32.mrb[30].mxu0  ;;  %7250 = vmatprep.mubr.bf16.mxu1 %v6984_v33 }
 0x842   : > { %v6599_v5 = vadd.f32 %v6598_v48, %v10693_v6  ;;  %v6600_v59 = vpop.f32.mrb[31].mxu0  ;;  %7251 = vmatmul.mubr.bf16.gmra.mrb[144].mxu1 %v6983_v42  ;;  %v6871_v19 = vmax.f32 %v6595_v51, 0.0 }
 0x843   : > { %v6601_v45 = vadd.f32 %v6600_v59, %v10696_v63  ;;  %v6872_v47 = vmax.f32 %v6597_v15, 0.0 }
 0x844   : > { %v6873_v46 = vmax.f32 %v6599_v5, 0.0 }
 0x845   : > { %v6874_v38 = vmax.f32 %v6601_v45, 0.0 }
 0x846   : > { %v6985_v8 = vpack.c.bf16 %v6873_v46, %v6871_v19 }
 0x847   : > { %v6986_v10 = vpack.c.bf16 %v6874_v38, %v6872_v47  ;;  %v6604_v28 = vpop.f32.mrb[32].mxu0 }
 0x848   : > { %v6605_v20 = vadd.f32 %v6604_v28, %v10693_v6  ;;  %v6606_v2 = vpop.f32.mrb[33].mxu0 }
 0x849   : > { %v6607_v50 = vadd.f32 %v6606_v2, %v10696_v63  ;;  %v6608_v11 = vpop.f32.mrb[34].mxu0  ;;  %7258 = vmatprep.mubr.bf16.mxu1 %v6986_v10 }
 0x84a   : > { %v6609_v43 = vadd.f32 %v6608_v11, %v10693_v6  ;;  %v6610_v60 = vpop.f32.mrb[35].mxu0  ;;  %7259 = vmatmul.mubr.bf16.gmra.mrb[148].mxu1 %v6985_v8  ;;  %v6875_v31 = vmax.f32 %v6605_v20, 0.0 }
 0x84b   : > { %v6611_v4 = vadd.f32 %v6610_v60, %v10696_v63  ;;  %v6876_v49 = vmax.f32 %v6607_v50, 0.0 }
 0x84c   : > { %v6877_v54 = vmax.f32 %v6609_v43, 0.0 }
 0x84d   : > { %v6878_v58 = vmax.f32 %v6611_v4, 0.0 }
 0x84e   : > { %v6987_v26 = vpack.c.bf16 %v6877_v54, %v6875_v31 }
 0x84f   : > { %v6988_v55 = vpack.c.bf16 %v6878_v58, %v6876_v49  ;;  %v6614_v62 = vpop.f32.mrb[36].mxu0 }
 0x850   : > { %v6615_v37 = vadd.f32 %v6614_v62, %v10693_v6  ;;  %v6616_v52 = vpop.f32.mrb[37].mxu0 }
 0x851   : > { %v6617_v27 = vadd.f32 %v6616_v52, %v10696_v63  ;;  %v6618_v30 = vpop.f32.mrb[38].mxu0  ;;  %7266 = vmatprep.mubr.bf16.mxu1 %v6988_v55 }
 0x852   : > { %v6619_v16 = vadd.f32 %v6618_v30, %v10693_v6  ;;  %v6620_v18 = vpop.f32.mrb[39].mxu0  ;;  %7267 = vmatmul.mubr.bf16.gmra.mrb[152].mxu1 %v6987_v26  ;;  %v6879_v36 = vmax.f32 %v6615_v37, 0.0 }
 0x853   : > { %v6621_v53 = vadd.f32 %v6620_v18, %v10696_v63  ;;  %v6880_v32 = vmax.f32 %v6617_v27, 0.0 }
 0x854   : > { %v6881_v23 = vmax.f32 %v6619_v16, 0.0 }
 0x855   : > { %v6882_v25 = vmax.f32 %v6621_v53, 0.0 }
 0x856   : > { %v6989_v1 = vpack.c.bf16 %v6881_v23, %v6879_v36 }
 0x857   : > { %v6990_v13 = vpack.c.bf16 %v6882_v25, %v6880_v32  ;;  %v6624_v40 = vpop.f32.mrb[40].mxu0 }
 0x858   : > { %v6625_v29 = vadd.f32 %v6624_v40, %v10693_v6  ;;  %v6626_v21 = vpop.f32.mrb[41].mxu0 }
 0x859   : > { %v6627_v12 = vadd.f32 %v6626_v21, %v10696_v63  ;;  %v6628_v44 = vpop.f32.mrb[42].mxu0  ;;  %7274 = vmatprep.mubr.bf16.mxu1 %v6990_v13 }
 0x85a   : > { %v6629_v7 = vadd.f32 %v6628_v44, %v10693_v6  ;;  %v6630_v39 = vpop.f32.mrb[43].mxu0  ;;  %7275 = vmatmul.mubr.bf16.gmra.mrb[156].mxu1 %v6989_v1  ;;  %v6883_v0 = vmax.f32 %v6625_v29, 0.0 }
 0x85b   : > { %v6631_v3 = vadd.f32 %v6630_v39, %v10696_v63  ;;  %v6884_v9 = vmax.f32 %v6627_v12, 0.0 }
 0x85c   : > { %v6885_v22 = vmax.f32 %v6629_v7, 0.0 }
 0x85d   : > { %v6886_v41 = vmax.f32 %v6631_v3, 0.0 }
 0x85e   : > { %v6991_v14 = vpack.c.bf16 %v6885_v22, %v6883_v0 }
 0x85f   : > { %v6992_v35 = vpack.c.bf16 %v6886_v41, %v6884_v9  ;;  %v6634_v34 = vpop.f32.mrb[44].mxu0 }
 0x860   : > { %v6635_v17 = vadd.f32 %v6634_v34, %v10693_v6  ;;  %v6636_v24 = vpop.f32.mrb[45].mxu0 }
 0x861   : > { %v6637_v56 = vadd.f32 %v6636_v24, %v10696_v63  ;;  %v6638_v42 = vpop.f32.mrb[46].mxu0  ;;  %7282 = vmatprep.mubr.bf16.mxu1 %v6992_v35 }
 0x862   : > { %v6639_v33 = vadd.f32 %v6638_v42, %v10693_v6  ;;  %v6640_v61 = vpop.f32.mrb[47].mxu0  ;;  %7283 = vmatmul.mubr.bf16.gmra.mrb[160].mxu1 %v6991_v14  ;;  %v6887_v57 = vmax.f32 %v6635_v17, 0.0 }
 0x863   : > { %v6641_v51 = vadd.f32 %v6640_v61, %v10696_v63  ;;  %v6888_v48 = vmax.f32 %v6637_v56, 0.0 }
 0x864   : > { %v6889_v15 = vmax.f32 %v6639_v33, 0.0 }
 0x865   : > { %v6890_v5 = vmax.f32 %v6641_v51, 0.0 }
 0x866   : > { %v6993_v59 = vpack.c.bf16 %v6889_v15, %v6887_v57 }
 0x867   : > { %v6994_v45 = vpack.c.bf16 %v6890_v5, %v6888_v48  ;;  %v6644_v19 = vpop.f32.mrb[48].mxu0 }
 0x868   : > { %v6645_v46 = vadd.f32 %v6644_v19, %v10693_v6  ;;  %v6646_v47 = vpop.f32.mrb[49].mxu0 }
 0x869   : > { %v6647_v38 = vadd.f32 %v6646_v47, %v10696_v63  ;;  %v6648_v8 = vpop.f32.mrb[50].mxu0  ;;  %7290 = vmatprep.mubr.bf16.mxu1 %v6994_v45 }
 0x86a   : > { %v6649_v10 = vadd.f32 %v6648_v8, %v10693_v6  ;;  %v6650_v28 = vpop.f32.mrb[51].mxu0  ;;  %7291 = vmatmul.mubr.bf16.gmra.mrb[164].mxu1 %v6993_v59  ;;  %v6891_v2 = vmax.f32 %v6645_v46, 0.0 }
 0x86b   : > { %v6651_v20 = vadd.f32 %v6650_v28, %v10696_v63  ;;  %v6892_v11 = vmax.f32 %v6647_v38, 0.0 }
 0x86c   : > { %v6893_v50 = vmax.f32 %v6649_v10, 0.0 }
 0x86d   : > { %v6894_v43 = vmax.f32 %v6651_v20, 0.0 }
 0x86e   : > { %v6995_v60 = vpack.c.bf16 %v6893_v50, %v6891_v2 }
 0x86f   : > { %v6996_v4 = vpack.c.bf16 %v6894_v43, %v6892_v11  ;;  %v6654_v31 = vpop.f32.mrb[52].mxu0 }
 0x870   : > { %v6655_v54 = vadd.f32 %v6654_v31, %v10693_v6  ;;  %v6656_v49 = vpop.f32.mrb[53].mxu0 }
 0x871   : > { %v6657_v58 = vadd.f32 %v6656_v49, %v10696_v63  ;;  %v6658_v26 = vpop.f32.mrb[54].mxu0  ;;  %7298 = vmatprep.mubr.bf16.mxu1 %v6996_v4 }
 0x872   : > { %v6659_v55 = vadd.f32 %v6658_v26, %v10693_v6  ;;  %v6660_v62 = vpop.f32.mrb[55].mxu0  ;;  %7299 = vmatmul.mubr.bf16.gmra.mrb[168].mxu1 %v6995_v60  ;;  %v6895_v52 = vmax.f32 %v6655_v54, 0.0 }
 0x873   : > { %v6661_v37 = vadd.f32 %v6660_v62, %v10696_v63  ;;  %v6896_v30 = vmax.f32 %v6657_v58, 0.0 }
 0x874   : > { %v6897_v27 = vmax.f32 %v6659_v55, 0.0 }
 0x875   : > { %v6898_v16 = vmax.f32 %v6661_v37, 0.0 }
 0x876   : > { %v6997_v18 = vpack.c.bf16 %v6897_v27, %v6895_v52 }
 0x877   : > { %v6998_v53 = vpack.c.bf16 %v6898_v16, %v6896_v30  ;;  %v6664_v36 = vpop.f32.mrb[56].mxu0 }
 0x878   : > { %v6665_v23 = vadd.f32 %v6664_v36, %v10693_v6  ;;  %v6666_v32 = vpop.f32.mrb[57].mxu0 }
 0x879   : > { %v6667_v25 = vadd.f32 %v6666_v32, %v10696_v63  ;;  %v6668_v1 = vpop.f32.mrb[58].mxu0  ;;  %7306 = vmatprep.mubr.bf16.mxu1 %v6998_v53 }
 0x87a   : > { %v6669_v13 = vadd.f32 %v6668_v1, %v10693_v6  ;;  %v6670_v40 = vpop.f32.mrb[59].mxu0  ;;  %7307 = vmatmul.mubr.bf16.gmra.mrb[172].mxu1 %v6997_v18  ;;  %v6899_v21 = vmax.f32 %v6665_v23, 0.0 }
 0x87b   : > { %v6671_v29 = vadd.f32 %v6670_v40, %v10696_v63  ;;  %v6900_v44 = vmax.f32 %v6667_v25, 0.0 }
 0x87c   : > { %v6901_v12 = vmax.f32 %v6669_v13, 0.0 }
 0x87d   : > { %v6902_v7 = vmax.f32 %v6671_v29, 0.0 }
 0x87e   : > { %v6999_v39 = vpack.c.bf16 %v6901_v12, %v6899_v21 }
 0x87f   : > { %v7000_v3 = vpack.c.bf16 %v6902_v7, %v6900_v44  ;;  %v6674_v0 = vpop.f32.mrb[60].mxu0 }
 0x880   : > { %v6675_v22 = vadd.f32 %v6674_v0, %v10693_v6  ;;  %v6676_v9 = vpop.f32.mrb[61].mxu0 }
 0x881   : > { %v6677_v41 = vadd.f32 %v6676_v9, %v10696_v63  ;;  %v6678_v14 = vpop.f32.mrb[62].mxu0  ;;  %7314 = vmatprep.mubr.bf16.mxu1 %v7000_v3 }
 0x882   : > { %v6679_v35 = vadd.f32 %v6678_v14, %v10693_v6  ;;  %v6680_v34 = vpop.f32.mrb[63].mxu0  ;;  %7315 = vmatmul.mubr.bf16.gmra.mrb[176].mxu1 %v6999_v39  ;;  %v6903_v24 = vmax.f32 %v6675_v22, 0.0 }
 0x883   : > { %v6681_v17 = vadd.f32 %v6680_v34, %v10696_v63  ;;  %v6904_v42 = vmax.f32 %v6677_v41, 0.0 }
 0x884   : > { %v6905_v56 = vmax.f32 %v6679_v35, 0.0 }
 0x885   : > { %v6906_v33 = vmax.f32 %v6681_v17, 0.0 }
 0x886   : > { %v7001_v61 = vpack.c.bf16 %v6905_v56, %v6903_v24 }
 0x887   : > { %v7002_v51 = vpack.c.bf16 %v6906_v33, %v6904_v42  ;;  %v6684_v57 = vpop.f32.mrb[64].mxu0 }
 0x888   : > { %v6685_v15 = vadd.f32 %v6684_v57, %v10693_v6  ;;  %v6686_v48 = vpop.f32.mrb[65].mxu0 }
 0x889   : > { %v6687_v5 = vadd.f32 %v6686_v48, %v10696_v63  ;;  %v6688_v59 = vpop.f32.mrb[66].mxu0  ;;  %7322 = vmatprep.mubr.bf16.mxu1 %v7002_v51 }
 0x88a   : > { %v6689_v45 = vadd.f32 %v6688_v59, %v10693_v6  ;;  %v6690_v19 = vpop.f32.mrb[67].mxu0  ;;  %7323 = vmatmul.mubr.bf16.gmra.mrb[180].mxu1 %v7001_v61  ;;  %v6907_v47 = vmax.f32 %v6685_v15, 0.0 }
 0x88b   : > { %v6691_v46 = vadd.f32 %v6690_v19, %v10696_v63  ;;  %v6908_v8 = vmax.f32 %v6687_v5, 0.0 }
 0x88c   : > { %v6909_v38 = vmax.f32 %v6689_v45, 0.0 }
 0x88d   : > { %v6910_v10 = vmax.f32 %v6691_v46, 0.0 }
 0x88e   : > { %v7003_v28 = vpack.c.bf16 %v6909_v38, %v6907_v47 }
 0x88f   : > { %v7004_v20 = vpack.c.bf16 %v6910_v10, %v6908_v8  ;;  %v6694_v2 = vpop.f32.mrb[68].mxu0 }
 0x890   : > { %v6695_v50 = vadd.f32 %v6694_v2, %v10693_v6  ;;  %v6696_v11 = vpop.f32.mrb[69].mxu0 }
 0x891   : > { %v6697_v43 = vadd.f32 %v6696_v11, %v10696_v63  ;;  %v6698_v60 = vpop.f32.mrb[70].mxu0  ;;  %7330 = vmatprep.mubr.bf16.mxu1 %v7004_v20 }
 0x892   : > { %v6699_v4 = vadd.f32 %v6698_v60, %v10693_v6  ;;  %v6700_v31 = vpop.f32.mrb[71].mxu0  ;;  %7331 = vmatmul.mubr.bf16.gmra.mrb[184].mxu1 %v7003_v28  ;;  %v6911_v49 = vmax.f32 %v6695_v50, 0.0 }
 0x893   : > { %v6701_v54 = vadd.f32 %v6700_v31, %v10696_v63  ;;  %v6912_v26 = vmax.f32 %v6697_v43, 0.0 }
 0x894   : > { %v6913_v58 = vmax.f32 %v6699_v4, 0.0 }
 0x895   : > { %v6914_v55 = vmax.f32 %v6701_v54, 0.0 }
 0x896   : > { %v7005_v62 = vpack.c.bf16 %v6913_v58, %v6911_v49 }
 0x897   : > { %v7006_v37 = vpack.c.bf16 %v6914_v55, %v6912_v26  ;;  %v6704_v52 = vpop.f32.mrb[72].mxu0 }
 0x898   : > { %v6705_v27 = vadd.f32 %v6704_v52, %v10693_v6  ;;  %v6706_v30 = vpop.f32.mrb[73].mxu0 }
 0x899   : > { %v6707_v16 = vadd.f32 %v6706_v30, %v10696_v63  ;;  %v6708_v18 = vpop.f32.mrb[74].mxu0  ;;  %7338 = vmatprep.mubr.bf16.mxu1 %v7006_v37 }
 0x89a   : > { %v6709_v53 = vadd.f32 %v6708_v18, %v10693_v6  ;;  %v6710_v36 = vpop.f32.mrb[75].mxu0  ;;  %7339 = vmatmul.mubr.bf16.gmra.mrb[188].mxu1 %v7005_v62  ;;  %v6915_v32 = vmax.f32 %v6705_v27, 0.0 }
 0x89b   : > { %v6711_v23 = vadd.f32 %v6710_v36, %v10696_v63  ;;  %v6916_v1 = vmax.f32 %v6707_v16, 0.0 }
 0x89c   : > { %v6917_v25 = vmax.f32 %v6709_v53, 0.0 }
 0x89d   : > { %v6918_v13 = vmax.f32 %v6711_v23, 0.0 }
 0x89e   : > { %v7007_v40 = vpack.c.bf16 %v6917_v25, %v6915_v32 }
 0x89f   : > { %v7008_v29 = vpack.c.bf16 %v6918_v13, %v6916_v1  ;;  %v6714_v21 = vpop.f32.mrb[76].mxu0 }
 0x8a0   : > { %v6715_v12 = vadd.f32 %v6714_v21, %v10693_v6  ;;  %v6716_v44 = vpop.f32.mrb[77].mxu0 }
 0x8a1   : > { %v6717_v7 = vadd.f32 %v6716_v44, %v10696_v63  ;;  %v6718_v39 = vpop.f32.mrb[78].mxu0  ;;  %7346 = vmatprep.mubr.bf16.mxu1 %v7008_v29 }
 0x8a2   : > { %v6719_v3 = vadd.f32 %v6718_v39, %v10693_v6  ;;  %v6720_v0 = vpop.f32.mrb[79].mxu0  ;;  %7347 = vmatmul.mubr.bf16.gmra.mrb[192].mxu1 %v7007_v40  ;;  %v6919_v9 = vmax.f32 %v6715_v12, 0.0 }
 0x8a3   : > { %v6721_v22 = vadd.f32 %v6720_v0, %v10696_v63  ;;  %v6920_v14 = vmax.f32 %v6717_v7, 0.0 }
 0x8a4   : > { %v6921_v41 = vmax.f32 %v6719_v3, 0.0 }
 0x8a5   : > { %v6922_v35 = vmax.f32 %v6721_v22, 0.0 }
 0x8a6   : > { %v7009_v34 = vpack.c.bf16 %v6921_v41, %v6919_v9 }
 0x8a7   : > { %v7010_v17 = vpack.c.bf16 %v6922_v35, %v6920_v14  ;;  %v6724_v24 = vpop.f32.mrb[80].mxu0 }
 0x8a8   : > { %v6725_v56 = vadd.f32 %v6724_v24, %v10693_v6  ;;  %v6726_v42 = vpop.f32.mrb[81].mxu0 }
 0x8a9   : > { %v6727_v33 = vadd.f32 %v6726_v42, %v10696_v63  ;;  %v6728_v61 = vpop.f32.mrb[82].mxu0  ;;  %7354 = vmatprep.mubr.bf16.mxu1 %v7010_v17 }
 0x8aa   : > { %v6729_v51 = vadd.f32 %v6728_v61, %v10693_v6  ;;  %v6730_v57 = vpop.f32.mrb[83].mxu0  ;;  %7355 = vmatmul.mubr.bf16.gmra.mrb[196].mxu1 %v7009_v34  ;;  %v6923_v48 = vmax.f32 %v6725_v56, 0.0 }
 0x8ab   : > { %v6731_v15 = vadd.f32 %v6730_v57, %v10696_v63  ;;  %v6924_v59 = vmax.f32 %v6727_v33, 0.0 }
 0x8ac   : > { %v6925_v5 = vmax.f32 %v6729_v51, 0.0 }
 0x8ad   : > { %v6926_v45 = vmax.f32 %v6731_v15, 0.0 }
 0x8ae   : > { %v7011_v19 = vpack.c.bf16 %v6925_v5, %v6923_v48 }
 0x8af   : > { %v7012_v46 = vpack.c.bf16 %v6926_v45, %v6924_v59  ;;  %v6734_v47 = vpop.f32.mrb[84].mxu0 }
 0x8b0   : > { %v6735_v38 = vadd.f32 %v6734_v47, %v10693_v6  ;;  %v6736_v8 = vpop.f32.mrb[85].mxu0 }
 0x8b1   : > { %v6737_v10 = vadd.f32 %v6736_v8, %v10696_v63  ;;  %v6738_v28 = vpop.f32.mrb[86].mxu0  ;;  %7362 = vmatprep.mubr.bf16.mxu1 %v7012_v46 }
 0x8b2   : > { %v6739_v20 = vadd.f32 %v6738_v28, %v10693_v6  ;;  %v6740_v2 = vpop.f32.mrb[87].mxu0  ;;  %7363 = vmatmul.mubr.bf16.gmra.mrb[200].mxu1 %v7011_v19  ;;  %v6927_v11 = vmax.f32 %v6735_v38, 0.0 }
 0x8b3   : > { %v6741_v50 = vadd.f32 %v6740_v2, %v10696_v63  ;;  %v6928_v60 = vmax.f32 %v6737_v10, 0.0 }
 0x8b4   : > { %v6929_v43 = vmax.f32 %v6739_v20, 0.0 }
 0x8b5   : > { %v6930_v4 = vmax.f32 %v6741_v50, 0.0 }
 0x8b6   : > { %v7013_v31 = vpack.c.bf16 %v6929_v43, %v6927_v11 }
 0x8b7   : > { %v7014_v54 = vpack.c.bf16 %v6930_v4, %v6928_v60  ;;  %v6744_v49 = vpop.f32.mrb[88].mxu0 }
 0x8b8   : > { %v6745_v58 = vadd.f32 %v6744_v49, %v10693_v6  ;;  %v6746_v26 = vpop.f32.mrb[89].mxu0 }
 0x8b9   : > { %v6747_v55 = vadd.f32 %v6746_v26, %v10696_v63  ;;  %v6748_v62 = vpop.f32.mrb[90].mxu0  ;;  %7370 = vmatprep.mubr.bf16.mxu1 %v7014_v54 }
 0x8ba   : > { %v6749_v37 = vadd.f32 %v6748_v62, %v10693_v6  ;;  %v6750_v52 = vpop.f32.mrb[91].mxu0  ;;  %7371 = vmatmul.mubr.bf16.gmra.mrb[204].mxu1 %v7013_v31  ;;  %v6931_v30 = vmax.f32 %v6745_v58, 0.0 }
 0x8bb   : > { %v6751_v27 = vadd.f32 %v6750_v52, %v10696_v63  ;;  %v6932_v18 = vmax.f32 %v6747_v55, 0.0 }
 0x8bc   : > { %v6933_v16 = vmax.f32 %v6749_v37, 0.0 }
 0x8bd   : > { %v6934_v53 = vmax.f32 %v6751_v27, 0.0 }
 0x8be   : > { %v7015_v36 = vpack.c.bf16 %v6933_v16, %v6931_v30 }
 0x8bf   : > { %v7016_v23 = vpack.c.bf16 %v6934_v53, %v6932_v18  ;;  %v6754_v32 = vpop.f32.mrb[92].mxu0 }
 0x8c0   : > { %v6755_v25 = vadd.f32 %v6754_v32, %v10693_v6  ;;  %v6756_v1 = vpop.f32.mrb[93].mxu0 }
 0x8c1   : > { %v6757_v13 = vadd.f32 %v6756_v1, %v10696_v63  ;;  %v6758_v40 = vpop.f32.mrb[94].mxu0  ;;  %7378 = vmatprep.mubr.bf16.mxu1 %v7016_v23 }
 0x8c2   : > { %v6759_v29 = vadd.f32 %v6758_v40, %v10693_v6  ;;  %v6760_v21 = vpop.f32.mrb[95].mxu0  ;;  %7379 = vmatmul.mubr.bf16.gmra.mrb[208].mxu1 %v7015_v36  ;;  %v6935_v44 = vmax.f32 %v6755_v25, 0.0 }
 0x8c3   : > { %v6761_v12 = vadd.f32 %v6760_v21, %v10696_v63  ;;  %v6936_v39 = vmax.f32 %v6757_v13, 0.0 }
 0x8c4   : > { %v6937_v7 = vmax.f32 %v6759_v29, 0.0 }
 0x8c5   : > { %v6938_v3 = vmax.f32 %v6761_v12, 0.0 }
 0x8c6   : > { %v7017_v0 = vpack.c.bf16 %v6937_v7, %v6935_v44 }
 0x8c7   : > { %v7018_v22 = vpack.c.bf16 %v6938_v3, %v6936_v39  ;;  %v6764_v9 = vpop.f32.mrb[96].mxu0 }
 0x8c8   : > { %v6765_v41 = vadd.f32 %v6764_v9, %v10693_v6  ;;  %v6766_v14 = vpop.f32.mrb[97].mxu0 }
 0x8c9   : > { %v6767_v35 = vadd.f32 %v6766_v14, %v10696_v63  ;;  %v6768_v34 = vpop.f32.mrb[98].mxu0  ;;  %7386 = vmatprep.mubr.bf16.mxu1 %v7018_v22 }
 0x8ca   : > { %v6769_v17 = vadd.f32 %v6768_v34, %v10693_v6  ;;  %v6770_v24 = vpop.f32.mrb[99].mxu0  ;;  %7387 = vmatmul.mubr.bf16.gmra.mrb[212].mxu1 %v7017_v0  ;;  %v6939_v42 = vmax.f32 %v6765_v41, 0.0 }
 0x8cb   : > { %v6771_v56 = vadd.f32 %v6770_v24, %v10696_v63  ;;  %v6940_v61 = vmax.f32 %v6767_v35, 0.0 }
 0x8cc   : > { %v6941_v33 = vmax.f32 %v6769_v17, 0.0 }
 0x8cd   : > { %v6942_v51 = vmax.f32 %v6771_v56, 0.0 }
 0x8ce   : > { %v7019_v57 = vpack.c.bf16 %v6941_v33, %v6939_v42 }
 0x8cf   : > { %v7020_v15 = vpack.c.bf16 %v6942_v51, %v6940_v61  ;;  %v6774_v48 = vpop.f32.mrb[100].mxu0 }
 0x8d0   : > { %v6775_v5 = vadd.f32 %v6774_v48, %v10693_v6  ;;  %v6776_v59 = vpop.f32.mrb[101].mxu0 }
 0x8d1   : > { %v6777_v45 = vadd.f32 %v6776_v59, %v10696_v63  ;;  %v6778_v19 = vpop.f32.mrb[102].mxu0  ;;  %7394 = vmatprep.mubr.bf16.mxu1 %v7020_v15  ;;  %v10847_v59 = vld [vmem:[%s11043_s5] ss:$0 sm:$0xff] }
 0x8d2   : > { %v6779_v46 = vadd.f32 %v6778_v19, %v10693_v6  ;;  %v6780_v47 = vpop.f32.mrb[103].mxu0  ;;  %7395 = vmatmul.mubr.bf16.gmra.mrb[216].mxu1 %v7019_v57  ;;  %v6943_v8 = vmax.f32 %v6775_v5, 0.0 }
 0x8d3   : > { %v6781_v38 = vadd.f32 %v6780_v47, %v10696_v63  ;;  %v6944_v28 = vmax.f32 %v6777_v45, 0.0 }
 0x8d4   : > { %v6945_v10 = vmax.f32 %v6779_v46, 0.0 }
 0x8d5   : > { %v6946_v20 = vmax.f32 %v6781_v38, 0.0 }
 0x8d6   : > { %v7021_v2 = vpack.c.bf16 %v6945_v10, %v6943_v8 }
 0x8d7   : > { %v7022_v50 = vpack.c.bf16 %v6946_v20, %v6944_v28  ;;  %v6784_v11 = vpop.f32.mrb[104].mxu0 }
 0x8d8   : > { %v6785_v43 = vadd.f32 %v6784_v11, %v10693_v6  ;;  %v6786_v60 = vpop.f32.mrb[105].mxu0 }
 0x8d9   : > { %v6787_v4 = vadd.f32 %v6786_v60, %v10696_v63  ;;  %v6788_v31 = vpop.f32.mrb[106].mxu0  ;;  %7402 = vmatprep.mubr.bf16.mxu1 %v7022_v50 }
 0x8da   : > { %v6789_v54 = vadd.f32 %v6788_v31, %v10693_v6  ;;  %v6790_v49 = vpop.f32.mrb[107].mxu0  ;;  %7403 = vmatmul.mubr.bf16.gmra.mrb[220].mxu1 %v7021_v2  ;;  %v6947_v26 = vmax.f32 %v6785_v43, 0.0 }
 0x8db   : > { %v6791_v58 = vadd.f32 %v6790_v49, %v10696_v63  ;;  %v6948_v62 = vmax.f32 %v6787_v4, 0.0 }
 0x8dc   : > { %v6949_v55 = vmax.f32 %v6789_v54, 0.0 }
 0x8dd   : > { %v6950_v37 = vmax.f32 %v6791_v58, 0.0 }
 0x8de   : > { %v7023_v52 = vpack.c.bf16 %v6949_v55, %v6947_v26 }
 0x8df   : > { %v7024_v27 = vpack.c.bf16 %v6950_v37, %v6948_v62  ;;  %v6794_v30 = vpop.f32.mrb[108].mxu0 }
 0x8e0   : > { %v6795_v16 = vadd.f32 %v6794_v30, %v10693_v6  ;;  %v6796_v18 = vpop.f32.mrb[109].mxu0 }
 0x8e1   : > { %v6797_v53 = vadd.f32 %v6796_v18, %v10696_v63  ;;  %v6798_v36 = vpop.f32.mrb[110].mxu0  ;;  %7410 = vmatprep.mubr.bf16.mxu1 %v7024_v27 }
 0x8e2   : > { %v6799_v23 = vadd.f32 %v6798_v36, %v10693_v6  ;;  %v6800_v32 = vpop.f32.mrb[111].mxu0  ;;  %7411 = vmatmul.mubr.bf16.gmra.mrb[224].mxu1 %v7023_v52  ;;  %v6951_v1 = vmax.f32 %v6795_v16, 0.0 }
 0x8e3   : > { %v6801_v25 = vadd.f32 %v6800_v32, %v10696_v63  ;;  %v6952_v40 = vmax.f32 %v6797_v53, 0.0 }
 0x8e4   : > { %v6953_v13 = vmax.f32 %v6799_v23, 0.0 }
 0x8e5   : > { %v6954_v29 = vmax.f32 %v6801_v25, 0.0 }
 0x8e6   : > { %v7025_v21 = vpack.c.bf16 %v6953_v13, %v6951_v1 }
 0x8e7   : > { %v7026_v12 = vpack.c.bf16 %v6954_v29, %v6952_v40  ;;  %v6804_v44 = vpop.f32.mrb[112].mxu0 }
 0x8e8   : > { %v6805_v7 = vadd.f32 %v6804_v44, %v10693_v6  ;;  %v6806_v39 = vpop.f32.mrb[113].mxu0 }
 0x8e9   : > { %v6807_v3 = vadd.f32 %v6806_v39, %v10696_v63  ;;  %v6808_v0 = vpop.f32.mrb[114].mxu0  ;;  %7418 = vmatprep.mubr.bf16.mxu1 %v7026_v12 }
 0x8ea   : > { %v6809_v22 = vadd.f32 %v6808_v0, %v10693_v6  ;;  %v6810_v9 = vpop.f32.mrb[115].mxu0  ;;  %7419 = vmatmul.mubr.bf16.gmra.mrb[228].mxu1 %v7025_v21  ;;  %v6955_v14 = vmax.f32 %v6805_v7, 0.0 }
 0x8eb   : > { %v6811_v41 = vadd.f32 %v6810_v9, %v10696_v63  ;;  %v6956_v34 = vmax.f32 %v6807_v3, 0.0 }
 0x8ec   : > { %v6957_v35 = vmax.f32 %v6809_v22, 0.0 }
 0x8ed   : > { %v6958_v17 = vmax.f32 %v6811_v41, 0.0 }
 0x8ee   : > { %v7027_v24 = vpack.c.bf16 %v6957_v35, %v6955_v14 }
 0x8ef   : > { %v7028_v56 = vpack.c.bf16 %v6958_v17, %v6956_v34  ;;  %v6814_v42 = vpop.f32.mrb[116].mxu0 }
 0x8f0   : > { %v6815_v33 = vadd.f32 %v6814_v42, %v10693_v6  ;;  %v6816_v61 = vpop.f32.mrb[117].mxu0 }
 0x8f1   : > { %v6817_v51 = vadd.f32 %v6816_v61, %v10696_v63  ;;  %v6818_v57 = vpop.f32.mrb[118].mxu0  ;;  %7426 = vmatprep.mubr.bf16.mxu1 %v7028_v56 }
 0x8f2   : > { %v6819_v15 = vadd.f32 %v6818_v57, %v10693_v6  ;;  %v6820_v48 = vpop.f32.mrb[119].mxu0  ;;  %7427 = vmatmul.mubr.bf16.gmra.mrb[232].mxu1 %v7027_v24  ;;  %v6959_v45 = vmax.f32 %v6815_v33, 0.0 }
 0x8f3   : > { %v6821_v5 = vadd.f32 %v6820_v48, %v10696_v63  ;;  %v6960_v46 = vmax.f32 %v6817_v51, 0.0 }
 0x8f4   : > { %v6961_v19 = vmax.f32 %v6819_v15, 0.0 }
 0x8f5   : > { %v6962_v47 = vmax.f32 %v6821_v5, 0.0  ;;  %v7220_v38 = vpop.f32.mrb[128].mxu1 }
 0x8f6   : > { %v7029_v8 = vpack.c.bf16 %v6961_v19, %v6959_v45  ;;  %v7221_v10 = vadd.f32 %v10847_v59, %v7220_v38  ;;  %v7222_v28 = vpop.f32.mrb[129].mxu1 }
 0x8f7   : > { %v7030_v20 = vpack.c.bf16 %v6962_v47, %v6960_v46  ;;  %v6824_v2 = vpop.f32.mrb[120].mxu0  ;;  %v7223_v50 = vpop.f32.mrb[130].mxu1 }
 0x8f8   : > { %7463 = vst [vmem:[%s10850_s18 + $0x20] sm:$0xff] %v7221_v10  ;;  %v6825_v11 = vadd.f32 %v6824_v2, %v10693_v6  ;;  %v7224_v43 = vadd.f32 %v10847_v59, %v7223_v50  ;;  %v6826_v60 = vpop.f32.mrb[121].mxu0  ;;  %v7225_v4 = vpop.f32.mrb[131].mxu1 }
 0x8f9   : > { %v6827_v31 = vadd.f32 %v6826_v60, %v10696_v63  ;;  %v6828_v54 = vpop.f32.mrb[122].mxu0  ;;  %7434 = vmatprep.mubr.bf16.mxu1 %v7030_v20 }
 0x8fa   : > { %7464 = vst [vmem:[%s10850_s18 + $0x28] sm:$0xff] %v7224_v43  ;;  %v6829_v49 = vadd.f32 %v6828_v54, %v10693_v6  ;;  %v6830_v58 = vpop.f32.mrb[123].mxu0  ;;  %7435 = vmatmul.mubr.bf16.gmra.mrb[236].mxu1 %v7029_v8  ;;  %v6963_v55 = vmax.f32 %v6825_v11, 0.0 }
 0x8fb   : > { %v6831_v26 = vadd.f32 %v6830_v58, %v10696_v63  ;;  %v6964_v37 = vmax.f32 %v6827_v31, 0.0 }
 0x8fc   : > { %v6965_v62 = vmax.f32 %v6829_v49, 0.0 }
 0x8fd   : > { %v6966_v52 = vmax.f32 %v6831_v26, 0.0  ;;  %v7228_v27 = vpop.f32.mrb[132].mxu1 }
 0x8fe   : > { %v7031_v30 = vpack.c.bf16 %v6965_v62, %v6963_v55  ;;  %v7229_v16 = vadd.f32 %v10847_v59, %v7228_v27  ;;  %v7230_v18 = vpop.f32.mrb[133].mxu1 }
 0x8ff   : > { %v7032_v53 = vpack.c.bf16 %v6966_v52, %v6964_v37  ;;  %v6834_v36 = vpop.f32.mrb[124].mxu0  ;;  %v7231_v23 = vpop.f32.mrb[134].mxu1 }
 0x900   : > { %7465 = vst [vmem:[%s10850_s18 + $0x30] sm:$0xff] %v7229_v16  ;;  %v6835_v32 = vadd.f32 %v6834_v36, %v10693_v6  ;;  %v7232_v25 = vadd.f32 %v10847_v59, %v7231_v23  ;;  %v6836_v1 = vpop.f32.mrb[125].mxu0  ;;  %v7233_v13 = vpop.f32.mrb[135].mxu1 }
 0x901   : > { %v6837_v40 = vadd.f32 %v6836_v1, %v10696_v63  ;;  %v6838_v29 = vpop.f32.mrb[126].mxu0  ;;  %7442 = vmatprep.mubr.bf16.mxu1 %v7032_v53 }
 0x902   : > { %7466 = vst [vmem:[%s10850_s18 + $0x38] sm:$0xff] %v7232_v25  ;;  %v6839_v21 = vadd.f32 %v6838_v29, %v10693_v6  ;;  %v6840_v12 = vpop.f32.mrb[127].mxu0  ;;  %7443 = vmatmul.mubr.bf16.gmra.mrb[240].mxu1 %v7031_v30  ;;  %v6967_v7 = vmax.f32 %v6835_v32, 0.0 }
 0x903   : > { %v6841_v44 = vadd.f32 %v6840_v12, %v10696_v63  ;;  %v6968_v3 = vmax.f32 %v6837_v40, 0.0 }
 0x904   : > { %v6969_v39 = vmax.f32 %v6839_v21, 0.0 }
 0x905   : > { %v6970_v0 = vmax.f32 %v6841_v44, 0.0  ;;  %v7236_v22 = vpop.f32.mrb[136].mxu1 }
 0x906   : > { %v7033_v9 = vpack.c.bf16 %v6969_v39, %v6967_v7  ;;  %v7237_v41 = vadd.f32 %v10847_v59, %v7236_v22  ;;  %v7238_v14 = vpop.f32.mrb[137].mxu1 }
 0x907   : > { %v7034_v35 = vpack.c.bf16 %v6970_v0, %v6968_v3  ;;  %v7204_v34 = vpop.f32.mrb[128].mxu0  ;;  %v7239_v17 = vpop.f32.mrb[138].mxu1 }
 0x908   : > { %7467 = vst [vmem:[%s10850_s18 + $0x40] sm:$0xff] %v7237_v41  ;;  %v7205_v6 = vadd.f32 %v10847_v59, %v7204_v34  ;;  %v7240_v63 = vadd.f32 %v10847_v59, %v7239_v17  ;;  %v7206_v24 = vpop.f32.mrb[129].mxu0  ;;  %v7241_v56 = vpop.f32.mrb[139].mxu1 }
 0x909   : > { %v7207_v42 = vpop.f32.mrb[130].mxu0  ;;  %7450 = vmatprep.mubr.bf16.mxu1 %v7034_v35 }
 0x90a   : > { %7459 = vst [vmem:[%s10850_s18] sm:$0xff] %v7205_v6  ;;  %7468 = vst [vmem:[%s10850_s18 + $0x48] sm:$0xff] %v7240_v63  ;;  %v7208_v33 = vadd.f32 %v10847_v59, %v7207_v42  ;;  %v7209_v61 = vpop.f32.mrb[131].mxu0  ;;  %7451 = vmatmul.mubr.bf16.gmra.mrb[244].mxu1 %v7033_v9 }
 0x90c   : > { %7460 = vst [vmem:[%s10850_s18 + $0x8] sm:$0xff] %v7208_v33 }
 0x90d   : > { %v7244_v51 = vpop.f32.mrb[140].mxu1 }
 0x90e   : > { %v7245_v57 = vadd.f32 %v10847_v59, %v7244_v51  ;;  %v7246_v15 = vpop.f32.mrb[141].mxu1 }
 0x90f   : > { %v7212_v48 = vpop.f32.mrb[132].mxu0  ;;  %v7247_v5 = vpop.f32.mrb[142].mxu1 }
 0x910   : > { %7469 = vst [vmem:[%s10850_s18 + $0x50] sm:$0xff] %v7245_v57  ;;  %v7213_v45 = vadd.f32 %v10847_v59, %v7212_v48  ;;  %v7248_v19 = vadd.f32 %v10847_v59, %v7247_v5  ;;  %v7214_v46 = vpop.f32.mrb[133].mxu0  ;;  %v7249_v47 = vpop.f32.mrb[143].mxu1 }
 0x911   : > { %v7215_v38 = vpop.f32.mrb[134].mxu0 }
 0x912   : > { %7461 = vst [vmem:[%s10850_s18 + $0x10] sm:$0xff] %v7213_v45  ;;  %7470 = vst [vmem:[%s10850_s18 + $0x58] sm:$0xff] %v7248_v19  ;;  %v7216_v8 = vadd.f32 %v10847_v59, %v7215_v38  ;;  %v7217_v10 = vpop.f32.mrb[135].mxu0 }
 0x914   : > { %7462 = vst [vmem:[%s10850_s18 + $0x18] sm:$0xff] %v7216_v8 }
 0x915   : > { %v7252_v28 = vpop.f32.mrb[144].mxu1 }
 0x916   : > { %v7253_v20 = vadd.f32 %v10847_v59, %v7252_v28  ;;  %v7254_v2 = vpop.f32.mrb[145].mxu1 }
 0x917   : > { %v7255_v50 = vpop.f32.mrb[146].mxu1 }
 0x918   : > { %7471 = vst [vmem:[%s10850_s18 + $0x60] sm:$0xff] %v7253_v20  ;;  %v7256_v11 = vadd.f32 %v10847_v59, %v7255_v50  ;;  %v7257_v43 = vpop.f32.mrb[147].mxu1 }
 0x91a   : > { %7472 = vst [vmem:[%s10850_s18 + $0x68] sm:$0xff] %v7256_v11 }
 0x91d   : > { %v7260_v60 = vpop.f32.mrb[148].mxu1 }
 0x91e   : > { %v7261_v4 = vadd.f32 %v10847_v59, %v7260_v60  ;;  %v7262_v31 = vpop.f32.mrb[149].mxu1 }
 0x91f   : > { %v7263_v54 = vpop.f32.mrb[150].mxu1 }
 0x920   : > { %7473 = vst [vmem:[%s10850_s18 + $0x70] sm:$0xff] %v7261_v4  ;;  %v7264_v49 = vadd.f32 %v10847_v59, %v7263_v54  ;;  %v7265_v58 = vpop.f32.mrb[151].mxu1 }
 0x922   : > { %7474 = vst [vmem:[%s10850_s18 + $0x78] sm:$0xff] %v7264_v49 }
 0x925   : > { %v7268_v26 = vpop.f32.mrb[152].mxu1 }
 0x926   : > { %v7269_v55 = vadd.f32 %v10847_v59, %v7268_v26  ;;  %v7270_v62 = vpop.f32.mrb[153].mxu1 }
 0x927   : > { %v7271_v37 = vpop.f32.mrb[154].mxu1 }
 0x928   : > { %7475 = vst [vmem:[%s10850_s18 + $0x80] sm:$0xff] %v7269_v55  ;;  %v7272_v52 = vadd.f32 %v10847_v59, %v7271_v37  ;;  %v7273_v27 = vpop.f32.mrb[155].mxu1 }
 0x92a   : > { %7476 = vst [vmem:[%s10850_s18 + $0x88] sm:$0xff] %v7272_v52 }
 0x92d   : > { %v7276_v30 = vpop.f32.mrb[156].mxu1 }
 0x92e   : > { %v7277_v16 = vadd.f32 %v10847_v59, %v7276_v30  ;;  %v7278_v18 = vpop.f32.mrb[157].mxu1 }
 0x92f   : > { %v7279_v53 = vpop.f32.mrb[158].mxu1 }
 0x930   : > { %7477 = vst [vmem:[%s10850_s18 + $0x90] sm:$0xff] %v7277_v16  ;;  %v7280_v36 = vadd.f32 %v10847_v59, %v7279_v53  ;;  %v7281_v23 = vpop.f32.mrb[159].mxu1 }
 0x932   : > { %7478 = vst [vmem:[%s10850_s18 + $0x98] sm:$0xff] %v7280_v36 }
 0x935   : > { %v7284_v32 = vpop.f32.mrb[160].mxu1 }
 0x936   : > { %v7285_v25 = vadd.f32 %v10847_v59, %v7284_v32  ;;  %v7286_v1 = vpop.f32.mrb[161].mxu1 }
 0x937   : > { %v7287_v13 = vpop.f32.mrb[162].mxu1 }
 0x938   : > { %7479 = vst [vmem:[%s10850_s18 + $0xa0] sm:$0xff] %v7285_v25  ;;  %v7288_v40 = vadd.f32 %v10847_v59, %v7287_v13  ;;  %v7289_v29 = vpop.f32.mrb[163].mxu1 }
 0x93a   : > { %7480 = vst [vmem:[%s10850_s18 + $0xa8] sm:$0xff] %v7288_v40 }
 0x93d   : > { %v7292_v21 = vpop.f32.mrb[164].mxu1 }
 0x93e   : > { %v7293_v12 = vadd.f32 %v10847_v59, %v7292_v21  ;;  %v7294_v44 = vpop.f32.mrb[165].mxu1 }
 0x93f   : > { %v7295_v7 = vpop.f32.mrb[166].mxu1 }
 0x940   : > { %7481 = vst [vmem:[%s10850_s18 + $0xb0] sm:$0xff] %v7293_v12  ;;  %v7296_v39 = vadd.f32 %v10847_v59, %v7295_v7  ;;  %v7297_v3 = vpop.f32.mrb[167].mxu1 }
 0x942   : > { %7482 = vst [vmem:[%s10850_s18 + $0xb8] sm:$0xff] %v7296_v39 }
 0x945   : > { %v7300_v0 = vpop.f32.mrb[168].mxu1 }
 0x946   : > { %v7301_v22 = vadd.f32 %v10847_v59, %v7300_v0  ;;  %v7302_v9 = vpop.f32.mrb[169].mxu1 }
 0x947   : > { %v7303_v41 = vpop.f32.mrb[170].mxu1 }
 0x948   : > { %7483 = vst [vmem:[%s10850_s18 + $0xc0] sm:$0xff] %v7301_v22  ;;  %v7304_v14 = vadd.f32 %v10847_v59, %v7303_v41  ;;  %v7305_v35 = vpop.f32.mrb[171].mxu1 }
 0x94a   : > { %7484 = vst [vmem:[%s10850_s18 + $0xc8] sm:$0xff] %v7304_v14 }
 0x94d   : > { %v7308_v34 = vpop.f32.mrb[172].mxu1 }
 0x94e   : > { %v7309_v17 = vadd.f32 %v10847_v59, %v7308_v34  ;;  %v7310_v6 = vpop.f32.mrb[173].mxu1 }
 0x94f   : > { %v7311_v63 = vpop.f32.mrb[174].mxu1 }
 0x950   : > { %7485 = vst [vmem:[%s10850_s18 + $0xd0] sm:$0xff] %v7309_v17  ;;  %v7312_v24 = vadd.f32 %v10847_v59, %v7311_v63  ;;  %v7313_v56 = vpop.f32.mrb[175].mxu1 }
 0x952   : > { %7486 = vst [vmem:[%s10850_s18 + $0xd8] sm:$0xff] %v7312_v24 }
 0x955   : > { %v7316_v42 = vpop.f32.mrb[176].mxu1 }
 0x956   : > { %v7317_v33 = vadd.f32 %v10847_v59, %v7316_v42  ;;  %v7318_v61 = vpop.f32.mrb[177].mxu1 }
 0x957   : > { %v7319_v51 = vpop.f32.mrb[178].mxu1 }
 0x958   : > { %7487 = vst [vmem:[%s10850_s18 + $0xe0] sm:$0xff] %v7317_v33  ;;  %v7320_v57 = vadd.f32 %v10847_v59, %v7319_v51  ;;  %v7321_v15 = vpop.f32.mrb[179].mxu1 }
 0x95a   : > { %7488 = vst [vmem:[%s10850_s18 + $0xe8] sm:$0xff] %v7320_v57 }
 0x95d   : > { %v7324_v48 = vpop.f32.mrb[180].mxu1 }
 0x95e   : > { %v7325_v5 = vadd.f32 %v10847_v59, %v7324_v48  ;;  %v7326_v45 = vpop.f32.mrb[181].mxu1 }
 0x95f   : > { %v7327_v19 = vpop.f32.mrb[182].mxu1 }
 0x960   : > { %7489 = vst [vmem:[%s10850_s18 + $0xf0] sm:$0xff] %v7325_v5  ;;  %v7328_v46 = vadd.f32 %v10847_v59, %v7327_v19  ;;  %v7329_v47 = vpop.f32.mrb[183].mxu1 }
 0x962   : > { %7490 = vst [vmem:[%s10850_s18 + $0xf8] sm:$0xff] %v7328_v46 }
 0x965   : > { %v7332_v38 = vpop.f32.mrb[184].mxu1 }
 0x966   : > { %v7333_v8 = vadd.f32 %v10847_v59, %v7332_v38  ;;  %v7334_v10 = vpop.f32.mrb[185].mxu1 }
 0x967   : > { %v7335_v28 = vpop.f32.mrb[186].mxu1 }
 0x968   : > { %7491 = vst [vmem:[%s10850_s18 + $0x100] sm:$0xff] %v7333_v8  ;;  %v7336_v20 = vadd.f32 %v10847_v59, %v7335_v28  ;;  %v7337_v2 = vpop.f32.mrb[187].mxu1 }
 0x96a   : > { %7492 = vst [vmem:[%s10850_s18 + $0x108] sm:$0xff] %v7336_v20 }
 0x96d   : > { %v7340_v50 = vpop.f32.mrb[188].mxu1 }
 0x96e   : > { %v7341_v11 = vadd.f32 %v10847_v59, %v7340_v50  ;;  %v7342_v43 = vpop.f32.mrb[189].mxu1 }
 0x96f   : > { %v7343_v60 = vpop.f32.mrb[190].mxu1 }
 0x970   : > { %7493 = vst [vmem:[%s10850_s18 + $0x110] sm:$0xff] %v7341_v11  ;;  %v7344_v4 = vadd.f32 %v10847_v59, %v7343_v60  ;;  %v7345_v31 = vpop.f32.mrb[191].mxu1 }
 0x972   : > { %7494 = vst [vmem:[%s10850_s18 + $0x118] sm:$0xff] %v7344_v4 }
 0x975   : > { %v7348_v54 = vpop.f32.mrb[192].mxu1 }
 0x976   : > { %v7349_v49 = vadd.f32 %v10847_v59, %v7348_v54  ;;  %v7350_v58 = vpop.f32.mrb[193].mxu1 }
 0x977   : > { %v7351_v26 = vpop.f32.mrb[194].mxu1 }
 0x978   : > { %7495 = vst [vmem:[%s10850_s18 + $0x120] sm:$0xff] %v7349_v49  ;;  %v7352_v55 = vadd.f32 %v10847_v59, %v7351_v26  ;;  %v7353_v62 = vpop.f32.mrb[195].mxu1 }
 0x97a   : > { %7496 = vst [vmem:[%s10850_s18 + $0x128] sm:$0xff] %v7352_v55 }
 0x97d   : > { %v7356_v37 = vpop.f32.mrb[196].mxu1 }
 0x97e   : > { %v7357_v52 = vadd.f32 %v10847_v59, %v7356_v37  ;;  %v7358_v27 = vpop.f32.mrb[197].mxu1 }
 0x97f   : > { %v7359_v30 = vpop.f32.mrb[198].mxu1 }
 0x980   : > { %7497 = vst [vmem:[%s10850_s18 + $0x130] sm:$0xff] %v7357_v52  ;;  %v7360_v16 = vadd.f32 %v10847_v59, %v7359_v30  ;;  %v7361_v18 = vpop.f32.mrb[199].mxu1 }
 0x982   : > { %7498 = vst [vmem:[%s10850_s18 + $0x138] sm:$0xff] %v7360_v16 }
 0x985   : > { %v7364_v53 = vpop.f32.mrb[200].mxu1 }
 0x986   : > { %v7365_v36 = vadd.f32 %v10847_v59, %v7364_v53  ;;  %v7366_v23 = vpop.f32.mrb[201].mxu1 }
 0x987   : > { %v7367_v32 = vpop.f32.mrb[202].mxu1 }
 0x988   : > { %7499 = vst [vmem:[%s10850_s18 + $0x140] sm:$0xff] %v7365_v36  ;;  %v7368_v25 = vadd.f32 %v10847_v59, %v7367_v32  ;;  %v7369_v1 = vpop.f32.mrb[203].mxu1 }
 0x98a   : > { %7500 = vst [vmem:[%s10850_s18 + $0x148] sm:$0xff] %v7368_v25 }
 0x98d   : > { %v7372_v13 = vpop.f32.mrb[204].mxu1 }
 0x98e   : > { %v7373_v40 = vadd.f32 %v10847_v59, %v7372_v13  ;;  %v7374_v29 = vpop.f32.mrb[205].mxu1 }
 0x98f   : > { %v7375_v21 = vpop.f32.mrb[206].mxu1 }
 0x990   : > { %7501 = vst [vmem:[%s10850_s18 + $0x150] sm:$0xff] %v7373_v40  ;;  %v7376_v12 = vadd.f32 %v10847_v59, %v7375_v21  ;;  %v7377_v44 = vpop.f32.mrb[207].mxu1 }
 0x992   : > { %7502 = vst [vmem:[%s10850_s18 + $0x158] sm:$0xff] %v7376_v12 }
 0x995   : > { %v7380_v7 = vpop.f32.mrb[208].mxu1 }
 0x996   : > { %v7381_v39 = vadd.f32 %v10847_v59, %v7380_v7  ;;  %v7382_v3 = vpop.f32.mrb[209].mxu1 }
 0x997   : > { %v7383_v0 = vpop.f32.mrb[210].mxu1 }
 0x998   : > { %7503 = vst [vmem:[%s10850_s18 + $0x160] sm:$0xff] %v7381_v39  ;;  %v7384_v22 = vadd.f32 %v10847_v59, %v7383_v0  ;;  %v7385_v9 = vpop.f32.mrb[211].mxu1 }
 0x99a   : > { %7504 = vst [vmem:[%s10850_s18 + $0x168] sm:$0xff] %v7384_v22 }
 0x99d   : > { %v7388_v41 = vpop.f32.mrb[212].mxu1 }
 0x99e   : > { %v7389_v14 = vadd.f32 %v10847_v59, %v7388_v41  ;;  %v7390_v35 = vpop.f32.mrb[213].mxu1 }
 0x99f   : > { %v7391_v34 = vpop.f32.mrb[214].mxu1 }
 0x9a0   : > { %7505 = vst [vmem:[%s10850_s18 + $0x170] sm:$0xff] %v7389_v14  ;;  %v7392_v17 = vadd.f32 %v10847_v59, %v7391_v34  ;;  %v7393_v6 = vpop.f32.mrb[215].mxu1 }
 0x9a2   : > { %7506 = vst [vmem:[%s10850_s18 + $0x178] sm:$0xff] %v7392_v17 }
 0x9a5   : > { %v7396_v63 = vpop.f32.mrb[216].mxu1 }
 0x9a6   : > { %v7397_v24 = vadd.f32 %v10847_v59, %v7396_v63  ;;  %v7398_v56 = vpop.f32.mrb[217].mxu1 }
 0x9a7   : > { %v7399_v42 = vpop.f32.mrb[218].mxu1 }
 0x9a8   : > { %7507 = vst [vmem:[%s10850_s18 + $0x180] sm:$0xff] %v7397_v24  ;;  %v7400_v33 = vadd.f32 %v10847_v59, %v7399_v42  ;;  %v7401_v61 = vpop.f32.mrb[219].mxu1 }
 0x9aa   : > { %7508 = vst [vmem:[%s10850_s18 + $0x188] sm:$0xff] %v7400_v33 }
 0x9ad   : > { %v7404_v51 = vpop.f32.mrb[220].mxu1 }
 0x9ae   : > { %v7405_v57 = vadd.f32 %v10847_v59, %v7404_v51  ;;  %v7406_v15 = vpop.f32.mrb[221].mxu1 }
 0x9af   : > { %v7407_v48 = vpop.f32.mrb[222].mxu1 }
 0x9b0   : > { %7509 = vst [vmem:[%s10850_s18 + $0x190] sm:$0xff] %v7405_v57  ;;  %v7408_v5 = vadd.f32 %v10847_v59, %v7407_v48  ;;  %v7409_v45 = vpop.f32.mrb[223].mxu1 }
 0x9b2   : > { %7510 = vst [vmem:[%s10850_s18 + $0x198] sm:$0xff] %v7408_v5 }
 0x9b5   : > { %v7412_v19 = vpop.f32.mrb[224].mxu1 }
 0x9b6   : > { %v7413_v46 = vadd.f32 %v10847_v59, %v7412_v19  ;;  %v7414_v47 = vpop.f32.mrb[225].mxu1 }
 0x9b7   : > { %v7415_v38 = vpop.f32.mrb[226].mxu1 }
 0x9b8   : > { %7511 = vst [vmem:[%s10850_s18 + $0x1a0] sm:$0xff] %v7413_v46  ;;  %v7416_v8 = vadd.f32 %v10847_v59, %v7415_v38  ;;  %v7417_v10 = vpop.f32.mrb[227].mxu1 }
 0x9ba   : > { %7512 = vst [vmem:[%s10850_s18 + $0x1a8] sm:$0xff] %v7416_v8 }
 0x9bd   : > { %v7420_v28 = vpop.f32.mrb[228].mxu1 }
 0x9be   : > { %v7421_v20 = vadd.f32 %v10847_v59, %v7420_v28  ;;  %v7422_v2 = vpop.f32.mrb[229].mxu1 }
 0x9bf   : > { %v7423_v50 = vpop.f32.mrb[230].mxu1 }
 0x9c0   : > { %7513 = vst [vmem:[%s10850_s18 + $0x1b0] sm:$0xff] %v7421_v20  ;;  %v7424_v11 = vadd.f32 %v10847_v59, %v7423_v50  ;;  %v7425_v43 = vpop.f32.mrb[231].mxu1 }
 0x9c2   : > { %7514 = vst [vmem:[%s10850_s18 + $0x1b8] sm:$0xff] %v7424_v11 }
 0x9c5   : > { %v7428_v60 = vpop.f32.mrb[232].mxu1 }
 0x9c6   : > { %v7429_v4 = vadd.f32 %v10847_v59, %v7428_v60  ;;  %v7430_v31 = vpop.f32.mrb[233].mxu1 }
 0x9c7   : > { %v7431_v54 = vpop.f32.mrb[234].mxu1 }
 0x9c8   : > { %7515 = vst [vmem:[%s10850_s18 + $0x1c0] sm:$0xff] %v7429_v4  ;;  %v7432_v49 = vadd.f32 %v10847_v59, %v7431_v54  ;;  %v7433_v58 = vpop.f32.mrb[235].mxu1 }
 0x9ca   : > { %7516 = vst [vmem:[%s10850_s18 + $0x1c8] sm:$0xff] %v7432_v49 }
 0x9cd   : > { %v7436_v26 = vpop.f32.mrb[236].mxu1 }
 0x9ce   : > { %v7437_v55 = vadd.f32 %v10847_v59, %v7436_v26  ;;  %v7438_v62 = vpop.f32.mrb[237].mxu1 }
 0x9cf   : > { %v7439_v37 = vpop.f32.mrb[238].mxu1 }
 0x9d0   : > { %7517 = vst [vmem:[%s10850_s18 + $0x1d0] sm:$0xff] %v7437_v55  ;;  %v7440_v52 = vadd.f32 %v10847_v59, %v7439_v37  ;;  %v7441_v27 = vpop.f32.mrb[239].mxu1 }
 0x9d2   : > { %7518 = vst [vmem:[%s10850_s18 + $0x1d8] sm:$0xff] %v7440_v52 }
 0x9d5   : > { %v7444_v30 = vpop.f32.mrb[240].mxu1 }
 0x9d6   : > { %v7445_v16 = vadd.f32 %v10847_v59, %v7444_v30  ;;  %v7446_v18 = vpop.f32.mrb[241].mxu1 }
 0x9d7   : > { %v7447_v53 = vpop.f32.mrb[242].mxu1 }
 0x9d8   : > { %7519 = vst [vmem:[%s10850_s18 + $0x1e0] sm:$0xff] %v7445_v16  ;;  %v7448_v36 = vadd.f32 %v10847_v59, %v7447_v53  ;;  %v7449_v23 = vpop.f32.mrb[243].mxu1 }
 0x9da   : > { %7520 = vst [vmem:[%s10850_s18 + $0x1e8] sm:$0xff] %v7448_v36 }
 0x9dd   : > { %v7452_v32 = vpop.f32.mrb[244].mxu1 }
 0x9de   : > { %v7453_v25 = vadd.f32 %v10847_v59, %v7452_v32  ;;  %v7454_v1 = vpop.f32.mrb[245].mxu1 }
 0x9df   : > { %v7455_v13 = vpop.f32.mrb[246].mxu1 }
 0x9e0   : > { %7521 = vst [vmem:[%s10850_s18 + $0x1f0] sm:$0xff] %v7453_v25  ;;  %v7456_v40 = vadd.f32 %v10847_v59, %v7455_v13  ;;  %v7457_v29 = vpop.f32.mrb[247].mxu1 }
 0x9e2   : > { %7522 = vst [vmem:[%s10850_s18 + $0x1f8] sm:$0xff] %v7456_v40 }
 0x9e3   : > { %8864 = shalt.err (!%p8861_p13)
}
 0x9e4   : > { %s8865_s17 = scalar_lea.hbm %s10989_s19, 8192  ;;  %s8869_s30 = scalar_lea.hbm %s11044_s6, 16384 }
 0x9e5   : > { %p8866_p9 = scmp.ne.s32.totalorder %s10989_s19, %s8865_s17  ;;  %p8870_p4 = scmp.lt.u32.totalorder %s10989_s19, %s11044_s6 }
 0x9e6   : > { %p8871_p8 = scmp.lt.u32.totalorder %s8869_s30, %s8865_s17  ;;  %p8873_p10 = scmp.lt.u32.totalorder %s8865_s17, %s10989_s19 }
 0x9e7   : > { %p8867_p0 = pnand %p8866_p9, %p9146_p3 }
 0x9e8   : > { %p8872_p6 = por %p8871_p8, %p8870_p4 }
 0x9e9   : > { %p8868_p11 = pneg %p8867_p0 }
 0x9ea   : > { %p8874_p5 = por %p8873_p10, %p8872_p6 }
 0x9ec   : > { %p8875_p7 = pnand %p8874_p5, %p8868_p11 }
 0x9ee   : > { %8878 = shalt.err (!%p8875_p7)
}
 0x9ef   : > { %s8938_s10 = smov 128   ;;  %s8939_s13 = smov 8  }
 0x9f0   : > { %8155 = dma.vmem_to_hbm [thread:$0]  (%p9146_p3), %s10991_s9, 8192, %s10989_s19, %s7524_s25, %s8938_s10, %s8938_s10, %s8939_s13  }
 0x9f1 PF: > { %s7552_s14 = sand.u32 1, %s8913_s21   ;;  %p11062_p12 = scmp.ne.s32.totalorder %s11049_s28, 0 }
 0x9f2   : > { %p11063_p1 = scmp.ge.s32.totalorder %s8925_s24, 2  ;;  %s7553_s26 = scalar_lea.sflag [#allocation4], %s7552_s14 }
 0x9f4   : > { %p8175_p2 = pnand %p11063_p1, %p11062_p12 }
 0x9f6   : > { %8908 = dma.done.wait (!%p8175_p2), %s7553_s26, 8192  }
 0x9f7   : > { %8910 = vsyncadd (!%p8175_p2), %s7553_s26, 4294959104  ;;  %p21_p13 = scmp.ge.s32.totalorder %s9133_s11, 4   ;;  %s11064_s21 = smov %s8917_s22 }
 0x9f8   : > { %s11065_s22 = smov %s8921_s23  ;;  %s11066_s23 = smov %s9142_s16 }
 0x9f9   : > { %s11067_s24 = smov %s9133_s11  ;;  %23 = sbr.rel (!%p21_p13) target bundleno = 7 (0x7), region = 112 }
 0xa00   :  { %7558 = vsyncpa [#allocation3], 1 }
 0xa01   :  { %7560 = vsyncpa [#allocation3 + $0x1], 1 }
 0xa02   :  { %7561 = vsyncpa [#allocation6], 1 }
 0xa03   :  { %7562 = vsyncpa [#allocation9], 1 }
 0xa04   :  { %7563 = vsyncpa [#allocation4], 1 }
 0xa05   :  { %7565 = vsyncpa [#allocation4 + $0x1], 1 }

</bundles_post_ra>
